<compile_context>
chip_gen: v6e
topology: v6e:2x2x1
jax: 0.10.0
libtpu: 0.0.40
codegen_flags: <defaults>
</compile_context>

<pallas_src>
import functools

import jax
import jax.numpy as jnp
from jax import lax
from jax.experimental import pallas as pl
from jax.experimental.pallas import tpu as pltpu


# ----------------------------------------------------------------------------
# Fused kernel
# ----------------------------------------------------------------------------
def _gru_cell(gx, gh, h_prev, H):
    # PyTorch GRU gate order (r, z, n); n = tanh(gx_n + r*gh_n); h = (1-z)*n + z*h
    r = jax.nn.sigmoid(gx[:, :H] + gh[:, :H])
    z = jax.nn.sigmoid(gx[:, H:2 * H] + gh[:, H:2 * H])
    n = jnp.tanh(gx[:, 2 * H:] + r * gh[:, 2 * H:])
    return (1.0 - z) * n + z * h_prev


def _rnn_character_kernel(*refs, num_layers):
    ids_ref, emb_t_ref = refs[0], refs[1]
    layer_refs = refs[2:2 + 4 * num_layers]
    (gamma_ref, beta_ref, rmean_ref, rvar_ref,
     wfc_ref, bfc_ref, out_ref) = refs[2 + 4 * num_layers:]

    B, T = ids_ref.shape
    E, V = emb_t_ref.shape
    H = layer_refs[2].shape[0] // 2        # whh_bd of layer 0 is (2H, 6H)

    # ---------------- CharacterEncoder (approximated) -------------------------
    # TODO(synk): CharacterEncoder class is not provided in the source; it is
    # approximated as a character-embedding lookup producing the Conv1d-style
    # (B, embed_size, T) layout the subsequent `.view` expects.
    ids = ids_ref[...]                                        # (B, T) int32
    emb_t = emb_t_ref[...]                                    # (E, V)
    iota_v = lax.broadcasted_iota(jnp.int32, (V, T), 0)       # (V, T)
    x_et = []                                                 # per-batch (E, T)
    for b in range(B):
        onehot_vt = (iota_v == ids[b:b + 1, :]).astype(jnp.float32)      # (V, T)
        x_et.append(jnp.dot(emb_t, onehot_vt,
                            preferred_element_type=jnp.float32))         # (E, T)

    # drop_en (Dropout) -> identity in eval mode.
    # `.view(B, T, E)` on the contiguous (B, E, T) tensor == row-major re-read
    # of the same data (intentional feature/time interleave, as in PyTorch).
    # Assembled with static slices + concats only (no in-kernel reshape).
    rows = []                                                 # time-major (t, b)
    for t in range(T):
        for b in range(B):
            pieces, f, rem = [], t * E, E
            while rem > 0:
                e_row, tau = divmod(f, T)
                take = min(T - tau, rem)
                pieces.append(x_et[b][e_row:e_row + 1, tau:tau + take])
                f += take
                rem -= take
            rows.append(pieces[0] if len(pieces) == 1
                        else jnp.concatenate(pieces, axis=1))            # (1, E)
    x_flat = jnp.concatenate(rows, axis=0)                    # (T*B, E) time-major

    # ---------------- Bidirectional multi-layer GRU ---------------------------
    outs_f, outs_b = [], []
    for l in range(num_layers):
        wih_ref, bih_ref, whh_ref, bhh_ref = layer_refs[4 * l:4 * l + 4]

        # Hoisted input projection for ALL time steps and BOTH directions.
        gx = jnp.dot(x_flat, wih_ref[...],
                     preferred_element_type=jnp.float32) + bih_ref[...]  # (T*B, 6H)
        whh_bd = whh_ref[...]                                            # (2H, 6H)
        bhh = bhh_ref[...]                                               # (1, 6H)

        h_cat = jnp.zeros((B, 2 * H), jnp.float32)            # [h_fwd | h_bwd]
        outs_f, outs_b = [], []
        for t in range(T):                                     # unrolled (T static)
            # One block-diagonal recurrent matmul for both directions.
            gh = jnp.dot(h_cat, whh_bd,
                         preferred_element_type=jnp.float32) + bhh       # (B, 6H)
            gx_f = gx[t * B:(t + 1) * B, :3 * H]
            gx_b = gx[(T - 1 - t) * B:(T - t) * B, 3 * H:]
            h_f = _gru_cell(gx_f, gh[:, :3 * H], h_cat[:, :H], H)
            h_b = _gru_cell(gx_b, gh[:, 3 * H:], h_cat[:, H:], H)
            h_cat = jnp.concatenate([h_f, h_b], axis=1)
            outs_f.append(h_f)
            outs_b.append(h_b)

        if l + 1 < num_layers:
            # Next-layer input at time s = [h_fwd(s) | h_bwd(s)] (bwd step t
            # processed time T-1-t).  Inter-layer dropout(0.1) -> identity (eval).
            x_flat = jnp.concatenate(
                [jnp.concatenate([outs_f[s], outs_b[T - 1 - s]], axis=1)
                 for s in range(T)], axis=0)                             # (T*B, 2H)

    # ---------------- Head: mean over time, BatchNorm1d(eval), Linear ---------
    # use_last=False -> temporal mean; ordering of bwd steps is irrelevant.
    pooled = jnp.concatenate([sum(outs_f), sum(outs_b)], axis=1) * (1.0 / T)  # (B, 2H)
    inv_std = lax.rsqrt(rvar_ref[...] + 1e-5)
    xbn = (pooled - rmean_ref[...]) * inv_std * gamma_ref[...] + beta_ref[...]
    out_ref[...] = jnp.dot(xbn, wfc_ref[...],
                           preferred_element_type=jnp.float32) + bfc_ref[...]


# ----------------------------------------------------------------------------
# Wrapper: everything fits in VMEM at these sizes -> single call, no grid.
# (If scaled up, add a batch grid dimension and set vmem_limit_bytes — v7x has
#  only 64 MiB VMEM vs 128 MiB on v5e/v6e.)
# ----------------------------------------------------------------------------
def rnn_character_forward(x_ids, params):
    B, _ = x_ids.shape
    out_dim = params["wfc_t"].shape[1]
    num_layers = len(params["layers"])

    inputs = [x_ids, params["emb_t"]]
    for lp in params["layers"]:
        inputs += [lp["wih_cat"], lp["bih_cat"], lp["whh_bd"], lp["bhh_cat"]]
    inputs += [params["bn_gamma"], params["bn_beta"], params["bn_mean"],
               params["bn_var"], params["wfc_t"], params["bfc"]]

    kernel = functools.partial(_rnn_character_kernel, num_layers=num_layers)
    return pl.pallas_call(
        kernel,
        out_shape=jax.ShapeDtypeStruct((B, out_dim), jnp.float32),
    )(*inputs)


# ----------------------------------------------------------------------------
# Deterministic synthetic parameters (shapes follow the nn.Module __init__),
# pre-packed into the fused layouts the kernel consumes.
# ----------------------------------------------------------------------------
def init_params(key, vocab, embed, hidden, num_layers, out_dim):
    keys = iter(jax.random.split(key, 128))

    def u(shape, scale):
        return jax.random.uniform(next(keys), shape, jnp.float32, -scale, scale)

    H = hidden
    emb = u((vocab, embed), 0.1)                      # embedding table (V, E)
    params = {"emb_t": emb.T}                         # (E, V) for (E,V)@(V,T)

    scale = 1.0 / (H ** 0.5)
    layers = []
    din = embed
    for _ in range(num_layers):
        w = {}
        for d in ("fwd", "bwd"):
            w[d] = dict(
                wih=u((3 * H, din), scale),           # torch weight_ih_l{k}[_reverse]
                whh=u((3 * H, H), scale),             # torch weight_hh_l{k}[_reverse]
                bih=u((3 * H,), scale),
                bhh=u((3 * H,), scale),
            )
        # Fused layouts: columns [0:3H] = fwd gates, [3H:6H] = bwd gates.
        wih_cat = jnp.concatenate([w["fwd"]["wih"].T, w["bwd"]["wih"].T], axis=1)
        bih_cat = jnp.concatenate([w["fwd"]["bih"], w["bwd"]["bih"]]).reshape(1, 6 * H)
        whh_bd = jnp.zeros((2 * H, 6 * H), jnp.float32)
        whh_bd = whh_bd.at[:H, :3 * H].set(w["fwd"]["whh"].T)
        whh_bd = whh_bd.at[H:, 3 * H:].set(w["bwd"]["whh"].T)
        bhh_cat = jnp.concatenate([w["fwd"]["bhh"], w["bwd"]["bhh"]]).reshape(1, 6 * H)
        layers.append(dict(wih_cat=wih_cat, bih_cat=bih_cat,
                           whh_bd=whh_bd, bhh_cat=bhh_cat))
        din = 2 * H                                   # bidirectional concat feeds next layer
    params["layers"] = layers

    H2 = 2 * H
    params["bn_gamma"] = 1.0 + u((1, H2), 0.1)
    params["bn_beta"] = u((1, H2), 0.1)
    params["bn_mean"] = u((1, H2), 0.1)
    params["bn_var"] = 1.0 + jnp.abs(u((1, H2), 0.1))

    wfc = u((out_dim, H2), 1.0 / (H2 ** 0.5))         # nn.Linear(2H, out_dim)
    bfc = u((out_dim,), 1.0 / (H2 ** 0.5))
    params["wfc_t"] = wfc.T
    params["bfc"] = bfc.reshape(1, -1)
    return params


if __name__ == "__main__":
    B, T = 2, 16
    VOCAB, EMBED, HIDDEN, LAYERS, OUT_DIM = 16, 32, 32, 2, 8

    key = jax.random.PRNGKey(0)
    kx, kp = jax.random.split(key)
    x_ids = jax.random.randint(kx, (B, T), 0, VOCAB, dtype=jnp.int32)
    params = init_params(kp, VOCAB, EMBED, HIDDEN, LAYERS, OUT_DIM)

    out = jax.jit(rnn_character_forward)(x_ids, params)
    out = jax.block_until_ready(out)
    assert out.shape == (B, OUT_DIM) and out.dtype == jnp.float32
    assert bool(jnp.all(jnp.isfinite(out)))
    print("KERNEL_OK")
</pallas_src>

<mosaic_0001>
module attributes {stable_mosaic.version = 11 : i64} {
  func.func @_rnn_character_kernel(%arg0: memref<2x16xi32, #tpu.memory_space<vmem>>, %arg1: memref<32x16xf32, #tpu.memory_space<vmem>>, %arg2: memref<32x192xf32, #tpu.memory_space<vmem>>, %arg3: memref<1x192xf32, #tpu.memory_space<vmem>>, %arg4: memref<64x192xf32, #tpu.memory_space<vmem>>, %arg5: memref<1x192xf32, #tpu.memory_space<vmem>>, %arg6: memref<64x192xf32, #tpu.memory_space<vmem>>, %arg7: memref<1x192xf32, #tpu.memory_space<vmem>>, %arg8: memref<64x192xf32, #tpu.memory_space<vmem>>, %arg9: memref<1x192xf32, #tpu.memory_space<vmem>>, %arg10: memref<1x64xf32, #tpu.memory_space<vmem>>, %arg11: memref<1x64xf32, #tpu.memory_space<vmem>>, %arg12: memref<1x64xf32, #tpu.memory_space<vmem>>, %arg13: memref<1x64xf32, #tpu.memory_space<vmem>>, %arg14: memref<64x8xf32, #tpu.memory_space<vmem>>, %arg15: memref<1x8xf32, #tpu.memory_space<vmem>>, %arg16: memref<2x8xf32, #tpu.memory_space<vmem>>) attributes {dimension_semantics = [], scalar_prefetch = 0 : i64, scratch_operands = 0 : i64, tpu.core_type = #tpu.core_type<tc>} {
    %c0 = arith.constant 0 : index
    %c0_0 = arith.constant 0 : index
    %0 = vector.load %arg0[%c0, %c0_0] : memref<2x16xi32, #tpu.memory_space<vmem>>, vector<2x16xi32>
    %c0_1 = arith.constant 0 : index
    %c0_2 = arith.constant 0 : index
    %1 = vector.load %arg1[%c0_1, %c0_2] : memref<32x16xf32, #tpu.memory_space<vmem>>, vector<32x16xf32>
    %2 = tpu.iota {dimensions = array<i32: 0>} : vector<16x16xi32>
    %3 = vector.extract_strided_slice %0 {offsets = [0, 0], sizes = [1, 16], strides = [1, 1]} : vector<2x16xi32> to vector<1x16xi32>
    %4 = vector.broadcast %3 : vector<1x16xi32> to vector<16x16xi32>
    %5 = arith.cmpi eq, %2, %4 : vector<16x16xi32>
    %6 = arith.extui %5 : vector<16x16xi1> to vector<16x16xi32>
    %7 = arith.sitofp %6 : vector<16x16xi32> to vector<16x16xf32>
    %cst = arith.constant dense<0.000000e+00> : vector<32x16xf32>
    %8 = tpu.matmul %1, %7, %cst {dimension_numbers = #tpu.dot_dimension_numbers<[1], [0], [0], [1], [0, 0, 1, 1], [], []>} : vector<32x16xf32>, vector<16x16xf32>, vector<32x16xf32> -> vector<32x16xf32>
    %9 = vector.extract_strided_slice %0 {offsets = [1, 0], sizes = [1, 16], strides = [1, 1]} : vector<2x16xi32> to vector<1x16xi32>
    %10 = vector.broadcast %9 : vector<1x16xi32> to vector<16x16xi32>
    %11 = arith.cmpi eq, %2, %10 : vector<16x16xi32>
    %12 = arith.extui %11 : vector<16x16xi1> to vector<16x16xi32>
    %13 = arith.sitofp %12 : vector<16x16xi32> to vector<16x16xf32>
    %cst_3 = arith.constant dense<0.000000e+00> : vector<32x16xf32>
    %14 = tpu.matmul %1, %13, %cst_3 {dimension_numbers = #tpu.dot_dimension_numbers<[1], [0], [0], [1], [0, 0, 1, 1], [], []>} : vector<32x16xf32>, vector<16x16xf32>, vector<32x16xf32> -> vector<32x16xf32>
    %15 = vector.extract_strided_slice %8 {offsets = [0, 0], sizes = [1, 16], strides = [1, 1]} : vector<32x16xf32> to vector<1x16xf32>
    %16 = vector.extract_strided_slice %8 {offsets = [1, 0], sizes = [1, 16], strides = [1, 1]} : vector<32x16xf32> to vector<1x16xf32>
    %17 = tpu.concatenate %15, %16 in 1 : vector<1x16xf32>, vector<1x16xf32> -> vector<1x32xf32>
    %18 = vector.extract_strided_slice %14 {offsets = [0, 0], sizes = [1, 16], strides = [1, 1]} : vector<32x16xf32> to vector<1x16xf32>
    %19 = vector.extract_strided_slice %14 {offsets = [1, 0], sizes = [1, 16], strides = [1, 1]} : vector<32x16xf32> to vector<1x16xf32>
    %20 = tpu.concatenate %18, %19 in 1 : vector<1x16xf32>, vector<1x16xf32> -> vector<1x32xf32>
    %21 = vector.extract_strided_slice %8 {offsets = [2, 0], sizes = [1, 16], strides = [1, 1]} : vector<32x16xf32> to vector<1x16xf32>
    %22 = vector.extract_strided_slice %8 {offsets = [3, 0], sizes = [1, 16], strides = [1, 1]} : vector<32x16xf32> to vector<1x16xf32>
    %23 = tpu.concatenate %21, %22 in 1 : vector<1x16xf32>, vector<1x16xf32> -> vector<1x32xf32>
    %24 = vector.extract_strided_slice %14 {offsets = [2, 0], sizes = [1, 16], strides = [1, 1]} : vector<32x16xf32> to vector<1x16xf32>
    %25 = vector.extract_strided_slice %14 {offsets = [3, 0], sizes = [1, 16], strides = [1, 1]} : vector<32x16xf32> to vector<1x16xf32>
    %26 = tpu.concatenate %24, %25 in 1 : vector<1x16xf32>, vector<1x16xf32> -> vector<1x32xf32>
    %27 = vector.extract_strided_slice %8 {offsets = [4, 0], sizes = [1, 16], strides = [1, 1]} : vector<32x16xf32> to vector<1x16xf32>
    %28 = vector.extract_strided_slice %8 {offsets = [5, 0], sizes = [1, 16], strides = [1, 1]} : vector<32x16xf32> to vector<1x16xf32>
    %29 = tpu.concatenate %27, %28 in 1 : vector<1x16xf32>, vector<1x16xf32> -> vector<1x32xf32>
    %30 = vector.extract_strided_slice %14 {offsets = [4, 0], sizes = [1, 16], strides = [1, 1]} : vector<32x16xf32> to vector<1x16xf32>
    %31 = vector.extract_strided_slice %14 {offsets = [5, 0], sizes = [1, 16], strides = [1, 1]} : vector<32x16xf32> to vector<1x16xf32>
    %32 = tpu.concatenate %30, %31 in 1 : vector<1x16xf32>, vector<1x16xf32> -> vector<1x32xf32>
    %33 = vector.extract_strided_slice %8 {offsets = [6, 0], sizes = [1, 16], strides = [1, 1]} : vector<32x16xf32> to vector<1x16xf32>
    %34 = vector.extract_strided_slice %8 {offsets = [7, 0], sizes = [1, 16], strides = [1, 1]} : vector<32x16xf32> to vector<1x16xf32>
    %35 = tpu.concatenate %33, %34 in 1 : vector<1x16xf32>, vector<1x16xf32> -> vector<1x32xf32>
    %36 = vector.extract_strided_slice %14 {offsets = [6, 0], sizes = [1, 16], strides = [1, 1]} : vector<32x16xf32> to vector<1x16xf32>
    %37 = vector.extract_strided_slice %14 {offsets = [7, 0], sizes = [1, 16], strides = [1, 1]} : vector<32x16xf32> to vector<1x16xf32>
    %38 = tpu.concatenate %36, %37 in 1 : vector<1x16xf32>, vector<1x16xf32> -> vector<1x32xf32>
    %39 = vector.extract_strided_slice %8 {offsets = [8, 0], sizes = [1, 16], strides = [1, 1]} : vector<32x16xf32> to vector<1x16xf32>
    %40 = vector.extract_strided_slice %8 {offsets = [9, 0], sizes = [1, 16], strides = [1, 1]} : vector<32x16xf32> to vector<1x16xf32>
    %41 = tpu.concatenate %39, %40 in 1 : vector<1x16xf32>, vector<1x16xf32> -> vector<1x32xf32>
    %42 = vector.extract_strided_slice %14 {offsets = [8, 0], sizes = [1, 16], strides = [1, 1]} : vector<32x16xf32> to vector<1x16xf32>
    %43 = vector.extract_strided_slice %14 {offsets = [9, 0], sizes = [1, 16], strides = [1, 1]} : vector<32x16xf32> to vector<1x16xf32>
    %44 = tpu.concatenate %42, %43 in 1 : vector<1x16xf32>, vector<1x16xf32> -> vector<1x32xf32>
    %45 = vector.extract_strided_slice %8 {offsets = [10, 0], sizes = [1, 16], strides = [1, 1]} : vector<32x16xf32> to vector<1x16xf32>
    %46 = vector.extract_strided_slice %8 {offsets = [11, 0], sizes = [1, 16], strides = [1, 1]} : vector<32x16xf32> to vector<1x16xf32>
    %47 = tpu.concatenate %45, %46 in 1 : vector<1x16xf32>, vector<1x16xf32> -> vector<1x32xf32>
    %48 = vector.extract_strided_slice %14 {offsets = [10, 0], sizes = [1, 16], strides = [1, 1]} : vector<32x16xf32> to vector<1x16xf32>
    %49 = vector.extract_strided_slice %14 {offsets = [11, 0], sizes = [1, 16], strides = [1, 1]} : vector<32x16xf32> to vector<1x16xf32>
    %50 = tpu.concatenate %48, %49 in 1 : vector<1x16xf32>, vector<1x16xf32> -> vector<1x32xf32>
    %51 = vector.extract_strided_slice %8 {offsets = [12, 0], sizes = [1, 16], strides = [1, 1]} : vector<32x16xf32> to vector<1x16xf32>
    %52 = vector.extract_strided_slice %8 {offsets = [13, 0], sizes = [1, 16], strides = [1, 1]} : vector<32x16xf32> to vector<1x16xf32>
    %53 = tpu.concatenate %51, %52 in 1 : vector<1x16xf32>, vector<1x16xf32> -> vector<1x32xf32>
    %54 = vector.extract_strided_slice %14 {offsets = [12, 0], sizes = [1, 16], strides = [1, 1]} : vector<32x16xf32> to vector<1x16xf32>
    %55 = vector.extract_strided_slice %14 {offsets = [13, 0], sizes = [1, 16], strides = [1, 1]} : vector<32x16xf32> to vector<1x16xf32>
    %56 = tpu.concatenate %54, %55 in 1 : vector<1x16xf32>, vector<1x16xf32> -> vector<1x32xf32>
    %57 = vector.extract_strided_slice %8 {offsets = [14, 0], sizes = [1, 16], strides = [1, 1]} : vector<32x16xf32> to vector<1x16xf32>
    %58 = vector.extract_strided_slice %8 {offsets = [15, 0], sizes = [1, 16], strides = [1, 1]} : vector<32x16xf32> to vector<1x16xf32>
    %59 = tpu.concatenate %57, %58 in 1 : vector<1x16xf32>, vector<1x16xf32> -> vector<1x32xf32>
    %60 = vector.extract_strided_slice %14 {offsets = [14, 0], sizes = [1, 16], strides = [1, 1]} : vector<32x16xf32> to vector<1x16xf32>
    %61 = vector.extract_strided_slice %14 {offsets = [15, 0], sizes = [1, 16], strides = [1, 1]} : vector<32x16xf32> to vector<1x16xf32>
    %62 = tpu.concatenate %60, %61 in 1 : vector<1x16xf32>, vector<1x16xf32> -> vector<1x32xf32>
    %63 = vector.extract_strided_slice %8 {offsets = [16, 0], sizes = [1, 16], strides = [1, 1]} : vector<32x16xf32> to vector<1x16xf32>
    %64 = vector.extract_strided_slice %8 {offsets = [17, 0], sizes = [1, 16], strides = [1, 1]} : vector<32x16xf32> to vector<1x16xf32>
    %65 = tpu.concatenate %63, %64 in 1 : vector<1x16xf32>, vector<1x16xf32> -> vector<1x32xf32>
    %66 = vector.extract_strided_slice %14 {offsets = [16, 0], sizes = [1, 16], strides = [1, 1]} : vector<32x16xf32> to vector<1x16xf32>
    %67 = vector.extract_strided_slice %14 {offsets = [17, 0], sizes = [1, 16], strides = [1, 1]} : vector<32x16xf32> to vector<1x16xf32>
    %68 = tpu.concatenate %66, %67 in 1 : vector<1x16xf32>, vector<1x16xf32> -> vector<1x32xf32>
    %69 = vector.extract_strided_slice %8 {offsets = [18, 0], sizes = [1, 16], strides = [1, 1]} : vector<32x16xf32> to vector<1x16xf32>
    %70 = vector.extract_strided_slice %8 {offsets = [19, 0], sizes = [1, 16], strides = [1, 1]} : vector<32x16xf32> to vector<1x16xf32>
    %71 = tpu.concatenate %69, %70 in 1 : vector<1x16xf32>, vector<1x16xf32> -> vector<1x32xf32>
    %72 = vector.extract_strided_slice %14 {offsets = [18, 0], sizes = [1, 16], strides = [1, 1]} : vector<32x16xf32> to vector<1x16xf32>
    %73 = vector.extract_strided_slice %14 {offsets = [19, 0], sizes = [1, 16], strides = [1, 1]} : vector<32x16xf32> to vector<1x16xf32>
    %74 = tpu.concatenate %72, %73 in 1 : vector<1x16xf32>, vector<1x16xf32> -> vector<1x32xf32>
    %75 = vector.extract_strided_slice %8 {offsets = [20, 0], sizes = [1, 16], strides = [1, 1]} : vector<32x16xf32> to vector<1x16xf32>
    %76 = vector.extract_strided_slice %8 {offsets = [21, 0], sizes = [1, 16], strides = [1, 1]} : vector<32x16xf32> to vector<1x16xf32>
    %77 = tpu.concatenate %75, %76 in 1 : vector<1x16xf32>, vector<1x16xf32> -> vector<1x32xf32>
    %78 = vector.extract_strided_slice %14 {offsets = [20, 0], sizes = [1, 16], strides = [1, 1]} : vector<32x16xf32> to vector<1x16xf32>
    %79 = vector.extract_strided_slice %14 {offsets = [21, 0], sizes = [1, 16], strides = [1, 1]} : vector<32x16xf32> to vector<1x16xf32>
    %80 = tpu.concatenate %78, %79 in 1 : vector<1x16xf32>, vector<1x16xf32> -> vector<1x32xf32>
    %81 = vector.extract_strided_slice %8 {offsets = [22, 0], sizes = [1, 16], strides = [1, 1]} : vector<32x16xf32> to vector<1x16xf32>
    %82 = vector.extract_strided_slice %8 {offsets = [23, 0], sizes = [1, 16], strides = [1, 1]} : vector<32x16xf32> to vector<1x16xf32>
    %83 = tpu.concatenate %81, %82 in 1 : vector<1x16xf32>, vector<1x16xf32> -> vector<1x32xf32>
    %84 = vector.extract_strided_slice %14 {offsets = [22, 0], sizes = [1, 16], strides = [1, 1]} : vector<32x16xf32> to vector<1x16xf32>
    %85 = vector.extract_strided_slice %14 {offsets = [23, 0], sizes = [1, 16], strides = [1, 1]} : vector<32x16xf32> to vector<1x16xf32>
    %86 = tpu.concatenate %84, %85 in 1 : vector<1x16xf32>, vector<1x16xf32> -> vector<1x32xf32>
    %87 = vector.extract_strided_slice %8 {offsets = [24, 0], sizes = [1, 16], strides = [1, 1]} : vector<32x16xf32> to vector<1x16xf32>
    %88 = vector.extract_strided_slice %8 {offsets = [25, 0], sizes = [1, 16], strides = [1, 1]} : vector<32x16xf32> to vector<1x16xf32>
    %89 = tpu.concatenate %87, %88 in 1 : vector<1x16xf32>, vector<1x16xf32> -> vector<1x32xf32>
    %90 = vector.extract_strided_slice %14 {offsets = [24, 0], sizes = [1, 16], strides = [1, 1]} : vector<32x16xf32> to vector<1x16xf32>
    %91 = vector.extract_strided_slice %14 {offsets = [25, 0], sizes = [1, 16], strides = [1, 1]} : vector<32x16xf32> to vector<1x16xf32>
    %92 = tpu.concatenate %90, %91 in 1 : vector<1x16xf32>, vector<1x16xf32> -> vector<1x32xf32>
    %93 = vector.extract_strided_slice %8 {offsets = [26, 0], sizes = [1, 16], strides = [1, 1]} : vector<32x16xf32> to vector<1x16xf32>
    %94 = vector.extract_strided_slice %8 {offsets = [27, 0], sizes = [1, 16], strides = [1, 1]} : vector<32x16xf32> to vector<1x16xf32>
    %95 = tpu.concatenate %93, %94 in 1 : vector<1x16xf32>, vector<1x16xf32> -> vector<1x32xf32>
    %96 = vector.extract_strided_slice %14 {offsets = [26, 0], sizes = [1, 16], strides = [1, 1]} : vector<32x16xf32> to vector<1x16xf32>
    %97 = vector.extract_strided_slice %14 {offsets = [27, 0], sizes = [1, 16], strides = [1, 1]} : vector<32x16xf32> to vector<1x16xf32>
    %98 = tpu.concatenate %96, %97 in 1 : vector<1x16xf32>, vector<1x16xf32> -> vector<1x32xf32>
    %99 = vector.extract_strided_slice %8 {offsets = [28, 0], sizes = [1, 16], strides = [1, 1]} : vector<32x16xf32> to vector<1x16xf32>
    %100 = vector.extract_strided_slice %8 {offsets = [29, 0], sizes = [1, 16], strides = [1, 1]} : vector<32x16xf32> to vector<1x16xf32>
    %101 = tpu.concatenate %99, %100 in 1 : vector<1x16xf32>, vector<1x16xf32> -> vector<1x32xf32>
    %102 = vector.extract_strided_slice %14 {offsets = [28, 0], sizes = [1, 16], strides = [1, 1]} : vector<32x16xf32> to vector<1x16xf32>
    %103 = vector.extract_strided_slice %14 {offsets = [29, 0], sizes = [1, 16], strides = [1, 1]} : vector<32x16xf32> to vector<1x16xf32>
    %104 = tpu.concatenate %102, %103 in 1 : vector<1x16xf32>, vector<1x16xf32> -> vector<1x32xf32>
    %105 = vector.extract_strided_slice %8 {offsets = [30, 0], sizes = [1, 16], strides = [1, 1]} : vector<32x16xf32> to vector<1x16xf32>
    %106 = vector.extract_strided_slice %8 {offsets = [31, 0], sizes = [1, 16], strides = [1, 1]} : vector<32x16xf32> to vector<1x16xf32>
    %107 = tpu.concatenate %105, %106 in 1 : vector<1x16xf32>, vector<1x16xf32> -> vector<1x32xf32>
    %108 = vector.extract_strided_slice %14 {offsets = [30, 0], sizes = [1, 16], strides = [1, 1]} : vector<32x16xf32> to vector<1x16xf32>
    %109 = vector.extract_strided_slice %14 {offsets = [31, 0], sizes = [1, 16], strides = [1, 1]} : vector<32x16xf32> to vector<1x16xf32>
    %110 = tpu.concatenate %108, %109 in 1 : vector<1x16xf32>, vector<1x16xf32> -> vector<1x32xf32>
    %111 = tpu.concatenate %17, %20, %23, %26, %29, %32, %35, %38, %41, %44, %47, %50, %53, %56, %59, %62 in 0 : vector<1x32xf32>, vector<1x32xf32>, vector<1x32xf32>, vector<1x32xf32>, vector<1x32xf32>, vector<1x32xf32>, vector<1x32xf32>, vector<1x32xf32>, vector<1x32xf32>, vector<1x32xf32>, vector<1x32xf32>, vector<1x32xf32>, vector<1x32xf32>, vector<1x32xf32>, vector<1x32xf32>, vector<1x32xf32> -> vector<16x32xf32>
    %112 = tpu.concatenate %65, %68, %71, %74, %77, %80, %83, %86, %89, %92, %95, %98, %101, %104, %107, %110 in 0 : vector<1x32xf32>, vector<1x32xf32>, vector<1x32xf32>, vector<1x32xf32>, vector<1x32xf32>, vector<1x32xf32>, vector<1x32xf32>, vector<1x32xf32>, vector<1x32xf32>, vector<1x32xf32>, vector<1x32xf32>, vector<1x32xf32>, vector<1x32xf32>, vector<1x32xf32>, vector<1x32xf32>, vector<1x32xf32> -> vector<16x32xf32>
    %113 = tpu.concatenate %111, %112 in 0 : vector<16x32xf32>, vector<16x32xf32> -> vector<32x32xf32>
    %c0_4 = arith.constant 0 : index
    %c0_5 = arith.constant 0 : index
    %114 = vector.load %arg2[%c0_4, %c0_5] : memref<32x192xf32, #tpu.memory_space<vmem>>, vector<32x192xf32>
    %cst_6 = arith.constant dense<0.000000e+00> : vector<32x192xf32>
    %115 = tpu.matmul %113, %114, %cst_6 {dimension_numbers = #tpu.dot_dimension_numbers<[1], [0], [0], [1], [0, 0, 1, 1], [], []>} : vector<32x32xf32>, vector<32x192xf32>, vector<32x192xf32> -> vector<32x192xf32>
    %c0_7 = arith.constant 0 : index
    %c0_8 = arith.constant 0 : index
    %116 = vector.load %arg3[%c0_7, %c0_8] : memref<1x192xf32, #tpu.memory_space<vmem>>, vector<1x192xf32>
    %117 = vector.broadcast %116 : vector<1x192xf32> to vector<32x192xf32>
    %118 = arith.addf %115, %117 : vector<32x192xf32>
    %c0_9 = arith.constant 0 : index
    %c0_10 = arith.constant 0 : index
    %119 = vector.load %arg4[%c0_9, %c0_10] : memref<64x192xf32, #tpu.memory_space<vmem>>, vector<64x192xf32>
    %c0_11 = arith.constant 0 : index
    %c0_12 = arith.constant 0 : index
    %120 = vector.load %arg5[%c0_11, %c0_12] : memref<1x192xf32, #tpu.memory_space<vmem>>, vector<1x192xf32>
    %cst_13 = arith.constant 0.000000e+00 : f32
    %121 = vector.broadcast %cst_13 : f32 to vector<2x64xf32>
    %cst_14 = arith.constant dense<0.000000e+00> : vector<2x192xf32>
    %122 = tpu.matmul %121, %119, %cst_14 {dimension_numbers = #tpu.dot_dimension_numbers<[1], [0], [0], [1], [0, 0, 1, 1], [], []>} : vector<2x64xf32>, vector<64x192xf32>, vector<2x192xf32> -> vector<2x192xf32>
    %123 = vector.broadcast %120 : vector<1x192xf32> to vector<2x192xf32>
    %124 = arith.addf %122, %123 : vector<2x192xf32>
    %125 = vector.extract_strided_slice %118 {offsets = [0, 0], sizes = [2, 96], strides = [1, 1]} : vector<32x192xf32> to vector<2x96xf32>
    %126 = vector.extract_strided_slice %118 {offsets = [30, 96], sizes = [2, 96], strides = [1, 1]} : vector<32x192xf32> to vector<2x96xf32>
    %127 = vector.extract_strided_slice %124 {offsets = [0, 0], sizes = [2, 96], strides = [1, 1]} : vector<2x192xf32> to vector<2x96xf32>
    %128 = vector.extract_strided_slice %121 {offsets = [0, 0], sizes = [2, 32], strides = [1, 1]} : vector<2x64xf32> to vector<2x32xf32>
    %129 = vector.extract_strided_slice %125 {offsets = [0, 0], sizes = [2, 32], strides = [1, 1]} : vector<2x96xf32> to vector<2x32xf32>
    %130 = vector.extract_strided_slice %127 {offsets = [0, 0], sizes = [2, 32], strides = [1, 1]} : vector<2x96xf32> to vector<2x32xf32>
    %131 = arith.addf %129, %130 : vector<2x32xf32>
    %132 = arith.negf %131 : vector<2x32xf32>
    %133 = math.exp %132 : vector<2x32xf32>
    %cst_15 = arith.constant 1.000000e+00 : f32
    %134 = vector.broadcast %cst_15 : f32 to vector<2x32xf32>
    %135 = arith.addf %134, %133 : vector<2x32xf32>
    %136 = arith.divf %134, %135 : vector<2x32xf32>
    %137 = vector.extract_strided_slice %125 {offsets = [0, 32], sizes = [2, 32], strides = [1, 1]} : vector<2x96xf32> to vector<2x32xf32>
    %138 = vector.extract_strided_slice %127 {offsets = [0, 32], sizes = [2, 32], strides = [1, 1]} : vector<2x96xf32> to vector<2x32xf32>
    %139 = arith.addf %137, %138 : vector<2x32xf32>
    %140 = arith.negf %139 : vector<2x32xf32>
    %141 = math.exp %140 : vector<2x32xf32>
    %cst_16 = arith.constant 1.000000e+00 : f32
    %142 = vector.broadcast %cst_16 : f32 to vector<2x32xf32>
    %143 = arith.addf %142, %141 : vector<2x32xf32>
    %144 = arith.divf %142, %143 : vector<2x32xf32>
    %145 = vector.extract_strided_slice %125 {offsets = [0, 64], sizes = [2, 32], strides = [1, 1]} : vector<2x96xf32> to vector<2x32xf32>
    %146 = vector.extract_strided_slice %127 {offsets = [0, 64], sizes = [2, 32], strides = [1, 1]} : vector<2x96xf32> to vector<2x32xf32>
    %147 = arith.mulf %136, %146 : vector<2x32xf32>
    %148 = arith.addf %145, %147 : vector<2x32xf32>
    %149 = math.tanh %148 : vector<2x32xf32>
    %cst_17 = arith.constant 1.000000e+00 : f32
    %150 = vector.broadcast %cst_17 : f32 to vector<2x32xf32>
    %151 = arith.subf %150, %144 : vector<2x32xf32>
    %152 = arith.mulf %151, %149 : vector<2x32xf32>
    %153 = arith.mulf %144, %128 : vector<2x32xf32>
    %154 = arith.addf %152, %153 : vector<2x32xf32>
    %155 = vector.extract_strided_slice %124 {offsets = [0, 96], sizes = [2, 96], strides = [1, 1]} : vector<2x192xf32> to vector<2x96xf32>
    %156 = vector.extract_strided_slice %121 {offsets = [0, 32], sizes = [2, 32], strides = [1, 1]} : vector<2x64xf32> to vector<2x32xf32>
    %157 = vector.extract_strided_slice %126 {offsets = [0, 0], sizes = [2, 32], strides = [1, 1]} : vector<2x96xf32> to vector<2x32xf32>
    %158 = vector.extract_strided_slice %155 {offsets = [0, 0], sizes = [2, 32], strides = [1, 1]} : vector<2x96xf32> to vector<2x32xf32>
    %159 = arith.addf %157, %158 : vector<2x32xf32>
    %160 = arith.negf %159 : vector<2x32xf32>
    %161 = math.exp %160 : vector<2x32xf32>
    %cst_18 = arith.constant 1.000000e+00 : f32
    %162 = vector.broadcast %cst_18 : f32 to vector<2x32xf32>
    %163 = arith.addf %162, %161 : vector<2x32xf32>
    %164 = arith.divf %162, %163 : vector<2x32xf32>
    %165 = vector.extract_strided_slice %126 {offsets = [0, 32], sizes = [2, 32], strides = [1, 1]} : vector<2x96xf32> to vector<2x32xf32>
    %166 = vector.extract_strided_slice %155 {offsets = [0, 32], sizes = [2, 32], strides = [1, 1]} : vector<2x96xf32> to vector<2x32xf32>
    %167 = arith.addf %165, %166 : vector<2x32xf32>
    %168 = arith.negf %167 : vector<2x32xf32>
    %169 = math.exp %168 : vector<2x32xf32>
    %cst_19 = arith.constant 1.000000e+00 : f32
    %170 = vector.broadcast %cst_19 : f32 to vector<2x32xf32>
    %171 = arith.addf %170, %169 : vector<2x32xf32>
    %172 = arith.divf %170, %171 : vector<2x32xf32>
    %173 = vector.extract_strided_slice %126 {offsets = [0, 64], sizes = [2, 32], strides = [1, 1]} : vector<2x96xf32> to vector<2x32xf32>
    %174 = vector.extract_strided_slice %155 {offsets = [0, 64], sizes = [2, 32], strides = [1, 1]} : vector<2x96xf32> to vector<2x32xf32>
    %175 = arith.mulf %164, %174 : vector<2x32xf32>
    %176 = arith.addf %173, %175 : vector<2x32xf32>
    %177 = math.tanh %176 : vector<2x32xf32>
    %cst_20 = arith.constant 1.000000e+00 : f32
    %178 = vector.broadcast %cst_20 : f32 to vector<2x32xf32>
    %179 = arith.subf %178, %172 : vector<2x32xf32>
    %180 = arith.mulf %179, %177 : vector<2x32xf32>
    %181 = arith.mulf %172, %156 : vector<2x32xf32>
    %182 = arith.addf %180, %181 : vector<2x32xf32>
    %183 = tpu.concatenate %154, %182 in 1 : vector<2x32xf32>, vector<2x32xf32> -> vector<2x64xf32>
    %cst_21 = arith.constant dense<0.000000e+00> : vector<2x192xf32>
    %184 = tpu.matmul %183, %119, %cst_21 {dimension_numbers = #tpu.dot_dimension_numbers<[1], [0], [0], [1], [0, 0, 1, 1], [], []>} : vector<2x64xf32>, vector<64x192xf32>, vector<2x192xf32> -> vector<2x192xf32>
    %185 = vector.broadcast %120 : vector<1x192xf32> to vector<2x192xf32>
    %186 = arith.addf %184, %185 : vector<2x192xf32>
    %187 = vector.extract_strided_slice %118 {offsets = [2, 0], sizes = [2, 96], strides = [1, 1]} : vector<32x192xf32> to vector<2x96xf32>
    %188 = vector.extract_strided_slice %118 {offsets = [28, 96], sizes = [2, 96], strides = [1, 1]} : vector<32x192xf32> to vector<2x96xf32>
    %189 = vector.extract_strided_slice %186 {offsets = [0, 0], sizes = [2, 96], strides = [1, 1]} : vector<2x192xf32> to vector<2x96xf32>
    %190 = vector.extract_strided_slice %183 {offsets = [0, 0], sizes = [2, 32], strides = [1, 1]} : vector<2x64xf32> to vector<2x32xf32>
    %191 = vector.extract_strided_slice %187 {offsets = [0, 0], sizes = [2, 32], strides = [1, 1]} : vector<2x96xf32> to vector<2x32xf32>
    %192 = vector.extract_strided_slice %189 {offsets = [0, 0], sizes = [2, 32], strides = [1, 1]} : vector<2x96xf32> to vector<2x32xf32>
    %193 = arith.addf %191, %192 : vector<2x32xf32>
    %194 = arith.negf %193 : vector<2x32xf32>
    %195 = math.exp %194 : vector<2x32xf32>
    %cst_22 = arith.constant 1.000000e+00 : f32
    %196 = vector.broadcast %cst_22 : f32 to vector<2x32xf32>
    %197 = arith.addf %196, %195 : vector<2x32xf32>
    %198 = arith.divf %196, %197 : vector<2x32xf32>
    %199 = vector.extract_strided_slice %187 {offsets = [0, 32], sizes = [2, 32], strides = [1, 1]} : vector<2x96xf32> to vector<2x32xf32>
    %200 = vector.extract_strided_slice %189 {offsets = [0, 32], sizes = [2, 32], strides = [1, 1]} : vector<2x96xf32> to vector<2x32xf32>
    %201 = arith.addf %199, %200 : vector<2x32xf32>
    %202 = arith.negf %201 : vector<2x32xf32>
    %203 = math.exp %202 : vector<2x32xf32>
    %cst_23 = arith.constant 1.000000e+00 : f32
    %204 = vector.broadcast %cst_23 : f32 to vector<2x32xf32>
    %205 = arith.addf %204, %203 : vector<2x32xf32>
    %206 = arith.divf %204, %205 : vector<2x32xf32>
    %207 = vector.extract_strided_slice %187 {offsets = [0, 64], sizes = [2, 32], strides = [1, 1]} : vector<2x96xf32> to vector<2x32xf32>
    %208 = vector.extract_strided_slice %189 {offsets = [0, 64], sizes = [2, 32], strides = [1, 1]} : vector<2x96xf32> to vector<2x32xf32>
    %209 = arith.mulf %198, %208 : vector<2x32xf32>
    %210 = arith.addf %207, %209 : vector<2x32xf32>
    %211 = math.tanh %210 : vector<2x32xf32>
    %cst_24 = arith.constant 1.000000e+00 : f32
    %212 = vector.broadcast %cst_24 : f32 to vector<2x32xf32>
    %213 = arith.subf %212, %206 : vector<2x32xf32>
    %214 = arith.mulf %213, %211 : vector<2x32xf32>
    %215 = arith.mulf %206, %190 : vector<2x32xf32>
    %216 = arith.addf %214, %215 : vector<2x32xf32>
    %217 = vector.extract_strided_slice %186 {offsets = [0, 96], sizes = [2, 96], strides = [1, 1]} : vector<2x192xf32> to vector<2x96xf32>
    %218 = vector.extract_strided_slice %183 {offsets = [0, 32], sizes = [2, 32], strides = [1, 1]} : vector<2x64xf32> to vector<2x32xf32>
    %219 = vector.extract_strided_slice %188 {offsets = [0, 0], sizes = [2, 32], strides = [1, 1]} : vector<2x96xf32> to vector<2x32xf32>
    %220 = vector.extract_strided_slice %217 {offsets = [0, 0], sizes = [2, 32], strides = [1, 1]} : vector<2x96xf32> to vector<2x32xf32>
    %221 = arith.addf %219, %220 : vector<2x32xf32>
    %222 = arith.negf %221 : vector<2x32xf32>
    %223 = math.exp %222 : vector<2x32xf32>
    %cst_25 = arith.constant 1.000000e+00 : f32
    %224 = vector.broadcast %cst_25 : f32 to vector<2x32xf32>
    %225 = arith.addf %224, %223 : vector<2x32xf32>
    %226 = arith.divf %224, %225 : vector<2x32xf32>
    %227 = vector.extract_strided_slice %188 {offsets = [0, 32], sizes = [2, 32], strides = [1, 1]} : vector<2x96xf32> to vector<2x32xf32>
    %228 = vector.extract_strided_slice %217 {offsets = [0, 32], sizes = [2, 32], strides = [1, 1]} : vector<2x96xf32> to vector<2x32xf32>
    %229 = arith.addf %227, %228 : vector<2x32xf32>
    %230 = arith.negf %229 : vector<2x32xf32>
    %231 = math.exp %230 : vector<2x32xf32>
    %cst_26 = arith.constant 1.000000e+00 : f32
    %232 = vector.broadcast %cst_26 : f32 to vector<2x32xf32>
    %233 = arith.addf %232, %231 : vector<2x32xf32>
    %234 = arith.divf %232, %233 : vector<2x32xf32>
    %235 = vector.extract_strided_slice %188 {offsets = [0, 64], sizes = [2, 32], strides = [1, 1]} : vector<2x96xf32> to vector<2x32xf32>
    %236 = vector.extract_strided_slice %217 {offsets = [0, 64], sizes = [2, 32], strides = [1, 1]} : vector<2x96xf32> to vector<2x32xf32>
    %237 = arith.mulf %226, %236 : vector<2x32xf32>
    %238 = arith.addf %235, %237 : vector<2x32xf32>
    %239 = math.tanh %238 : vector<2x32xf32>
    %cst_27 = arith.constant 1.000000e+00 : f32
    %240 = vector.broadcast %cst_27 : f32 to vector<2x32xf32>
    %241 = arith.subf %240, %234 : vector<2x32xf32>
    %242 = arith.mulf %241, %239 : vector<2x32xf32>
    %243 = arith.mulf %234, %218 : vector<2x32xf32>
    %244 = arith.addf %242, %243 : vector<2x32xf32>
    %245 = tpu.concatenate %216, %244 in 1 : vector<2x32xf32>, vector<2x32xf32> -> vector<2x64xf32>
    %cst_28 = arith.constant dense<0.000000e+00> : vector<2x192xf32>
    %246 = tpu.matmul %245, %119, %cst_28 {dimension_numbers = #tpu.dot_dimension_numbers<[1], [0], [0], [1], [0, 0, 1, 1], [], []>} : vector<2x64xf32>, vector<64x192xf32>, vector<2x192xf32> -> vector<2x192xf32>
    %247 = vector.broadcast %120 : vector<1x192xf32> to vector<2x192xf32>
    %248 = arith.addf %246, %247 : vector<2x192xf32>
    %249 = vector.extract_strided_slice %118 {offsets = [4, 0], sizes = [2, 96], strides = [1, 1]} : vector<32x192xf32> to vector<2x96xf32>
    %250 = vector.extract_strided_slice %118 {offsets = [26, 96], sizes = [2, 96], strides = [1, 1]} : vector<32x192xf32> to vector<2x96xf32>
    %251 = vector.extract_strided_slice %248 {offsets = [0, 0], sizes = [2, 96], strides = [1, 1]} : vector<2x192xf32> to vector<2x96xf32>
    %252 = vector.extract_strided_slice %245 {offsets = [0, 0], sizes = [2, 32], strides = [1, 1]} : vector<2x64xf32> to vector<2x32xf32>
    %253 = vector.extract_strided_slice %249 {offsets = [0, 0], sizes = [2, 32], strides = [1, 1]} : vector<2x96xf32> to vector<2x32xf32>
    %254 = vector.extract_strided_slice %251 {offsets = [0, 0], sizes = [2, 32], strides = [1, 1]} : vector<2x96xf32> to vector<2x32xf32>
    %255 = arith.addf %253, %254 : vector<2x32xf32>
    %256 = arith.negf %255 : vector<2x32xf32>
    %257 = math.exp %256 : vector<2x32xf32>
    %cst_29 = arith.constant 1.000000e+00 : f32
    %258 = vector.broadcast %cst_29 : f32 to vector<2x32xf32>
    %259 = arith.addf %258, %257 : vector<2x32xf32>
    %260 = arith.divf %258, %259 : vector<2x32xf32>
    %261 = vector.extract_strided_slice %249 {offsets = [0, 32], sizes = [2, 32], strides = [1, 1]} : vector<2x96xf32> to vector<2x32xf32>
    %262 = vector.extract_strided_slice %251 {offsets = [0, 32], sizes = [2, 32], strides = [1, 1]} : vector<2x96xf32> to vector<2x32xf32>
    %263 = arith.addf %261, %262 : vector<2x32xf32>
    %264 = arith.negf %263 : vector<2x32xf32>
    %265 = math.exp %264 : vector<2x32xf32>
    %cst_30 = arith.constant 1.000000e+00 : f32
    %266 = vector.broadcast %cst_30 : f32 to vector<2x32xf32>
    %267 = arith.addf %266, %265 : vector<2x32xf32>
    %268 = arith.divf %266, %267 : vector<2x32xf32>
    %269 = vector.extract_strided_slice %249 {offsets = [0, 64], sizes = [2, 32], strides = [1, 1]} : vector<2x96xf32> to vector<2x32xf32>
    %270 = vector.extract_strided_slice %251 {offsets = [0, 64], sizes = [2, 32], strides = [1, 1]} : vector<2x96xf32> to vector<2x32xf32>
    %271 = arith.mulf %260, %270 : vector<2x32xf32>
    %272 = arith.addf %269, %271 : vector<2x32xf32>
    %273 = math.tanh %272 : vector<2x32xf32>
    %cst_31 = arith.constant 1.000000e+00 : f32
    %274 = vector.broadcast %cst_31 : f32 to vector<2x32xf32>
    %275 = arith.subf %274, %268 : vector<2x32xf32>
    %276 = arith.mulf %275, %273 : vector<2x32xf32>
    %277 = arith.mulf %268, %252 : vector<2x32xf32>
    %278 = arith.addf %276, %277 : vector<2x32xf32>
    %279 = vector.extract_strided_slice %248 {offsets = [0, 96], sizes = [2, 96], strides = [1, 1]} : vector<2x192xf32> to vector<2x96xf32>
    %280 = vector.extract_strided_slice %245 {offsets = [0, 32], sizes = [2, 32], strides = [1, 1]} : vector<2x64xf32> to vector<2x32xf32>
    %281 = vector.extract_strided_slice %250 {offsets = [0, 0], sizes = [2, 32], strides = [1, 1]} : vector<2x96xf32> to vector<2x32xf32>
    %282 = vector.extract_strided_slice %279 {offsets = [0, 0], sizes = [2, 32], strides = [1, 1]} : vector<2x96xf32> to vector<2x32xf32>
    %283 = arith.addf %281, %282 : vector<2x32xf32>
    %284 = arith.negf %283 : vector<2x32xf32>
    %285 = math.exp %284 : vector<2x32xf32>
    %cst_32 = arith.constant 1.000000e+00 : f32
    %286 = vector.broadcast %cst_32 : f32 to vector<2x32xf32>
    %287 = arith.addf %286, %285 : vector<2x32xf32>
    %288 = arith.divf %286, %287 : vector<2x32xf32>
    %289 = vector.extract_strided_slice %250 {offsets = [0, 32], sizes = [2, 32], strides = [1, 1]} : vector<2x96xf32> to vector<2x32xf32>
    %290 = vector.extract_strided_slice %279 {offsets = [0, 32], sizes = [2, 32], strides = [1, 1]} : vector<2x96xf32> to vector<2x32xf32>
    %291 = arith.addf %289, %290 : vector<2x32xf32>
    %292 = arith.negf %291 : vector<2x32xf32>
    %293 = math.exp %292 : vector<2x32xf32>
    %cst_33 = arith.constant 1.000000e+00 : f32
    %294 = vector.broadcast %cst_33 : f32 to vector<2x32xf32>
    %295 = arith.addf %294, %293 : vector<2x32xf32>
    %296 = arith.divf %294, %295 : vector<2x32xf32>
    %297 = vector.extract_strided_slice %250 {offsets = [0, 64], sizes = [2, 32], strides = [1, 1]} : vector<2x96xf32> to vector<2x32xf32>
    %298 = vector.extract_strided_slice %279 {offsets = [0, 64], sizes = [2, 32], strides = [1, 1]} : vector<2x96xf32> to vector<2x32xf32>
    %299 = arith.mulf %288, %298 : vector<2x32xf32>
    %300 = arith.addf %297, %299 : vector<2x32xf32>
    %301 = math.tanh %300 : vector<2x32xf32>
    %cst_34 = arith.constant 1.000000e+00 : f32
    %302 = vector.broadcast %cst_34 : f32 to vector<2x32xf32>
    %303 = arith.subf %302, %296 : vector<2x32xf32>
    %304 = arith.mulf %303, %301 : vector<2x32xf32>
    %305 = arith.mulf %296, %280 : vector<2x32xf32>
    %306 = arith.addf %304, %305 : vector<2x32xf32>
    %307 = tpu.concatenate %278, %306 in 1 : vector<2x32xf32>, vector<2x32xf32> -> vector<2x64xf32>
    %cst_35 = arith.constant dense<0.000000e+00> : vector<2x192xf32>
    %308 = tpu.matmul %307, %119, %cst_35 {dimension_numbers = #tpu.dot_dimension_numbers<[1], [0], [0], [1], [0, 0, 1, 1], [], []>} : vector<2x64xf32>, vector<64x192xf32>, vector<2x192xf32> -> vector<2x192xf32>
    %309 = vector.broadcast %120 : vector<1x192xf32> to vector<2x192xf32>
    %310 = arith.addf %308, %309 : vector<2x192xf32>
    %311 = vector.extract_strided_slice %118 {offsets = [6, 0], sizes = [2, 96], strides = [1, 1]} : vector<32x192xf32> to vector<2x96xf32>
    %312 = vector.extract_strided_slice %118 {offsets = [24, 96], sizes = [2, 96], strides = [1, 1]} : vector<32x192xf32> to vector<2x96xf32>
    %313 = vector.extract_strided_slice %310 {offsets = [0, 0], sizes = [2, 96], strides = [1, 1]} : vector<2x192xf32> to vector<2x96xf32>
    %314 = vector.extract_strided_slice %307 {offsets = [0, 0], sizes = [2, 32], strides = [1, 1]} : vector<2x64xf32> to vector<2x32xf32>
    %315 = vector.extract_strided_slice %311 {offsets = [0, 0], sizes = [2, 32], strides = [1, 1]} : vector<2x96xf32> to vector<2x32xf32>
    %316 = vector.extract_strided_slice %313 {offsets = [0, 0], sizes = [2, 32], strides = [1, 1]} : vector<2x96xf32> to vector<2x32xf32>
    %317 = arith.addf %315, %316 : vector<2x32xf32>
    %318 = arith.negf %317 : vector<2x32xf32>
    %319 = math.exp %318 : vector<2x32xf32>
    %cst_36 = arith.constant 1.000000e+00 : f32
    %320 = vector.broadcast %cst_36 : f32 to vector<2x32xf32>
    %321 = arith.addf %320, %319 : vector<2x32xf32>
    %322 = arith.divf %320, %321 : vector<2x32xf32>
    %323 = vector.extract_strided_slice %311 {offsets = [0, 32], sizes = [2, 32], strides = [1, 1]} : vector<2x96xf32> to vector<2x32xf32>
    %324 = vector.extract_strided_slice %313 {offsets = [0, 32], sizes = [2, 32], strides = [1, 1]} : vector<2x96xf32> to vector<2x32xf32>
    %325 = arith.addf %323, %324 : vector<2x32xf32>
    %326 = arith.negf %325 : vector<2x32xf32>
    %327 = math.exp %326 : vector<2x32xf32>
    %cst_37 = arith.constant 1.000000e+00 : f32
    %328 = vector.broadcast %cst_37 : f32 to vector<2x32xf32>
    %329 = arith.addf %328, %327 : vector<2x32xf32>
    %330 = arith.divf %328, %329 : vector<2x32xf32>
    %331 = vector.extract_strided_slice %311 {offsets = [0, 64], sizes = [2, 32], strides = [1, 1]} : vector<2x96xf32> to vector<2x32xf32>
    %332 = vector.extract_strided_slice %313 {offsets = [0, 64], sizes = [2, 32], strides = [1, 1]} : vector<2x96xf32> to vector<2x32xf32>
    %333 = arith.mulf %322, %332 : vector<2x32xf32>
    %334 = arith.addf %331, %333 : vector<2x32xf32>
    %335 = math.tanh %334 : vector<2x32xf32>
    %cst_38 = arith.constant 1.000000e+00 : f32
    %336 = vector.broadcast %cst_38 : f32 to vector<2x32xf32>
    %337 = arith.subf %336, %330 : vector<2x32xf32>
    %338 = arith.mulf %337, %335 : vector<2x32xf32>
    %339 = arith.mulf %330, %314 : vector<2x32xf32>
    %340 = arith.addf %338, %339 : vector<2x32xf32>
    %341 = vector.extract_strided_slice %310 {offsets = [0, 96], sizes = [2, 96], strides = [1, 1]} : vector<2x192xf32> to vector<2x96xf32>
    %342 = vector.extract_strided_slice %307 {offsets = [0, 32], sizes = [2, 32], strides = [1, 1]} : vector<2x64xf32> to vector<2x32xf32>
    %343 = vector.extract_strided_slice %312 {offsets = [0, 0], sizes = [2, 32], strides = [1, 1]} : vector<2x96xf32> to vector<2x32xf32>
    %344 = vector.extract_strided_slice %341 {offsets = [0, 0], sizes = [2, 32], strides = [1, 1]} : vector<2x96xf32> to vector<2x32xf32>
    %345 = arith.addf %343, %344 : vector<2x32xf32>
    %346 = arith.negf %345 : vector<2x32xf32>
    %347 = math.exp %346 : vector<2x32xf32>
    %cst_39 = arith.constant 1.000000e+00 : f32
    %348 = vector.broadcast %cst_39 : f32 to vector<2x32xf32>
    %349 = arith.addf %348, %347 : vector<2x32xf32>
    %350 = arith.divf %348, %349 : vector<2x32xf32>
    %351 = vector.extract_strided_slice %312 {offsets = [0, 32], sizes = [2, 32], strides = [1, 1]} : vector<2x96xf32> to vector<2x32xf32>
    %352 = vector.extract_strided_slice %341 {offsets = [0, 32], sizes = [2, 32], strides = [1, 1]} : vector<2x96xf32> to vector<2x32xf32>
    %353 = arith.addf %351, %352 : vector<2x32xf32>
    %354 = arith.negf %353 : vector<2x32xf32>
    %355 = math.exp %354 : vector<2x32xf32>
    %cst_40 = arith.constant 1.000000e+00 : f32
    %356 = vector.broadcast %cst_40 : f32 to vector<2x32xf32>
    %357 = arith.addf %356, %355 : vector<2x32xf32>
    %358 = arith.divf %356, %357 : vector<2x32xf32>
    %359 = vector.extract_strided_slice %312 {offsets = [0, 64], sizes = [2, 32], strides = [1, 1]} : vector<2x96xf32> to vector<2x32xf32>
    %360 = vector.extract_strided_slice %341 {offsets = [0, 64], sizes = [2, 32], strides = [1, 1]} : vector<2x96xf32> to vector<2x32xf32>
    %361 = arith.mulf %350, %360 : vector<2x32xf32>
    %362 = arith.addf %359, %361 : vector<2x32xf32>
    %363 = math.tanh %362 : vector<2x32xf32>
    %cst_41 = arith.constant 1.000000e+00 : f32
    %364 = vector.broadcast %cst_41 : f32 to vector<2x32xf32>
    %365 = arith.subf %364, %358 : vector<2x32xf32>
    %366 = arith.mulf %365, %363 : vector<2x32xf32>
    %367 = arith.mulf %358, %342 : vector<2x32xf32>
    %368 = arith.addf %366, %367 : vector<2x32xf32>
    %369 = tpu.concatenate %340, %368 in 1 : vector<2x32xf32>, vector<2x32xf32> -> vector<2x64xf32>
    %cst_42 = arith.constant dense<0.000000e+00> : vector<2x192xf32>
    %370 = tpu.matmul %369, %119, %cst_42 {dimension_numbers = #tpu.dot_dimension_numbers<[1], [0], [0], [1], [0, 0, 1, 1], [], []>} : vector<2x64xf32>, vector<64x192xf32>, vector<2x192xf32> -> vector<2x192xf32>
    %371 = vector.broadcast %120 : vector<1x192xf32> to vector<2x192xf32>
    %372 = arith.addf %370, %371 : vector<2x192xf32>
    %373 = vector.extract_strided_slice %118 {offsets = [8, 0], sizes = [2, 96], strides = [1, 1]} : vector<32x192xf32> to vector<2x96xf32>
    %374 = vector.extract_strided_slice %118 {offsets = [22, 96], sizes = [2, 96], strides = [1, 1]} : vector<32x192xf32> to vector<2x96xf32>
    %375 = vector.extract_strided_slice %372 {offsets = [0, 0], sizes = [2, 96], strides = [1, 1]} : vector<2x192xf32> to vector<2x96xf32>
    %376 = vector.extract_strided_slice %369 {offsets = [0, 0], sizes = [2, 32], strides = [1, 1]} : vector<2x64xf32> to vector<2x32xf32>
    %377 = vector.extract_strided_slice %373 {offsets = [0, 0], sizes = [2, 32], strides = [1, 1]} : vector<2x96xf32> to vector<2x32xf32>
    %378 = vector.extract_strided_slice %375 {offsets = [0, 0], sizes = [2, 32], strides = [1, 1]} : vector<2x96xf32> to vector<2x32xf32>
    %379 = arith.addf %377, %378 : vector<2x32xf32>
    %380 = arith.negf %379 : vector<2x32xf32>
    %381 = math.exp %380 : vector<2x32xf32>
    %cst_43 = arith.constant 1.000000e+00 : f32
    %382 = vector.broadcast %cst_43 : f32 to vector<2x32xf32>
    %383 = arith.addf %382, %381 : vector<2x32xf32>
    %384 = arith.divf %382, %383 : vector<2x32xf32>
    %385 = vector.extract_strided_slice %373 {offsets = [0, 32], sizes = [2, 32], strides = [1, 1]} : vector<2x96xf32> to vector<2x32xf32>
    %386 = vector.extract_strided_slice %375 {offsets = [0, 32], sizes = [2, 32], strides = [1, 1]} : vector<2x96xf32> to vector<2x32xf32>
    %387 = arith.addf %385, %386 : vector<2x32xf32>
    %388 = arith.negf %387 : vector<2x32xf32>
    %389 = math.exp %388 : vector<2x32xf32>
    %cst_44 = arith.constant 1.000000e+00 : f32
    %390 = vector.broadcast %cst_44 : f32 to vector<2x32xf32>
    %391 = arith.addf %390, %389 : vector<2x32xf32>
    %392 = arith.divf %390, %391 : vector<2x32xf32>
    %393 = vector.extract_strided_slice %373 {offsets = [0, 64], sizes = [2, 32], strides = [1, 1]} : vector<2x96xf32> to vector<2x32xf32>
    %394 = vector.extract_strided_slice %375 {offsets = [0, 64], sizes = [2, 32], strides = [1, 1]} : vector<2x96xf32> to vector<2x32xf32>
    %395 = arith.mulf %384, %394 : vector<2x32xf32>
    %396 = arith.addf %393, %395 : vector<2x32xf32>
    %397 = math.tanh %396 : vector<2x32xf32>
    %cst_45 = arith.constant 1.000000e+00 : f32
    %398 = vector.broadcast %cst_45 : f32 to vector<2x32xf32>
    %399 = arith.subf %398, %392 : vector<2x32xf32>
    %400 = arith.mulf %399, %397 : vector<2x32xf32>
    %401 = arith.mulf %392, %376 : vector<2x32xf32>
    %402 = arith.addf %400, %401 : vector<2x32xf32>
    %403 = vector.extract_strided_slice %372 {offsets = [0, 96], sizes = [2, 96], strides = [1, 1]} : vector<2x192xf32> to vector<2x96xf32>
    %404 = vector.extract_strided_slice %369 {offsets = [0, 32], sizes = [2, 32], strides = [1, 1]} : vector<2x64xf32> to vector<2x32xf32>
    %405 = vector.extract_strided_slice %374 {offsets = [0, 0], sizes = [2, 32], strides = [1, 1]} : vector<2x96xf32> to vector<2x32xf32>
    %406 = vector.extract_strided_slice %403 {offsets = [0, 0], sizes = [2, 32], strides = [1, 1]} : vector<2x96xf32> to vector<2x32xf32>
    %407 = arith.addf %405, %406 : vector<2x32xf32>
    %408 = arith.negf %407 : vector<2x32xf32>
    %409 = math.exp %408 : vector<2x32xf32>
    %cst_46 = arith.constant 1.000000e+00 : f32
    %410 = vector.broadcast %cst_46 : f32 to vector<2x32xf32>
    %411 = arith.addf %410, %409 : vector<2x32xf32>
    %412 = arith.divf %410, %411 : vector<2x32xf32>
    %413 = vector.extract_strided_slice %374 {offsets = [0, 32], sizes = [2, 32], strides = [1, 1]} : vector<2x96xf32> to vector<2x32xf32>
    %414 = vector.extract_strided_slice %403 {offsets = [0, 32], sizes = [2, 32], strides = [1, 1]} : vector<2x96xf32> to vector<2x32xf32>
    %415 = arith.addf %413, %414 : vector<2x32xf32>
    %416 = arith.negf %415 : vector<2x32xf32>
    %417 = math.exp %416 : vector<2x32xf32>
    %cst_47 = arith.constant 1.000000e+00 : f32
    %418 = vector.broadcast %cst_47 : f32 to vector<2x32xf32>
    %419 = arith.addf %418, %417 : vector<2x32xf32>
    %420 = arith.divf %418, %419 : vector<2x32xf32>
    %421 = vector.extract_strided_slice %374 {offsets = [0, 64], sizes = [2, 32], strides = [1, 1]} : vector<2x96xf32> to vector<2x32xf32>
    %422 = vector.extract_strided_slice %403 {offsets = [0, 64], sizes = [2, 32], strides = [1, 1]} : vector<2x96xf32> to vector<2x32xf32>
    %423 = arith.mulf %412, %422 : vector<2x32xf32>
    %424 = arith.addf %421, %423 : vector<2x32xf32>
    %425 = math.tanh %424 : vector<2x32xf32>
    %cst_48 = arith.constant 1.000000e+00 : f32
    %426 = vector.broadcast %cst_48 : f32 to vector<2x32xf32>
    %427 = arith.subf %426, %420 : vector<2x32xf32>
    %428 = arith.mulf %427, %425 : vector<2x32xf32>
    %429 = arith.mulf %420, %404 : vector<2x32xf32>
    %430 = arith.addf %428, %429 : vector<2x32xf32>
    %431 = tpu.concatenate %402, %430 in 1 : vector<2x32xf32>, vector<2x32xf32> -> vector<2x64xf32>
    %cst_49 = arith.constant dense<0.000000e+00> : vector<2x192xf32>
    %432 = tpu.matmul %431, %119, %cst_49 {dimension_numbers = #tpu.dot_dimension_numbers<[1], [0], [0], [1], [0, 0, 1, 1], [], []>} : vector<2x64xf32>, vector<64x192xf32>, vector<2x192xf32> -> vector<2x192xf32>
    %433 = vector.broadcast %120 : vector<1x192xf32> to vector<2x192xf32>
    %434 = arith.addf %432, %433 : vector<2x192xf32>
    %435 = vector.extract_strided_slice %118 {offsets = [10, 0], sizes = [2, 96], strides = [1, 1]} : vector<32x192xf32> to vector<2x96xf32>
    %436 = vector.extract_strided_slice %118 {offsets = [20, 96], sizes = [2, 96], strides = [1, 1]} : vector<32x192xf32> to vector<2x96xf32>
    %437 = vector.extract_strided_slice %434 {offsets = [0, 0], sizes = [2, 96], strides = [1, 1]} : vector<2x192xf32> to vector<2x96xf32>
    %438 = vector.extract_strided_slice %431 {offsets = [0, 0], sizes = [2, 32], strides = [1, 1]} : vector<2x64xf32> to vector<2x32xf32>
    %439 = vector.extract_strided_slice %435 {offsets = [0, 0], sizes = [2, 32], strides = [1, 1]} : vector<2x96xf32> to vector<2x32xf32>
    %440 = vector.extract_strided_slice %437 {offsets = [0, 0], sizes = [2, 32], strides = [1, 1]} : vector<2x96xf32> to vector<2x32xf32>
    %441 = arith.addf %439, %440 : vector<2x32xf32>
    %442 = arith.negf %441 : vector<2x32xf32>
    %443 = math.exp %442 : vector<2x32xf32>
    %cst_50 = arith.constant 1.000000e+00 : f32
    %444 = vector.broadcast %cst_50 : f32 to vector<2x32xf32>
    %445 = arith.addf %444, %443 : vector<2x32xf32>
    %446 = arith.divf %444, %445 : vector<2x32xf32>
    %447 = vector.extract_strided_slice %435 {offsets = [0, 32], sizes = [2, 32], strides = [1, 1]} : vector<2x96xf32> to vector<2x32xf32>
    %448 = vector.extract_strided_slice %437 {offsets = [0, 32], sizes = [2, 32], strides = [1, 1]} : vector<2x96xf32> to vector<2x32xf32>
    %449 = arith.addf %447, %448 : vector<2x32xf32>
    %450 = arith.negf %449 : vector<2x32xf32>
    %451 = math.exp %450 : vector<2x32xf32>
    %cst_51 = arith.constant 1.000000e+00 : f32
    %452 = vector.broadcast %cst_51 : f32 to vector<2x32xf32>
    %453 = arith.addf %452, %451 : vector<2x32xf32>
    %454 = arith.divf %452, %453 : vector<2x32xf32>
    %455 = vector.extract_strided_slice %435 {offsets = [0, 64], sizes = [2, 32], strides = [1, 1]} : vector<2x96xf32> to vector<2x32xf32>
    %456 = vector.extract_strided_slice %437 {offsets = [0, 64], sizes = [2, 32], strides = [1, 1]} : vector<2x96xf32> to vector<2x32xf32>
    %457 = arith.mulf %446, %456 : vector<2x32xf32>
    %458 = arith.addf %455, %457 : vector<2x32xf32>
    %459 = math.tanh %458 : vector<2x32xf32>
    %cst_52 = arith.constant 1.000000e+00 : f32
    %460 = vector.broadcast %cst_52 : f32 to vector<2x32xf32>
    %461 = arith.subf %460, %454 : vector<2x32xf32>
    %462 = arith.mulf %461, %459 : vector<2x32xf32>
    %463 = arith.mulf %454, %438 : vector<2x32xf32>
    %464 = arith.addf %462, %463 : vector<2x32xf32>
    %465 = vector.extract_strided_slice %434 {offsets = [0, 96], sizes = [2, 96], strides = [1, 1]} : vector<2x192xf32> to vector<2x96xf32>
    %466 = vector.extract_strided_slice %431 {offsets = [0, 32], sizes = [2, 32], strides = [1, 1]} : vector<2x64xf32> to vector<2x32xf32>
    %467 = vector.extract_strided_slice %436 {offsets = [0, 0], sizes = [2, 32], strides = [1, 1]} : vector<2x96xf32> to vector<2x32xf32>
    %468 = vector.extract_strided_slice %465 {offsets = [0, 0], sizes = [2, 32], strides = [1, 1]} : vector<2x96xf32> to vector<2x32xf32>
    %469 = arith.addf %467, %468 : vector<2x32xf32>
    %470 = arith.negf %469 : vector<2x32xf32>
    %471 = math.exp %470 : vector<2x32xf32>
    %cst_53 = arith.constant 1.000000e+00 : f32
    %472 = vector.broadcast %cst_53 : f32 to vector<2x32xf32>
    %473 = arith.addf %472, %471 : vector<2x32xf32>
    %474 = arith.divf %472, %473 : vector<2x32xf32>
    %475 = vector.extract_strided_slice %436 {offsets = [0, 32], sizes = [2, 32], strides = [1, 1]} : vector<2x96xf32> to vector<2x32xf32>
    %476 = vector.extract_strided_slice %465 {offsets = [0, 32], sizes = [2, 32], strides = [1, 1]} : vector<2x96xf32> to vector<2x32xf32>
    %477 = arith.addf %475, %476 : vector<2x32xf32>
    %478 = arith.negf %477 : vector<2x32xf32>
    %479 = math.exp %478 : vector<2x32xf32>
    %cst_54 = arith.constant 1.000000e+00 : f32
    %480 = vector.broadcast %cst_54 : f32 to vector<2x32xf32>
    %481 = arith.addf %480, %479 : vector<2x32xf32>
    %482 = arith.divf %480, %481 : vector<2x32xf32>
    %483 = vector.extract_strided_slice %436 {offsets = [0, 64], sizes = [2, 32], strides = [1, 1]} : vector<2x96xf32> to vector<2x32xf32>
    %484 = vector.extract_strided_slice %465 {offsets = [0, 64], sizes = [2, 32], strides = [1, 1]} : vector<2x96xf32> to vector<2x32xf32>
    %485 = arith.mulf %474, %484 : vector<2x32xf32>
    %486 = arith.addf %483, %485 : vector<2x32xf32>
    %487 = math.tanh %486 : vector<2x32xf32>
    %cst_55 = arith.constant 1.000000e+00 : f32
    %488 = vector.broadcast %cst_55 : f32 to vector<2x32xf32>
    %489 = arith.subf %488, %482 : vector<2x32xf32>
    %490 = arith.mulf %489, %487 : vector<2x32xf32>
    %491 = arith.mulf %482, %466 : vector<2x32xf32>
    %492 = arith.addf %490, %491 : vector<2x32xf32>
    %493 = tpu.concatenate %464, %492 in 1 : vector<2x32xf32>, vector<2x32xf32> -> vector<2x64xf32>
    %cst_56 = arith.constant dense<0.000000e+00> : vector<2x192xf32>
    %494 = tpu.matmul %493, %119, %cst_56 {dimension_numbers = #tpu.dot_dimension_numbers<[1], [0], [0], [1], [0, 0, 1, 1], [], []>} : vector<2x64xf32>, vector<64x192xf32>, vector<2x192xf32> -> vector<2x192xf32>
    %495 = vector.broadcast %120 : vector<1x192xf32> to vector<2x192xf32>
    %496 = arith.addf %494, %495 : vector<2x192xf32>
    %497 = vector.extract_strided_slice %118 {offsets = [12, 0], sizes = [2, 96], strides = [1, 1]} : vector<32x192xf32> to vector<2x96xf32>
    %498 = vector.extract_strided_slice %118 {offsets = [18, 96], sizes = [2, 96], strides = [1, 1]} : vector<32x192xf32> to vector<2x96xf32>
    %499 = vector.extract_strided_slice %496 {offsets = [0, 0], sizes = [2, 96], strides = [1, 1]} : vector<2x192xf32> to vector<2x96xf32>
    %500 = vector.extract_strided_slice %493 {offsets = [0, 0], sizes = [2, 32], strides = [1, 1]} : vector<2x64xf32> to vector<2x32xf32>
    %501 = vector.extract_strided_slice %497 {offsets = [0, 0], sizes = [2, 32], strides = [1, 1]} : vector<2x96xf32> to vector<2x32xf32>
    %502 = vector.extract_strided_slice %499 {offsets = [0, 0], sizes = [2, 32], strides = [1, 1]} : vector<2x96xf32> to vector<2x32xf32>
    %503 = arith.addf %501, %502 : vector<2x32xf32>
    %504 = arith.negf %503 : vector<2x32xf32>
    %505 = math.exp %504 : vector<2x32xf32>
    %cst_57 = arith.constant 1.000000e+00 : f32
    %506 = vector.broadcast %cst_57 : f32 to vector<2x32xf32>
    %507 = arith.addf %506, %505 : vector<2x32xf32>
    %508 = arith.divf %506, %507 : vector<2x32xf32>
    %509 = vector.extract_strided_slice %497 {offsets = [0, 32], sizes = [2, 32], strides = [1, 1]} : vector<2x96xf32> to vector<2x32xf32>
    %510 = vector.extract_strided_slice %499 {offsets = [0, 32], sizes = [2, 32], strides = [1, 1]} : vector<2x96xf32> to vector<2x32xf32>
    %511 = arith.addf %509, %510 : vector<2x32xf32>
    %512 = arith.negf %511 : vector<2x32xf32>
    %513 = math.exp %512 : vector<2x32xf32>
    %cst_58 = arith.constant 1.000000e+00 : f32
    %514 = vector.broadcast %cst_58 : f32 to vector<2x32xf32>
    %515 = arith.addf %514, %513 : vector<2x32xf32>
    %516 = arith.divf %514, %515 : vector<2x32xf32>
    %517 = vector.extract_strided_slice %497 {offsets = [0, 64], sizes = [2, 32], strides = [1, 1]} : vector<2x96xf32> to vector<2x32xf32>
    %518 = vector.extract_strided_slice %499 {offsets = [0, 64], sizes = [2, 32], strides = [1, 1]} : vector<2x96xf32> to vector<2x32xf32>
    %519 = arith.mulf %508, %518 : vector<2x32xf32>
    %520 = arith.addf %517, %519 : vector<2x32xf32>
    %521 = math.tanh %520 : vector<2x32xf32>
    %cst_59 = arith.constant 1.000000e+00 : f32
    %522 = vector.broadcast %cst_59 : f32 to vector<2x32xf32>
    %523 = arith.subf %522, %516 : vector<2x32xf32>
    %524 = arith.mulf %523, %521 : vector<2x32xf32>
    %525 = arith.mulf %516, %500 : vector<2x32xf32>
    %526 = arith.addf %524, %525 : vector<2x32xf32>
    %527 = vector.extract_strided_slice %496 {offsets = [0, 96], sizes = [2, 96], strides = [1, 1]} : vector<2x192xf32> to vector<2x96xf32>
    %528 = vector.extract_strided_slice %493 {offsets = [0, 32], sizes = [2, 32], strides = [1, 1]} : vector<2x64xf32> to vector<2x32xf32>
    %529 = vector.extract_strided_slice %498 {offsets = [0, 0], sizes = [2, 32], strides = [1, 1]} : vector<2x96xf32> to vector<2x32xf32>
    %530 = vector.extract_strided_slice %527 {offsets = [0, 0], sizes = [2, 32], strides = [1, 1]} : vector<2x96xf32> to vector<2x32xf32>
    %531 = arith.addf %529, %530 : vector<2x32xf32>
    %532 = arith.negf %531 : vector<2x32xf32>
    %533 = math.exp %532 : vector<2x32xf32>
    %cst_60 = arith.constant 1.000000e+00 : f32
    %534 = vector.broadcast %cst_60 : f32 to vector<2x32xf32>
    %535 = arith.addf %534, %533 : vector<2x32xf32>
    %536 = arith.divf %534, %535 : vector<2x32xf32>
    %537 = vector.extract_strided_slice %498 {offsets = [0, 32], sizes = [2, 32], strides = [1, 1]} : vector<2x96xf32> to vector<2x32xf32>
    %538 = vector.extract_strided_slice %527 {offsets = [0, 32], sizes = [2, 32], strides = [1, 1]} : vector<2x96xf32> to vector<2x32xf32>
    %539 = arith.addf %537, %538 : vector<2x32xf32>
    %540 = arith.negf %539 : vector<2x32xf32>
    %541 = math.exp %540 : vector<2x32xf32>
    %cst_61 = arith.constant 1.000000e+00 : f32
    %542 = vector.broadcast %cst_61 : f32 to vector<2x32xf32>
    %543 = arith.addf %542, %541 : vector<2x32xf32>
    %544 = arith.divf %542, %543 : vector<2x32xf32>
    %545 = vector.extract_strided_slice %498 {offsets = [0, 64], sizes = [2, 32], strides = [1, 1]} : vector<2x96xf32> to vector<2x32xf32>
    %546 = vector.extract_strided_slice %527 {offsets = [0, 64], sizes = [2, 32], strides = [1, 1]} : vector<2x96xf32> to vector<2x32xf32>
    %547 = arith.mulf %536, %546 : vector<2x32xf32>
    %548 = arith.addf %545, %547 : vector<2x32xf32>
    %549 = math.tanh %548 : vector<2x32xf32>
    %cst_62 = arith.constant 1.000000e+00 : f32
    %550 = vector.broadcast %cst_62 : f32 to vector<2x32xf32>
    %551 = arith.subf %550, %544 : vector<2x32xf32>
    %552 = arith.mulf %551, %549 : vector<2x32xf32>
    %553 = arith.mulf %544, %528 : vector<2x32xf32>
    %554 = arith.addf %552, %553 : vector<2x32xf32>
    %555 = tpu.concatenate %526, %554 in 1 : vector<2x32xf32>, vector<2x32xf32> -> vector<2x64xf32>
    %cst_63 = arith.constant dense<0.000000e+00> : vector<2x192xf32>
    %556 = tpu.matmul %555, %119, %cst_63 {dimension_numbers = #tpu.dot_dimension_numbers<[1], [0], [0], [1], [0, 0, 1, 1], [], []>} : vector<2x64xf32>, vector<64x192xf32>, vector<2x192xf32> -> vector<2x192xf32>
    %557 = vector.broadcast %120 : vector<1x192xf32> to vector<2x192xf32>
    %558 = arith.addf %556, %557 : vector<2x192xf32>
    %559 = vector.extract_strided_slice %118 {offsets = [14, 0], sizes = [2, 96], strides = [1, 1]} : vector<32x192xf32> to vector<2x96xf32>
    %560 = vector.extract_strided_slice %118 {offsets = [16, 96], sizes = [2, 96], strides = [1, 1]} : vector<32x192xf32> to vector<2x96xf32>
    %561 = vector.extract_strided_slice %558 {offsets = [0, 0], sizes = [2, 96], strides = [1, 1]} : vector<2x192xf32> to vector<2x96xf32>
    %562 = vector.extract_strided_slice %555 {offsets = [0, 0], sizes = [2, 32], strides = [1, 1]} : vector<2x64xf32> to vector<2x32xf32>
    %563 = vector.extract_strided_slice %559 {offsets = [0, 0], sizes = [2, 32], strides = [1, 1]} : vector<2x96xf32> to vector<2x32xf32>
    %564 = vector.extract_strided_slice %561 {offsets = [0, 0], sizes = [2, 32], strides = [1, 1]} : vector<2x96xf32> to vector<2x32xf32>
    %565 = arith.addf %563, %564 : vector<2x32xf32>
    %566 = arith.negf %565 : vector<2x32xf32>
    %567 = math.exp %566 : vector<2x32xf32>
    %cst_64 = arith.constant 1.000000e+00 : f32
    %568 = vector.broadcast %cst_64 : f32 to vector<2x32xf32>
    %569 = arith.addf %568, %567 : vector<2x32xf32>
    %570 = arith.divf %568, %569 : vector<2x32xf32>
    %571 = vector.extract_strided_slice %559 {offsets = [0, 32], sizes = [2, 32], strides = [1, 1]} : vector<2x96xf32> to vector<2x32xf32>
    %572 = vector.extract_strided_slice %561 {offsets = [0, 32], sizes = [2, 32], strides = [1, 1]} : vector<2x96xf32> to vector<2x32xf32>
    %573 = arith.addf %571, %572 : vector<2x32xf32>
    %574 = arith.negf %573 : vector<2x32xf32>
    %575 = math.exp %574 : vector<2x32xf32>
    %cst_65 = arith.constant 1.000000e+00 : f32
    %576 = vector.broadcast %cst_65 : f32 to vector<2x32xf32>
    %577 = arith.addf %576, %575 : vector<2x32xf32>
    %578 = arith.divf %576, %577 : vector<2x32xf32>
    %579 = vector.extract_strided_slice %559 {offsets = [0, 64], sizes = [2, 32], strides = [1, 1]} : vector<2x96xf32> to vector<2x32xf32>
    %580 = vector.extract_strided_slice %561 {offsets = [0, 64], sizes = [2, 32], strides = [1, 1]} : vector<2x96xf32> to vector<2x32xf32>
    %581 = arith.mulf %570, %580 : vector<2x32xf32>
    %582 = arith.addf %579, %581 : vector<2x32xf32>
    %583 = math.tanh %582 : vector<2x32xf32>
    %cst_66 = arith.constant 1.000000e+00 : f32
    %584 = vector.broadcast %cst_66 : f32 to vector<2x32xf32>
    %585 = arith.subf %584, %578 : vector<2x32xf32>
    %586 = arith.mulf %585, %583 : vector<2x32xf32>
    %587 = arith.mulf %578, %562 : vector<2x32xf32>
    %588 = arith.addf %586, %587 : vector<2x32xf32>
    %589 = vector.extract_strided_slice %558 {offsets = [0, 96], sizes = [2, 96], strides = [1, 1]} : vector<2x192xf32> to vector<2x96xf32>
    %590 = vector.extract_strided_slice %555 {offsets = [0, 32], sizes = [2, 32], strides = [1, 1]} : vector<2x64xf32> to vector<2x32xf32>
    %591 = vector.extract_strided_slice %560 {offsets = [0, 0], sizes = [2, 32], strides = [1, 1]} : vector<2x96xf32> to vector<2x32xf32>
    %592 = vector.extract_strided_slice %589 {offsets = [0, 0], sizes = [2, 32], strides = [1, 1]} : vector<2x96xf32> to vector<2x32xf32>
    %593 = arith.addf %591, %592 : vector<2x32xf32>
    %594 = arith.negf %593 : vector<2x32xf32>
    %595 = math.exp %594 : vector<2x32xf32>
    %cst_67 = arith.constant 1.000000e+00 : f32
    %596 = vector.broadcast %cst_67 : f32 to vector<2x32xf32>
    %597 = arith.addf %596, %595 : vector<2x32xf32>
    %598 = arith.divf %596, %597 : vector<2x32xf32>
    %599 = vector.extract_strided_slice %560 {offsets = [0, 32], sizes = [2, 32], strides = [1, 1]} : vector<2x96xf32> to vector<2x32xf32>
    %600 = vector.extract_strided_slice %589 {offsets = [0, 32], sizes = [2, 32], strides = [1, 1]} : vector<2x96xf32> to vector<2x32xf32>
    %601 = arith.addf %599, %600 : vector<2x32xf32>
    %602 = arith.negf %601 : vector<2x32xf32>
    %603 = math.exp %602 : vector<2x32xf32>
    %cst_68 = arith.constant 1.000000e+00 : f32
    %604 = vector.broadcast %cst_68 : f32 to vector<2x32xf32>
    %605 = arith.addf %604, %603 : vector<2x32xf32>
    %606 = arith.divf %604, %605 : vector<2x32xf32>
    %607 = vector.extract_strided_slice %560 {offsets = [0, 64], sizes = [2, 32], strides = [1, 1]} : vector<2x96xf32> to vector<2x32xf32>
    %608 = vector.extract_strided_slice %589 {offsets = [0, 64], sizes = [2, 32], strides = [1, 1]} : vector<2x96xf32> to vector<2x32xf32>
    %609 = arith.mulf %598, %608 : vector<2x32xf32>
    %610 = arith.addf %607, %609 : vector<2x32xf32>
    %611 = math.tanh %610 : vector<2x32xf32>
    %cst_69 = arith.constant 1.000000e+00 : f32
    %612 = vector.broadcast %cst_69 : f32 to vector<2x32xf32>
    %613 = arith.subf %612, %606 : vector<2x32xf32>
    %614 = arith.mulf %613, %611 : vector<2x32xf32>
    %615 = arith.mulf %606, %590 : vector<2x32xf32>
    %616 = arith.addf %614, %615 : vector<2x32xf32>
    %617 = tpu.concatenate %588, %616 in 1 : vector<2x32xf32>, vector<2x32xf32> -> vector<2x64xf32>
    %cst_70 = arith.constant dense<0.000000e+00> : vector<2x192xf32>
    %618 = tpu.matmul %617, %119, %cst_70 {dimension_numbers = #tpu.dot_dimension_numbers<[1], [0], [0], [1], [0, 0, 1, 1], [], []>} : vector<2x64xf32>, vector<64x192xf32>, vector<2x192xf32> -> vector<2x192xf32>
    %619 = vector.broadcast %120 : vector<1x192xf32> to vector<2x192xf32>
    %620 = arith.addf %618, %619 : vector<2x192xf32>
    %621 = vector.extract_strided_slice %118 {offsets = [16, 0], sizes = [2, 96], strides = [1, 1]} : vector<32x192xf32> to vector<2x96xf32>
    %622 = vector.extract_strided_slice %118 {offsets = [14, 96], sizes = [2, 96], strides = [1, 1]} : vector<32x192xf32> to vector<2x96xf32>
    %623 = vector.extract_strided_slice %620 {offsets = [0, 0], sizes = [2, 96], strides = [1, 1]} : vector<2x192xf32> to vector<2x96xf32>
    %624 = vector.extract_strided_slice %617 {offsets = [0, 0], sizes = [2, 32], strides = [1, 1]} : vector<2x64xf32> to vector<2x32xf32>
    %625 = vector.extract_strided_slice %621 {offsets = [0, 0], sizes = [2, 32], strides = [1, 1]} : vector<2x96xf32> to vector<2x32xf32>
    %626 = vector.extract_strided_slice %623 {offsets = [0, 0], sizes = [2, 32], strides = [1, 1]} : vector<2x96xf32> to vector<2x32xf32>
    %627 = arith.addf %625, %626 : vector<2x32xf32>
    %628 = arith.negf %627 : vector<2x32xf32>
    %629 = math.exp %628 : vector<2x32xf32>
    %cst_71 = arith.constant 1.000000e+00 : f32
    %630 = vector.broadcast %cst_71 : f32 to vector<2x32xf32>
    %631 = arith.addf %630, %629 : vector<2x32xf32>
    %632 = arith.divf %630, %631 : vector<2x32xf32>
    %633 = vector.extract_strided_slice %621 {offsets = [0, 32], sizes = [2, 32], strides = [1, 1]} : vector<2x96xf32> to vector<2x32xf32>
    %634 = vector.extract_strided_slice %623 {offsets = [0, 32], sizes = [2, 32], strides = [1, 1]} : vector<2x96xf32> to vector<2x32xf32>
    %635 = arith.addf %633, %634 : vector<2x32xf32>
    %636 = arith.negf %635 : vector<2x32xf32>
    %637 = math.exp %636 : vector<2x32xf32>
    %cst_72 = arith.constant 1.000000e+00 : f32
    %638 = vector.broadcast %cst_72 : f32 to vector<2x32xf32>
    %639 = arith.addf %638, %637 : vector<2x32xf32>
    %640 = arith.divf %638, %639 : vector<2x32xf32>
    %641 = vector.extract_strided_slice %621 {offsets = [0, 64], sizes = [2, 32], strides = [1, 1]} : vector<2x96xf32> to vector<2x32xf32>
    %642 = vector.extract_strided_slice %623 {offsets = [0, 64], sizes = [2, 32], strides = [1, 1]} : vector<2x96xf32> to vector<2x32xf32>
    %643 = arith.mulf %632, %642 : vector<2x32xf32>
    %644 = arith.addf %641, %643 : vector<2x32xf32>
    %645 = math.tanh %644 : vector<2x32xf32>
    %cst_73 = arith.constant 1.000000e+00 : f32
    %646 = vector.broadcast %cst_73 : f32 to vector<2x32xf32>
    %647 = arith.subf %646, %640 : vector<2x32xf32>
    %648 = arith.mulf %647, %645 : vector<2x32xf32>
    %649 = arith.mulf %640, %624 : vector<2x32xf32>
    %650 = arith.addf %648, %649 : vector<2x32xf32>
    %651 = vector.extract_strided_slice %620 {offsets = [0, 96], sizes = [2, 96], strides = [1, 1]} : vector<2x192xf32> to vector<2x96xf32>
    %652 = vector.extract_strided_slice %617 {offsets = [0, 32], sizes = [2, 32], strides = [1, 1]} : vector<2x64xf32> to vector<2x32xf32>
    %653 = vector.extract_strided_slice %622 {offsets = [0, 0], sizes = [2, 32], strides = [1, 1]} : vector<2x96xf32> to vector<2x32xf32>
    %654 = vector.extract_strided_slice %651 {offsets = [0, 0], sizes = [2, 32], strides = [1, 1]} : vector<2x96xf32> to vector<2x32xf32>
    %655 = arith.addf %653, %654 : vector<2x32xf32>
    %656 = arith.negf %655 : vector<2x32xf32>
    %657 = math.exp %656 : vector<2x32xf32>
    %cst_74 = arith.constant 1.000000e+00 : f32
    %658 = vector.broadcast %cst_74 : f32 to vector<2x32xf32>
    %659 = arith.addf %658, %657 : vector<2x32xf32>
    %660 = arith.divf %658, %659 : vector<2x32xf32>
    %661 = vector.extract_strided_slice %622 {offsets = [0, 32], sizes = [2, 32], strides = [1, 1]} : vector<2x96xf32> to vector<2x32xf32>
    %662 = vector.extract_strided_slice %651 {offsets = [0, 32], sizes = [2, 32], strides = [1, 1]} : vector<2x96xf32> to vector<2x32xf32>
    %663 = arith.addf %661, %662 : vector<2x32xf32>
    %664 = arith.negf %663 : vector<2x32xf32>
    %665 = math.exp %664 : vector<2x32xf32>
    %cst_75 = arith.constant 1.000000e+00 : f32
    %666 = vector.broadcast %cst_75 : f32 to vector<2x32xf32>
    %667 = arith.addf %666, %665 : vector<2x32xf32>
    %668 = arith.divf %666, %667 : vector<2x32xf32>
    %669 = vector.extract_strided_slice %622 {offsets = [0, 64], sizes = [2, 32], strides = [1, 1]} : vector<2x96xf32> to vector<2x32xf32>
    %670 = vector.extract_strided_slice %651 {offsets = [0, 64], sizes = [2, 32], strides = [1, 1]} : vector<2x96xf32> to vector<2x32xf32>
    %671 = arith.mulf %660, %670 : vector<2x32xf32>
    %672 = arith.addf %669, %671 : vector<2x32xf32>
    %673 = math.tanh %672 : vector<2x32xf32>
    %cst_76 = arith.constant 1.000000e+00 : f32
    %674 = vector.broadcast %cst_76 : f32 to vector<2x32xf32>
    %675 = arith.subf %674, %668 : vector<2x32xf32>
    %676 = arith.mulf %675, %673 : vector<2x32xf32>
    %677 = arith.mulf %668, %652 : vector<2x32xf32>
    %678 = arith.addf %676, %677 : vector<2x32xf32>
    %679 = tpu.concatenate %650, %678 in 1 : vector<2x32xf32>, vector<2x32xf32> -> vector<2x64xf32>
    %cst_77 = arith.constant dense<0.000000e+00> : vector<2x192xf32>
    %680 = tpu.matmul %679, %119, %cst_77 {dimension_numbers = #tpu.dot_dimension_numbers<[1], [0], [0], [1], [0, 0, 1, 1], [], []>} : vector<2x64xf32>, vector<64x192xf32>, vector<2x192xf32> -> vector<2x192xf32>
    %681 = vector.broadcast %120 : vector<1x192xf32> to vector<2x192xf32>
    %682 = arith.addf %680, %681 : vector<2x192xf32>
    %683 = vector.extract_strided_slice %118 {offsets = [18, 0], sizes = [2, 96], strides = [1, 1]} : vector<32x192xf32> to vector<2x96xf32>
    %684 = vector.extract_strided_slice %118 {offsets = [12, 96], sizes = [2, 96], strides = [1, 1]} : vector<32x192xf32> to vector<2x96xf32>
    %685 = vector.extract_strided_slice %682 {offsets = [0, 0], sizes = [2, 96], strides = [1, 1]} : vector<2x192xf32> to vector<2x96xf32>
    %686 = vector.extract_strided_slice %679 {offsets = [0, 0], sizes = [2, 32], strides = [1, 1]} : vector<2x64xf32> to vector<2x32xf32>
    %687 = vector.extract_strided_slice %683 {offsets = [0, 0], sizes = [2, 32], strides = [1, 1]} : vector<2x96xf32> to vector<2x32xf32>
    %688 = vector.extract_strided_slice %685 {offsets = [0, 0], sizes = [2, 32], strides = [1, 1]} : vector<2x96xf32> to vector<2x32xf32>
    %689 = arith.addf %687, %688 : vector<2x32xf32>
    %690 = arith.negf %689 : vector<2x32xf32>
    %691 = math.exp %690 : vector<2x32xf32>
    %cst_78 = arith.constant 1.000000e+00 : f32
    %692 = vector.broadcast %cst_78 : f32 to vector<2x32xf32>
    %693 = arith.addf %692, %691 : vector<2x32xf32>
    %694 = arith.divf %692, %693 : vector<2x32xf32>
    %695 = vector.extract_strided_slice %683 {offsets = [0, 32], sizes = [2, 32], strides = [1, 1]} : vector<2x96xf32> to vector<2x32xf32>
    %696 = vector.extract_strided_slice %685 {offsets = [0, 32], sizes = [2, 32], strides = [1, 1]} : vector<2x96xf32> to vector<2x32xf32>
    %697 = arith.addf %695, %696 : vector<2x32xf32>
    %698 = arith.negf %697 : vector<2x32xf32>
    %699 = math.exp %698 : vector<2x32xf32>
    %cst_79 = arith.constant 1.000000e+00 : f32
    %700 = vector.broadcast %cst_79 : f32 to vector<2x32xf32>
    %701 = arith.addf %700, %699 : vector<2x32xf32>
    %702 = arith.divf %700, %701 : vector<2x32xf32>
    %703 = vector.extract_strided_slice %683 {offsets = [0, 64], sizes = [2, 32], strides = [1, 1]} : vector<2x96xf32> to vector<2x32xf32>
    %704 = vector.extract_strided_slice %685 {offsets = [0, 64], sizes = [2, 32], strides = [1, 1]} : vector<2x96xf32> to vector<2x32xf32>
    %705 = arith.mulf %694, %704 : vector<2x32xf32>
    %706 = arith.addf %703, %705 : vector<2x32xf32>
    %707 = math.tanh %706 : vector<2x32xf32>
    %cst_80 = arith.constant 1.000000e+00 : f32
    %708 = vector.broadcast %cst_80 : f32 to vector<2x32xf32>
    %709 = arith.subf %708, %702 : vector<2x32xf32>
    %710 = arith.mulf %709, %707 : vector<2x32xf32>
    %711 = arith.mulf %702, %686 : vector<2x32xf32>
    %712 = arith.addf %710, %711 : vector<2x32xf32>
    %713 = vector.extract_strided_slice %682 {offsets = [0, 96], sizes = [2, 96], strides = [1, 1]} : vector<2x192xf32> to vector<2x96xf32>
    %714 = vector.extract_strided_slice %679 {offsets = [0, 32], sizes = [2, 32], strides = [1, 1]} : vector<2x64xf32> to vector<2x32xf32>
    %715 = vector.extract_strided_slice %684 {offsets = [0, 0], sizes = [2, 32], strides = [1, 1]} : vector<2x96xf32> to vector<2x32xf32>
    %716 = vector.extract_strided_slice %713 {offsets = [0, 0], sizes = [2, 32], strides = [1, 1]} : vector<2x96xf32> to vector<2x32xf32>
    %717 = arith.addf %715, %716 : vector<2x32xf32>
    %718 = arith.negf %717 : vector<2x32xf32>
    %719 = math.exp %718 : vector<2x32xf32>
    %cst_81 = arith.constant 1.000000e+00 : f32
    %720 = vector.broadcast %cst_81 : f32 to vector<2x32xf32>
    %721 = arith.addf %720, %719 : vector<2x32xf32>
    %722 = arith.divf %720, %721 : vector<2x32xf32>
    %723 = vector.extract_strided_slice %684 {offsets = [0, 32], sizes = [2, 32], strides = [1, 1]} : vector<2x96xf32> to vector<2x32xf32>
    %724 = vector.extract_strided_slice %713 {offsets = [0, 32], sizes = [2, 32], strides = [1, 1]} : vector<2x96xf32> to vector<2x32xf32>
    %725 = arith.addf %723, %724 : vector<2x32xf32>
    %726 = arith.negf %725 : vector<2x32xf32>
    %727 = math.exp %726 : vector<2x32xf32>
    %cst_82 = arith.constant 1.000000e+00 : f32
    %728 = vector.broadcast %cst_82 : f32 to vector<2x32xf32>
    %729 = arith.addf %728, %727 : vector<2x32xf32>
    %730 = arith.divf %728, %729 : vector<2x32xf32>
    %731 = vector.extract_strided_slice %684 {offsets = [0, 64], sizes = [2, 32], strides = [1, 1]} : vector<2x96xf32> to vector<2x32xf32>
    %732 = vector.extract_strided_slice %713 {offsets = [0, 64], sizes = [2, 32], strides = [1, 1]} : vector<2x96xf32> to vector<2x32xf32>
    %733 = arith.mulf %722, %732 : vector<2x32xf32>
    %734 = arith.addf %731, %733 : vector<2x32xf32>
    %735 = math.tanh %734 : vector<2x32xf32>
    %cst_83 = arith.constant 1.000000e+00 : f32
    %736 = vector.broadcast %cst_83 : f32 to vector<2x32xf32>
    %737 = arith.subf %736, %730 : vector<2x32xf32>
    %738 = arith.mulf %737, %735 : vector<2x32xf32>
    %739 = arith.mulf %730, %714 : vector<2x32xf32>
    %740 = arith.addf %738, %739 : vector<2x32xf32>
    %741 = tpu.concatenate %712, %740 in 1 : vector<2x32xf32>, vector<2x32xf32> -> vector<2x64xf32>
    %cst_84 = arith.constant dense<0.000000e+00> : vector<2x192xf32>
    %742 = tpu.matmul %741, %119, %cst_84 {dimension_numbers = #tpu.dot_dimension_numbers<[1], [0], [0], [1], [0, 0, 1, 1], [], []>} : vector<2x64xf32>, vector<64x192xf32>, vector<2x192xf32> -> vector<2x192xf32>
    %743 = vector.broadcast %120 : vector<1x192xf32> to vector<2x192xf32>
    %744 = arith.addf %742, %743 : vector<2x192xf32>
    %745 = vector.extract_strided_slice %118 {offsets = [20, 0], sizes = [2, 96], strides = [1, 1]} : vector<32x192xf32> to vector<2x96xf32>
    %746 = vector.extract_strided_slice %118 {offsets = [10, 96], sizes = [2, 96], strides = [1, 1]} : vector<32x192xf32> to vector<2x96xf32>
    %747 = vector.extract_strided_slice %744 {offsets = [0, 0], sizes = [2, 96], strides = [1, 1]} : vector<2x192xf32> to vector<2x96xf32>
    %748 = vector.extract_strided_slice %741 {offsets = [0, 0], sizes = [2, 32], strides = [1, 1]} : vector<2x64xf32> to vector<2x32xf32>
    %749 = vector.extract_strided_slice %745 {offsets = [0, 0], sizes = [2, 32], strides = [1, 1]} : vector<2x96xf32> to vector<2x32xf32>
    %750 = vector.extract_strided_slice %747 {offsets = [0, 0], sizes = [2, 32], strides = [1, 1]} : vector<2x96xf32> to vector<2x32xf32>
    %751 = arith.addf %749, %750 : vector<2x32xf32>
    %752 = arith.negf %751 : vector<2x32xf32>
    %753 = math.exp %752 : vector<2x32xf32>
    %cst_85 = arith.constant 1.000000e+00 : f32
    %754 = vector.broadcast %cst_85 : f32 to vector<2x32xf32>
    %755 = arith.addf %754, %753 : vector<2x32xf32>
    %756 = arith.divf %754, %755 : vector<2x32xf32>
    %757 = vector.extract_strided_slice %745 {offsets = [0, 32], sizes = [2, 32], strides = [1, 1]} : vector<2x96xf32> to vector<2x32xf32>
    %758 = vector.extract_strided_slice %747 {offsets = [0, 32], sizes = [2, 32], strides = [1, 1]} : vector<2x96xf32> to vector<2x32xf32>
    %759 = arith.addf %757, %758 : vector<2x32xf32>
    %760 = arith.negf %759 : vector<2x32xf32>
    %761 = math.exp %760 : vector<2x32xf32>
    %cst_86 = arith.constant 1.000000e+00 : f32
    %762 = vector.broadcast %cst_86 : f32 to vector<2x32xf32>
    %763 = arith.addf %762, %761 : vector<2x32xf32>
    %764 = arith.divf %762, %763 : vector<2x32xf32>
    %765 = vector.extract_strided_slice %745 {offsets = [0, 64], sizes = [2, 32], strides = [1, 1]} : vector<2x96xf32> to vector<2x32xf32>
    %766 = vector.extract_strided_slice %747 {offsets = [0, 64], sizes = [2, 32], strides = [1, 1]} : vector<2x96xf32> to vector<2x32xf32>
    %767 = arith.mulf %756, %766 : vector<2x32xf32>
    %768 = arith.addf %765, %767 : vector<2x32xf32>
    %769 = math.tanh %768 : vector<2x32xf32>
    %cst_87 = arith.constant 1.000000e+00 : f32
    %770 = vector.broadcast %cst_87 : f32 to vector<2x32xf32>
    %771 = arith.subf %770, %764 : vector<2x32xf32>
    %772 = arith.mulf %771, %769 : vector<2x32xf32>
    %773 = arith.mulf %764, %748 : vector<2x32xf32>
    %774 = arith.addf %772, %773 : vector<2x32xf32>
    %775 = vector.extract_strided_slice %744 {offsets = [0, 96], sizes = [2, 96], strides = [1, 1]} : vector<2x192xf32> to vector<2x96xf32>
    %776 = vector.extract_strided_slice %741 {offsets = [0, 32], sizes = [2, 32], strides = [1, 1]} : vector<2x64xf32> to vector<2x32xf32>
    %777 = vector.extract_strided_slice %746 {offsets = [0, 0], sizes = [2, 32], strides = [1, 1]} : vector<2x96xf32> to vector<2x32xf32>
    %778 = vector.extract_strided_slice %775 {offsets = [0, 0], sizes = [2, 32], strides = [1, 1]} : vector<2x96xf32> to vector<2x32xf32>
    %779 = arith.addf %777, %778 : vector<2x32xf32>
    %780 = arith.negf %779 : vector<2x32xf32>
    %781 = math.exp %780 : vector<2x32xf32>
    %cst_88 = arith.constant 1.000000e+00 : f32
    %782 = vector.broadcast %cst_88 : f32 to vector<2x32xf32>
    %783 = arith.addf %782, %781 : vector<2x32xf32>
    %784 = arith.divf %782, %783 : vector<2x32xf32>
    %785 = vector.extract_strided_slice %746 {offsets = [0, 32], sizes = [2, 32], strides = [1, 1]} : vector<2x96xf32> to vector<2x32xf32>
    %786 = vector.extract_strided_slice %775 {offsets = [0, 32], sizes = [2, 32], strides = [1, 1]} : vector<2x96xf32> to vector<2x32xf32>
    %787 = arith.addf %785, %786 : vector<2x32xf32>
    %788 = arith.negf %787 : vector<2x32xf32>
    %789 = math.exp %788 : vector<2x32xf32>
    %cst_89 = arith.constant 1.000000e+00 : f32
    %790 = vector.broadcast %cst_89 : f32 to vector<2x32xf32>
    %791 = arith.addf %790, %789 : vector<2x32xf32>
    %792 = arith.divf %790, %791 : vector<2x32xf32>
    %793 = vector.extract_strided_slice %746 {offsets = [0, 64], sizes = [2, 32], strides = [1, 1]} : vector<2x96xf32> to vector<2x32xf32>
    %794 = vector.extract_strided_slice %775 {offsets = [0, 64], sizes = [2, 32], strides = [1, 1]} : vector<2x96xf32> to vector<2x32xf32>
    %795 = arith.mulf %784, %794 : vector<2x32xf32>
    %796 = arith.addf %793, %795 : vector<2x32xf32>
    %797 = math.tanh %796 : vector<2x32xf32>
    %cst_90 = arith.constant 1.000000e+00 : f32
    %798 = vector.broadcast %cst_90 : f32 to vector<2x32xf32>
    %799 = arith.subf %798, %792 : vector<2x32xf32>
    %800 = arith.mulf %799, %797 : vector<2x32xf32>
    %801 = arith.mulf %792, %776 : vector<2x32xf32>
    %802 = arith.addf %800, %801 : vector<2x32xf32>
    %803 = tpu.concatenate %774, %802 in 1 : vector<2x32xf32>, vector<2x32xf32> -> vector<2x64xf32>
    %cst_91 = arith.constant dense<0.000000e+00> : vector<2x192xf32>
    %804 = tpu.matmul %803, %119, %cst_91 {dimension_numbers = #tpu.dot_dimension_numbers<[1], [0], [0], [1], [0, 0, 1, 1], [], []>} : vector<2x64xf32>, vector<64x192xf32>, vector<2x192xf32> -> vector<2x192xf32>
    %805 = vector.broadcast %120 : vector<1x192xf32> to vector<2x192xf32>
    %806 = arith.addf %804, %805 : vector<2x192xf32>
    %807 = vector.extract_strided_slice %118 {offsets = [22, 0], sizes = [2, 96], strides = [1, 1]} : vector<32x192xf32> to vector<2x96xf32>
    %808 = vector.extract_strided_slice %118 {offsets = [8, 96], sizes = [2, 96], strides = [1, 1]} : vector<32x192xf32> to vector<2x96xf32>
    %809 = vector.extract_strided_slice %806 {offsets = [0, 0], sizes = [2, 96], strides = [1, 1]} : vector<2x192xf32> to vector<2x96xf32>
    %810 = vector.extract_strided_slice %803 {offsets = [0, 0], sizes = [2, 32], strides = [1, 1]} : vector<2x64xf32> to vector<2x32xf32>
    %811 = vector.extract_strided_slice %807 {offsets = [0, 0], sizes = [2, 32], strides = [1, 1]} : vector<2x96xf32> to vector<2x32xf32>
    %812 = vector.extract_strided_slice %809 {offsets = [0, 0], sizes = [2, 32], strides = [1, 1]} : vector<2x96xf32> to vector<2x32xf32>
    %813 = arith.addf %811, %812 : vector<2x32xf32>
    %814 = arith.negf %813 : vector<2x32xf32>
    %815 = math.exp %814 : vector<2x32xf32>
    %cst_92 = arith.constant 1.000000e+00 : f32
    %816 = vector.broadcast %cst_92 : f32 to vector<2x32xf32>
    %817 = arith.addf %816, %815 : vector<2x32xf32>
    %818 = arith.divf %816, %817 : vector<2x32xf32>
    %819 = vector.extract_strided_slice %807 {offsets = [0, 32], sizes = [2, 32], strides = [1, 1]} : vector<2x96xf32> to vector<2x32xf32>
    %820 = vector.extract_strided_slice %809 {offsets = [0, 32], sizes = [2, 32], strides = [1, 1]} : vector<2x96xf32> to vector<2x32xf32>
    %821 = arith.addf %819, %820 : vector<2x32xf32>
    %822 = arith.negf %821 : vector<2x32xf32>
    %823 = math.exp %822 : vector<2x32xf32>
    %cst_93 = arith.constant 1.000000e+00 : f32
    %824 = vector.broadcast %cst_93 : f32 to vector<2x32xf32>
    %825 = arith.addf %824, %823 : vector<2x32xf32>
    %826 = arith.divf %824, %825 : vector<2x32xf32>
    %827 = vector.extract_strided_slice %807 {offsets = [0, 64], sizes = [2, 32], strides = [1, 1]} : vector<2x96xf32> to vector<2x32xf32>
    %828 = vector.extract_strided_slice %809 {offsets = [0, 64], sizes = [2, 32], strides = [1, 1]} : vector<2x96xf32> to vector<2x32xf32>
    %829 = arith.mulf %818, %828 : vector<2x32xf32>
    %830 = arith.addf %827, %829 : vector<2x32xf32>
    %831 = math.tanh %830 : vector<2x32xf32>
    %cst_94 = arith.constant 1.000000e+00 : f32
    %832 = vector.broadcast %cst_94 : f32 to vector<2x32xf32>
    %833 = arith.subf %832, %826 : vector<2x32xf32>
    %834 = arith.mulf %833, %831 : vector<2x32xf32>
    %835 = arith.mulf %826, %810 : vector<2x32xf32>
    %836 = arith.addf %834, %835 : vector<2x32xf32>
    %837 = vector.extract_strided_slice %806 {offsets = [0, 96], sizes = [2, 96], strides = [1, 1]} : vector<2x192xf32> to vector<2x96xf32>
    %838 = vector.extract_strided_slice %803 {offsets = [0, 32], sizes = [2, 32], strides = [1, 1]} : vector<2x64xf32> to vector<2x32xf32>
    %839 = vector.extract_strided_slice %808 {offsets = [0, 0], sizes = [2, 32], strides = [1, 1]} : vector<2x96xf32> to vector<2x32xf32>
    %840 = vector.extract_strided_slice %837 {offsets = [0, 0], sizes = [2, 32], strides = [1, 1]} : vector<2x96xf32> to vector<2x32xf32>
    %841 = arith.addf %839, %840 : vector<2x32xf32>
    %842 = arith.negf %841 : vector<2x32xf32>
    %843 = math.exp %842 : vector<2x32xf32>
    %cst_95 = arith.constant 1.000000e+00 : f32
    %844 = vector.broadcast %cst_95 : f32 to vector<2x32xf32>
    %845 = arith.addf %844, %843 : vector<2x32xf32>
    %846 = arith.divf %844, %845 : vector<2x32xf32>
    %847 = vector.extract_strided_slice %808 {offsets = [0, 32], sizes = [2, 32], strides = [1, 1]} : vector<2x96xf32> to vector<2x32xf32>
    %848 = vector.extract_strided_slice %837 {offsets = [0, 32], sizes = [2, 32], strides = [1, 1]} : vector<2x96xf32> to vector<2x32xf32>
    %849 = arith.addf %847, %848 : vector<2x32xf32>
    %850 = arith.negf %849 : vector<2x32xf32>
    %851 = math.exp %850 : vector<2x32xf32>
    %cst_96 = arith.constant 1.000000e+00 : f32
    %852 = vector.broadcast %cst_96 : f32 to vector<2x32xf32>
    %853 = arith.addf %852, %851 : vector<2x32xf32>
    %854 = arith.divf %852, %853 : vector<2x32xf32>
    %855 = vector.extract_strided_slice %808 {offsets = [0, 64], sizes = [2, 32], strides = [1, 1]} : vector<2x96xf32> to vector<2x32xf32>
    %856 = vector.extract_strided_slice %837 {offsets = [0, 64], sizes = [2, 32], strides = [1, 1]} : vector<2x96xf32> to vector<2x32xf32>
    %857 = arith.mulf %846, %856 : vector<2x32xf32>
    %858 = arith.addf %855, %857 : vector<2x32xf32>
    %859 = math.tanh %858 : vector<2x32xf32>
    %cst_97 = arith.constant 1.000000e+00 : f32
    %860 = vector.broadcast %cst_97 : f32 to vector<2x32xf32>
    %861 = arith.subf %860, %854 : vector<2x32xf32>
    %862 = arith.mulf %861, %859 : vector<2x32xf32>
    %863 = arith.mulf %854, %838 : vector<2x32xf32>
    %864 = arith.addf %862, %863 : vector<2x32xf32>
    %865 = tpu.concatenate %836, %864 in 1 : vector<2x32xf32>, vector<2x32xf32> -> vector<2x64xf32>
    %cst_98 = arith.constant dense<0.000000e+00> : vector<2x192xf32>
    %866 = tpu.matmul %865, %119, %cst_98 {dimension_numbers = #tpu.dot_dimension_numbers<[1], [0], [0], [1], [0, 0, 1, 1], [], []>} : vector<2x64xf32>, vector<64x192xf32>, vector<2x192xf32> -> vector<2x192xf32>
    %867 = vector.broadcast %120 : vector<1x192xf32> to vector<2x192xf32>
    %868 = arith.addf %866, %867 : vector<2x192xf32>
    %869 = vector.extract_strided_slice %118 {offsets = [24, 0], sizes = [2, 96], strides = [1, 1]} : vector<32x192xf32> to vector<2x96xf32>
    %870 = vector.extract_strided_slice %118 {offsets = [6, 96], sizes = [2, 96], strides = [1, 1]} : vector<32x192xf32> to vector<2x96xf32>
    %871 = vector.extract_strided_slice %868 {offsets = [0, 0], sizes = [2, 96], strides = [1, 1]} : vector<2x192xf32> to vector<2x96xf32>
    %872 = vector.extract_strided_slice %865 {offsets = [0, 0], sizes = [2, 32], strides = [1, 1]} : vector<2x64xf32> to vector<2x32xf32>
    %873 = vector.extract_strided_slice %869 {offsets = [0, 0], sizes = [2, 32], strides = [1, 1]} : vector<2x96xf32> to vector<2x32xf32>
    %874 = vector.extract_strided_slice %871 {offsets = [0, 0], sizes = [2, 32], strides = [1, 1]} : vector<2x96xf32> to vector<2x32xf32>
    %875 = arith.addf %873, %874 : vector<2x32xf32>
    %876 = arith.negf %875 : vector<2x32xf32>
    %877 = math.exp %876 : vector<2x32xf32>
    %cst_99 = arith.constant 1.000000e+00 : f32
    %878 = vector.broadcast %cst_99 : f32 to vector<2x32xf32>
    %879 = arith.addf %878, %877 : vector<2x32xf32>
    %880 = arith.divf %878, %879 : vector<2x32xf32>
    %881 = vector.extract_strided_slice %869 {offsets = [0, 32], sizes = [2, 32], strides = [1, 1]} : vector<2x96xf32> to vector<2x32xf32>
    %882 = vector.extract_strided_slice %871 {offsets = [0, 32], sizes = [2, 32], strides = [1, 1]} : vector<2x96xf32> to vector<2x32xf32>
    %883 = arith.addf %881, %882 : vector<2x32xf32>
    %884 = arith.negf %883 : vector<2x32xf32>
    %885 = math.exp %884 : vector<2x32xf32>
    %cst_100 = arith.constant 1.000000e+00 : f32
    %886 = vector.broadcast %cst_100 : f32 to vector<2x32xf32>
    %887 = arith.addf %886, %885 : vector<2x32xf32>
    %888 = arith.divf %886, %887 : vector<2x32xf32>
    %889 = vector.extract_strided_slice %869 {offsets = [0, 64], sizes = [2, 32], strides = [1, 1]} : vector<2x96xf32> to vector<2x32xf32>
    %890 = vector.extract_strided_slice %871 {offsets = [0, 64], sizes = [2, 32], strides = [1, 1]} : vector<2x96xf32> to vector<2x32xf32>
    %891 = arith.mulf %880, %890 : vector<2x32xf32>
    %892 = arith.addf %889, %891 : vector<2x32xf32>
    %893 = math.tanh %892 : vector<2x32xf32>
    %cst_101 = arith.constant 1.000000e+00 : f32
    %894 = vector.broadcast %cst_101 : f32 to vector<2x32xf32>
    %895 = arith.subf %894, %888 : vector<2x32xf32>
    %896 = arith.mulf %895, %893 : vector<2x32xf32>
    %897 = arith.mulf %888, %872 : vector<2x32xf32>
    %898 = arith.addf %896, %897 : vector<2x32xf32>
    %899 = vector.extract_strided_slice %868 {offsets = [0, 96], sizes = [2, 96], strides = [1, 1]} : vector<2x192xf32> to vector<2x96xf32>
    %900 = vector.extract_strided_slice %865 {offsets = [0, 32], sizes = [2, 32], strides = [1, 1]} : vector<2x64xf32> to vector<2x32xf32>
    %901 = vector.extract_strided_slice %870 {offsets = [0, 0], sizes = [2, 32], strides = [1, 1]} : vector<2x96xf32> to vector<2x32xf32>
    %902 = vector.extract_strided_slice %899 {offsets = [0, 0], sizes = [2, 32], strides = [1, 1]} : vector<2x96xf32> to vector<2x32xf32>
    %903 = arith.addf %901, %902 : vector<2x32xf32>
    %904 = arith.negf %903 : vector<2x32xf32>
    %905 = math.exp %904 : vector<2x32xf32>
    %cst_102 = arith.constant 1.000000e+00 : f32
    %906 = vector.broadcast %cst_102 : f32 to vector<2x32xf32>
    %907 = arith.addf %906, %905 : vector<2x32xf32>
    %908 = arith.divf %906, %907 : vector<2x32xf32>
    %909 = vector.extract_strided_slice %870 {offsets = [0, 32], sizes = [2, 32], strides = [1, 1]} : vector<2x96xf32> to vector<2x32xf32>
    %910 = vector.extract_strided_slice %899 {offsets = [0, 32], sizes = [2, 32], strides = [1, 1]} : vector<2x96xf32> to vector<2x32xf32>
    %911 = arith.addf %909, %910 : vector<2x32xf32>
    %912 = arith.negf %911 : vector<2x32xf32>
    %913 = math.exp %912 : vector<2x32xf32>
    %cst_103 = arith.constant 1.000000e+00 : f32
    %914 = vector.broadcast %cst_103 : f32 to vector<2x32xf32>
    %915 = arith.addf %914, %913 : vector<2x32xf32>
    %916 = arith.divf %914, %915 : vector<2x32xf32>
    %917 = vector.extract_strided_slice %870 {offsets = [0, 64], sizes = [2, 32], strides = [1, 1]} : vector<2x96xf32> to vector<2x32xf32>
    %918 = vector.extract_strided_slice %899 {offsets = [0, 64], sizes = [2, 32], strides = [1, 1]} : vector<2x96xf32> to vector<2x32xf32>
    %919 = arith.mulf %908, %918 : vector<2x32xf32>
    %920 = arith.addf %917, %919 : vector<2x32xf32>
    %921 = math.tanh %920 : vector<2x32xf32>
    %cst_104 = arith.constant 1.000000e+00 : f32
    %922 = vector.broadcast %cst_104 : f32 to vector<2x32xf32>
    %923 = arith.subf %922, %916 : vector<2x32xf32>
    %924 = arith.mulf %923, %921 : vector<2x32xf32>
    %925 = arith.mulf %916, %900 : vector<2x32xf32>
    %926 = arith.addf %924, %925 : vector<2x32xf32>
    %927 = tpu.concatenate %898, %926 in 1 : vector<2x32xf32>, vector<2x32xf32> -> vector<2x64xf32>
    %cst_105 = arith.constant dense<0.000000e+00> : vector<2x192xf32>
    %928 = tpu.matmul %927, %119, %cst_105 {dimension_numbers = #tpu.dot_dimension_numbers<[1], [0], [0], [1], [0, 0, 1, 1], [], []>} : vector<2x64xf32>, vector<64x192xf32>, vector<2x192xf32> -> vector<2x192xf32>
    %929 = vector.broadcast %120 : vector<1x192xf32> to vector<2x192xf32>
    %930 = arith.addf %928, %929 : vector<2x192xf32>
    %931 = vector.extract_strided_slice %118 {offsets = [26, 0], sizes = [2, 96], strides = [1, 1]} : vector<32x192xf32> to vector<2x96xf32>
    %932 = vector.extract_strided_slice %118 {offsets = [4, 96], sizes = [2, 96], strides = [1, 1]} : vector<32x192xf32> to vector<2x96xf32>
    %933 = vector.extract_strided_slice %930 {offsets = [0, 0], sizes = [2, 96], strides = [1, 1]} : vector<2x192xf32> to vector<2x96xf32>
    %934 = vector.extract_strided_slice %927 {offsets = [0, 0], sizes = [2, 32], strides = [1, 1]} : vector<2x64xf32> to vector<2x32xf32>
    %935 = vector.extract_strided_slice %931 {offsets = [0, 0], sizes = [2, 32], strides = [1, 1]} : vector<2x96xf32> to vector<2x32xf32>
    %936 = vector.extract_strided_slice %933 {offsets = [0, 0], sizes = [2, 32], strides = [1, 1]} : vector<2x96xf32> to vector<2x32xf32>
    %937 = arith.addf %935, %936 : vector<2x32xf32>
    %938 = arith.negf %937 : vector<2x32xf32>
    %939 = math.exp %938 : vector<2x32xf32>
    %cst_106 = arith.constant 1.000000e+00 : f32
    %940 = vector.broadcast %cst_106 : f32 to vector<2x32xf32>
    %941 = arith.addf %940, %939 : vector<2x32xf32>
    %942 = arith.divf %940, %941 : vector<2x32xf32>
    %943 = vector.extract_strided_slice %931 {offsets = [0, 32], sizes = [2, 32], strides = [1, 1]} : vector<2x96xf32> to vector<2x32xf32>
    %944 = vector.extract_strided_slice %933 {offsets = [0, 32], sizes = [2, 32], strides = [1, 1]} : vector<2x96xf32> to vector<2x32xf32>
    %945 = arith.addf %943, %944 : vector<2x32xf32>
    %946 = arith.negf %945 : vector<2x32xf32>
    %947 = math.exp %946 : vector<2x32xf32>
    %cst_107 = arith.constant 1.000000e+00 : f32
    %948 = vector.broadcast %cst_107 : f32 to vector<2x32xf32>
    %949 = arith.addf %948, %947 : vector<2x32xf32>
    %950 = arith.divf %948, %949 : vector<2x32xf32>
    %951 = vector.extract_strided_slice %931 {offsets = [0, 64], sizes = [2, 32], strides = [1, 1]} : vector<2x96xf32> to vector<2x32xf32>
    %952 = vector.extract_strided_slice %933 {offsets = [0, 64], sizes = [2, 32], strides = [1, 1]} : vector<2x96xf32> to vector<2x32xf32>
    %953 = arith.mulf %942, %952 : vector<2x32xf32>
    %954 = arith.addf %951, %953 : vector<2x32xf32>
    %955 = math.tanh %954 : vector<2x32xf32>
    %cst_108 = arith.constant 1.000000e+00 : f32
    %956 = vector.broadcast %cst_108 : f32 to vector<2x32xf32>
    %957 = arith.subf %956, %950 : vector<2x32xf32>
    %958 = arith.mulf %957, %955 : vector<2x32xf32>
    %959 = arith.mulf %950, %934 : vector<2x32xf32>
    %960 = arith.addf %958, %959 : vector<2x32xf32>
    %961 = vector.extract_strided_slice %930 {offsets = [0, 96], sizes = [2, 96], strides = [1, 1]} : vector<2x192xf32> to vector<2x96xf32>
    %962 = vector.extract_strided_slice %927 {offsets = [0, 32], sizes = [2, 32], strides = [1, 1]} : vector<2x64xf32> to vector<2x32xf32>
    %963 = vector.extract_strided_slice %932 {offsets = [0, 0], sizes = [2, 32], strides = [1, 1]} : vector<2x96xf32> to vector<2x32xf32>
    %964 = vector.extract_strided_slice %961 {offsets = [0, 0], sizes = [2, 32], strides = [1, 1]} : vector<2x96xf32> to vector<2x32xf32>
    %965 = arith.addf %963, %964 : vector<2x32xf32>
    %966 = arith.negf %965 : vector<2x32xf32>
    %967 = math.exp %966 : vector<2x32xf32>
    %cst_109 = arith.constant 1.000000e+00 : f32
    %968 = vector.broadcast %cst_109 : f32 to vector<2x32xf32>
    %969 = arith.addf %968, %967 : vector<2x32xf32>
    %970 = arith.divf %968, %969 : vector<2x32xf32>
    %971 = vector.extract_strided_slice %932 {offsets = [0, 32], sizes = [2, 32], strides = [1, 1]} : vector<2x96xf32> to vector<2x32xf32>
    %972 = vector.extract_strided_slice %961 {offsets = [0, 32], sizes = [2, 32], strides = [1, 1]} : vector<2x96xf32> to vector<2x32xf32>
    %973 = arith.addf %971, %972 : vector<2x32xf32>
    %974 = arith.negf %973 : vector<2x32xf32>
    %975 = math.exp %974 : vector<2x32xf32>
    %cst_110 = arith.constant 1.000000e+00 : f32
    %976 = vector.broadcast %cst_110 : f32 to vector<2x32xf32>
    %977 = arith.addf %976, %975 : vector<2x32xf32>
    %978 = arith.divf %976, %977 : vector<2x32xf32>
    %979 = vector.extract_strided_slice %932 {offsets = [0, 64], sizes = [2, 32], strides = [1, 1]} : vector<2x96xf32> to vector<2x32xf32>
    %980 = vector.extract_strided_slice %961 {offsets = [0, 64], sizes = [2, 32], strides = [1, 1]} : vector<2x96xf32> to vector<2x32xf32>
    %981 = arith.mulf %970, %980 : vector<2x32xf32>
    %982 = arith.addf %979, %981 : vector<2x32xf32>
    %983 = math.tanh %982 : vector<2x32xf32>
    %cst_111 = arith.constant 1.000000e+00 : f32
    %984 = vector.broadcast %cst_111 : f32 to vector<2x32xf32>
    %985 = arith.subf %984, %978 : vector<2x32xf32>
    %986 = arith.mulf %985, %983 : vector<2x32xf32>
    %987 = arith.mulf %978, %962 : vector<2x32xf32>
    %988 = arith.addf %986, %987 : vector<2x32xf32>
    %989 = tpu.concatenate %960, %988 in 1 : vector<2x32xf32>, vector<2x32xf32> -> vector<2x64xf32>
    %cst_112 = arith.constant dense<0.000000e+00> : vector<2x192xf32>
    %990 = tpu.matmul %989, %119, %cst_112 {dimension_numbers = #tpu.dot_dimension_numbers<[1], [0], [0], [1], [0, 0, 1, 1], [], []>} : vector<2x64xf32>, vector<64x192xf32>, vector<2x192xf32> -> vector<2x192xf32>
    %991 = vector.broadcast %120 : vector<1x192xf32> to vector<2x192xf32>
    %992 = arith.addf %990, %991 : vector<2x192xf32>
    %993 = vector.extract_strided_slice %118 {offsets = [28, 0], sizes = [2, 96], strides = [1, 1]} : vector<32x192xf32> to vector<2x96xf32>
    %994 = vector.extract_strided_slice %118 {offsets = [2, 96], sizes = [2, 96], strides = [1, 1]} : vector<32x192xf32> to vector<2x96xf32>
    %995 = vector.extract_strided_slice %992 {offsets = [0, 0], sizes = [2, 96], strides = [1, 1]} : vector<2x192xf32> to vector<2x96xf32>
    %996 = vector.extract_strided_slice %989 {offsets = [0, 0], sizes = [2, 32], strides = [1, 1]} : vector<2x64xf32> to vector<2x32xf32>
    %997 = vector.extract_strided_slice %993 {offsets = [0, 0], sizes = [2, 32], strides = [1, 1]} : vector<2x96xf32> to vector<2x32xf32>
    %998 = vector.extract_strided_slice %995 {offsets = [0, 0], sizes = [2, 32], strides = [1, 1]} : vector<2x96xf32> to vector<2x32xf32>
    %999 = arith.addf %997, %998 : vector<2x32xf32>
    %1000 = arith.negf %999 : vector<2x32xf32>
    %1001 = math.exp %1000 : vector<2x32xf32>
    %cst_113 = arith.constant 1.000000e+00 : f32
    %1002 = vector.broadcast %cst_113 : f32 to vector<2x32xf32>
    %1003 = arith.addf %1002, %1001 : vector<2x32xf32>
    %1004 = arith.divf %1002, %1003 : vector<2x32xf32>
    %1005 = vector.extract_strided_slice %993 {offsets = [0, 32], sizes = [2, 32], strides = [1, 1]} : vector<2x96xf32> to vector<2x32xf32>
    %1006 = vector.extract_strided_slice %995 {offsets = [0, 32], sizes = [2, 32], strides = [1, 1]} : vector<2x96xf32> to vector<2x32xf32>
    %1007 = arith.addf %1005, %1006 : vector<2x32xf32>
    %1008 = arith.negf %1007 : vector<2x32xf32>
    %1009 = math.exp %1008 : vector<2x32xf32>
    %cst_114 = arith.constant 1.000000e+00 : f32
    %1010 = vector.broadcast %cst_114 : f32 to vector<2x32xf32>
    %1011 = arith.addf %1010, %1009 : vector<2x32xf32>
    %1012 = arith.divf %1010, %1011 : vector<2x32xf32>
    %1013 = vector.extract_strided_slice %993 {offsets = [0, 64], sizes = [2, 32], strides = [1, 1]} : vector<2x96xf32> to vector<2x32xf32>
    %1014 = vector.extract_strided_slice %995 {offsets = [0, 64], sizes = [2, 32], strides = [1, 1]} : vector<2x96xf32> to vector<2x32xf32>
    %1015 = arith.mulf %1004, %1014 : vector<2x32xf32>
    %1016 = arith.addf %1013, %1015 : vector<2x32xf32>
    %1017 = math.tanh %1016 : vector<2x32xf32>
    %cst_115 = arith.constant 1.000000e+00 : f32
    %1018 = vector.broadcast %cst_115 : f32 to vector<2x32xf32>
    %1019 = arith.subf %1018, %1012 : vector<2x32xf32>
    %1020 = arith.mulf %1019, %1017 : vector<2x32xf32>
    %1021 = arith.mulf %1012, %996 : vector<2x32xf32>
    %1022 = arith.addf %1020, %1021 : vector<2x32xf32>
    %1023 = vector.extract_strided_slice %992 {offsets = [0, 96], sizes = [2, 96], strides = [1, 1]} : vector<2x192xf32> to vector<2x96xf32>
    %1024 = vector.extract_strided_slice %989 {offsets = [0, 32], sizes = [2, 32], strides = [1, 1]} : vector<2x64xf32> to vector<2x32xf32>
    %1025 = vector.extract_strided_slice %994 {offsets = [0, 0], sizes = [2, 32], strides = [1, 1]} : vector<2x96xf32> to vector<2x32xf32>
    %1026 = vector.extract_strided_slice %1023 {offsets = [0, 0], sizes = [2, 32], strides = [1, 1]} : vector<2x96xf32> to vector<2x32xf32>
    %1027 = arith.addf %1025, %1026 : vector<2x32xf32>
    %1028 = arith.negf %1027 : vector<2x32xf32>
    %1029 = math.exp %1028 : vector<2x32xf32>
    %cst_116 = arith.constant 1.000000e+00 : f32
    %1030 = vector.broadcast %cst_116 : f32 to vector<2x32xf32>
    %1031 = arith.addf %1030, %1029 : vector<2x32xf32>
    %1032 = arith.divf %1030, %1031 : vector<2x32xf32>
    %1033 = vector.extract_strided_slice %994 {offsets = [0, 32], sizes = [2, 32], strides = [1, 1]} : vector<2x96xf32> to vector<2x32xf32>
    %1034 = vector.extract_strided_slice %1023 {offsets = [0, 32], sizes = [2, 32], strides = [1, 1]} : vector<2x96xf32> to vector<2x32xf32>
    %1035 = arith.addf %1033, %1034 : vector<2x32xf32>
    %1036 = arith.negf %1035 : vector<2x32xf32>
    %1037 = math.exp %1036 : vector<2x32xf32>
    %cst_117 = arith.constant 1.000000e+00 : f32
    %1038 = vector.broadcast %cst_117 : f32 to vector<2x32xf32>
    %1039 = arith.addf %1038, %1037 : vector<2x32xf32>
    %1040 = arith.divf %1038, %1039 : vector<2x32xf32>
    %1041 = vector.extract_strided_slice %994 {offsets = [0, 64], sizes = [2, 32], strides = [1, 1]} : vector<2x96xf32> to vector<2x32xf32>
    %1042 = vector.extract_strided_slice %1023 {offsets = [0, 64], sizes = [2, 32], strides = [1, 1]} : vector<2x96xf32> to vector<2x32xf32>
    %1043 = arith.mulf %1032, %1042 : vector<2x32xf32>
    %1044 = arith.addf %1041, %1043 : vector<2x32xf32>
    %1045 = math.tanh %1044 : vector<2x32xf32>
    %cst_118 = arith.constant 1.000000e+00 : f32
    %1046 = vector.broadcast %cst_118 : f32 to vector<2x32xf32>
    %1047 = arith.subf %1046, %1040 : vector<2x32xf32>
    %1048 = arith.mulf %1047, %1045 : vector<2x32xf32>
    %1049 = arith.mulf %1040, %1024 : vector<2x32xf32>
    %1050 = arith.addf %1048, %1049 : vector<2x32xf32>
    %1051 = tpu.concatenate %1022, %1050 in 1 : vector<2x32xf32>, vector<2x32xf32> -> vector<2x64xf32>
    %cst_119 = arith.constant dense<0.000000e+00> : vector<2x192xf32>
    %1052 = tpu.matmul %1051, %119, %cst_119 {dimension_numbers = #tpu.dot_dimension_numbers<[1], [0], [0], [1], [0, 0, 1, 1], [], []>} : vector<2x64xf32>, vector<64x192xf32>, vector<2x192xf32> -> vector<2x192xf32>
    %1053 = vector.broadcast %120 : vector<1x192xf32> to vector<2x192xf32>
    %1054 = arith.addf %1052, %1053 : vector<2x192xf32>
    %1055 = vector.extract_strided_slice %118 {offsets = [30, 0], sizes = [2, 96], strides = [1, 1]} : vector<32x192xf32> to vector<2x96xf32>
    %1056 = vector.extract_strided_slice %118 {offsets = [0, 96], sizes = [2, 96], strides = [1, 1]} : vector<32x192xf32> to vector<2x96xf32>
    %1057 = vector.extract_strided_slice %1054 {offsets = [0, 0], sizes = [2, 96], strides = [1, 1]} : vector<2x192xf32> to vector<2x96xf32>
    %1058 = vector.extract_strided_slice %1051 {offsets = [0, 0], sizes = [2, 32], strides = [1, 1]} : vector<2x64xf32> to vector<2x32xf32>
    %1059 = vector.extract_strided_slice %1055 {offsets = [0, 0], sizes = [2, 32], strides = [1, 1]} : vector<2x96xf32> to vector<2x32xf32>
    %1060 = vector.extract_strided_slice %1057 {offsets = [0, 0], sizes = [2, 32], strides = [1, 1]} : vector<2x96xf32> to vector<2x32xf32>
    %1061 = arith.addf %1059, %1060 : vector<2x32xf32>
    %1062 = arith.negf %1061 : vector<2x32xf32>
    %1063 = math.exp %1062 : vector<2x32xf32>
    %cst_120 = arith.constant 1.000000e+00 : f32
    %1064 = vector.broadcast %cst_120 : f32 to vector<2x32xf32>
    %1065 = arith.addf %1064, %1063 : vector<2x32xf32>
    %1066 = arith.divf %1064, %1065 : vector<2x32xf32>
    %1067 = vector.extract_strided_slice %1055 {offsets = [0, 32], sizes = [2, 32], strides = [1, 1]} : vector<2x96xf32> to vector<2x32xf32>
    %1068 = vector.extract_strided_slice %1057 {offsets = [0, 32], sizes = [2, 32], strides = [1, 1]} : vector<2x96xf32> to vector<2x32xf32>
    %1069 = arith.addf %1067, %1068 : vector<2x32xf32>
    %1070 = arith.negf %1069 : vector<2x32xf32>
    %1071 = math.exp %1070 : vector<2x32xf32>
    %cst_121 = arith.constant 1.000000e+00 : f32
    %1072 = vector.broadcast %cst_121 : f32 to vector<2x32xf32>
    %1073 = arith.addf %1072, %1071 : vector<2x32xf32>
    %1074 = arith.divf %1072, %1073 : vector<2x32xf32>
    %1075 = vector.extract_strided_slice %1055 {offsets = [0, 64], sizes = [2, 32], strides = [1, 1]} : vector<2x96xf32> to vector<2x32xf32>
    %1076 = vector.extract_strided_slice %1057 {offsets = [0, 64], sizes = [2, 32], strides = [1, 1]} : vector<2x96xf32> to vector<2x32xf32>
    %1077 = arith.mulf %1066, %1076 : vector<2x32xf32>
    %1078 = arith.addf %1075, %1077 : vector<2x32xf32>
    %1079 = math.tanh %1078 : vector<2x32xf32>
    %cst_122 = arith.constant 1.000000e+00 : f32
    %1080 = vector.broadcast %cst_122 : f32 to vector<2x32xf32>
    %1081 = arith.subf %1080, %1074 : vector<2x32xf32>
    %1082 = arith.mulf %1081, %1079 : vector<2x32xf32>
    %1083 = arith.mulf %1074, %1058 : vector<2x32xf32>
    %1084 = arith.addf %1082, %1083 : vector<2x32xf32>
    %1085 = vector.extract_strided_slice %1054 {offsets = [0, 96], sizes = [2, 96], strides = [1, 1]} : vector<2x192xf32> to vector<2x96xf32>
    %1086 = vector.extract_strided_slice %1051 {offsets = [0, 32], sizes = [2, 32], strides = [1, 1]} : vector<2x64xf32> to vector<2x32xf32>
    %1087 = vector.extract_strided_slice %1056 {offsets = [0, 0], sizes = [2, 32], strides = [1, 1]} : vector<2x96xf32> to vector<2x32xf32>
    %1088 = vector.extract_strided_slice %1085 {offsets = [0, 0], sizes = [2, 32], strides = [1, 1]} : vector<2x96xf32> to vector<2x32xf32>
    %1089 = arith.addf %1087, %1088 : vector<2x32xf32>
    %1090 = arith.negf %1089 : vector<2x32xf32>
    %1091 = math.exp %1090 : vector<2x32xf32>
    %cst_123 = arith.constant 1.000000e+00 : f32
    %1092 = vector.broadcast %cst_123 : f32 to vector<2x32xf32>
    %1093 = arith.addf %1092, %1091 : vector<2x32xf32>
    %1094 = arith.divf %1092, %1093 : vector<2x32xf32>
    %1095 = vector.extract_strided_slice %1056 {offsets = [0, 32], sizes = [2, 32], strides = [1, 1]} : vector<2x96xf32> to vector<2x32xf32>
    %1096 = vector.extract_strided_slice %1085 {offsets = [0, 32], sizes = [2, 32], strides = [1, 1]} : vector<2x96xf32> to vector<2x32xf32>
    %1097 = arith.addf %1095, %1096 : vector<2x32xf32>
    %1098 = arith.negf %1097 : vector<2x32xf32>
    %1099 = math.exp %1098 : vector<2x32xf32>
    %cst_124 = arith.constant 1.000000e+00 : f32
    %1100 = vector.broadcast %cst_124 : f32 to vector<2x32xf32>
    %1101 = arith.addf %1100, %1099 : vector<2x32xf32>
    %1102 = arith.divf %1100, %1101 : vector<2x32xf32>
    %1103 = vector.extract_strided_slice %1056 {offsets = [0, 64], sizes = [2, 32], strides = [1, 1]} : vector<2x96xf32> to vector<2x32xf32>
    %1104 = vector.extract_strided_slice %1085 {offsets = [0, 64], sizes = [2, 32], strides = [1, 1]} : vector<2x96xf32> to vector<2x32xf32>
    %1105 = arith.mulf %1094, %1104 : vector<2x32xf32>
    %1106 = arith.addf %1103, %1105 : vector<2x32xf32>
    %1107 = math.tanh %1106 : vector<2x32xf32>
    %cst_125 = arith.constant 1.000000e+00 : f32
    %1108 = vector.broadcast %cst_125 : f32 to vector<2x32xf32>
    %1109 = arith.subf %1108, %1102 : vector<2x32xf32>
    %1110 = arith.mulf %1109, %1107 : vector<2x32xf32>
    %1111 = arith.mulf %1102, %1086 : vector<2x32xf32>
    %1112 = arith.addf %1110, %1111 : vector<2x32xf32>
    %1113 = tpu.concatenate %154, %1112 in 1 : vector<2x32xf32>, vector<2x32xf32> -> vector<2x64xf32>
    %1114 = tpu.concatenate %216, %1050 in 1 : vector<2x32xf32>, vector<2x32xf32> -> vector<2x64xf32>
    %1115 = tpu.concatenate %278, %988 in 1 : vector<2x32xf32>, vector<2x32xf32> -> vector<2x64xf32>
    %1116 = tpu.concatenate %340, %926 in 1 : vector<2x32xf32>, vector<2x32xf32> -> vector<2x64xf32>
    %1117 = tpu.concatenate %402, %864 in 1 : vector<2x32xf32>, vector<2x32xf32> -> vector<2x64xf32>
    %1118 = tpu.concatenate %464, %802 in 1 : vector<2x32xf32>, vector<2x32xf32> -> vector<2x64xf32>
    %1119 = tpu.concatenate %526, %740 in 1 : vector<2x32xf32>, vector<2x32xf32> -> vector<2x64xf32>
    %1120 = tpu.concatenate %588, %678 in 1 : vector<2x32xf32>, vector<2x32xf32> -> vector<2x64xf32>
    %1121 = tpu.concatenate %650, %616 in 1 : vector<2x32xf32>, vector<2x32xf32> -> vector<2x64xf32>
    %1122 = tpu.concatenate %712, %554 in 1 : vector<2x32xf32>, vector<2x32xf32> -> vector<2x64xf32>
    %1123 = tpu.concatenate %774, %492 in 1 : vector<2x32xf32>, vector<2x32xf32> -> vector<2x64xf32>
    %1124 = tpu.concatenate %836, %430 in 1 : vector<2x32xf32>, vector<2x32xf32> -> vector<2x64xf32>
    %1125 = tpu.concatenate %898, %368 in 1 : vector<2x32xf32>, vector<2x32xf32> -> vector<2x64xf32>
    %1126 = tpu.concatenate %960, %306 in 1 : vector<2x32xf32>, vector<2x32xf32> -> vector<2x64xf32>
    %1127 = tpu.concatenate %1022, %244 in 1 : vector<2x32xf32>, vector<2x32xf32> -> vector<2x64xf32>
    %1128 = tpu.concatenate %1084, %182 in 1 : vector<2x32xf32>, vector<2x32xf32> -> vector<2x64xf32>
    %1129 = tpu.concatenate %1113, %1114, %1115, %1116, %1117, %1118, %1119, %1120, %1121, %1122, %1123, %1124, %1125, %1126, %1127, %1128 in 0 : vector<2x64xf32>, vector<2x64xf32>, vector<2x64xf32>, vector<2x64xf32>, vector<2x64xf32>, vector<2x64xf32>, vector<2x64xf32>, vector<2x64xf32>, vector<2x64xf32>, vector<2x64xf32>, vector<2x64xf32>, vector<2x64xf32>, vector<2x64xf32>, vector<2x64xf32>, vector<2x64xf32>, vector<2x64xf32> -> vector<32x64xf32>
    %c0_126 = arith.constant 0 : index
    %c0_127 = arith.constant 0 : index
    %1130 = vector.load %arg6[%c0_126, %c0_127] : memref<64x192xf32, #tpu.memory_space<vmem>>, vector<64x192xf32>
    %cst_128 = arith.constant dense<0.000000e+00> : vector<32x192xf32>
    %1131 = tpu.matmul %1129, %1130, %cst_128 {dimension_numbers = #tpu.dot_dimension_numbers<[1], [0], [0], [1], [0, 0, 1, 1], [], []>} : vector<32x64xf32>, vector<64x192xf32>, vector<32x192xf32> -> vector<32x192xf32>
    %c0_129 = arith.constant 0 : index
    %c0_130 = arith.constant 0 : index
    %1132 = vector.load %arg7[%c0_129, %c0_130] : memref<1x192xf32, #tpu.memory_space<vmem>>, vector<1x192xf32>
    %1133 = vector.broadcast %1132 : vector<1x192xf32> to vector<32x192xf32>
    %1134 = arith.addf %1131, %1133 : vector<32x192xf32>
    %c0_131 = arith.constant 0 : index
    %c0_132 = arith.constant 0 : index
    %1135 = vector.load %arg8[%c0_131, %c0_132] : memref<64x192xf32, #tpu.memory_space<vmem>>, vector<64x192xf32>
    %c0_133 = arith.constant 0 : index
    %c0_134 = arith.constant 0 : index
    %1136 = vector.load %arg9[%c0_133, %c0_134] : memref<1x192xf32, #tpu.memory_space<vmem>>, vector<1x192xf32>
    %cst_135 = arith.constant 0.000000e+00 : f32
    %1137 = vector.broadcast %cst_135 : f32 to vector<2x64xf32>
    %cst_136 = arith.constant dense<0.000000e+00> : vector<2x192xf32>
    %1138 = tpu.matmul %1137, %1135, %cst_136 {dimension_numbers = #tpu.dot_dimension_numbers<[1], [0], [0], [1], [0, 0, 1, 1], [], []>} : vector<2x64xf32>, vector<64x192xf32>, vector<2x192xf32> -> vector<2x192xf32>
    %1139 = vector.broadcast %1136 : vector<1x192xf32> to vector<2x192xf32>
    %1140 = arith.addf %1138, %1139 : vector<2x192xf32>
    %1141 = vector.extract_strided_slice %1134 {offsets = [0, 0], sizes = [2, 96], strides = [1, 1]} : vector<32x192xf32> to vector<2x96xf32>
    %1142 = vector.extract_strided_slice %1134 {offsets = [30, 96], sizes = [2, 96], strides = [1, 1]} : vector<32x192xf32> to vector<2x96xf32>
    %1143 = vector.extract_strided_slice %1140 {offsets = [0, 0], sizes = [2, 96], strides = [1, 1]} : vector<2x192xf32> to vector<2x96xf32>
    %1144 = vector.extract_strided_slice %1137 {offsets = [0, 0], sizes = [2, 32], strides = [1, 1]} : vector<2x64xf32> to vector<2x32xf32>
    %1145 = vector.extract_strided_slice %1141 {offsets = [0, 0], sizes = [2, 32], strides = [1, 1]} : vector<2x96xf32> to vector<2x32xf32>
    %1146 = vector.extract_strided_slice %1143 {offsets = [0, 0], sizes = [2, 32], strides = [1, 1]} : vector<2x96xf32> to vector<2x32xf32>
    %1147 = arith.addf %1145, %1146 : vector<2x32xf32>
    %1148 = arith.negf %1147 : vector<2x32xf32>
    %1149 = math.exp %1148 : vector<2x32xf32>
    %cst_137 = arith.constant 1.000000e+00 : f32
    %1150 = vector.broadcast %cst_137 : f32 to vector<2x32xf32>
    %1151 = arith.addf %1150, %1149 : vector<2x32xf32>
    %1152 = arith.divf %1150, %1151 : vector<2x32xf32>
    %1153 = vector.extract_strided_slice %1141 {offsets = [0, 32], sizes = [2, 32], strides = [1, 1]} : vector<2x96xf32> to vector<2x32xf32>
    %1154 = vector.extract_strided_slice %1143 {offsets = [0, 32], sizes = [2, 32], strides = [1, 1]} : vector<2x96xf32> to vector<2x32xf32>
    %1155 = arith.addf %1153, %1154 : vector<2x32xf32>
    %1156 = arith.negf %1155 : vector<2x32xf32>
    %1157 = math.exp %1156 : vector<2x32xf32>
    %cst_138 = arith.constant 1.000000e+00 : f32
    %1158 = vector.broadcast %cst_138 : f32 to vector<2x32xf32>
    %1159 = arith.addf %1158, %1157 : vector<2x32xf32>
    %1160 = arith.divf %1158, %1159 : vector<2x32xf32>
    %1161 = vector.extract_strided_slice %1141 {offsets = [0, 64], sizes = [2, 32], strides = [1, 1]} : vector<2x96xf32> to vector<2x32xf32>
    %1162 = vector.extract_strided_slice %1143 {offsets = [0, 64], sizes = [2, 32], strides = [1, 1]} : vector<2x96xf32> to vector<2x32xf32>
    %1163 = arith.mulf %1152, %1162 : vector<2x32xf32>
    %1164 = arith.addf %1161, %1163 : vector<2x32xf32>
    %1165 = math.tanh %1164 : vector<2x32xf32>
    %cst_139 = arith.constant 1.000000e+00 : f32
    %1166 = vector.broadcast %cst_139 : f32 to vector<2x32xf32>
    %1167 = arith.subf %1166, %1160 : vector<2x32xf32>
    %1168 = arith.mulf %1167, %1165 : vector<2x32xf32>
    %1169 = arith.mulf %1160, %1144 : vector<2x32xf32>
    %1170 = arith.addf %1168, %1169 : vector<2x32xf32>
    %1171 = vector.extract_strided_slice %1140 {offsets = [0, 96], sizes = [2, 96], strides = [1, 1]} : vector<2x192xf32> to vector<2x96xf32>
    %1172 = vector.extract_strided_slice %1137 {offsets = [0, 32], sizes = [2, 32], strides = [1, 1]} : vector<2x64xf32> to vector<2x32xf32>
    %1173 = vector.extract_strided_slice %1142 {offsets = [0, 0], sizes = [2, 32], strides = [1, 1]} : vector<2x96xf32> to vector<2x32xf32>
    %1174 = vector.extract_strided_slice %1171 {offsets = [0, 0], sizes = [2, 32], strides = [1, 1]} : vector<2x96xf32> to vector<2x32xf32>
    %1175 = arith.addf %1173, %1174 : vector<2x32xf32>
    %1176 = arith.negf %1175 : vector<2x32xf32>
    %1177 = math.exp %1176 : vector<2x32xf32>
    %cst_140 = arith.constant 1.000000e+00 : f32
    %1178 = vector.broadcast %cst_140 : f32 to vector<2x32xf32>
    %1179 = arith.addf %1178, %1177 : vector<2x32xf32>
    %1180 = arith.divf %1178, %1179 : vector<2x32xf32>
    %1181 = vector.extract_strided_slice %1142 {offsets = [0, 32], sizes = [2, 32], strides = [1, 1]} : vector<2x96xf32> to vector<2x32xf32>
    %1182 = vector.extract_strided_slice %1171 {offsets = [0, 32], sizes = [2, 32], strides = [1, 1]} : vector<2x96xf32> to vector<2x32xf32>
    %1183 = arith.addf %1181, %1182 : vector<2x32xf32>
    %1184 = arith.negf %1183 : vector<2x32xf32>
    %1185 = math.exp %1184 : vector<2x32xf32>
    %cst_141 = arith.constant 1.000000e+00 : f32
    %1186 = vector.broadcast %cst_141 : f32 to vector<2x32xf32>
    %1187 = arith.addf %1186, %1185 : vector<2x32xf32>
    %1188 = arith.divf %1186, %1187 : vector<2x32xf32>
    %1189 = vector.extract_strided_slice %1142 {offsets = [0, 64], sizes = [2, 32], strides = [1, 1]} : vector<2x96xf32> to vector<2x32xf32>
    %1190 = vector.extract_strided_slice %1171 {offsets = [0, 64], sizes = [2, 32], strides = [1, 1]} : vector<2x96xf32> to vector<2x32xf32>
    %1191 = arith.mulf %1180, %1190 : vector<2x32xf32>
    %1192 = arith.addf %1189, %1191 : vector<2x32xf32>
    %1193 = math.tanh %1192 : vector<2x32xf32>
    %cst_142 = arith.constant 1.000000e+00 : f32
    %1194 = vector.broadcast %cst_142 : f32 to vector<2x32xf32>
    %1195 = arith.subf %1194, %1188 : vector<2x32xf32>
    %1196 = arith.mulf %1195, %1193 : vector<2x32xf32>
    %1197 = arith.mulf %1188, %1172 : vector<2x32xf32>
    %1198 = arith.addf %1196, %1197 : vector<2x32xf32>
    %1199 = tpu.concatenate %1170, %1198 in 1 : vector<2x32xf32>, vector<2x32xf32> -> vector<2x64xf32>
    %cst_143 = arith.constant dense<0.000000e+00> : vector<2x192xf32>
    %1200 = tpu.matmul %1199, %1135, %cst_143 {dimension_numbers = #tpu.dot_dimension_numbers<[1], [0], [0], [1], [0, 0, 1, 1], [], []>} : vector<2x64xf32>, vector<64x192xf32>, vector<2x192xf32> -> vector<2x192xf32>
    %1201 = vector.broadcast %1136 : vector<1x192xf32> to vector<2x192xf32>
    %1202 = arith.addf %1200, %1201 : vector<2x192xf32>
    %1203 = vector.extract_strided_slice %1134 {offsets = [2, 0], sizes = [2, 96], strides = [1, 1]} : vector<32x192xf32> to vector<2x96xf32>
    %1204 = vector.extract_strided_slice %1134 {offsets = [28, 96], sizes = [2, 96], strides = [1, 1]} : vector<32x192xf32> to vector<2x96xf32>
    %1205 = vector.extract_strided_slice %1202 {offsets = [0, 0], sizes = [2, 96], strides = [1, 1]} : vector<2x192xf32> to vector<2x96xf32>
    %1206 = vector.extract_strided_slice %1199 {offsets = [0, 0], sizes = [2, 32], strides = [1, 1]} : vector<2x64xf32> to vector<2x32xf32>
    %1207 = vector.extract_strided_slice %1203 {offsets = [0, 0], sizes = [2, 32], strides = [1, 1]} : vector<2x96xf32> to vector<2x32xf32>
    %1208 = vector.extract_strided_slice %1205 {offsets = [0, 0], sizes = [2, 32], strides = [1, 1]} : vector<2x96xf32> to vector<2x32xf32>
    %1209 = arith.addf %1207, %1208 : vector<2x32xf32>
    %1210 = arith.negf %1209 : vector<2x32xf32>
    %1211 = math.exp %1210 : vector<2x32xf32>
    %cst_144 = arith.constant 1.000000e+00 : f32
    %1212 = vector.broadcast %cst_144 : f32 to vector<2x32xf32>
    %1213 = arith.addf %1212, %1211 : vector<2x32xf32>
    %1214 = arith.divf %1212, %1213 : vector<2x32xf32>
    %1215 = vector.extract_strided_slice %1203 {offsets = [0, 32], sizes = [2, 32], strides = [1, 1]} : vector<2x96xf32> to vector<2x32xf32>
    %1216 = vector.extract_strided_slice %1205 {offsets = [0, 32], sizes = [2, 32], strides = [1, 1]} : vector<2x96xf32> to vector<2x32xf32>
    %1217 = arith.addf %1215, %1216 : vector<2x32xf32>
    %1218 = arith.negf %1217 : vector<2x32xf32>
    %1219 = math.exp %1218 : vector<2x32xf32>
    %cst_145 = arith.constant 1.000000e+00 : f32
    %1220 = vector.broadcast %cst_145 : f32 to vector<2x32xf32>
    %1221 = arith.addf %1220, %1219 : vector<2x32xf32>
    %1222 = arith.divf %1220, %1221 : vector<2x32xf32>
    %1223 = vector.extract_strided_slice %1203 {offsets = [0, 64], sizes = [2, 32], strides = [1, 1]} : vector<2x96xf32> to vector<2x32xf32>
    %1224 = vector.extract_strided_slice %1205 {offsets = [0, 64], sizes = [2, 32], strides = [1, 1]} : vector<2x96xf32> to vector<2x32xf32>
    %1225 = arith.mulf %1214, %1224 : vector<2x32xf32>
    %1226 = arith.addf %1223, %1225 : vector<2x32xf32>
    %1227 = math.tanh %1226 : vector<2x32xf32>
    %cst_146 = arith.constant 1.000000e+00 : f32
    %1228 = vector.broadcast %cst_146 : f32 to vector<2x32xf32>
    %1229 = arith.subf %1228, %1222 : vector<2x32xf32>
    %1230 = arith.mulf %1229, %1227 : vector<2x32xf32>
    %1231 = arith.mulf %1222, %1206 : vector<2x32xf32>
    %1232 = arith.addf %1230, %1231 : vector<2x32xf32>
    %1233 = vector.extract_strided_slice %1202 {offsets = [0, 96], sizes = [2, 96], strides = [1, 1]} : vector<2x192xf32> to vector<2x96xf32>
    %1234 = vector.extract_strided_slice %1199 {offsets = [0, 32], sizes = [2, 32], strides = [1, 1]} : vector<2x64xf32> to vector<2x32xf32>
    %1235 = vector.extract_strided_slice %1204 {offsets = [0, 0], sizes = [2, 32], strides = [1, 1]} : vector<2x96xf32> to vector<2x32xf32>
    %1236 = vector.extract_strided_slice %1233 {offsets = [0, 0], sizes = [2, 32], strides = [1, 1]} : vector<2x96xf32> to vector<2x32xf32>
    %1237 = arith.addf %1235, %1236 : vector<2x32xf32>
    %1238 = arith.negf %1237 : vector<2x32xf32>
    %1239 = math.exp %1238 : vector<2x32xf32>
    %cst_147 = arith.constant 1.000000e+00 : f32
    %1240 = vector.broadcast %cst_147 : f32 to vector<2x32xf32>
    %1241 = arith.addf %1240, %1239 : vector<2x32xf32>
    %1242 = arith.divf %1240, %1241 : vector<2x32xf32>
    %1243 = vector.extract_strided_slice %1204 {offsets = [0, 32], sizes = [2, 32], strides = [1, 1]} : vector<2x96xf32> to vector<2x32xf32>
    %1244 = vector.extract_strided_slice %1233 {offsets = [0, 32], sizes = [2, 32], strides = [1, 1]} : vector<2x96xf32> to vector<2x32xf32>
    %1245 = arith.addf %1243, %1244 : vector<2x32xf32>
    %1246 = arith.negf %1245 : vector<2x32xf32>
    %1247 = math.exp %1246 : vector<2x32xf32>
    %cst_148 = arith.constant 1.000000e+00 : f32
    %1248 = vector.broadcast %cst_148 : f32 to vector<2x32xf32>
    %1249 = arith.addf %1248, %1247 : vector<2x32xf32>
    %1250 = arith.divf %1248, %1249 : vector<2x32xf32>
    %1251 = vector.extract_strided_slice %1204 {offsets = [0, 64], sizes = [2, 32], strides = [1, 1]} : vector<2x96xf32> to vector<2x32xf32>
    %1252 = vector.extract_strided_slice %1233 {offsets = [0, 64], sizes = [2, 32], strides = [1, 1]} : vector<2x96xf32> to vector<2x32xf32>
    %1253 = arith.mulf %1242, %1252 : vector<2x32xf32>
    %1254 = arith.addf %1251, %1253 : vector<2x32xf32>
    %1255 = math.tanh %1254 : vector<2x32xf32>
    %cst_149 = arith.constant 1.000000e+00 : f32
    %1256 = vector.broadcast %cst_149 : f32 to vector<2x32xf32>
    %1257 = arith.subf %1256, %1250 : vector<2x32xf32>
    %1258 = arith.mulf %1257, %1255 : vector<2x32xf32>
    %1259 = arith.mulf %1250, %1234 : vector<2x32xf32>
    %1260 = arith.addf %1258, %1259 : vector<2x32xf32>
    %1261 = tpu.concatenate %1232, %1260 in 1 : vector<2x32xf32>, vector<2x32xf32> -> vector<2x64xf32>
    %cst_150 = arith.constant dense<0.000000e+00> : vector<2x192xf32>
    %1262 = tpu.matmul %1261, %1135, %cst_150 {dimension_numbers = #tpu.dot_dimension_numbers<[1], [0], [0], [1], [0, 0, 1, 1], [], []>} : vector<2x64xf32>, vector<64x192xf32>, vector<2x192xf32> -> vector<2x192xf32>
    %1263 = vector.broadcast %1136 : vector<1x192xf32> to vector<2x192xf32>
    %1264 = arith.addf %1262, %1263 : vector<2x192xf32>
    %1265 = vector.extract_strided_slice %1134 {offsets = [4, 0], sizes = [2, 96], strides = [1, 1]} : vector<32x192xf32> to vector<2x96xf32>
    %1266 = vector.extract_strided_slice %1134 {offsets = [26, 96], sizes = [2, 96], strides = [1, 1]} : vector<32x192xf32> to vector<2x96xf32>
    %1267 = vector.extract_strided_slice %1264 {offsets = [0, 0], sizes = [2, 96], strides = [1, 1]} : vector<2x192xf32> to vector<2x96xf32>
    %1268 = vector.extract_strided_slice %1261 {offsets = [0, 0], sizes = [2, 32], strides = [1, 1]} : vector<2x64xf32> to vector<2x32xf32>
    %1269 = vector.extract_strided_slice %1265 {offsets = [0, 0], sizes = [2, 32], strides = [1, 1]} : vector<2x96xf32> to vector<2x32xf32>
    %1270 = vector.extract_strided_slice %1267 {offsets = [0, 0], sizes = [2, 32], strides = [1, 1]} : vector<2x96xf32> to vector<2x32xf32>
    %1271 = arith.addf %1269, %1270 : vector<2x32xf32>
    %1272 = arith.negf %1271 : vector<2x32xf32>
    %1273 = math.exp %1272 : vector<2x32xf32>
    %cst_151 = arith.constant 1.000000e+00 : f32
    %1274 = vector.broadcast %cst_151 : f32 to vector<2x32xf32>
    %1275 = arith.addf %1274, %1273 : vector<2x32xf32>
    %1276 = arith.divf %1274, %1275 : vector<2x32xf32>
    %1277 = vector.extract_strided_slice %1265 {offsets = [0, 32], sizes = [2, 32], strides = [1, 1]} : vector<2x96xf32> to vector<2x32xf32>
    %1278 = vector.extract_strided_slice %1267 {offsets = [0, 32], sizes = [2, 32], strides = [1, 1]} : vector<2x96xf32> to vector<2x32xf32>
    %1279 = arith.addf %1277, %1278 : vector<2x32xf32>
    %1280 = arith.negf %1279 : vector<2x32xf32>
    %1281 = math.exp %1280 : vector<2x32xf32>
    %cst_152 = arith.constant 1.000000e+00 : f32
    %1282 = vector.broadcast %cst_152 : f32 to vector<2x32xf32>
    %1283 = arith.addf %1282, %1281 : vector<2x32xf32>
    %1284 = arith.divf %1282, %1283 : vector<2x32xf32>
    %1285 = vector.extract_strided_slice %1265 {offsets = [0, 64], sizes = [2, 32], strides = [1, 1]} : vector<2x96xf32> to vector<2x32xf32>
    %1286 = vector.extract_strided_slice %1267 {offsets = [0, 64], sizes = [2, 32], strides = [1, 1]} : vector<2x96xf32> to vector<2x32xf32>
    %1287 = arith.mulf %1276, %1286 : vector<2x32xf32>
    %1288 = arith.addf %1285, %1287 : vector<2x32xf32>
    %1289 = math.tanh %1288 : vector<2x32xf32>
    %cst_153 = arith.constant 1.000000e+00 : f32
    %1290 = vector.broadcast %cst_153 : f32 to vector<2x32xf32>
    %1291 = arith.subf %1290, %1284 : vector<2x32xf32>
    %1292 = arith.mulf %1291, %1289 : vector<2x32xf32>
    %1293 = arith.mulf %1284, %1268 : vector<2x32xf32>
    %1294 = arith.addf %1292, %1293 : vector<2x32xf32>
    %1295 = vector.extract_strided_slice %1264 {offsets = [0, 96], sizes = [2, 96], strides = [1, 1]} : vector<2x192xf32> to vector<2x96xf32>
    %1296 = vector.extract_strided_slice %1261 {offsets = [0, 32], sizes = [2, 32], strides = [1, 1]} : vector<2x64xf32> to vector<2x32xf32>
    %1297 = vector.extract_strided_slice %1266 {offsets = [0, 0], sizes = [2, 32], strides = [1, 1]} : vector<2x96xf32> to vector<2x32xf32>
    %1298 = vector.extract_strided_slice %1295 {offsets = [0, 0], sizes = [2, 32], strides = [1, 1]} : vector<2x96xf32> to vector<2x32xf32>
    %1299 = arith.addf %1297, %1298 : vector<2x32xf32>
    %1300 = arith.negf %1299 : vector<2x32xf32>
    %1301 = math.exp %1300 : vector<2x32xf32>
    %cst_154 = arith.constant 1.000000e+00 : f32
    %1302 = vector.broadcast %cst_154 : f32 to vector<2x32xf32>
    %1303 = arith.addf %1302, %1301 : vector<2x32xf32>
    %1304 = arith.divf %1302, %1303 : vector<2x32xf32>
    %1305 = vector.extract_strided_slice %1266 {offsets = [0, 32], sizes = [2, 32], strides = [1, 1]} : vector<2x96xf32> to vector<2x32xf32>
    %1306 = vector.extract_strided_slice %1295 {offsets = [0, 32], sizes = [2, 32], strides = [1, 1]} : vector<2x96xf32> to vector<2x32xf32>
    %1307 = arith.addf %1305, %1306 : vector<2x32xf32>
    %1308 = arith.negf %1307 : vector<2x32xf32>
    %1309 = math.exp %1308 : vector<2x32xf32>
    %cst_155 = arith.constant 1.000000e+00 : f32
    %1310 = vector.broadcast %cst_155 : f32 to vector<2x32xf32>
    %1311 = arith.addf %1310, %1309 : vector<2x32xf32>
    %1312 = arith.divf %1310, %1311 : vector<2x32xf32>
    %1313 = vector.extract_strided_slice %1266 {offsets = [0, 64], sizes = [2, 32], strides = [1, 1]} : vector<2x96xf32> to vector<2x32xf32>
    %1314 = vector.extract_strided_slice %1295 {offsets = [0, 64], sizes = [2, 32], strides = [1, 1]} : vector<2x96xf32> to vector<2x32xf32>
    %1315 = arith.mulf %1304, %1314 : vector<2x32xf32>
    %1316 = arith.addf %1313, %1315 : vector<2x32xf32>
    %1317 = math.tanh %1316 : vector<2x32xf32>
    %cst_156 = arith.constant 1.000000e+00 : f32
    %1318 = vector.broadcast %cst_156 : f32 to vector<2x32xf32>
    %1319 = arith.subf %1318, %1312 : vector<2x32xf32>
    %1320 = arith.mulf %1319, %1317 : vector<2x32xf32>
    %1321 = arith.mulf %1312, %1296 : vector<2x32xf32>
    %1322 = arith.addf %1320, %1321 : vector<2x32xf32>
    %1323 = tpu.concatenate %1294, %1322 in 1 : vector<2x32xf32>, vector<2x32xf32> -> vector<2x64xf32>
    %cst_157 = arith.constant dense<0.000000e+00> : vector<2x192xf32>
    %1324 = tpu.matmul %1323, %1135, %cst_157 {dimension_numbers = #tpu.dot_dimension_numbers<[1], [0], [0], [1], [0, 0, 1, 1], [], []>} : vector<2x64xf32>, vector<64x192xf32>, vector<2x192xf32> -> vector<2x192xf32>
    %1325 = vector.broadcast %1136 : vector<1x192xf32> to vector<2x192xf32>
    %1326 = arith.addf %1324, %1325 : vector<2x192xf32>
    %1327 = vector.extract_strided_slice %1134 {offsets = [6, 0], sizes = [2, 96], strides = [1, 1]} : vector<32x192xf32> to vector<2x96xf32>
    %1328 = vector.extract_strided_slice %1134 {offsets = [24, 96], sizes = [2, 96], strides = [1, 1]} : vector<32x192xf32> to vector<2x96xf32>
    %1329 = vector.extract_strided_slice %1326 {offsets = [0, 0], sizes = [2, 96], strides = [1, 1]} : vector<2x192xf32> to vector<2x96xf32>
    %1330 = vector.extract_strided_slice %1323 {offsets = [0, 0], sizes = [2, 32], strides = [1, 1]} : vector<2x64xf32> to vector<2x32xf32>
    %1331 = vector.extract_strided_slice %1327 {offsets = [0, 0], sizes = [2, 32], strides = [1, 1]} : vector<2x96xf32> to vector<2x32xf32>
    %1332 = vector.extract_strided_slice %1329 {offsets = [0, 0], sizes = [2, 32], strides = [1, 1]} : vector<2x96xf32> to vector<2x32xf32>
    %1333 = arith.addf %1331, %1332 : vector<2x32xf32>
    %1334 = arith.negf %1333 : vector<2x32xf32>
    %1335 = math.exp %1334 : vector<2x32xf32>
    %cst_158 = arith.constant 1.000000e+00 : f32
    %1336 = vector.broadcast %cst_158 : f32 to vector<2x32xf32>
    %1337 = arith.addf %1336, %1335 : vector<2x32xf32>
    %1338 = arith.divf %1336, %1337 : vector<2x32xf32>
    %1339 = vector.extract_strided_slice %1327 {offsets = [0, 32], sizes = [2, 32], strides = [1, 1]} : vector<2x96xf32> to vector<2x32xf32>
    %1340 = vector.extract_strided_slice %1329 {offsets = [0, 32], sizes = [2, 32], strides = [1, 1]} : vector<2x96xf32> to vector<2x32xf32>
    %1341 = arith.addf %1339, %1340 : vector<2x32xf32>
    %1342 = arith.negf %1341 : vector<2x32xf32>
    %1343 = math.exp %1342 : vector<2x32xf32>
    %cst_159 = arith.constant 1.000000e+00 : f32
    %1344 = vector.broadcast %cst_159 : f32 to vector<2x32xf32>
    %1345 = arith.addf %1344, %1343 : vector<2x32xf32>
    %1346 = arith.divf %1344, %1345 : vector<2x32xf32>
    %1347 = vector.extract_strided_slice %1327 {offsets = [0, 64], sizes = [2, 32], strides = [1, 1]} : vector<2x96xf32> to vector<2x32xf32>
    %1348 = vector.extract_strided_slice %1329 {offsets = [0, 64], sizes = [2, 32], strides = [1, 1]} : vector<2x96xf32> to vector<2x32xf32>
    %1349 = arith.mulf %1338, %1348 : vector<2x32xf32>
    %1350 = arith.addf %1347, %1349 : vector<2x32xf32>
    %1351 = math.tanh %1350 : vector<2x32xf32>
    %cst_160 = arith.constant 1.000000e+00 : f32
    %1352 = vector.broadcast %cst_160 : f32 to vector<2x32xf32>
    %1353 = arith.subf %1352, %1346 : vector<2x32xf32>
    %1354 = arith.mulf %1353, %1351 : vector<2x32xf32>
    %1355 = arith.mulf %1346, %1330 : vector<2x32xf32>
    %1356 = arith.addf %1354, %1355 : vector<2x32xf32>
    %1357 = vector.extract_strided_slice %1326 {offsets = [0, 96], sizes = [2, 96], strides = [1, 1]} : vector<2x192xf32> to vector<2x96xf32>
    %1358 = vector.extract_strided_slice %1323 {offsets = [0, 32], sizes = [2, 32], strides = [1, 1]} : vector<2x64xf32> to vector<2x32xf32>
    %1359 = vector.extract_strided_slice %1328 {offsets = [0, 0], sizes = [2, 32], strides = [1, 1]} : vector<2x96xf32> to vector<2x32xf32>
    %1360 = vector.extract_strided_slice %1357 {offsets = [0, 0], sizes = [2, 32], strides = [1, 1]} : vector<2x96xf32> to vector<2x32xf32>
    %1361 = arith.addf %1359, %1360 : vector<2x32xf32>
    %1362 = arith.negf %1361 : vector<2x32xf32>
    %1363 = math.exp %1362 : vector<2x32xf32>
    %cst_161 = arith.constant 1.000000e+00 : f32
    %1364 = vector.broadcast %cst_161 : f32 to vector<2x32xf32>
    %1365 = arith.addf %1364, %1363 : vector<2x32xf32>
    %1366 = arith.divf %1364, %1365 : vector<2x32xf32>
    %1367 = vector.extract_strided_slice %1328 {offsets = [0, 32], sizes = [2, 32], strides = [1, 1]} : vector<2x96xf32> to vector<2x32xf32>
    %1368 = vector.extract_strided_slice %1357 {offsets = [0, 32], sizes = [2, 32], strides = [1, 1]} : vector<2x96xf32> to vector<2x32xf32>
    %1369 = arith.addf %1367, %1368 : vector<2x32xf32>
    %1370 = arith.negf %1369 : vector<2x32xf32>
    %1371 = math.exp %1370 : vector<2x32xf32>
    %cst_162 = arith.constant 1.000000e+00 : f32
    %1372 = vector.broadcast %cst_162 : f32 to vector<2x32xf32>
    %1373 = arith.addf %1372, %1371 : vector<2x32xf32>
    %1374 = arith.divf %1372, %1373 : vector<2x32xf32>
    %1375 = vector.extract_strided_slice %1328 {offsets = [0, 64], sizes = [2, 32], strides = [1, 1]} : vector<2x96xf32> to vector<2x32xf32>
    %1376 = vector.extract_strided_slice %1357 {offsets = [0, 64], sizes = [2, 32], strides = [1, 1]} : vector<2x96xf32> to vector<2x32xf32>
    %1377 = arith.mulf %1366, %1376 : vector<2x32xf32>
    %1378 = arith.addf %1375, %1377 : vector<2x32xf32>
    %1379 = math.tanh %1378 : vector<2x32xf32>
    %cst_163 = arith.constant 1.000000e+00 : f32
    %1380 = vector.broadcast %cst_163 : f32 to vector<2x32xf32>
    %1381 = arith.subf %1380, %1374 : vector<2x32xf32>
    %1382 = arith.mulf %1381, %1379 : vector<2x32xf32>
    %1383 = arith.mulf %1374, %1358 : vector<2x32xf32>
    %1384 = arith.addf %1382, %1383 : vector<2x32xf32>
    %1385 = tpu.concatenate %1356, %1384 in 1 : vector<2x32xf32>, vector<2x32xf32> -> vector<2x64xf32>
    %cst_164 = arith.constant dense<0.000000e+00> : vector<2x192xf32>
    %1386 = tpu.matmul %1385, %1135, %cst_164 {dimension_numbers = #tpu.dot_dimension_numbers<[1], [0], [0], [1], [0, 0, 1, 1], [], []>} : vector<2x64xf32>, vector<64x192xf32>, vector<2x192xf32> -> vector<2x192xf32>
    %1387 = vector.broadcast %1136 : vector<1x192xf32> to vector<2x192xf32>
    %1388 = arith.addf %1386, %1387 : vector<2x192xf32>
    %1389 = vector.extract_strided_slice %1134 {offsets = [8, 0], sizes = [2, 96], strides = [1, 1]} : vector<32x192xf32> to vector<2x96xf32>
    %1390 = vector.extract_strided_slice %1134 {offsets = [22, 96], sizes = [2, 96], strides = [1, 1]} : vector<32x192xf32> to vector<2x96xf32>
    %1391 = vector.extract_strided_slice %1388 {offsets = [0, 0], sizes = [2, 96], strides = [1, 1]} : vector<2x192xf32> to vector<2x96xf32>
    %1392 = vector.extract_strided_slice %1385 {offsets = [0, 0], sizes = [2, 32], strides = [1, 1]} : vector<2x64xf32> to vector<2x32xf32>
    %1393 = vector.extract_strided_slice %1389 {offsets = [0, 0], sizes = [2, 32], strides = [1, 1]} : vector<2x96xf32> to vector<2x32xf32>
    %1394 = vector.extract_strided_slice %1391 {offsets = [0, 0], sizes = [2, 32], strides = [1, 1]} : vector<2x96xf32> to vector<2x32xf32>
    %1395 = arith.addf %1393, %1394 : vector<2x32xf32>
    %1396 = arith.negf %1395 : vector<2x32xf32>
    %1397 = math.exp %1396 : vector<2x32xf32>
    %cst_165 = arith.constant 1.000000e+00 : f32
    %1398 = vector.broadcast %cst_165 : f32 to vector<2x32xf32>
    %1399 = arith.addf %1398, %1397 : vector<2x32xf32>
    %1400 = arith.divf %1398, %1399 : vector<2x32xf32>
    %1401 = vector.extract_strided_slice %1389 {offsets = [0, 32], sizes = [2, 32], strides = [1, 1]} : vector<2x96xf32> to vector<2x32xf32>
    %1402 = vector.extract_strided_slice %1391 {offsets = [0, 32], sizes = [2, 32], strides = [1, 1]} : vector<2x96xf32> to vector<2x32xf32>
    %1403 = arith.addf %1401, %1402 : vector<2x32xf32>
    %1404 = arith.negf %1403 : vector<2x32xf32>
    %1405 = math.exp %1404 : vector<2x32xf32>
    %cst_166 = arith.constant 1.000000e+00 : f32
    %1406 = vector.broadcast %cst_166 : f32 to vector<2x32xf32>
    %1407 = arith.addf %1406, %1405 : vector<2x32xf32>
    %1408 = arith.divf %1406, %1407 : vector<2x32xf32>
    %1409 = vector.extract_strided_slice %1389 {offsets = [0, 64], sizes = [2, 32], strides = [1, 1]} : vector<2x96xf32> to vector<2x32xf32>
    %1410 = vector.extract_strided_slice %1391 {offsets = [0, 64], sizes = [2, 32], strides = [1, 1]} : vector<2x96xf32> to vector<2x32xf32>
    %1411 = arith.mulf %1400, %1410 : vector<2x32xf32>
    %1412 = arith.addf %1409, %1411 : vector<2x32xf32>
    %1413 = math.tanh %1412 : vector<2x32xf32>
    %cst_167 = arith.constant 1.000000e+00 : f32
    %1414 = vector.broadcast %cst_167 : f32 to vector<2x32xf32>
    %1415 = arith.subf %1414, %1408 : vector<2x32xf32>
    %1416 = arith.mulf %1415, %1413 : vector<2x32xf32>
    %1417 = arith.mulf %1408, %1392 : vector<2x32xf32>
    %1418 = arith.addf %1416, %1417 : vector<2x32xf32>
    %1419 = vector.extract_strided_slice %1388 {offsets = [0, 96], sizes = [2, 96], strides = [1, 1]} : vector<2x192xf32> to vector<2x96xf32>
    %1420 = vector.extract_strided_slice %1385 {offsets = [0, 32], sizes = [2, 32], strides = [1, 1]} : vector<2x64xf32> to vector<2x32xf32>
    %1421 = vector.extract_strided_slice %1390 {offsets = [0, 0], sizes = [2, 32], strides = [1, 1]} : vector<2x96xf32> to vector<2x32xf32>
    %1422 = vector.extract_strided_slice %1419 {offsets = [0, 0], sizes = [2, 32], strides = [1, 1]} : vector<2x96xf32> to vector<2x32xf32>
    %1423 = arith.addf %1421, %1422 : vector<2x32xf32>
    %1424 = arith.negf %1423 : vector<2x32xf32>
    %1425 = math.exp %1424 : vector<2x32xf32>
    %cst_168 = arith.constant 1.000000e+00 : f32
    %1426 = vector.broadcast %cst_168 : f32 to vector<2x32xf32>
    %1427 = arith.addf %1426, %1425 : vector<2x32xf32>
    %1428 = arith.divf %1426, %1427 : vector<2x32xf32>
    %1429 = vector.extract_strided_slice %1390 {offsets = [0, 32], sizes = [2, 32], strides = [1, 1]} : vector<2x96xf32> to vector<2x32xf32>
    %1430 = vector.extract_strided_slice %1419 {offsets = [0, 32], sizes = [2, 32], strides = [1, 1]} : vector<2x96xf32> to vector<2x32xf32>
    %1431 = arith.addf %1429, %1430 : vector<2x32xf32>
    %1432 = arith.negf %1431 : vector<2x32xf32>
    %1433 = math.exp %1432 : vector<2x32xf32>
    %cst_169 = arith.constant 1.000000e+00 : f32
    %1434 = vector.broadcast %cst_169 : f32 to vector<2x32xf32>
    %1435 = arith.addf %1434, %1433 : vector<2x32xf32>
    %1436 = arith.divf %1434, %1435 : vector<2x32xf32>
    %1437 = vector.extract_strided_slice %1390 {offsets = [0, 64], sizes = [2, 32], strides = [1, 1]} : vector<2x96xf32> to vector<2x32xf32>
    %1438 = vector.extract_strided_slice %1419 {offsets = [0, 64], sizes = [2, 32], strides = [1, 1]} : vector<2x96xf32> to vector<2x32xf32>
    %1439 = arith.mulf %1428, %1438 : vector<2x32xf32>
    %1440 = arith.addf %1437, %1439 : vector<2x32xf32>
    %1441 = math.tanh %1440 : vector<2x32xf32>
    %cst_170 = arith.constant 1.000000e+00 : f32
    %1442 = vector.broadcast %cst_170 : f32 to vector<2x32xf32>
    %1443 = arith.subf %1442, %1436 : vector<2x32xf32>
    %1444 = arith.mulf %1443, %1441 : vector<2x32xf32>
    %1445 = arith.mulf %1436, %1420 : vector<2x32xf32>
    %1446 = arith.addf %1444, %1445 : vector<2x32xf32>
    %1447 = tpu.concatenate %1418, %1446 in 1 : vector<2x32xf32>, vector<2x32xf32> -> vector<2x64xf32>
    %cst_171 = arith.constant dense<0.000000e+00> : vector<2x192xf32>
    %1448 = tpu.matmul %1447, %1135, %cst_171 {dimension_numbers = #tpu.dot_dimension_numbers<[1], [0], [0], [1], [0, 0, 1, 1], [], []>} : vector<2x64xf32>, vector<64x192xf32>, vector<2x192xf32> -> vector<2x192xf32>
    %1449 = vector.broadcast %1136 : vector<1x192xf32> to vector<2x192xf32>
    %1450 = arith.addf %1448, %1449 : vector<2x192xf32>
    %1451 = vector.extract_strided_slice %1134 {offsets = [10, 0], sizes = [2, 96], strides = [1, 1]} : vector<32x192xf32> to vector<2x96xf32>
    %1452 = vector.extract_strided_slice %1134 {offsets = [20, 96], sizes = [2, 96], strides = [1, 1]} : vector<32x192xf32> to vector<2x96xf32>
    %1453 = vector.extract_strided_slice %1450 {offsets = [0, 0], sizes = [2, 96], strides = [1, 1]} : vector<2x192xf32> to vector<2x96xf32>
    %1454 = vector.extract_strided_slice %1447 {offsets = [0, 0], sizes = [2, 32], strides = [1, 1]} : vector<2x64xf32> to vector<2x32xf32>
    %1455 = vector.extract_strided_slice %1451 {offsets = [0, 0], sizes = [2, 32], strides = [1, 1]} : vector<2x96xf32> to vector<2x32xf32>
    %1456 = vector.extract_strided_slice %1453 {offsets = [0, 0], sizes = [2, 32], strides = [1, 1]} : vector<2x96xf32> to vector<2x32xf32>
    %1457 = arith.addf %1455, %1456 : vector<2x32xf32>
    %1458 = arith.negf %1457 : vector<2x32xf32>
    %1459 = math.exp %1458 : vector<2x32xf32>
    %cst_172 = arith.constant 1.000000e+00 : f32
    %1460 = vector.broadcast %cst_172 : f32 to vector<2x32xf32>
    %1461 = arith.addf %1460, %1459 : vector<2x32xf32>
    %1462 = arith.divf %1460, %1461 : vector<2x32xf32>
    %1463 = vector.extract_strided_slice %1451 {offsets = [0, 32], sizes = [2, 32], strides = [1, 1]} : vector<2x96xf32> to vector<2x32xf32>
    %1464 = vector.extract_strided_slice %1453 {offsets = [0, 32], sizes = [2, 32], strides = [1, 1]} : vector<2x96xf32> to vector<2x32xf32>
    %1465 = arith.addf %1463, %1464 : vector<2x32xf32>
    %1466 = arith.negf %1465 : vector<2x32xf32>
    %1467 = math.exp %1466 : vector<2x32xf32>
    %cst_173 = arith.constant 1.000000e+00 : f32
    %1468 = vector.broadcast %cst_173 : f32 to vector<2x32xf32>
    %1469 = arith.addf %1468, %1467 : vector<2x32xf32>
    %1470 = arith.divf %1468, %1469 : vector<2x32xf32>
    %1471 = vector.extract_strided_slice %1451 {offsets = [0, 64], sizes = [2, 32], strides = [1, 1]} : vector<2x96xf32> to vector<2x32xf32>
    %1472 = vector.extract_strided_slice %1453 {offsets = [0, 64], sizes = [2, 32], strides = [1, 1]} : vector<2x96xf32> to vector<2x32xf32>
    %1473 = arith.mulf %1462, %1472 : vector<2x32xf32>
    %1474 = arith.addf %1471, %1473 : vector<2x32xf32>
    %1475 = math.tanh %1474 : vector<2x32xf32>
    %cst_174 = arith.constant 1.000000e+00 : f32
    %1476 = vector.broadcast %cst_174 : f32 to vector<2x32xf32>
    %1477 = arith.subf %1476, %1470 : vector<2x32xf32>
    %1478 = arith.mulf %1477, %1475 : vector<2x32xf32>
    %1479 = arith.mulf %1470, %1454 : vector<2x32xf32>
    %1480 = arith.addf %1478, %1479 : vector<2x32xf32>
    %1481 = vector.extract_strided_slice %1450 {offsets = [0, 96], sizes = [2, 96], strides = [1, 1]} : vector<2x192xf32> to vector<2x96xf32>
    %1482 = vector.extract_strided_slice %1447 {offsets = [0, 32], sizes = [2, 32], strides = [1, 1]} : vector<2x64xf32> to vector<2x32xf32>
    %1483 = vector.extract_strided_slice %1452 {offsets = [0, 0], sizes = [2, 32], strides = [1, 1]} : vector<2x96xf32> to vector<2x32xf32>
    %1484 = vector.extract_strided_slice %1481 {offsets = [0, 0], sizes = [2, 32], strides = [1, 1]} : vector<2x96xf32> to vector<2x32xf32>
    %1485 = arith.addf %1483, %1484 : vector<2x32xf32>
    %1486 = arith.negf %1485 : vector<2x32xf32>
    %1487 = math.exp %1486 : vector<2x32xf32>
    %cst_175 = arith.constant 1.000000e+00 : f32
    %1488 = vector.broadcast %cst_175 : f32 to vector<2x32xf32>
    %1489 = arith.addf %1488, %1487 : vector<2x32xf32>
    %1490 = arith.divf %1488, %1489 : vector<2x32xf32>
    %1491 = vector.extract_strided_slice %1452 {offsets = [0, 32], sizes = [2, 32], strides = [1, 1]} : vector<2x96xf32> to vector<2x32xf32>
    %1492 = vector.extract_strided_slice %1481 {offsets = [0, 32], sizes = [2, 32], strides = [1, 1]} : vector<2x96xf32> to vector<2x32xf32>
    %1493 = arith.addf %1491, %1492 : vector<2x32xf32>
    %1494 = arith.negf %1493 : vector<2x32xf32>
    %1495 = math.exp %1494 : vector<2x32xf32>
    %cst_176 = arith.constant 1.000000e+00 : f32
    %1496 = vector.broadcast %cst_176 : f32 to vector<2x32xf32>
    %1497 = arith.addf %1496, %1495 : vector<2x32xf32>
    %1498 = arith.divf %1496, %1497 : vector<2x32xf32>
    %1499 = vector.extract_strided_slice %1452 {offsets = [0, 64], sizes = [2, 32], strides = [1, 1]} : vector<2x96xf32> to vector<2x32xf32>
    %1500 = vector.extract_strided_slice %1481 {offsets = [0, 64], sizes = [2, 32], strides = [1, 1]} : vector<2x96xf32> to vector<2x32xf32>
    %1501 = arith.mulf %1490, %1500 : vector<2x32xf32>
    %1502 = arith.addf %1499, %1501 : vector<2x32xf32>
    %1503 = math.tanh %1502 : vector<2x32xf32>
    %cst_177 = arith.constant 1.000000e+00 : f32
    %1504 = vector.broadcast %cst_177 : f32 to vector<2x32xf32>
    %1505 = arith.subf %1504, %1498 : vector<2x32xf32>
    %1506 = arith.mulf %1505, %1503 : vector<2x32xf32>
    %1507 = arith.mulf %1498, %1482 : vector<2x32xf32>
    %1508 = arith.addf %1506, %1507 : vector<2x32xf32>
    %1509 = tpu.concatenate %1480, %1508 in 1 : vector<2x32xf32>, vector<2x32xf32> -> vector<2x64xf32>
    %cst_178 = arith.constant dense<0.000000e+00> : vector<2x192xf32>
    %1510 = tpu.matmul %1509, %1135, %cst_178 {dimension_numbers = #tpu.dot_dimension_numbers<[1], [0], [0], [1], [0, 0, 1, 1], [], []>} : vector<2x64xf32>, vector<64x192xf32>, vector<2x192xf32> -> vector<2x192xf32>
    %1511 = vector.broadcast %1136 : vector<1x192xf32> to vector<2x192xf32>
    %1512 = arith.addf %1510, %1511 : vector<2x192xf32>
    %1513 = vector.extract_strided_slice %1134 {offsets = [12, 0], sizes = [2, 96], strides = [1, 1]} : vector<32x192xf32> to vector<2x96xf32>
    %1514 = vector.extract_strided_slice %1134 {offsets = [18, 96], sizes = [2, 96], strides = [1, 1]} : vector<32x192xf32> to vector<2x96xf32>
    %1515 = vector.extract_strided_slice %1512 {offsets = [0, 0], sizes = [2, 96], strides = [1, 1]} : vector<2x192xf32> to vector<2x96xf32>
    %1516 = vector.extract_strided_slice %1509 {offsets = [0, 0], sizes = [2, 32], strides = [1, 1]} : vector<2x64xf32> to vector<2x32xf32>
    %1517 = vector.extract_strided_slice %1513 {offsets = [0, 0], sizes = [2, 32], strides = [1, 1]} : vector<2x96xf32> to vector<2x32xf32>
    %1518 = vector.extract_strided_slice %1515 {offsets = [0, 0], sizes = [2, 32], strides = [1, 1]} : vector<2x96xf32> to vector<2x32xf32>
    %1519 = arith.addf %1517, %1518 : vector<2x32xf32>
    %1520 = arith.negf %1519 : vector<2x32xf32>
    %1521 = math.exp %1520 : vector<2x32xf32>
    %cst_179 = arith.constant 1.000000e+00 : f32
    %1522 = vector.broadcast %cst_179 : f32 to vector<2x32xf32>
    %1523 = arith.addf %1522, %1521 : vector<2x32xf32>
    %1524 = arith.divf %1522, %1523 : vector<2x32xf32>
    %1525 = vector.extract_strided_slice %1513 {offsets = [0, 32], sizes = [2, 32], strides = [1, 1]} : vector<2x96xf32> to vector<2x32xf32>
    %1526 = vector.extract_strided_slice %1515 {offsets = [0, 32], sizes = [2, 32], strides = [1, 1]} : vector<2x96xf32> to vector<2x32xf32>
    %1527 = arith.addf %1525, %1526 : vector<2x32xf32>
    %1528 = arith.negf %1527 : vector<2x32xf32>
    %1529 = math.exp %1528 : vector<2x32xf32>
    %cst_180 = arith.constant 1.000000e+00 : f32
    %1530 = vector.broadcast %cst_180 : f32 to vector<2x32xf32>
    %1531 = arith.addf %1530, %1529 : vector<2x32xf32>
    %1532 = arith.divf %1530, %1531 : vector<2x32xf32>
    %1533 = vector.extract_strided_slice %1513 {offsets = [0, 64], sizes = [2, 32], strides = [1, 1]} : vector<2x96xf32> to vector<2x32xf32>
    %1534 = vector.extract_strided_slice %1515 {offsets = [0, 64], sizes = [2, 32], strides = [1, 1]} : vector<2x96xf32> to vector<2x32xf32>
    %1535 = arith.mulf %1524, %1534 : vector<2x32xf32>
    %1536 = arith.addf %1533, %1535 : vector<2x32xf32>
    %1537 = math.tanh %1536 : vector<2x32xf32>
    %cst_181 = arith.constant 1.000000e+00 : f32
    %1538 = vector.broadcast %cst_181 : f32 to vector<2x32xf32>
    %1539 = arith.subf %1538, %1532 : vector<2x32xf32>
    %1540 = arith.mulf %1539, %1537 : vector<2x32xf32>
    %1541 = arith.mulf %1532, %1516 : vector<2x32xf32>
    %1542 = arith.addf %1540, %1541 : vector<2x32xf32>
    %1543 = vector.extract_strided_slice %1512 {offsets = [0, 96], sizes = [2, 96], strides = [1, 1]} : vector<2x192xf32> to vector<2x96xf32>
    %1544 = vector.extract_strided_slice %1509 {offsets = [0, 32], sizes = [2, 32], strides = [1, 1]} : vector<2x64xf32> to vector<2x32xf32>
    %1545 = vector.extract_strided_slice %1514 {offsets = [0, 0], sizes = [2, 32], strides = [1, 1]} : vector<2x96xf32> to vector<2x32xf32>
    %1546 = vector.extract_strided_slice %1543 {offsets = [0, 0], sizes = [2, 32], strides = [1, 1]} : vector<2x96xf32> to vector<2x32xf32>
    %1547 = arith.addf %1545, %1546 : vector<2x32xf32>
    %1548 = arith.negf %1547 : vector<2x32xf32>
    %1549 = math.exp %1548 : vector<2x32xf32>
    %cst_182 = arith.constant 1.000000e+00 : f32
    %1550 = vector.broadcast %cst_182 : f32 to vector<2x32xf32>
    %1551 = arith.addf %1550, %1549 : vector<2x32xf32>
    %1552 = arith.divf %1550, %1551 : vector<2x32xf32>
    %1553 = vector.extract_strided_slice %1514 {offsets = [0, 32], sizes = [2, 32], strides = [1, 1]} : vector<2x96xf32> to vector<2x32xf32>
    %1554 = vector.extract_strided_slice %1543 {offsets = [0, 32], sizes = [2, 32], strides = [1, 1]} : vector<2x96xf32> to vector<2x32xf32>
    %1555 = arith.addf %1553, %1554 : vector<2x32xf32>
    %1556 = arith.negf %1555 : vector<2x32xf32>
    %1557 = math.exp %1556 : vector<2x32xf32>
    %cst_183 = arith.constant 1.000000e+00 : f32
    %1558 = vector.broadcast %cst_183 : f32 to vector<2x32xf32>
    %1559 = arith.addf %1558, %1557 : vector<2x32xf32>
    %1560 = arith.divf %1558, %1559 : vector<2x32xf32>
    %1561 = vector.extract_strided_slice %1514 {offsets = [0, 64], sizes = [2, 32], strides = [1, 1]} : vector<2x96xf32> to vector<2x32xf32>
    %1562 = vector.extract_strided_slice %1543 {offsets = [0, 64], sizes = [2, 32], strides = [1, 1]} : vector<2x96xf32> to vector<2x32xf32>
    %1563 = arith.mulf %1552, %1562 : vector<2x32xf32>
    %1564 = arith.addf %1561, %1563 : vector<2x32xf32>
    %1565 = math.tanh %1564 : vector<2x32xf32>
    %cst_184 = arith.constant 1.000000e+00 : f32
    %1566 = vector.broadcast %cst_184 : f32 to vector<2x32xf32>
    %1567 = arith.subf %1566, %1560 : vector<2x32xf32>
    %1568 = arith.mulf %1567, %1565 : vector<2x32xf32>
    %1569 = arith.mulf %1560, %1544 : vector<2x32xf32>
    %1570 = arith.addf %1568, %1569 : vector<2x32xf32>
    %1571 = tpu.concatenate %1542, %1570 in 1 : vector<2x32xf32>, vector<2x32xf32> -> vector<2x64xf32>
    %cst_185 = arith.constant dense<0.000000e+00> : vector<2x192xf32>
    %1572 = tpu.matmul %1571, %1135, %cst_185 {dimension_numbers = #tpu.dot_dimension_numbers<[1], [0], [0], [1], [0, 0, 1, 1], [], []>} : vector<2x64xf32>, vector<64x192xf32>, vector<2x192xf32> -> vector<2x192xf32>
    %1573 = vector.broadcast %1136 : vector<1x192xf32> to vector<2x192xf32>
    %1574 = arith.addf %1572, %1573 : vector<2x192xf32>
    %1575 = vector.extract_strided_slice %1134 {offsets = [14, 0], sizes = [2, 96], strides = [1, 1]} : vector<32x192xf32> to vector<2x96xf32>
    %1576 = vector.extract_strided_slice %1134 {offsets = [16, 96], sizes = [2, 96], strides = [1, 1]} : vector<32x192xf32> to vector<2x96xf32>
    %1577 = vector.extract_strided_slice %1574 {offsets = [0, 0], sizes = [2, 96], strides = [1, 1]} : vector<2x192xf32> to vector<2x96xf32>
    %1578 = vector.extract_strided_slice %1571 {offsets = [0, 0], sizes = [2, 32], strides = [1, 1]} : vector<2x64xf32> to vector<2x32xf32>
    %1579 = vector.extract_strided_slice %1575 {offsets = [0, 0], sizes = [2, 32], strides = [1, 1]} : vector<2x96xf32> to vector<2x32xf32>
    %1580 = vector.extract_strided_slice %1577 {offsets = [0, 0], sizes = [2, 32], strides = [1, 1]} : vector<2x96xf32> to vector<2x32xf32>
    %1581 = arith.addf %1579, %1580 : vector<2x32xf32>
    %1582 = arith.negf %1581 : vector<2x32xf32>
    %1583 = math.exp %1582 : vector<2x32xf32>
    %cst_186 = arith.constant 1.000000e+00 : f32
    %1584 = vector.broadcast %cst_186 : f32 to vector<2x32xf32>
    %1585 = arith.addf %1584, %1583 : vector<2x32xf32>
    %1586 = arith.divf %1584, %1585 : vector<2x32xf32>
    %1587 = vector.extract_strided_slice %1575 {offsets = [0, 32], sizes = [2, 32], strides = [1, 1]} : vector<2x96xf32> to vector<2x32xf32>
    %1588 = vector.extract_strided_slice %1577 {offsets = [0, 32], sizes = [2, 32], strides = [1, 1]} : vector<2x96xf32> to vector<2x32xf32>
    %1589 = arith.addf %1587, %1588 : vector<2x32xf32>
    %1590 = arith.negf %1589 : vector<2x32xf32>
    %1591 = math.exp %1590 : vector<2x32xf32>
    %cst_187 = arith.constant 1.000000e+00 : f32
    %1592 = vector.broadcast %cst_187 : f32 to vector<2x32xf32>
    %1593 = arith.addf %1592, %1591 : vector<2x32xf32>
    %1594 = arith.divf %1592, %1593 : vector<2x32xf32>
    %1595 = vector.extract_strided_slice %1575 {offsets = [0, 64], sizes = [2, 32], strides = [1, 1]} : vector<2x96xf32> to vector<2x32xf32>
    %1596 = vector.extract_strided_slice %1577 {offsets = [0, 64], sizes = [2, 32], strides = [1, 1]} : vector<2x96xf32> to vector<2x32xf32>
    %1597 = arith.mulf %1586, %1596 : vector<2x32xf32>
    %1598 = arith.addf %1595, %1597 : vector<2x32xf32>
    %1599 = math.tanh %1598 : vector<2x32xf32>
    %cst_188 = arith.constant 1.000000e+00 : f32
    %1600 = vector.broadcast %cst_188 : f32 to vector<2x32xf32>
    %1601 = arith.subf %1600, %1594 : vector<2x32xf32>
    %1602 = arith.mulf %1601, %1599 : vector<2x32xf32>
    %1603 = arith.mulf %1594, %1578 : vector<2x32xf32>
    %1604 = arith.addf %1602, %1603 : vector<2x32xf32>
    %1605 = vector.extract_strided_slice %1574 {offsets = [0, 96], sizes = [2, 96], strides = [1, 1]} : vector<2x192xf32> to vector<2x96xf32>
    %1606 = vector.extract_strided_slice %1571 {offsets = [0, 32], sizes = [2, 32], strides = [1, 1]} : vector<2x64xf32> to vector<2x32xf32>
    %1607 = vector.extract_strided_slice %1576 {offsets = [0, 0], sizes = [2, 32], strides = [1, 1]} : vector<2x96xf32> to vector<2x32xf32>
    %1608 = vector.extract_strided_slice %1605 {offsets = [0, 0], sizes = [2, 32], strides = [1, 1]} : vector<2x96xf32> to vector<2x32xf32>
    %1609 = arith.addf %1607, %1608 : vector<2x32xf32>
    %1610 = arith.negf %1609 : vector<2x32xf32>
    %1611 = math.exp %1610 : vector<2x32xf32>
    %cst_189 = arith.constant 1.000000e+00 : f32
    %1612 = vector.broadcast %cst_189 : f32 to vector<2x32xf32>
    %1613 = arith.addf %1612, %1611 : vector<2x32xf32>
    %1614 = arith.divf %1612, %1613 : vector<2x32xf32>
    %1615 = vector.extract_strided_slice %1576 {offsets = [0, 32], sizes = [2, 32], strides = [1, 1]} : vector<2x96xf32> to vector<2x32xf32>
    %1616 = vector.extract_strided_slice %1605 {offsets = [0, 32], sizes = [2, 32], strides = [1, 1]} : vector<2x96xf32> to vector<2x32xf32>
    %1617 = arith.addf %1615, %1616 : vector<2x32xf32>
    %1618 = arith.negf %1617 : vector<2x32xf32>
    %1619 = math.exp %1618 : vector<2x32xf32>
    %cst_190 = arith.constant 1.000000e+00 : f32
    %1620 = vector.broadcast %cst_190 : f32 to vector<2x32xf32>
    %1621 = arith.addf %1620, %1619 : vector<2x32xf32>
    %1622 = arith.divf %1620, %1621 : vector<2x32xf32>
    %1623 = vector.extract_strided_slice %1576 {offsets = [0, 64], sizes = [2, 32], strides = [1, 1]} : vector<2x96xf32> to vector<2x32xf32>
    %1624 = vector.extract_strided_slice %1605 {offsets = [0, 64], sizes = [2, 32], strides = [1, 1]} : vector<2x96xf32> to vector<2x32xf32>
    %1625 = arith.mulf %1614, %1624 : vector<2x32xf32>
    %1626 = arith.addf %1623, %1625 : vector<2x32xf32>
    %1627 = math.tanh %1626 : vector<2x32xf32>
    %cst_191 = arith.constant 1.000000e+00 : f32
    %1628 = vector.broadcast %cst_191 : f32 to vector<2x32xf32>
    %1629 = arith.subf %1628, %1622 : vector<2x32xf32>
    %1630 = arith.mulf %1629, %1627 : vector<2x32xf32>
    %1631 = arith.mulf %1622, %1606 : vector<2x32xf32>
    %1632 = arith.addf %1630, %1631 : vector<2x32xf32>
    %1633 = tpu.concatenate %1604, %1632 in 1 : vector<2x32xf32>, vector<2x32xf32> -> vector<2x64xf32>
    %cst_192 = arith.constant dense<0.000000e+00> : vector<2x192xf32>
    %1634 = tpu.matmul %1633, %1135, %cst_192 {dimension_numbers = #tpu.dot_dimension_numbers<[1], [0], [0], [1], [0, 0, 1, 1], [], []>} : vector<2x64xf32>, vector<64x192xf32>, vector<2x192xf32> -> vector<2x192xf32>
    %1635 = vector.broadcast %1136 : vector<1x192xf32> to vector<2x192xf32>
    %1636 = arith.addf %1634, %1635 : vector<2x192xf32>
    %1637 = vector.extract_strided_slice %1134 {offsets = [16, 0], sizes = [2, 96], strides = [1, 1]} : vector<32x192xf32> to vector<2x96xf32>
    %1638 = vector.extract_strided_slice %1134 {offsets = [14, 96], sizes = [2, 96], strides = [1, 1]} : vector<32x192xf32> to vector<2x96xf32>
    %1639 = vector.extract_strided_slice %1636 {offsets = [0, 0], sizes = [2, 96], strides = [1, 1]} : vector<2x192xf32> to vector<2x96xf32>
    %1640 = vector.extract_strided_slice %1633 {offsets = [0, 0], sizes = [2, 32], strides = [1, 1]} : vector<2x64xf32> to vector<2x32xf32>
    %1641 = vector.extract_strided_slice %1637 {offsets = [0, 0], sizes = [2, 32], strides = [1, 1]} : vector<2x96xf32> to vector<2x32xf32>
    %1642 = vector.extract_strided_slice %1639 {offsets = [0, 0], sizes = [2, 32], strides = [1, 1]} : vector<2x96xf32> to vector<2x32xf32>
    %1643 = arith.addf %1641, %1642 : vector<2x32xf32>
    %1644 = arith.negf %1643 : vector<2x32xf32>
    %1645 = math.exp %1644 : vector<2x32xf32>
    %cst_193 = arith.constant 1.000000e+00 : f32
    %1646 = vector.broadcast %cst_193 : f32 to vector<2x32xf32>
    %1647 = arith.addf %1646, %1645 : vector<2x32xf32>
    %1648 = arith.divf %1646, %1647 : vector<2x32xf32>
    %1649 = vector.extract_strided_slice %1637 {offsets = [0, 32], sizes = [2, 32], strides = [1, 1]} : vector<2x96xf32> to vector<2x32xf32>
    %1650 = vector.extract_strided_slice %1639 {offsets = [0, 32], sizes = [2, 32], strides = [1, 1]} : vector<2x96xf32> to vector<2x32xf32>
    %1651 = arith.addf %1649, %1650 : vector<2x32xf32>
    %1652 = arith.negf %1651 : vector<2x32xf32>
    %1653 = math.exp %1652 : vector<2x32xf32>
    %cst_194 = arith.constant 1.000000e+00 : f32
    %1654 = vector.broadcast %cst_194 : f32 to vector<2x32xf32>
    %1655 = arith.addf %1654, %1653 : vector<2x32xf32>
    %1656 = arith.divf %1654, %1655 : vector<2x32xf32>
    %1657 = vector.extract_strided_slice %1637 {offsets = [0, 64], sizes = [2, 32], strides = [1, 1]} : vector<2x96xf32> to vector<2x32xf32>
    %1658 = vector.extract_strided_slice %1639 {offsets = [0, 64], sizes = [2, 32], strides = [1, 1]} : vector<2x96xf32> to vector<2x32xf32>
    %1659 = arith.mulf %1648, %1658 : vector<2x32xf32>
    %1660 = arith.addf %1657, %1659 : vector<2x32xf32>
    %1661 = math.tanh %1660 : vector<2x32xf32>
    %cst_195 = arith.constant 1.000000e+00 : f32
    %1662 = vector.broadcast %cst_195 : f32 to vector<2x32xf32>
    %1663 = arith.subf %1662, %1656 : vector<2x32xf32>
    %1664 = arith.mulf %1663, %1661 : vector<2x32xf32>
    %1665 = arith.mulf %1656, %1640 : vector<2x32xf32>
    %1666 = arith.addf %1664, %1665 : vector<2x32xf32>
    %1667 = vector.extract_strided_slice %1636 {offsets = [0, 96], sizes = [2, 96], strides = [1, 1]} : vector<2x192xf32> to vector<2x96xf32>
    %1668 = vector.extract_strided_slice %1633 {offsets = [0, 32], sizes = [2, 32], strides = [1, 1]} : vector<2x64xf32> to vector<2x32xf32>
    %1669 = vector.extract_strided_slice %1638 {offsets = [0, 0], sizes = [2, 32], strides = [1, 1]} : vector<2x96xf32> to vector<2x32xf32>
    %1670 = vector.extract_strided_slice %1667 {offsets = [0, 0], sizes = [2, 32], strides = [1, 1]} : vector<2x96xf32> to vector<2x32xf32>
    %1671 = arith.addf %1669, %1670 : vector<2x32xf32>
    %1672 = arith.negf %1671 : vector<2x32xf32>
    %1673 = math.exp %1672 : vector<2x32xf32>
    %cst_196 = arith.constant 1.000000e+00 : f32
    %1674 = vector.broadcast %cst_196 : f32 to vector<2x32xf32>
    %1675 = arith.addf %1674, %1673 : vector<2x32xf32>
    %1676 = arith.divf %1674, %1675 : vector<2x32xf32>
    %1677 = vector.extract_strided_slice %1638 {offsets = [0, 32], sizes = [2, 32], strides = [1, 1]} : vector<2x96xf32> to vector<2x32xf32>
    %1678 = vector.extract_strided_slice %1667 {offsets = [0, 32], sizes = [2, 32], strides = [1, 1]} : vector<2x96xf32> to vector<2x32xf32>
    %1679 = arith.addf %1677, %1678 : vector<2x32xf32>
    %1680 = arith.negf %1679 : vector<2x32xf32>
    %1681 = math.exp %1680 : vector<2x32xf32>
    %cst_197 = arith.constant 1.000000e+00 : f32
    %1682 = vector.broadcast %cst_197 : f32 to vector<2x32xf32>
    %1683 = arith.addf %1682, %1681 : vector<2x32xf32>
    %1684 = arith.divf %1682, %1683 : vector<2x32xf32>
    %1685 = vector.extract_strided_slice %1638 {offsets = [0, 64], sizes = [2, 32], strides = [1, 1]} : vector<2x96xf32> to vector<2x32xf32>
    %1686 = vector.extract_strided_slice %1667 {offsets = [0, 64], sizes = [2, 32], strides = [1, 1]} : vector<2x96xf32> to vector<2x32xf32>
    %1687 = arith.mulf %1676, %1686 : vector<2x32xf32>
    %1688 = arith.addf %1685, %1687 : vector<2x32xf32>
    %1689 = math.tanh %1688 : vector<2x32xf32>
    %cst_198 = arith.constant 1.000000e+00 : f32
    %1690 = vector.broadcast %cst_198 : f32 to vector<2x32xf32>
    %1691 = arith.subf %1690, %1684 : vector<2x32xf32>
    %1692 = arith.mulf %1691, %1689 : vector<2x32xf32>
    %1693 = arith.mulf %1684, %1668 : vector<2x32xf32>
    %1694 = arith.addf %1692, %1693 : vector<2x32xf32>
    %1695 = tpu.concatenate %1666, %1694 in 1 : vector<2x32xf32>, vector<2x32xf32> -> vector<2x64xf32>
    %cst_199 = arith.constant dense<0.000000e+00> : vector<2x192xf32>
    %1696 = tpu.matmul %1695, %1135, %cst_199 {dimension_numbers = #tpu.dot_dimension_numbers<[1], [0], [0], [1], [0, 0, 1, 1], [], []>} : vector<2x64xf32>, vector<64x192xf32>, vector<2x192xf32> -> vector<2x192xf32>
    %1697 = vector.broadcast %1136 : vector<1x192xf32> to vector<2x192xf32>
    %1698 = arith.addf %1696, %1697 : vector<2x192xf32>
    %1699 = vector.extract_strided_slice %1134 {offsets = [18, 0], sizes = [2, 96], strides = [1, 1]} : vector<32x192xf32> to vector<2x96xf32>
    %1700 = vector.extract_strided_slice %1134 {offsets = [12, 96], sizes = [2, 96], strides = [1, 1]} : vector<32x192xf32> to vector<2x96xf32>
    %1701 = vector.extract_strided_slice %1698 {offsets = [0, 0], sizes = [2, 96], strides = [1, 1]} : vector<2x192xf32> to vector<2x96xf32>
    %1702 = vector.extract_strided_slice %1695 {offsets = [0, 0], sizes = [2, 32], strides = [1, 1]} : vector<2x64xf32> to vector<2x32xf32>
    %1703 = vector.extract_strided_slice %1699 {offsets = [0, 0], sizes = [2, 32], strides = [1, 1]} : vector<2x96xf32> to vector<2x32xf32>
    %1704 = vector.extract_strided_slice %1701 {offsets = [0, 0], sizes = [2, 32], strides = [1, 1]} : vector<2x96xf32> to vector<2x32xf32>
    %1705 = arith.addf %1703, %1704 : vector<2x32xf32>
    %1706 = arith.negf %1705 : vector<2x32xf32>
    %1707 = math.exp %1706 : vector<2x32xf32>
    %cst_200 = arith.constant 1.000000e+00 : f32
    %1708 = vector.broadcast %cst_200 : f32 to vector<2x32xf32>
    %1709 = arith.addf %1708, %1707 : vector<2x32xf32>
    %1710 = arith.divf %1708, %1709 : vector<2x32xf32>
    %1711 = vector.extract_strided_slice %1699 {offsets = [0, 32], sizes = [2, 32], strides = [1, 1]} : vector<2x96xf32> to vector<2x32xf32>
    %1712 = vector.extract_strided_slice %1701 {offsets = [0, 32], sizes = [2, 32], strides = [1, 1]} : vector<2x96xf32> to vector<2x32xf32>
    %1713 = arith.addf %1711, %1712 : vector<2x32xf32>
    %1714 = arith.negf %1713 : vector<2x32xf32>
    %1715 = math.exp %1714 : vector<2x32xf32>
    %cst_201 = arith.constant 1.000000e+00 : f32
    %1716 = vector.broadcast %cst_201 : f32 to vector<2x32xf32>
    %1717 = arith.addf %1716, %1715 : vector<2x32xf32>
    %1718 = arith.divf %1716, %1717 : vector<2x32xf32>
    %1719 = vector.extract_strided_slice %1699 {offsets = [0, 64], sizes = [2, 32], strides = [1, 1]} : vector<2x96xf32> to vector<2x32xf32>
    %1720 = vector.extract_strided_slice %1701 {offsets = [0, 64], sizes = [2, 32], strides = [1, 1]} : vector<2x96xf32> to vector<2x32xf32>
    %1721 = arith.mulf %1710, %1720 : vector<2x32xf32>
    %1722 = arith.addf %1719, %1721 : vector<2x32xf32>
    %1723 = math.tanh %1722 : vector<2x32xf32>
    %cst_202 = arith.constant 1.000000e+00 : f32
    %1724 = vector.broadcast %cst_202 : f32 to vector<2x32xf32>
    %1725 = arith.subf %1724, %1718 : vector<2x32xf32>
    %1726 = arith.mulf %1725, %1723 : vector<2x32xf32>
    %1727 = arith.mulf %1718, %1702 : vector<2x32xf32>
    %1728 = arith.addf %1726, %1727 : vector<2x32xf32>
    %1729 = vector.extract_strided_slice %1698 {offsets = [0, 96], sizes = [2, 96], strides = [1, 1]} : vector<2x192xf32> to vector<2x96xf32>
    %1730 = vector.extract_strided_slice %1695 {offsets = [0, 32], sizes = [2, 32], strides = [1, 1]} : vector<2x64xf32> to vector<2x32xf32>
    %1731 = vector.extract_strided_slice %1700 {offsets = [0, 0], sizes = [2, 32], strides = [1, 1]} : vector<2x96xf32> to vector<2x32xf32>
    %1732 = vector.extract_strided_slice %1729 {offsets = [0, 0], sizes = [2, 32], strides = [1, 1]} : vector<2x96xf32> to vector<2x32xf32>
    %1733 = arith.addf %1731, %1732 : vector<2x32xf32>
    %1734 = arith.negf %1733 : vector<2x32xf32>
    %1735 = math.exp %1734 : vector<2x32xf32>
    %cst_203 = arith.constant 1.000000e+00 : f32
    %1736 = vector.broadcast %cst_203 : f32 to vector<2x32xf32>
    %1737 = arith.addf %1736, %1735 : vector<2x32xf32>
    %1738 = arith.divf %1736, %1737 : vector<2x32xf32>
    %1739 = vector.extract_strided_slice %1700 {offsets = [0, 32], sizes = [2, 32], strides = [1, 1]} : vector<2x96xf32> to vector<2x32xf32>
    %1740 = vector.extract_strided_slice %1729 {offsets = [0, 32], sizes = [2, 32], strides = [1, 1]} : vector<2x96xf32> to vector<2x32xf32>
    %1741 = arith.addf %1739, %1740 : vector<2x32xf32>
    %1742 = arith.negf %1741 : vector<2x32xf32>
    %1743 = math.exp %1742 : vector<2x32xf32>
    %cst_204 = arith.constant 1.000000e+00 : f32
    %1744 = vector.broadcast %cst_204 : f32 to vector<2x32xf32>
    %1745 = arith.addf %1744, %1743 : vector<2x32xf32>
    %1746 = arith.divf %1744, %1745 : vector<2x32xf32>
    %1747 = vector.extract_strided_slice %1700 {offsets = [0, 64], sizes = [2, 32], strides = [1, 1]} : vector<2x96xf32> to vector<2x32xf32>
    %1748 = vector.extract_strided_slice %1729 {offsets = [0, 64], sizes = [2, 32], strides = [1, 1]} : vector<2x96xf32> to vector<2x32xf32>
    %1749 = arith.mulf %1738, %1748 : vector<2x32xf32>
    %1750 = arith.addf %1747, %1749 : vector<2x32xf32>
    %1751 = math.tanh %1750 : vector<2x32xf32>
    %cst_205 = arith.constant 1.000000e+00 : f32
    %1752 = vector.broadcast %cst_205 : f32 to vector<2x32xf32>
    %1753 = arith.subf %1752, %1746 : vector<2x32xf32>
    %1754 = arith.mulf %1753, %1751 : vector<2x32xf32>
    %1755 = arith.mulf %1746, %1730 : vector<2x32xf32>
    %1756 = arith.addf %1754, %1755 : vector<2x32xf32>
    %1757 = tpu.concatenate %1728, %1756 in 1 : vector<2x32xf32>, vector<2x32xf32> -> vector<2x64xf32>
    %cst_206 = arith.constant dense<0.000000e+00> : vector<2x192xf32>
    %1758 = tpu.matmul %1757, %1135, %cst_206 {dimension_numbers = #tpu.dot_dimension_numbers<[1], [0], [0], [1], [0, 0, 1, 1], [], []>} : vector<2x64xf32>, vector<64x192xf32>, vector<2x192xf32> -> vector<2x192xf32>
    %1759 = vector.broadcast %1136 : vector<1x192xf32> to vector<2x192xf32>
    %1760 = arith.addf %1758, %1759 : vector<2x192xf32>
    %1761 = vector.extract_strided_slice %1134 {offsets = [20, 0], sizes = [2, 96], strides = [1, 1]} : vector<32x192xf32> to vector<2x96xf32>
    %1762 = vector.extract_strided_slice %1134 {offsets = [10, 96], sizes = [2, 96], strides = [1, 1]} : vector<32x192xf32> to vector<2x96xf32>
    %1763 = vector.extract_strided_slice %1760 {offsets = [0, 0], sizes = [2, 96], strides = [1, 1]} : vector<2x192xf32> to vector<2x96xf32>
    %1764 = vector.extract_strided_slice %1757 {offsets = [0, 0], sizes = [2, 32], strides = [1, 1]} : vector<2x64xf32> to vector<2x32xf32>
    %1765 = vector.extract_strided_slice %1761 {offsets = [0, 0], sizes = [2, 32], strides = [1, 1]} : vector<2x96xf32> to vector<2x32xf32>
    %1766 = vector.extract_strided_slice %1763 {offsets = [0, 0], sizes = [2, 32], strides = [1, 1]} : vector<2x96xf32> to vector<2x32xf32>
    %1767 = arith.addf %1765, %1766 : vector<2x32xf32>
    %1768 = arith.negf %1767 : vector<2x32xf32>
    %1769 = math.exp %1768 : vector<2x32xf32>
    %cst_207 = arith.constant 1.000000e+00 : f32
    %1770 = vector.broadcast %cst_207 : f32 to vector<2x32xf32>
    %1771 = arith.addf %1770, %1769 : vector<2x32xf32>
    %1772 = arith.divf %1770, %1771 : vector<2x32xf32>
    %1773 = vector.extract_strided_slice %1761 {offsets = [0, 32], sizes = [2, 32], strides = [1, 1]} : vector<2x96xf32> to vector<2x32xf32>
    %1774 = vector.extract_strided_slice %1763 {offsets = [0, 32], sizes = [2, 32], strides = [1, 1]} : vector<2x96xf32> to vector<2x32xf32>
    %1775 = arith.addf %1773, %1774 : vector<2x32xf32>
    %1776 = arith.negf %1775 : vector<2x32xf32>
    %1777 = math.exp %1776 : vector<2x32xf32>
    %cst_208 = arith.constant 1.000000e+00 : f32
    %1778 = vector.broadcast %cst_208 : f32 to vector<2x32xf32>
    %1779 = arith.addf %1778, %1777 : vector<2x32xf32>
    %1780 = arith.divf %1778, %1779 : vector<2x32xf32>
    %1781 = vector.extract_strided_slice %1761 {offsets = [0, 64], sizes = [2, 32], strides = [1, 1]} : vector<2x96xf32> to vector<2x32xf32>
    %1782 = vector.extract_strided_slice %1763 {offsets = [0, 64], sizes = [2, 32], strides = [1, 1]} : vector<2x96xf32> to vector<2x32xf32>
    %1783 = arith.mulf %1772, %1782 : vector<2x32xf32>
    %1784 = arith.addf %1781, %1783 : vector<2x32xf32>
    %1785 = math.tanh %1784 : vector<2x32xf32>
    %cst_209 = arith.constant 1.000000e+00 : f32
    %1786 = vector.broadcast %cst_209 : f32 to vector<2x32xf32>
    %1787 = arith.subf %1786, %1780 : vector<2x32xf32>
    %1788 = arith.mulf %1787, %1785 : vector<2x32xf32>
    %1789 = arith.mulf %1780, %1764 : vector<2x32xf32>
    %1790 = arith.addf %1788, %1789 : vector<2x32xf32>
    %1791 = vector.extract_strided_slice %1760 {offsets = [0, 96], sizes = [2, 96], strides = [1, 1]} : vector<2x192xf32> to vector<2x96xf32>
    %1792 = vector.extract_strided_slice %1757 {offsets = [0, 32], sizes = [2, 32], strides = [1, 1]} : vector<2x64xf32> to vector<2x32xf32>
    %1793 = vector.extract_strided_slice %1762 {offsets = [0, 0], sizes = [2, 32], strides = [1, 1]} : vector<2x96xf32> to vector<2x32xf32>
    %1794 = vector.extract_strided_slice %1791 {offsets = [0, 0], sizes = [2, 32], strides = [1, 1]} : vector<2x96xf32> to vector<2x32xf32>
    %1795 = arith.addf %1793, %1794 : vector<2x32xf32>
    %1796 = arith.negf %1795 : vector<2x32xf32>
    %1797 = math.exp %1796 : vector<2x32xf32>
    %cst_210 = arith.constant 1.000000e+00 : f32
    %1798 = vector.broadcast %cst_210 : f32 to vector<2x32xf32>
    %1799 = arith.addf %1798, %1797 : vector<2x32xf32>
    %1800 = arith.divf %1798, %1799 : vector<2x32xf32>
    %1801 = vector.extract_strided_slice %1762 {offsets = [0, 32], sizes = [2, 32], strides = [1, 1]} : vector<2x96xf32> to vector<2x32xf32>
    %1802 = vector.extract_strided_slice %1791 {offsets = [0, 32], sizes = [2, 32], strides = [1, 1]} : vector<2x96xf32> to vector<2x32xf32>
    %1803 = arith.addf %1801, %1802 : vector<2x32xf32>
    %1804 = arith.negf %1803 : vector<2x32xf32>
    %1805 = math.exp %1804 : vector<2x32xf32>
    %cst_211 = arith.constant 1.000000e+00 : f32
    %1806 = vector.broadcast %cst_211 : f32 to vector<2x32xf32>
    %1807 = arith.addf %1806, %1805 : vector<2x32xf32>
    %1808 = arith.divf %1806, %1807 : vector<2x32xf32>
    %1809 = vector.extract_strided_slice %1762 {offsets = [0, 64], sizes = [2, 32], strides = [1, 1]} : vector<2x96xf32> to vector<2x32xf32>
    %1810 = vector.extract_strided_slice %1791 {offsets = [0, 64], sizes = [2, 32], strides = [1, 1]} : vector<2x96xf32> to vector<2x32xf32>
    %1811 = arith.mulf %1800, %1810 : vector<2x32xf32>
    %1812 = arith.addf %1809, %1811 : vector<2x32xf32>
    %1813 = math.tanh %1812 : vector<2x32xf32>
    %cst_212 = arith.constant 1.000000e+00 : f32
    %1814 = vector.broadcast %cst_212 : f32 to vector<2x32xf32>
    %1815 = arith.subf %1814, %1808 : vector<2x32xf32>
    %1816 = arith.mulf %1815, %1813 : vector<2x32xf32>
    %1817 = arith.mulf %1808, %1792 : vector<2x32xf32>
    %1818 = arith.addf %1816, %1817 : vector<2x32xf32>
    %1819 = tpu.concatenate %1790, %1818 in 1 : vector<2x32xf32>, vector<2x32xf32> -> vector<2x64xf32>
    %cst_213 = arith.constant dense<0.000000e+00> : vector<2x192xf32>
    %1820 = tpu.matmul %1819, %1135, %cst_213 {dimension_numbers = #tpu.dot_dimension_numbers<[1], [0], [0], [1], [0, 0, 1, 1], [], []>} : vector<2x64xf32>, vector<64x192xf32>, vector<2x192xf32> -> vector<2x192xf32>
    %1821 = vector.broadcast %1136 : vector<1x192xf32> to vector<2x192xf32>
    %1822 = arith.addf %1820, %1821 : vector<2x192xf32>
    %1823 = vector.extract_strided_slice %1134 {offsets = [22, 0], sizes = [2, 96], strides = [1, 1]} : vector<32x192xf32> to vector<2x96xf32>
    %1824 = vector.extract_strided_slice %1134 {offsets = [8, 96], sizes = [2, 96], strides = [1, 1]} : vector<32x192xf32> to vector<2x96xf32>
    %1825 = vector.extract_strided_slice %1822 {offsets = [0, 0], sizes = [2, 96], strides = [1, 1]} : vector<2x192xf32> to vector<2x96xf32>
    %1826 = vector.extract_strided_slice %1819 {offsets = [0, 0], sizes = [2, 32], strides = [1, 1]} : vector<2x64xf32> to vector<2x32xf32>
    %1827 = vector.extract_strided_slice %1823 {offsets = [0, 0], sizes = [2, 32], strides = [1, 1]} : vector<2x96xf32> to vector<2x32xf32>
    %1828 = vector.extract_strided_slice %1825 {offsets = [0, 0], sizes = [2, 32], strides = [1, 1]} : vector<2x96xf32> to vector<2x32xf32>
    %1829 = arith.addf %1827, %1828 : vector<2x32xf32>
    %1830 = arith.negf %1829 : vector<2x32xf32>
    %1831 = math.exp %1830 : vector<2x32xf32>
    %cst_214 = arith.constant 1.000000e+00 : f32
    %1832 = vector.broadcast %cst_214 : f32 to vector<2x32xf32>
    %1833 = arith.addf %1832, %1831 : vector<2x32xf32>
    %1834 = arith.divf %1832, %1833 : vector<2x32xf32>
    %1835 = vector.extract_strided_slice %1823 {offsets = [0, 32], sizes = [2, 32], strides = [1, 1]} : vector<2x96xf32> to vector<2x32xf32>
    %1836 = vector.extract_strided_slice %1825 {offsets = [0, 32], sizes = [2, 32], strides = [1, 1]} : vector<2x96xf32> to vector<2x32xf32>
    %1837 = arith.addf %1835, %1836 : vector<2x32xf32>
    %1838 = arith.negf %1837 : vector<2x32xf32>
    %1839 = math.exp %1838 : vector<2x32xf32>
    %cst_215 = arith.constant 1.000000e+00 : f32
    %1840 = vector.broadcast %cst_215 : f32 to vector<2x32xf32>
    %1841 = arith.addf %1840, %1839 : vector<2x32xf32>
    %1842 = arith.divf %1840, %1841 : vector<2x32xf32>
    %1843 = vector.extract_strided_slice %1823 {offsets = [0, 64], sizes = [2, 32], strides = [1, 1]} : vector<2x96xf32> to vector<2x32xf32>
    %1844 = vector.extract_strided_slice %1825 {offsets = [0, 64], sizes = [2, 32], strides = [1, 1]} : vector<2x96xf32> to vector<2x32xf32>
    %1845 = arith.mulf %1834, %1844 : vector<2x32xf32>
    %1846 = arith.addf %1843, %1845 : vector<2x32xf32>
    %1847 = math.tanh %1846 : vector<2x32xf32>
    %cst_216 = arith.constant 1.000000e+00 : f32
    %1848 = vector.broadcast %cst_216 : f32 to vector<2x32xf32>
    %1849 = arith.subf %1848, %1842 : vector<2x32xf32>
    %1850 = arith.mulf %1849, %1847 : vector<2x32xf32>
    %1851 = arith.mulf %1842, %1826 : vector<2x32xf32>
    %1852 = arith.addf %1850, %1851 : vector<2x32xf32>
    %1853 = vector.extract_strided_slice %1822 {offsets = [0, 96], sizes = [2, 96], strides = [1, 1]} : vector<2x192xf32> to vector<2x96xf32>
    %1854 = vector.extract_strided_slice %1819 {offsets = [0, 32], sizes = [2, 32], strides = [1, 1]} : vector<2x64xf32> to vector<2x32xf32>
    %1855 = vector.extract_strided_slice %1824 {offsets = [0, 0], sizes = [2, 32], strides = [1, 1]} : vector<2x96xf32> to vector<2x32xf32>
    %1856 = vector.extract_strided_slice %1853 {offsets = [0, 0], sizes = [2, 32], strides = [1, 1]} : vector<2x96xf32> to vector<2x32xf32>
    %1857 = arith.addf %1855, %1856 : vector<2x32xf32>
    %1858 = arith.negf %1857 : vector<2x32xf32>
    %1859 = math.exp %1858 : vector<2x32xf32>
    %cst_217 = arith.constant 1.000000e+00 : f32
    %1860 = vector.broadcast %cst_217 : f32 to vector<2x32xf32>
    %1861 = arith.addf %1860, %1859 : vector<2x32xf32>
    %1862 = arith.divf %1860, %1861 : vector<2x32xf32>
    %1863 = vector.extract_strided_slice %1824 {offsets = [0, 32], sizes = [2, 32], strides = [1, 1]} : vector<2x96xf32> to vector<2x32xf32>
    %1864 = vector.extract_strided_slice %1853 {offsets = [0, 32], sizes = [2, 32], strides = [1, 1]} : vector<2x96xf32> to vector<2x32xf32>
    %1865 = arith.addf %1863, %1864 : vector<2x32xf32>
    %1866 = arith.negf %1865 : vector<2x32xf32>
    %1867 = math.exp %1866 : vector<2x32xf32>
    %cst_218 = arith.constant 1.000000e+00 : f32
    %1868 = vector.broadcast %cst_218 : f32 to vector<2x32xf32>
    %1869 = arith.addf %1868, %1867 : vector<2x32xf32>
    %1870 = arith.divf %1868, %1869 : vector<2x32xf32>
    %1871 = vector.extract_strided_slice %1824 {offsets = [0, 64], sizes = [2, 32], strides = [1, 1]} : vector<2x96xf32> to vector<2x32xf32>
    %1872 = vector.extract_strided_slice %1853 {offsets = [0, 64], sizes = [2, 32], strides = [1, 1]} : vector<2x96xf32> to vector<2x32xf32>
    %1873 = arith.mulf %1862, %1872 : vector<2x32xf32>
    %1874 = arith.addf %1871, %1873 : vector<2x32xf32>
    %1875 = math.tanh %1874 : vector<2x32xf32>
    %cst_219 = arith.constant 1.000000e+00 : f32
    %1876 = vector.broadcast %cst_219 : f32 to vector<2x32xf32>
    %1877 = arith.subf %1876, %1870 : vector<2x32xf32>
    %1878 = arith.mulf %1877, %1875 : vector<2x32xf32>
    %1879 = arith.mulf %1870, %1854 : vector<2x32xf32>
    %1880 = arith.addf %1878, %1879 : vector<2x32xf32>
    %1881 = tpu.concatenate %1852, %1880 in 1 : vector<2x32xf32>, vector<2x32xf32> -> vector<2x64xf32>
    %cst_220 = arith.constant dense<0.000000e+00> : vector<2x192xf32>
    %1882 = tpu.matmul %1881, %1135, %cst_220 {dimension_numbers = #tpu.dot_dimension_numbers<[1], [0], [0], [1], [0, 0, 1, 1], [], []>} : vector<2x64xf32>, vector<64x192xf32>, vector<2x192xf32> -> vector<2x192xf32>
    %1883 = vector.broadcast %1136 : vector<1x192xf32> to vector<2x192xf32>
    %1884 = arith.addf %1882, %1883 : vector<2x192xf32>
    %1885 = vector.extract_strided_slice %1134 {offsets = [24, 0], sizes = [2, 96], strides = [1, 1]} : vector<32x192xf32> to vector<2x96xf32>
    %1886 = vector.extract_strided_slice %1134 {offsets = [6, 96], sizes = [2, 96], strides = [1, 1]} : vector<32x192xf32> to vector<2x96xf32>
    %1887 = vector.extract_strided_slice %1884 {offsets = [0, 0], sizes = [2, 96], strides = [1, 1]} : vector<2x192xf32> to vector<2x96xf32>
    %1888 = vector.extract_strided_slice %1881 {offsets = [0, 0], sizes = [2, 32], strides = [1, 1]} : vector<2x64xf32> to vector<2x32xf32>
    %1889 = vector.extract_strided_slice %1885 {offsets = [0, 0], sizes = [2, 32], strides = [1, 1]} : vector<2x96xf32> to vector<2x32xf32>
    %1890 = vector.extract_strided_slice %1887 {offsets = [0, 0], sizes = [2, 32], strides = [1, 1]} : vector<2x96xf32> to vector<2x32xf32>
    %1891 = arith.addf %1889, %1890 : vector<2x32xf32>
    %1892 = arith.negf %1891 : vector<2x32xf32>
    %1893 = math.exp %1892 : vector<2x32xf32>
    %cst_221 = arith.constant 1.000000e+00 : f32
    %1894 = vector.broadcast %cst_221 : f32 to vector<2x32xf32>
    %1895 = arith.addf %1894, %1893 : vector<2x32xf32>
    %1896 = arith.divf %1894, %1895 : vector<2x32xf32>
    %1897 = vector.extract_strided_slice %1885 {offsets = [0, 32], sizes = [2, 32], strides = [1, 1]} : vector<2x96xf32> to vector<2x32xf32>
    %1898 = vector.extract_strided_slice %1887 {offsets = [0, 32], sizes = [2, 32], strides = [1, 1]} : vector<2x96xf32> to vector<2x32xf32>
    %1899 = arith.addf %1897, %1898 : vector<2x32xf32>
    %1900 = arith.negf %1899 : vector<2x32xf32>
    %1901 = math.exp %1900 : vector<2x32xf32>
    %cst_222 = arith.constant 1.000000e+00 : f32
    %1902 = vector.broadcast %cst_222 : f32 to vector<2x32xf32>
    %1903 = arith.addf %1902, %1901 : vector<2x32xf32>
    %1904 = arith.divf %1902, %1903 : vector<2x32xf32>
    %1905 = vector.extract_strided_slice %1885 {offsets = [0, 64], sizes = [2, 32], strides = [1, 1]} : vector<2x96xf32> to vector<2x32xf32>
    %1906 = vector.extract_strided_slice %1887 {offsets = [0, 64], sizes = [2, 32], strides = [1, 1]} : vector<2x96xf32> to vector<2x32xf32>
    %1907 = arith.mulf %1896, %1906 : vector<2x32xf32>
    %1908 = arith.addf %1905, %1907 : vector<2x32xf32>
    %1909 = math.tanh %1908 : vector<2x32xf32>
    %cst_223 = arith.constant 1.000000e+00 : f32
    %1910 = vector.broadcast %cst_223 : f32 to vector<2x32xf32>
    %1911 = arith.subf %1910, %1904 : vector<2x32xf32>
    %1912 = arith.mulf %1911, %1909 : vector<2x32xf32>
    %1913 = arith.mulf %1904, %1888 : vector<2x32xf32>
    %1914 = arith.addf %1912, %1913 : vector<2x32xf32>
    %1915 = vector.extract_strided_slice %1884 {offsets = [0, 96], sizes = [2, 96], strides = [1, 1]} : vector<2x192xf32> to vector<2x96xf32>
    %1916 = vector.extract_strided_slice %1881 {offsets = [0, 32], sizes = [2, 32], strides = [1, 1]} : vector<2x64xf32> to vector<2x32xf32>
    %1917 = vector.extract_strided_slice %1886 {offsets = [0, 0], sizes = [2, 32], strides = [1, 1]} : vector<2x96xf32> to vector<2x32xf32>
    %1918 = vector.extract_strided_slice %1915 {offsets = [0, 0], sizes = [2, 32], strides = [1, 1]} : vector<2x96xf32> to vector<2x32xf32>
    %1919 = arith.addf %1917, %1918 : vector<2x32xf32>
    %1920 = arith.negf %1919 : vector<2x32xf32>
    %1921 = math.exp %1920 : vector<2x32xf32>
    %cst_224 = arith.constant 1.000000e+00 : f32
    %1922 = vector.broadcast %cst_224 : f32 to vector<2x32xf32>
    %1923 = arith.addf %1922, %1921 : vector<2x32xf32>
    %1924 = arith.divf %1922, %1923 : vector<2x32xf32>
    %1925 = vector.extract_strided_slice %1886 {offsets = [0, 32], sizes = [2, 32], strides = [1, 1]} : vector<2x96xf32> to vector<2x32xf32>
    %1926 = vector.extract_strided_slice %1915 {offsets = [0, 32], sizes = [2, 32], strides = [1, 1]} : vector<2x96xf32> to vector<2x32xf32>
    %1927 = arith.addf %1925, %1926 : vector<2x32xf32>
    %1928 = arith.negf %1927 : vector<2x32xf32>
    %1929 = math.exp %1928 : vector<2x32xf32>
    %cst_225 = arith.constant 1.000000e+00 : f32
    %1930 = vector.broadcast %cst_225 : f32 to vector<2x32xf32>
    %1931 = arith.addf %1930, %1929 : vector<2x32xf32>
    %1932 = arith.divf %1930, %1931 : vector<2x32xf32>
    %1933 = vector.extract_strided_slice %1886 {offsets = [0, 64], sizes = [2, 32], strides = [1, 1]} : vector<2x96xf32> to vector<2x32xf32>
    %1934 = vector.extract_strided_slice %1915 {offsets = [0, 64], sizes = [2, 32], strides = [1, 1]} : vector<2x96xf32> to vector<2x32xf32>
    %1935 = arith.mulf %1924, %1934 : vector<2x32xf32>
    %1936 = arith.addf %1933, %1935 : vector<2x32xf32>
    %1937 = math.tanh %1936 : vector<2x32xf32>
    %cst_226 = arith.constant 1.000000e+00 : f32
    %1938 = vector.broadcast %cst_226 : f32 to vector<2x32xf32>
    %1939 = arith.subf %1938, %1932 : vector<2x32xf32>
    %1940 = arith.mulf %1939, %1937 : vector<2x32xf32>
    %1941 = arith.mulf %1932, %1916 : vector<2x32xf32>
    %1942 = arith.addf %1940, %1941 : vector<2x32xf32>
    %1943 = tpu.concatenate %1914, %1942 in 1 : vector<2x32xf32>, vector<2x32xf32> -> vector<2x64xf32>
    %cst_227 = arith.constant dense<0.000000e+00> : vector<2x192xf32>
    %1944 = tpu.matmul %1943, %1135, %cst_227 {dimension_numbers = #tpu.dot_dimension_numbers<[1], [0], [0], [1], [0, 0, 1, 1], [], []>} : vector<2x64xf32>, vector<64x192xf32>, vector<2x192xf32> -> vector<2x192xf32>
    %1945 = vector.broadcast %1136 : vector<1x192xf32> to vector<2x192xf32>
    %1946 = arith.addf %1944, %1945 : vector<2x192xf32>
    %1947 = vector.extract_strided_slice %1134 {offsets = [26, 0], sizes = [2, 96], strides = [1, 1]} : vector<32x192xf32> to vector<2x96xf32>
    %1948 = vector.extract_strided_slice %1134 {offsets = [4, 96], sizes = [2, 96], strides = [1, 1]} : vector<32x192xf32> to vector<2x96xf32>
    %1949 = vector.extract_strided_slice %1946 {offsets = [0, 0], sizes = [2, 96], strides = [1, 1]} : vector<2x192xf32> to vector<2x96xf32>
    %1950 = vector.extract_strided_slice %1943 {offsets = [0, 0], sizes = [2, 32], strides = [1, 1]} : vector<2x64xf32> to vector<2x32xf32>
    %1951 = vector.extract_strided_slice %1947 {offsets = [0, 0], sizes = [2, 32], strides = [1, 1]} : vector<2x96xf32> to vector<2x32xf32>
    %1952 = vector.extract_strided_slice %1949 {offsets = [0, 0], sizes = [2, 32], strides = [1, 1]} : vector<2x96xf32> to vector<2x32xf32>
    %1953 = arith.addf %1951, %1952 : vector<2x32xf32>
    %1954 = arith.negf %1953 : vector<2x32xf32>
    %1955 = math.exp %1954 : vector<2x32xf32>
    %cst_228 = arith.constant 1.000000e+00 : f32
    %1956 = vector.broadcast %cst_228 : f32 to vector<2x32xf32>
    %1957 = arith.addf %1956, %1955 : vector<2x32xf32>
    %1958 = arith.divf %1956, %1957 : vector<2x32xf32>
    %1959 = vector.extract_strided_slice %1947 {offsets = [0, 32], sizes = [2, 32], strides = [1, 1]} : vector<2x96xf32> to vector<2x32xf32>
    %1960 = vector.extract_strided_slice %1949 {offsets = [0, 32], sizes = [2, 32], strides = [1, 1]} : vector<2x96xf32> to vector<2x32xf32>
    %1961 = arith.addf %1959, %1960 : vector<2x32xf32>
    %1962 = arith.negf %1961 : vector<2x32xf32>
    %1963 = math.exp %1962 : vector<2x32xf32>
    %cst_229 = arith.constant 1.000000e+00 : f32
    %1964 = vector.broadcast %cst_229 : f32 to vector<2x32xf32>
    %1965 = arith.addf %1964, %1963 : vector<2x32xf32>
    %1966 = arith.divf %1964, %1965 : vector<2x32xf32>
    %1967 = vector.extract_strided_slice %1947 {offsets = [0, 64], sizes = [2, 32], strides = [1, 1]} : vector<2x96xf32> to vector<2x32xf32>
    %1968 = vector.extract_strided_slice %1949 {offsets = [0, 64], sizes = [2, 32], strides = [1, 1]} : vector<2x96xf32> to vector<2x32xf32>
    %1969 = arith.mulf %1958, %1968 : vector<2x32xf32>
    %1970 = arith.addf %1967, %1969 : vector<2x32xf32>
    %1971 = math.tanh %1970 : vector<2x32xf32>
    %cst_230 = arith.constant 1.000000e+00 : f32
    %1972 = vector.broadcast %cst_230 : f32 to vector<2x32xf32>
    %1973 = arith.subf %1972, %1966 : vector<2x32xf32>
    %1974 = arith.mulf %1973, %1971 : vector<2x32xf32>
    %1975 = arith.mulf %1966, %1950 : vector<2x32xf32>
    %1976 = arith.addf %1974, %1975 : vector<2x32xf32>
    %1977 = vector.extract_strided_slice %1946 {offsets = [0, 96], sizes = [2, 96], strides = [1, 1]} : vector<2x192xf32> to vector<2x96xf32>
    %1978 = vector.extract_strided_slice %1943 {offsets = [0, 32], sizes = [2, 32], strides = [1, 1]} : vector<2x64xf32> to vector<2x32xf32>
    %1979 = vector.extract_strided_slice %1948 {offsets = [0, 0], sizes = [2, 32], strides = [1, 1]} : vector<2x96xf32> to vector<2x32xf32>
    %1980 = vector.extract_strided_slice %1977 {offsets = [0, 0], sizes = [2, 32], strides = [1, 1]} : vector<2x96xf32> to vector<2x32xf32>
    %1981 = arith.addf %1979, %1980 : vector<2x32xf32>
    %1982 = arith.negf %1981 : vector<2x32xf32>
    %1983 = math.exp %1982 : vector<2x32xf32>
    %cst_231 = arith.constant 1.000000e+00 : f32
    %1984 = vector.broadcast %cst_231 : f32 to vector<2x32xf32>
    %1985 = arith.addf %1984, %1983 : vector<2x32xf32>
    %1986 = arith.divf %1984, %1985 : vector<2x32xf32>
    %1987 = vector.extract_strided_slice %1948 {offsets = [0, 32], sizes = [2, 32], strides = [1, 1]} : vector<2x96xf32> to vector<2x32xf32>
    %1988 = vector.extract_strided_slice %1977 {offsets = [0, 32], sizes = [2, 32], strides = [1, 1]} : vector<2x96xf32> to vector<2x32xf32>
    %1989 = arith.addf %1987, %1988 : vector<2x32xf32>
    %1990 = arith.negf %1989 : vector<2x32xf32>
    %1991 = math.exp %1990 : vector<2x32xf32>
    %cst_232 = arith.constant 1.000000e+00 : f32
    %1992 = vector.broadcast %cst_232 : f32 to vector<2x32xf32>
    %1993 = arith.addf %1992, %1991 : vector<2x32xf32>
    %1994 = arith.divf %1992, %1993 : vector<2x32xf32>
    %1995 = vector.extract_strided_slice %1948 {offsets = [0, 64], sizes = [2, 32], strides = [1, 1]} : vector<2x96xf32> to vector<2x32xf32>
    %1996 = vector.extract_strided_slice %1977 {offsets = [0, 64], sizes = [2, 32], strides = [1, 1]} : vector<2x96xf32> to vector<2x32xf32>
    %1997 = arith.mulf %1986, %1996 : vector<2x32xf32>
    %1998 = arith.addf %1995, %1997 : vector<2x32xf32>
    %1999 = math.tanh %1998 : vector<2x32xf32>
    %cst_233 = arith.constant 1.000000e+00 : f32
    %2000 = vector.broadcast %cst_233 : f32 to vector<2x32xf32>
    %2001 = arith.subf %2000, %1994 : vector<2x32xf32>
    %2002 = arith.mulf %2001, %1999 : vector<2x32xf32>
    %2003 = arith.mulf %1994, %1978 : vector<2x32xf32>
    %2004 = arith.addf %2002, %2003 : vector<2x32xf32>
    %2005 = tpu.concatenate %1976, %2004 in 1 : vector<2x32xf32>, vector<2x32xf32> -> vector<2x64xf32>
    %cst_234 = arith.constant dense<0.000000e+00> : vector<2x192xf32>
    %2006 = tpu.matmul %2005, %1135, %cst_234 {dimension_numbers = #tpu.dot_dimension_numbers<[1], [0], [0], [1], [0, 0, 1, 1], [], []>} : vector<2x64xf32>, vector<64x192xf32>, vector<2x192xf32> -> vector<2x192xf32>
    %2007 = vector.broadcast %1136 : vector<1x192xf32> to vector<2x192xf32>
    %2008 = arith.addf %2006, %2007 : vector<2x192xf32>
    %2009 = vector.extract_strided_slice %1134 {offsets = [28, 0], sizes = [2, 96], strides = [1, 1]} : vector<32x192xf32> to vector<2x96xf32>
    %2010 = vector.extract_strided_slice %1134 {offsets = [2, 96], sizes = [2, 96], strides = [1, 1]} : vector<32x192xf32> to vector<2x96xf32>
    %2011 = vector.extract_strided_slice %2008 {offsets = [0, 0], sizes = [2, 96], strides = [1, 1]} : vector<2x192xf32> to vector<2x96xf32>
    %2012 = vector.extract_strided_slice %2005 {offsets = [0, 0], sizes = [2, 32], strides = [1, 1]} : vector<2x64xf32> to vector<2x32xf32>
    %2013 = vector.extract_strided_slice %2009 {offsets = [0, 0], sizes = [2, 32], strides = [1, 1]} : vector<2x96xf32> to vector<2x32xf32>
    %2014 = vector.extract_strided_slice %2011 {offsets = [0, 0], sizes = [2, 32], strides = [1, 1]} : vector<2x96xf32> to vector<2x32xf32>
    %2015 = arith.addf %2013, %2014 : vector<2x32xf32>
    %2016 = arith.negf %2015 : vector<2x32xf32>
    %2017 = math.exp %2016 : vector<2x32xf32>
    %cst_235 = arith.constant 1.000000e+00 : f32
    %2018 = vector.broadcast %cst_235 : f32 to vector<2x32xf32>
    %2019 = arith.addf %2018, %2017 : vector<2x32xf32>
    %2020 = arith.divf %2018, %2019 : vector<2x32xf32>
    %2021 = vector.extract_strided_slice %2009 {offsets = [0, 32], sizes = [2, 32], strides = [1, 1]} : vector<2x96xf32> to vector<2x32xf32>
    %2022 = vector.extract_strided_slice %2011 {offsets = [0, 32], sizes = [2, 32], strides = [1, 1]} : vector<2x96xf32> to vector<2x32xf32>
    %2023 = arith.addf %2021, %2022 : vector<2x32xf32>
    %2024 = arith.negf %2023 : vector<2x32xf32>
    %2025 = math.exp %2024 : vector<2x32xf32>
    %cst_236 = arith.constant 1.000000e+00 : f32
    %2026 = vector.broadcast %cst_236 : f32 to vector<2x32xf32>
    %2027 = arith.addf %2026, %2025 : vector<2x32xf32>
    %2028 = arith.divf %2026, %2027 : vector<2x32xf32>
    %2029 = vector.extract_strided_slice %2009 {offsets = [0, 64], sizes = [2, 32], strides = [1, 1]} : vector<2x96xf32> to vector<2x32xf32>
    %2030 = vector.extract_strided_slice %2011 {offsets = [0, 64], sizes = [2, 32], strides = [1, 1]} : vector<2x96xf32> to vector<2x32xf32>
    %2031 = arith.mulf %2020, %2030 : vector<2x32xf32>
    %2032 = arith.addf %2029, %2031 : vector<2x32xf32>
    %2033 = math.tanh %2032 : vector<2x32xf32>
    %cst_237 = arith.constant 1.000000e+00 : f32
    %2034 = vector.broadcast %cst_237 : f32 to vector<2x32xf32>
    %2035 = arith.subf %2034, %2028 : vector<2x32xf32>
    %2036 = arith.mulf %2035, %2033 : vector<2x32xf32>
    %2037 = arith.mulf %2028, %2012 : vector<2x32xf32>
    %2038 = arith.addf %2036, %2037 : vector<2x32xf32>
    %2039 = vector.extract_strided_slice %2008 {offsets = [0, 96], sizes = [2, 96], strides = [1, 1]} : vector<2x192xf32> to vector<2x96xf32>
    %2040 = vector.extract_strided_slice %2005 {offsets = [0, 32], sizes = [2, 32], strides = [1, 1]} : vector<2x64xf32> to vector<2x32xf32>
    %2041 = vector.extract_strided_slice %2010 {offsets = [0, 0], sizes = [2, 32], strides = [1, 1]} : vector<2x96xf32> to vector<2x32xf32>
    %2042 = vector.extract_strided_slice %2039 {offsets = [0, 0], sizes = [2, 32], strides = [1, 1]} : vector<2x96xf32> to vector<2x32xf32>
    %2043 = arith.addf %2041, %2042 : vector<2x32xf32>
    %2044 = arith.negf %2043 : vector<2x32xf32>
    %2045 = math.exp %2044 : vector<2x32xf32>
    %cst_238 = arith.constant 1.000000e+00 : f32
    %2046 = vector.broadcast %cst_238 : f32 to vector<2x32xf32>
    %2047 = arith.addf %2046, %2045 : vector<2x32xf32>
    %2048 = arith.divf %2046, %2047 : vector<2x32xf32>
    %2049 = vector.extract_strided_slice %2010 {offsets = [0, 32], sizes = [2, 32], strides = [1, 1]} : vector<2x96xf32> to vector<2x32xf32>
    %2050 = vector.extract_strided_slice %2039 {offsets = [0, 32], sizes = [2, 32], strides = [1, 1]} : vector<2x96xf32> to vector<2x32xf32>
    %2051 = arith.addf %2049, %2050 : vector<2x32xf32>
    %2052 = arith.negf %2051 : vector<2x32xf32>
    %2053 = math.exp %2052 : vector<2x32xf32>
    %cst_239 = arith.constant 1.000000e+00 : f32
    %2054 = vector.broadcast %cst_239 : f32 to vector<2x32xf32>
    %2055 = arith.addf %2054, %2053 : vector<2x32xf32>
    %2056 = arith.divf %2054, %2055 : vector<2x32xf32>
    %2057 = vector.extract_strided_slice %2010 {offsets = [0, 64], sizes = [2, 32], strides = [1, 1]} : vector<2x96xf32> to vector<2x32xf32>
    %2058 = vector.extract_strided_slice %2039 {offsets = [0, 64], sizes = [2, 32], strides = [1, 1]} : vector<2x96xf32> to vector<2x32xf32>
    %2059 = arith.mulf %2048, %2058 : vector<2x32xf32>
    %2060 = arith.addf %2057, %2059 : vector<2x32xf32>
    %2061 = math.tanh %2060 : vector<2x32xf32>
    %cst_240 = arith.constant 1.000000e+00 : f32
    %2062 = vector.broadcast %cst_240 : f32 to vector<2x32xf32>
    %2063 = arith.subf %2062, %2056 : vector<2x32xf32>
    %2064 = arith.mulf %2063, %2061 : vector<2x32xf32>
    %2065 = arith.mulf %2056, %2040 : vector<2x32xf32>
    %2066 = arith.addf %2064, %2065 : vector<2x32xf32>
    %2067 = tpu.concatenate %2038, %2066 in 1 : vector<2x32xf32>, vector<2x32xf32> -> vector<2x64xf32>
    %cst_241 = arith.constant dense<0.000000e+00> : vector<2x192xf32>
    %2068 = tpu.matmul %2067, %1135, %cst_241 {dimension_numbers = #tpu.dot_dimension_numbers<[1], [0], [0], [1], [0, 0, 1, 1], [], []>} : vector<2x64xf32>, vector<64x192xf32>, vector<2x192xf32> -> vector<2x192xf32>
    %2069 = vector.broadcast %1136 : vector<1x192xf32> to vector<2x192xf32>
    %2070 = arith.addf %2068, %2069 : vector<2x192xf32>
    %2071 = vector.extract_strided_slice %1134 {offsets = [30, 0], sizes = [2, 96], strides = [1, 1]} : vector<32x192xf32> to vector<2x96xf32>
    %2072 = vector.extract_strided_slice %1134 {offsets = [0, 96], sizes = [2, 96], strides = [1, 1]} : vector<32x192xf32> to vector<2x96xf32>
    %2073 = vector.extract_strided_slice %2070 {offsets = [0, 0], sizes = [2, 96], strides = [1, 1]} : vector<2x192xf32> to vector<2x96xf32>
    %2074 = vector.extract_strided_slice %2067 {offsets = [0, 0], sizes = [2, 32], strides = [1, 1]} : vector<2x64xf32> to vector<2x32xf32>
    %2075 = vector.extract_strided_slice %2071 {offsets = [0, 0], sizes = [2, 32], strides = [1, 1]} : vector<2x96xf32> to vector<2x32xf32>
    %2076 = vector.extract_strided_slice %2073 {offsets = [0, 0], sizes = [2, 32], strides = [1, 1]} : vector<2x96xf32> to vector<2x32xf32>
    %2077 = arith.addf %2075, %2076 : vector<2x32xf32>
    %2078 = arith.negf %2077 : vector<2x32xf32>
    %2079 = math.exp %2078 : vector<2x32xf32>
    %cst_242 = arith.constant 1.000000e+00 : f32
    %2080 = vector.broadcast %cst_242 : f32 to vector<2x32xf32>
    %2081 = arith.addf %2080, %2079 : vector<2x32xf32>
    %2082 = arith.divf %2080, %2081 : vector<2x32xf32>
    %2083 = vector.extract_strided_slice %2071 {offsets = [0, 32], sizes = [2, 32], strides = [1, 1]} : vector<2x96xf32> to vector<2x32xf32>
    %2084 = vector.extract_strided_slice %2073 {offsets = [0, 32], sizes = [2, 32], strides = [1, 1]} : vector<2x96xf32> to vector<2x32xf32>
    %2085 = arith.addf %2083, %2084 : vector<2x32xf32>
    %2086 = arith.negf %2085 : vector<2x32xf32>
    %2087 = math.exp %2086 : vector<2x32xf32>
    %cst_243 = arith.constant 1.000000e+00 : f32
    %2088 = vector.broadcast %cst_243 : f32 to vector<2x32xf32>
    %2089 = arith.addf %2088, %2087 : vector<2x32xf32>
    %2090 = arith.divf %2088, %2089 : vector<2x32xf32>
    %2091 = vector.extract_strided_slice %2071 {offsets = [0, 64], sizes = [2, 32], strides = [1, 1]} : vector<2x96xf32> to vector<2x32xf32>
    %2092 = vector.extract_strided_slice %2073 {offsets = [0, 64], sizes = [2, 32], strides = [1, 1]} : vector<2x96xf32> to vector<2x32xf32>
    %2093 = arith.mulf %2082, %2092 : vector<2x32xf32>
    %2094 = arith.addf %2091, %2093 : vector<2x32xf32>
    %2095 = math.tanh %2094 : vector<2x32xf32>
    %cst_244 = arith.constant 1.000000e+00 : f32
    %2096 = vector.broadcast %cst_244 : f32 to vector<2x32xf32>
    %2097 = arith.subf %2096, %2090 : vector<2x32xf32>
    %2098 = arith.mulf %2097, %2095 : vector<2x32xf32>
    %2099 = arith.mulf %2090, %2074 : vector<2x32xf32>
    %2100 = arith.addf %2098, %2099 : vector<2x32xf32>
    %2101 = vector.extract_strided_slice %2070 {offsets = [0, 96], sizes = [2, 96], strides = [1, 1]} : vector<2x192xf32> to vector<2x96xf32>
    %2102 = vector.extract_strided_slice %2067 {offsets = [0, 32], sizes = [2, 32], strides = [1, 1]} : vector<2x64xf32> to vector<2x32xf32>
    %2103 = vector.extract_strided_slice %2072 {offsets = [0, 0], sizes = [2, 32], strides = [1, 1]} : vector<2x96xf32> to vector<2x32xf32>
    %2104 = vector.extract_strided_slice %2101 {offsets = [0, 0], sizes = [2, 32], strides = [1, 1]} : vector<2x96xf32> to vector<2x32xf32>
    %2105 = arith.addf %2103, %2104 : vector<2x32xf32>
    %2106 = arith.negf %2105 : vector<2x32xf32>
    %2107 = math.exp %2106 : vector<2x32xf32>
    %cst_245 = arith.constant 1.000000e+00 : f32
    %2108 = vector.broadcast %cst_245 : f32 to vector<2x32xf32>
    %2109 = arith.addf %2108, %2107 : vector<2x32xf32>
    %2110 = arith.divf %2108, %2109 : vector<2x32xf32>
    %2111 = vector.extract_strided_slice %2072 {offsets = [0, 32], sizes = [2, 32], strides = [1, 1]} : vector<2x96xf32> to vector<2x32xf32>
    %2112 = vector.extract_strided_slice %2101 {offsets = [0, 32], sizes = [2, 32], strides = [1, 1]} : vector<2x96xf32> to vector<2x32xf32>
    %2113 = arith.addf %2111, %2112 : vector<2x32xf32>
    %2114 = arith.negf %2113 : vector<2x32xf32>
    %2115 = math.exp %2114 : vector<2x32xf32>
    %cst_246 = arith.constant 1.000000e+00 : f32
    %2116 = vector.broadcast %cst_246 : f32 to vector<2x32xf32>
    %2117 = arith.addf %2116, %2115 : vector<2x32xf32>
    %2118 = arith.divf %2116, %2117 : vector<2x32xf32>
    %2119 = vector.extract_strided_slice %2072 {offsets = [0, 64], sizes = [2, 32], strides = [1, 1]} : vector<2x96xf32> to vector<2x32xf32>
    %2120 = vector.extract_strided_slice %2101 {offsets = [0, 64], sizes = [2, 32], strides = [1, 1]} : vector<2x96xf32> to vector<2x32xf32>
    %2121 = arith.mulf %2110, %2120 : vector<2x32xf32>
    %2122 = arith.addf %2119, %2121 : vector<2x32xf32>
    %2123 = math.tanh %2122 : vector<2x32xf32>
    %cst_247 = arith.constant 1.000000e+00 : f32
    %2124 = vector.broadcast %cst_247 : f32 to vector<2x32xf32>
    %2125 = arith.subf %2124, %2118 : vector<2x32xf32>
    %2126 = arith.mulf %2125, %2123 : vector<2x32xf32>
    %2127 = arith.mulf %2118, %2102 : vector<2x32xf32>
    %2128 = arith.addf %2126, %2127 : vector<2x32xf32>
    %cst_248 = arith.constant 0.000000e+00 : f32
    %2129 = vector.broadcast %cst_248 : f32 to vector<2x32xf32>
    %2130 = arith.addf %2129, %1170 : vector<2x32xf32>
    %2131 = arith.addf %2130, %1232 : vector<2x32xf32>
    %2132 = arith.addf %2131, %1294 : vector<2x32xf32>
    %2133 = arith.addf %2132, %1356 : vector<2x32xf32>
    %2134 = arith.addf %2133, %1418 : vector<2x32xf32>
    %2135 = arith.addf %2134, %1480 : vector<2x32xf32>
    %2136 = arith.addf %2135, %1542 : vector<2x32xf32>
    %2137 = arith.addf %2136, %1604 : vector<2x32xf32>
    %2138 = arith.addf %2137, %1666 : vector<2x32xf32>
    %2139 = arith.addf %2138, %1728 : vector<2x32xf32>
    %2140 = arith.addf %2139, %1790 : vector<2x32xf32>
    %2141 = arith.addf %2140, %1852 : vector<2x32xf32>
    %2142 = arith.addf %2141, %1914 : vector<2x32xf32>
    %2143 = arith.addf %2142, %1976 : vector<2x32xf32>
    %2144 = arith.addf %2143, %2038 : vector<2x32xf32>
    %2145 = arith.addf %2144, %2100 : vector<2x32xf32>
    %cst_249 = arith.constant 0.000000e+00 : f32
    %2146 = vector.broadcast %cst_249 : f32 to vector<2x32xf32>
    %2147 = arith.addf %2146, %1198 : vector<2x32xf32>
    %2148 = arith.addf %2147, %1260 : vector<2x32xf32>
    %2149 = arith.addf %2148, %1322 : vector<2x32xf32>
    %2150 = arith.addf %2149, %1384 : vector<2x32xf32>
    %2151 = arith.addf %2150, %1446 : vector<2x32xf32>
    %2152 = arith.addf %2151, %1508 : vector<2x32xf32>
    %2153 = arith.addf %2152, %1570 : vector<2x32xf32>
    %2154 = arith.addf %2153, %1632 : vector<2x32xf32>
    %2155 = arith.addf %2154, %1694 : vector<2x32xf32>
    %2156 = arith.addf %2155, %1756 : vector<2x32xf32>
    %2157 = arith.addf %2156, %1818 : vector<2x32xf32>
    %2158 = arith.addf %2157, %1880 : vector<2x32xf32>
    %2159 = arith.addf %2158, %1942 : vector<2x32xf32>
    %2160 = arith.addf %2159, %2004 : vector<2x32xf32>
    %2161 = arith.addf %2160, %2066 : vector<2x32xf32>
    %2162 = arith.addf %2161, %2128 : vector<2x32xf32>
    %2163 = tpu.concatenate %2145, %2162 in 1 : vector<2x32xf32>, vector<2x32xf32> -> vector<2x64xf32>
    %cst_250 = arith.constant 6.250000e-02 : f32
    %2164 = vector.broadcast %cst_250 : f32 to vector<2x64xf32>
    %2165 = arith.mulf %2163, %2164 : vector<2x64xf32>
    %c0_251 = arith.constant 0 : index
    %c0_252 = arith.constant 0 : index
    %2166 = vector.load %arg13[%c0_251, %c0_252] : memref<1x64xf32, #tpu.memory_space<vmem>>, vector<1x64xf32>
    %cst_253 = arith.constant 9.99999974E-6 : f32
    %2167 = vector.broadcast %cst_253 : f32 to vector<1x64xf32>
    %2168 = arith.addf %2166, %2167 : vector<1x64xf32>
    %2169 = math.rsqrt %2168 : vector<1x64xf32>
    %c0_254 = arith.constant 0 : index
    %c0_255 = arith.constant 0 : index
    %2170 = vector.load %arg12[%c0_254, %c0_255] : memref<1x64xf32, #tpu.memory_space<vmem>>, vector<1x64xf32>
    %2171 = vector.broadcast %2170 : vector<1x64xf32> to vector<2x64xf32>
    %2172 = arith.subf %2165, %2171 : vector<2x64xf32>
    %2173 = vector.broadcast %2169 : vector<1x64xf32> to vector<2x64xf32>
    %2174 = arith.mulf %2172, %2173 : vector<2x64xf32>
    %c0_256 = arith.constant 0 : index
    %c0_257 = arith.constant 0 : index
    %2175 = vector.load %arg10[%c0_256, %c0_257] : memref<1x64xf32, #tpu.memory_space<vmem>>, vector<1x64xf32>
    %2176 = vector.broadcast %2175 : vector<1x64xf32> to vector<2x64xf32>
    %2177 = arith.mulf %2174, %2176 : vector<2x64xf32>
    %c0_258 = arith.constant 0 : index
    %c0_259 = arith.constant 0 : index
    %2178 = vector.load %arg11[%c0_258, %c0_259] : memref<1x64xf32, #tpu.memory_space<vmem>>, vector<1x64xf32>
    %2179 = vector.broadcast %2178 : vector<1x64xf32> to vector<2x64xf32>
    %2180 = arith.addf %2177, %2179 : vector<2x64xf32>
    %c0_260 = arith.constant 0 : index
    %c0_261 = arith.constant 0 : index
    %2181 = vector.load %arg14[%c0_260, %c0_261] : memref<64x8xf32, #tpu.memory_space<vmem>>, vector<64x8xf32>
    %cst_262 = arith.constant dense<0.000000e+00> : vector<2x8xf32>
    %2182 = tpu.matmul %2180, %2181, %cst_262 {dimension_numbers = #tpu.dot_dimension_numbers<[1], [0], [0], [1], [0, 0, 1, 1], [], []>} : vector<2x64xf32>, vector<64x8xf32>, vector<2x8xf32> -> vector<2x8xf32>
    %c0_263 = arith.constant 0 : index
    %c0_264 = arith.constant 0 : index
    %2183 = vector.load %arg15[%c0_263, %c0_264] : memref<1x8xf32, #tpu.memory_space<vmem>>, vector<1x8xf32>
    %2184 = vector.broadcast %2183 : vector<1x8xf32> to vector<2x8xf32>
    %2185 = arith.addf %2182, %2184 : vector<2x8xf32>
    %c0_265 = arith.constant 0 : index
    %c0_266 = arith.constant 0 : index
    %2186 = vector.load %arg16[%c0_265, %c0_266] : memref<2x8xf32, #tpu.memory_space<vmem>>, vector<2x8xf32>
    tpu.vector_store %arg16[%c0_265, %c0_266], %2185 {strides = array<i32>} : memref<2x8xf32, #tpu.memory_space<vmem>>, vector<2x8xf32>,
    return
  }
}

</mosaic_0001>

<bundles_post_ra>
// kernel: rnn_character_forward.1
= control target key start
LH: loop header
LB: loop body
LE: loop exit
PB: predicated region body
PF: predicated region fallthrough
CT: control target
= control target key end

     0   :  { %s9222_s0 = inlined_call_operand.vmem [shape: s32[2,16], index: 0, kind: input, shape index: {}]   ;;  %s9223_s1 = inlined_call_operand.vmem [shape: f32[32,16], index: 1, kind: input, shape index: {}]   ;;  %s9224_s2 = inlined_call_operand.hbm [shape: f32[32,192], index: 2, kind: input, shape index: {}]   ;;  %s9225_s3 = inlined_call_operand.hbm [shape: f32[1,192], index: 3, kind: input, shape index: {}]   ;;  %s9226_s4 = inlined_call_operand.vmem [shape: f32[64,192], index: 4, kind: input, shape index: {}]   ;;  %s9227_s5 = inlined_call_operand.hbm [shape: f32[1,192], index: 5, kind: input, shape index: {}]   ;;  %s9228_s6 = inlined_call_operand.hbm [shape: f32[64,192], index: 6, kind: input, shape index: {}]   ;;  %s9229_s7 = inlined_call_operand.vmem [shape: f32[1,192], index: 7, kind: input, shape index: {}]   ;;  %s9230_s8 = inlined_call_operand.hbm [shape: f32[64,192], index: 8, kind: input, shape index: {}]   ;;  %s9231_s9 = inlined_call_operand.hbm [shape: f32[1,192], index: 9, kind: input, shape index: {}]   ;;  %s9232_s10 = inlined_call_operand.hbm [shape: f32[1,64], index: 10, kind: input, shape index: {}]   ;;  %s9233_s11 = inlined_call_operand.hbm [shape: f32[1,64], index: 11, kind: input, shape index: {}]   ;;  %s9234_s12 = inlined_call_operand.hbm [shape: f32[1,64], index: 12, kind: input, shape index: {}]   ;;  %s9235_s13 = inlined_call_operand.hbm [shape: f32[1,64], index: 13, kind: input, shape index: {}]   ;;  %s9236_s14 = inlined_call_operand.vmem [shape: f32[64,8], index: 14, kind: input, shape index: {}]   ;;  %s9237_s15 = inlined_call_operand.hbm [shape: f32[1,8], index: 15, kind: input, shape index: {}]   ;;  %s9238_s16 = inlined_call_operand.hbm [shape: f32[2,8], index: 16, kind: output, shape index: {}]  }
   0x1   :  { %9243 = sst [smem:[#allocation30_spill]] %s9222_s0 }
   0x2   :  { %21 = vsyncpa [#allocation3], 0 }
   0x3   :  { %22 = vsyncpa [#allocation6], 0 }
   0x4   :  { %23 = vsyncpa [#allocation9], 0 }
   0x5   :  { %24 = vsyncpa [#allocation12], 0 }
   0x6   :  { %25 = vsyncpa [#allocation15], 0 }
   0x7   :  { %26 = vsyncpa [#allocation18], 0 }
   0x8   :  { %27 = vsyncpa [#allocation4], 0  ;;  %s7114_s21 = smov [#allocation5]  }
   0x9   :  { %s50_s22 = sshll.u32 %s7114_s21, 4  ;;  %s51_s22 = int_to_ptr.vmem [resolvable:$true] %s50_s22 }
   0xa   :  { %s6868_s23 = scalar_lea.vmem %s51_s22, 32  ;;  %p6873_p1 = scmp.lt.s32.totalorder %s51_s22, %s51_s22 }
   0xb   :  { %p6869_p0 = scmp.ne.s32.totalorder %s51_s22, %s6868_s23  ;;  %p6874_p2 = scmp.lt.s32.totalorder %s6868_s23, %s6868_s23 }
   0xd   :  { %p6875_p3 = por %p6874_p2, %p6873_p1 }
   0xf   :  { %p6876_p4 = pnand %p6875_p3, %p6869_p0 }
  0x11   :  { %6879 = shalt.err (!%p6876_p4)
}
  0x12   :  { %53 = dma.hbm_to_vmem [thread:$0]  %s9225_s3, 32, %s51_s22, [#allocation6]  }
  0x13   :  { %s7115_s26 = smov [#allocation8]   ;;  %s7116_s28 = smov [#allocation11]  }
  0x14   :  { %s71_s27 = sshll.u32 %s7115_s26, 4  ;;  %s98_s29 = sshll.u32 %s7116_s28, 4  ;;  %s72_s27 = int_to_ptr.vmem [resolvable:$true] %s71_s27  ;;  %s99_s29 = int_to_ptr.vmem [resolvable:$true] %s98_s29 }
  0x15   :  { %s6888_s30 = scalar_lea.vmem %s72_s27, 2048  ;;  %p6893_p6 = scmp.lt.s32.totalorder %s72_s27, %s72_s27 }
  0x16   :  { %p6889_p5 = scmp.ne.s32.totalorder %s72_s27, %s6888_s30  ;;  %p6894_p7 = scmp.lt.s32.totalorder %s6888_s30, %s6888_s30 }
  0x18   :  { %p6895_p8 = por %p6894_p7, %p6893_p6 }
  0x1a   :  { %p6896_p9 = pnand %p6895_p8, %p6889_p5 }
  0x1c   :  { %6899 = shalt.err (!%p6896_p9)
}
  0x1d   :  { %s7117_s0 = smov 256   ;;  %s7118_s17 = smov 16  }
  0x1e   :  { %77 = dma.hbm_to_vmem [thread:$0]  %s9228_s6, 2048, %s72_s27, [#allocation9], %s7117_s0, %s7117_s0, %s7118_s17  }
  0x1f   :  { %s6908_s3 = scalar_lea.vmem %s99_s29, 32  ;;  %p6913_p11 = scmp.lt.s32.totalorder %s99_s29, %s99_s29 }
  0x20   :  { %p6909_p10 = scmp.ne.s32.totalorder %s99_s29, %s6908_s3  ;;  %p6914_p12 = scmp.lt.s32.totalorder %s6908_s3, %s6908_s3 }
  0x22   :  { %p6915_p13 = por %p6914_p12, %p6913_p11 }
  0x24   :  { %p6916_p0 = pnand %p6915_p13, %p6909_p10 }
  0x26   :  { %6919 = shalt.err (!%p6916_p0)
}
  0x27   :  { %101 = dma.hbm_to_vmem [thread:$0]  %s9231_s9, 32, %s99_s29, [#allocation12]  }
  0x28   :  { %s7119_s22 = smov [#allocation14]   ;;  %s7120_s24 = smov [#allocation17]  }
  0x29   :  { %s118_s23 = sshll.u32 %s7119_s22, 4  ;;  %s138_s25 = sshll.u32 %s7120_s24, 4  ;;  %s119_s23 = int_to_ptr.vmem [resolvable:$true] %s118_s23  ;;  %s139_s25 = int_to_ptr.vmem [resolvable:$true] %s138_s25 }
  0x2a   :  { %s6928_s26 = scalar_lea.vmem %s119_s23, 16  ;;  %s6932_s6 = scalar_lea.vmem %s119_s23, 32 }
  0x2b   :  { %p6929_p1 = scmp.ne.s32.totalorder %s119_s23, %s6928_s26  ;;  %p6933_p2 = scmp.lt.s32.totalorder %s119_s23, %s119_s23 }
  0x2c   :  { %p6934_p3 = scmp.lt.s32.totalorder %s6932_s6, %s6928_s26 }
  0x2e   :  { %p6935_p4 = por %p6934_p3, %p6933_p2 }
  0x30   :  { %p6936_p5 = pnand %p6935_p4, %p6929_p1 }
  0x32   :  { %6939 = shalt.err (!%p6936_p5)
}
  0x33   :  { %121 = dma.hbm_to_vmem [thread:$0]  %s9233_s11, 16, %s119_s23, [#allocation15]  }
  0x34   :  { %s6948_s30 = scalar_lea.vmem %s139_s25, 16  ;;  %s6952_s9 = scalar_lea.vmem %s139_s25, 32 }
  0x35   :  { %p6949_p6 = scmp.ne.s32.totalorder %s139_s25, %s6948_s30  ;;  %p6953_p7 = scmp.lt.s32.totalorder %s139_s25, %s139_s25 }
  0x36   :  { %p6954_p8 = scmp.lt.s32.totalorder %s6952_s9, %s6948_s30 }
  0x38   :  { %p6955_p9 = por %p6954_p8, %p6953_p7 }
  0x3a   :  { %p6956_p10 = pnand %p6955_p9, %p6949_p6 }
  0x3c   :  { %6959 = shalt.err (!%p6956_p10)
}
  0x3d   :  { %141 = dma.hbm_to_vmem [thread:$0]  %s9235_s13, 16, %s139_s25, [#allocation18]  }
  0x3e   :  { %s7121_s19 = smov [#allocation2]   ;;  %s7122_s20 = smov [#allocation7]  }
  0x3f   :  { %s37_s3 = sshll.u32 %s7121_s19, 4  ;;  %s62_s21 = sshll.u32 %s7122_s20, 4  ;;  %s38_s3 = int_to_ptr.vmem [resolvable:$true] %s37_s3  ;;  %s63_s21 = int_to_ptr.vmem [resolvable:$true] %s62_s21 }
  0x40   :  { %s6968_s22 = scalar_lea.vmem %s38_s3, 1024  ;;  %p6973_p12 = scmp.lt.s32.totalorder %s38_s3, %s38_s3 }
  0x41   :  { %p6969_p11 = scmp.ne.s32.totalorder %s38_s3, %s6968_s22  ;;  %p6974_p13 = scmp.lt.s32.totalorder %s6968_s22, %s6968_s22 }
  0x43   :  { %p6975_p0 = por %p6974_p13, %p6973_p12 }
  0x45   :  { %p6976_p1 = pnand %p6975_p0, %p6969_p11 }
  0x47   :  { %6979 = shalt.err (!%p6976_p1)
}
  0x48   :  { %43 = dma.hbm_to_vmem [thread:$0]  %s9224_s2, 1024, %s38_s3, [#allocation3], %s7117_s0, %s7117_s0, %s7118_s17  }
  0x49   :  { %s6988_s13 = scalar_lea.vmem %s63_s21, 32  ;;  %p6993_p3 = scmp.lt.s32.totalorder %s63_s21, %s63_s21 }
  0x4a   :  { %p6989_p2 = scmp.ne.s32.totalorder %s63_s21, %s6988_s13  ;;  %p6994_p4 = scmp.lt.s32.totalorder %s6988_s13, %s6988_s13 }
  0x4c   :  { %p6995_p5 = por %p6994_p4, %p6993_p3 }
  0x4e   :  { %p6996_p6 = pnand %p6995_p5, %p6989_p2 }
  0x50   :  { %6999 = shalt.err (!%p6996_p6)
}
  0x51   :  { %65 = dma.hbm_to_vmem [thread:$0]  %s9227_s5, 32, %s63_s21, [#allocation6]  }
  0x52   :  { %s7123_s26 = smov [#allocation10]   ;;  %s7124_s27 = smov [#allocation13]  }
  0x53   :  { %s85_s6 = sshll.u32 %s7123_s26, 4  ;;  %s108_s28 = sshll.u32 %s7124_s27, 4  ;;  %s86_s6 = int_to_ptr.vmem [resolvable:$true] %s85_s6  ;;  %s109_s28 = int_to_ptr.vmem [resolvable:$true] %s108_s28 }
  0x54   :  { %s7008_s30 = scalar_lea.vmem %s86_s6, 2048  ;;  %p7013_p8 = scmp.lt.s32.totalorder %s86_s6, %s86_s6 }
  0x55   :  { %p7009_p7 = scmp.ne.s32.totalorder %s86_s6, %s7008_s30  ;;  %p7014_p9 = scmp.lt.s32.totalorder %s7008_s30, %s7008_s30 }
  0x57   :  { %p7015_p10 = por %p7014_p9, %p7013_p8 }
  0x59   :  { %p7016_p11 = pnand %p7015_p10, %p7009_p7 }
  0x5b   :  { %7019 = shalt.err (!%p7016_p11)
}
  0x5c   :  { %91 = dma.hbm_to_vmem [thread:$0]  %s9230_s8, 2048, %s86_s6, [#allocation9], %s7117_s0, %s7117_s0, %s7118_s17  }
  0x5d   :  { %s7028_s5 = scalar_lea.vmem %s109_s28, 16  ;;  %s7032_s29 = scalar_lea.vmem %s109_s28, 32 }
  0x5e   :  { %p7029_p12 = scmp.ne.s32.totalorder %s109_s28, %s7028_s5  ;;  %p7033_p13 = scmp.lt.s32.totalorder %s109_s28, %s109_s28 }
  0x5f   :  { %p7034_p0 = scmp.lt.s32.totalorder %s7032_s29, %s7028_s5 }
  0x61   :  { %p7035_p1 = por %p7034_p0, %p7033_p13 }
  0x63   :  { %p7036_p2 = pnand %p7035_p1, %p7029_p12 }
  0x65   :  { %7039 = shalt.err (!%p7036_p2)
}
  0x66   :  { %111 = dma.hbm_to_vmem [thread:$0]  %s9232_s10, 16, %s109_s28, [#allocation12]  }
  0x67   :  { %s7125_s3 = smov [#allocation16]   ;;  %s7126_s21 = smov [#allocation19]  }
  0x68   :  { %s128_s20 = sshll.u32 %s7125_s3, 4  ;;  %s150_s22 = sshll.u32 %s7126_s21, 4  ;;  %s129_s20 = int_to_ptr.vmem [resolvable:$true] %s128_s20  ;;  %s151_s22 = int_to_ptr.vmem [resolvable:$true] %s150_s22 }
  0x69   :  { %s7048_s11 = scalar_lea.vmem %s129_s20, 16  ;;  %s7052_s8 = scalar_lea.vmem %s129_s20, 32 }
  0x6a   :  { %p7049_p3 = scmp.ne.s32.totalorder %s129_s20, %s7048_s11  ;;  %p7053_p4 = scmp.lt.s32.totalorder %s129_s20, %s129_s20 }
  0x6b   :  { %p7054_p5 = scmp.lt.s32.totalorder %s7052_s8, %s7048_s11 }
  0x6d   :  { %p7055_p6 = por %p7054_p5, %p7053_p4 }
  0x6f   :  { %p7056_p7 = pnand %p7055_p6, %p7049_p3 }
  0x71   :  { %7059 = shalt.err (!%p7056_p7)
}
  0x72   :  { %131 = dma.hbm_to_vmem [thread:$0]  %s9234_s12, 16, %s129_s20, [#allocation15]  }
  0x73   :  { %s7068_s13 = scalar_lea.vmem %s151_s22, 16  ;;  %s7072_s10 = scalar_lea.vmem %s151_s22, 32 }
  0x74   :  { %p7069_p8 = scmp.ne.s32.totalorder %s151_s22, %s7068_s13  ;;  %p7073_p9 = scmp.lt.s32.totalorder %s151_s22, %s151_s22 }
  0x75   :  { %p7074_p10 = scmp.lt.s32.totalorder %s7072_s10, %s7068_s13 }
  0x77   :  { %p7075_p11 = por %p7074_p10, %p7073_p9 }
  0x79   :  { %p7076_p12 = pnand %p7075_p11, %p7069_p8 }
  0x7b   :  { %7079 = shalt.err (!%p7076_p12)
}
  0x7c   :  { %153 = dma.hbm_to_vmem [thread:$0]  %s9237_s15, 16, %s151_s22, [#allocation18]  }
  0x7d   :  { %7100 = dma.done.wait [#allocation3], 1024  }
  0x7e   :  { %7101 = vsyncadd [#allocation3], 4294966272 }
  0x7f   :  { %7102 = dma.done.wait [#allocation6], 64  }
  0x80   :  { %7103 = vsyncadd [#allocation6], 4294967232 }
  0x81   :  { %7104 = dma.done.wait [#allocation9], 4096  }
  0x82   :  { %7105 = vsyncadd [#allocation9], 4294963200 }
  0x83   :  { %7106 = dma.done.wait [#allocation12], 48  }
  0x84   :  { %7107 = vsyncadd [#allocation12], 4294967248 }
  0x85   :  { %7108 = dma.done.wait [#allocation15], 32  }
  0x86   :  { %7109 = vsyncadd [#allocation15], 4294967264 }
  0x87   :  { %7110 = dma.done.wait [#allocation18], 32  }
  0x88   :  { %7111 = vsyncadd [#allocation18], 4294967264  ;;  %v192_v0 = vlaneseq  ;;  %vm205_vm0 = vcmask 130048   ;;  %s9244_s26 = sld [smem:[#allocation30_spill]]  ;;  %v188_v8 = vld [vmem:[%s9223_s1] sm:$0xff]  ;;  %v7127_v9 = vmov 1.0  }
  0x89   :  { %6237 = vmatprep.mubr.msk.f32.mxu1 %vm205_vm0, %v188_v8  ;;  %6227 = vmatprep.mubr.msk.f32.mxu0 %vm205_vm0, %v188_v8  ;;  %v189_v10 = vld [vmem:[%s9223_s1 + $0x8] sm:$0xff]  ;;  %v190_v11 = vld [vmem:[%s9223_s1 + $0x10] sm:$0xff]  ;;  %v191_v12 = vld [vmem:[%s9223_s1 + $0x18] sm:$0xff]  ;;  %v9239_v17 = vmov 0.0   ;;  %s7129_s1 = smov 64   ;;  %vm452_vm5 = vcmask 1040384  }
  0x8a   :  { %v193_v1 = vshrl.u32 %v192_v0, 7  ;;  %v7293_v13 = vld [vmem:[%s9226_s4 + $0x78] sm:$0xff]  ;;  %v7298_v14 = vld [vmem:[%s9226_s4 + $0x70] sm:$0xff]  ;;  %v7303_v15 = vld [vmem:[%s9226_s4 + $0x68] sm:$0xff]  ;;  %vm454_vm6 = vcmask 1041408   ;;  %vm456_vm7 = vcmask 1042432  }
  0x8b   :  { %v7309_v16 = vld [vmem:[%s9226_s4 + $0x60] sm:$0xff]  ;;  %v7316_v18 = vld [vmem:[%s9226_s4 + $0x58] sm:$0xff]  ;;  %v7323_v19 = vld [vmem:[%s9226_s4 + $0x50] sm:$0xff]  ;;  %vm458_vm8 = vcmask 1043456   ;;  %vm460_vm9 = vcmask 1044480   ;;  %vm462_vm10 = vcmask 1045504  }
  0x8c   :  { %v7261_v2 = vsub.s32 1, %v193_v1  ;;  %v7263_v3 = vsub.s32 0, %v193_v1  ;;  %v194_v4 = vadd.s32 8, %v193_v1  ;;  %v7329_v20 = vld [vmem:[%s9226_s4 + $0x48] sm:$0xff]  ;;  %v7335_v21 = vld [vmem:[%s9226_s4 + $0x40] sm:$0xff]  ;;  %v7341_v22 = vld [vmem:[%s9226_s4 + $0x38] sm:$0xff] }
  0x8d   :  { %v7347_v23 = vld [vmem:[%s9226_s4 + $0x30] sm:$0xff]  ;;  %v7353_v24 = vld [vmem:[%s9226_s4 + $0x28] sm:$0xff]  ;;  %v7359_v25 = vld [vmem:[%s9226_s4 + $0x20] sm:$0xff]  ;;  %vm513_vm11 = vcmask 261120   ;;  %vm464_vm12 = vcmask 1046528   ;;  %s7131_s11 = smov 32  }
  0x8e   :  { %v187_v5 = vld [vmem:[%s9244_s26] sm:$0x3]  ;;  %v7365_v26 = vld [vmem:[%s9226_s4 + $0x18] sm:$0xff]  ;;  %v7371_v27 = vld [vmem:[%s9226_s4 + $0x10] sm:$0xff]  ;;  %vm643_vm13 = vcmask 523264   ;;  %vm7132_vm14 = vmmov 0  }
  0x8f   :  { %v306_v6 = vrot.slane %v187_v5, %v7261_v2  ;;  %v198_v7 = vrot.slane %v187_v5, %v7263_v3  ;;  %v7377_v28 = vld [vmem:[%s9226_s4 + $0x8] sm:$0xff]  ;;  %v7383_v29 = vld [vmem:[%s9226_s4] sm:$0xff]  ;;  %v500_v30 = vld [vmem:[#allocation2 + $0x38] sm:$0xff]  ;;  %vm6025_vm15 = vcmask 58368  }
  0x90   :  { %v499_v31 = vld [vmem:[#allocation2 + $0x30] sm:$0xff]  ;;  %v498_v32 = vld [vmem:[#allocation2 + $0x28] sm:$0xff]  ;;  %v497_v33 = vld [vmem:[#allocation2 + $0x20] sm:$0xff] }
  0x91   :  { %vm308_vm1 = vcmp.eq.s32.totalorder %v194_v4, %v306_v6  ;;  %vm200_vm2 = vcmp.eq.s32.totalorder %v194_v4, %v198_v7  ;;  %vm307_vm3 = vcmp.eq.s32.totalorder %v193_v1, %v306_v6  ;;  %vm199_vm4 = vcmp.eq.s32.totalorder %v193_v1, %v198_v7  ;;  %v496_v34 = vld [vmem:[#allocation2 + $0x18] sm:$0xff]  ;;  %v495_v37 = vld [vmem:[#allocation2 + $0x10] sm:$0xff]  ;;  %v494_v39 = vld [vmem:[#allocation2 + $0x8] sm:$0xff] }
  0x92   :  { %6233 = vmatprep.subr.msk.mxu1 %vm308_vm1, %v7127_v9  ;;  %6223 = vmatprep.subr.msk.mxu0 %vm200_vm2, %v7127_v9  ;;  %v493_v42 = vld [vmem:[#allocation2] sm:$0xff] }
  0x93   :  { %6234 = vmatpush3.msk.msra.mxu1 %vm308_vm1, %v7127_v9  ;;  %6224 = vmatpush3.msk.msra.mxu0 %vm200_vm2, %v7127_v9  ;;  %v631_v54 = vld [vmem:[#allocation7] sm:$0x3] }
  0x94   :  { %6235 = vmatprep.subr.msk.mxu1 %vm307_vm3, %v7127_v9  ;;  %6225 = vmatprep.subr.msk.mxu0 %vm199_vm4, %v7127_v9  ;;  %v7423_v55 = vrot.slane %v631_v54, %v7263_v3  ;;  %v7426_v56 = vrot.slane %v631_v54, %v7261_v2 }
  0x95   :  { %6236 = vmatpush3.msk.msra.mxu1 %vm307_vm3, %v7127_v9  ;;  %6226 = vmatpush3.msk.msra.mxu0 %vm199_vm4, %v7127_v9 }
  0x96   :  { %6238 = vmatmul.mubr.msk.f32.vlgmr.msra.gmra.mxu1 %vm205_vm0, %v189_v10  ;;  %6228 = vmatmul.mubr.msk.f32.vlgmr.msra.gmra.mxu0 %vm205_vm0, %v189_v10 }
  0x97   :  { %6230 = vmatprep.mubr.msk.f32.mxu0 %vm205_vm0, %v190_v11  ;;  %6240 = vmatprep.mubr.msk.f32.mxu1 %vm205_vm0, %v190_v11 }
  0x98   :  { %663 = vmatprep.subr.mxu1 %v7293_v13  ;;  %550 = vmatprep.subr.mxu0 %v500_v30 }
  0x99   :  { %664 = vmatpush1.msra.mxu1 %v7298_v14  ;;  %551 = vmatpush1.msra.mxu0 %v499_v31 }
  0x9a   :  { %6231 = vmatmul.mubr.msk.f32.gmra.mxu0 %vm205_vm0, %v191_v12  ;;  %6241 = vmatmul.mubr.msk.f32.gmra.mxu1 %vm205_vm0, %v191_v12 }
  0x9b   :  { %711 = vmatprep.mubr.f32.mxu1 %v9239_v17  ;;  %590 = vmatprep.mubr.f32.mxu0 %v9239_v17 }
  0x9c   :  { %665 = vmatprep.subr.mxu1 %v7303_v15  ;;  %552 = vmatprep.subr.mxu0 %v498_v32 }
  0x9d   :  { %666 = vmatpush1.msra.mxu1 %v7309_v16  ;;  %553 = vmatpush1.msra.mxu0 %v497_v33 }
  0x9e   :  { %667 = vmatprep.subr.mxu1 %v7316_v18  ;;  %554 = vmatprep.subr.mxu0 %v496_v34 }
  0x9f   :  { %668 = vmatpush1.msra.mxu1 %v7323_v19  ;;  %555 = vmatpush1.msra.mxu0 %v495_v37 }
  0xa0   :  { %669 = vmatprep.subr.mxu1 %v7329_v20  ;;  %556 = vmatprep.subr.mxu0 %v494_v39 }
  0xa1   :  { %670 = vmatpush1.msra.mxu1 %v7335_v21  ;;  %557 = vmatpush1.msra.mxu0 %v493_v42 }
  0xa2   :  { %671 = vmatprep.subr.mxu1 %v7341_v22  ;;  %810 = vmatprep.subr.mxu0 %v7293_v13 }
  0xa3   :  { %672 = vmatpush1.msra.mxu1 %v7347_v23 }
  0xa4   :  { %673 = vmatprep.subr.mxu1 %v7353_v24 }
  0xa5   :  { %674 = vmatpush1.msra.mxu1 %v7359_v25 }
  0xa6   :  { %675 = vmatprep.subr.mxu1 %v7365_v26 }
  0xa7   :  { %676 = vmatpush1.msra.mxu1 %v7371_v27 }
  0xa8   :  { %677 = vmatprep.subr.mxu1 %v7377_v28 }
  0xa9   :  { %678 = vmatpush1.msra.mxu1 %v7383_v29 }
  0xaa   :  { %712 = vmatmul.mubr.f32.vlgmr.msra.gmra.mxu1 %v9239_v17  ;;  %968 = vmatprep.subr.mxu1 %v7293_v13 }
  0xab   :  { %969 = vmatpush1.msra.mxu1 %v7298_v14  ;;  %1016 = vmatprep.mubr.f32.mxu1 %v9239_v17 }
  0xac   :  { %970 = vmatprep.subr.mxu1 %v7303_v15 }
  0xad   :  { %971 = vmatpush1.msra.mxu1 %v7309_v16 }
  0xae   :  { %972 = vmatprep.subr.mxu1 %v7316_v18 }
  0xaf   :  { %973 = vmatpush1.msra.mxu1 %v7323_v19 }
  0xb0   :  { %974 = vmatprep.subr.mxu1 %v7329_v20 }
  0xb1   :  { %975 = vmatpush1.msra.mxu1 %v7335_v21 }
  0xb2   :  { %976 = vmatprep.subr.mxu1 %v7341_v22 }
  0xb3   :  { %977 = vmatpush1.msra.mxu1 %v7347_v23 }
  0xb4   :  { %978 = vmatprep.subr.mxu1 %v7353_v24 }
  0xb5   :  { %979 = vmatpush1.msra.mxu1 %v7359_v25 }
  0xb6   :  { %980 = vmatprep.subr.mxu1 %v7365_v26 }
  0xb7   :  { %981 = vmatpush1.msra.mxu1 %v7371_v27 }
  0xb8   :  { %982 = vmatprep.subr.mxu1 %v7377_v28 }
  0xb9   :  { %983 = vmatpush1.msra.mxu1 %v7383_v29 }
  0xba   :  { %1278 = vmatprep.subr.mxu1 %v7293_v13 }
 0x156   :  { %v6239_v35 = vpop.f32.mrf.mxu1  ;;  %v6229_v36 = vpop.f32.mrf.mxu0 }
 0x157   :  { %v417_v38 = vrot.slane %v6239_v35, 1  ;;  %v411_v44 = vrot.slane %v6229_v36, 1 }
 0x158   :  { %v379_v40 = vpop.f32.mrf.mxu1  ;;  %v284_v41 = vpop.f32.mrf.mxu0 }
 0x159   :  { %418 = vrot.lane.b32.xlu1 %v417_v38, %s7118_s17  ;;  %v405_v43 = vrot.slane %v379_v40, 1  ;;  %v399_v49 = vrot.slane %v284_v41, 1 }
 0x15a   :  { %v7408_v45 = vpop.f32.mrf.mxu0  ;;  %v7410_v46 = vpop.f32.mrf.mxu1 }
 0x15b   :  { %406 = vrot.lane.b32.xlu0 %v405_v43, %s7118_s17  ;;  %v435_v52 = vrot.slane %v7408_v45, 1  ;;  %v441_v53 = vrot.slane %v7410_v46, 1 }
 0x15c   :  { %v294_v47 = vpop.f32.mrf.mxu0  ;;  %v389_v48 = vpop.f32.mrf.mxu1 }
 0x15d   :  { %412 = vrot.lane.b32.xlu1 %v411_v44, %s7118_s17  ;;  %v423_v50 = vrot.slane %v294_v47, 1  ;;  %v429_v51 = vrot.slane %v389_v48, 1 }
 0x15f   :  { %400 = vrot.lane.b32.xlu0 %v399_v49, %s7118_s17 }
 0x161   :  { %424 = vrot.lane.b32.xlu1 %v423_v50, %s7118_s17 }
 0x163   :  { %430 = vrot.lane.b32.xlu0 %v429_v51, %s7118_s17 }
 0x165   :  { %436 = vrot.lane.b32.xlu1 %v435_v52, %s7118_s17 }
 0x167   :  { %442 = vrot.lane.b32.xlu0 %v441_v53, %s7118_s17  ;;  %s7130_s17 = smov 96  }
 0x16a   :  { %v713_v57 = vpop.f32.mrf.mxu1 }
 0x16b   :  { %v7429_v58 = vadd.f32 %v713_v57, %v7423_v55 }
 0x16c   :  { %v715_v59 = vpop.f32.mrf.mxu1 }
 0x16d   :  { %726 = vrot.lane.b32.xlu1 %v7429_v58, %s7129_s1  ;;  %v7434_v60 = vadd.f32 %v715_v59, %v7426_v56 }
 0x16f   :  { %v754_v61 = vrot.slane %v7434_v60, 2 }
 0x171   :  { %763 = vrot.lane.b32.xlu0 %v754_v61, %s7129_s1 }
 0x1cb   :  { %v419_v62 = vpop.permute.xlu1 %418 }
 0x1cc   :  { %v421_v63 = vsel %vm205_vm0, %v6239_v35, %v419_v62 }
 0x1cd   :  { %v407_v0 = vpop.permute.xlu0 %406  ;;  %v450_v4 = vrot.slane %v421_v63, 7 }
 0x1ce   :  { %v409_v1 = vsel %vm205_vm0, %v379_v40, %v407_v0 }
 0x1cf   :  { %v413_v5 = vpop.permute.xlu1 %412  ;;  %v447_v7 = vrot.slane %v409_v1, 7 }
 0x1d0   :  { %v415_v6 = vsel %vm205_vm0, %v6229_v36, %v413_v5 }
 0x1d1   :  { %v466_v8 = vsel %vm452_vm5, %v415_v6, %v450_v4  ;;  %v401_v9 = vpop.permute.xlu0 %400 }
 0x1d2   :  { %v467_v10 = vsel %vm454_vm6, %v466_v8, %v415_v6  ;;  %v403_v11 = vsel %vm205_vm0, %v284_v41, %v401_v9  ;;  %v501_v8 = vld [vmem:[#allocation5] sm:$0x3] }
 0x1d3   :  { %v468_v12 = vsel %vm456_vm7, %v467_v10, %v450_v4  ;;  %v453_v30 = vsel %vm452_vm5, %v403_v11, %v447_v7  ;;  %v425_v31 = vpop.permute.xlu1 %424  ;;  %v506_v9 = vrot.slane %v501_v8, %v7263_v3  ;;  %v510_v10 = vrot.slane %v501_v8, %v7261_v2 }
 0x1d4   :  { %v469_v32 = vsel %vm458_vm8, %v468_v12, %v415_v6  ;;  %v455_v33 = vsel %vm454_vm6, %v453_v30, %v403_v11  ;;  %v427_v42 = vsel %vm205_vm0, %v294_v47, %v425_v31 }
 0x1d5   :  { %v457_v34 = vsel %vm456_vm7, %v455_v33, %v447_v7  ;;  %v431_v35 = vpop.permute.xlu0 %430  ;;  %v470_v40 = vsel %vm460_vm9, %v469_v32, %v450_v4 }
 0x1d6   :  { %v459_v36 = vsel %vm458_vm8, %v457_v34, %v403_v11  ;;  %v433_v37 = vsel %vm205_vm0, %v389_v48, %v431_v35  ;;  %v471_v52 = vsel %vm462_vm10, %v470_v40, %v415_v6 }
 0x1d7   :  { %v461_v38 = vsel %vm460_vm9, %v459_v36, %v447_v7  ;;  %v474_v39 = vrot.slane %v433_v37, 7  ;;  %v437_v49 = vpop.permute.xlu1 %436  ;;  %v472_v59 = vsel %vm464_vm12, %v471_v52, %v450_v4 }
 0x1d8   :  { %v463_v41 = vsel %vm462_vm10, %v461_v38, %v403_v11  ;;  %v439_v47 = vsel %vm205_vm0, %v7408_v45, %v437_v49 }
 0x1d9   :  { %v465_v43 = vsel %vm464_vm12, %v463_v41, %v447_v7  ;;  %v479_v44 = vsel %vm452_vm5, %v427_v42, %v474_v39  ;;  %v443_v50 = vpop.permute.xlu0 %442 }
 0x1da   :  { %v480_v51 = vsel %vm454_vm6, %v479_v44, %v427_v42  ;;  %v445_v48 = vsel %vm205_vm0, %v7410_v46, %v443_v50  ;;  %6063 = vmatmul.mubr.msk.f32.vlgmr.msra.gmra.mxu0 %vm513_vm11, %v465_v43  ;;  %v744_v43 = vrot.slane %v7429_v58, 2 }
 0x1db   :  { %v481_v53 = vsel %vm456_vm7, %v480_v51, %v474_v39  ;;  %v477_v54 = vrot.slane %v445_v48, 7  ;;  %596 = vmatprep.mubr.f32.mxu0 %v9239_v17  ;;  %811 = vmatpush1.msra.mxu0 %v7298_v14 }
 0x1dc   :  { %v482_v57 = vsel %vm458_vm8, %v481_v53, %v427_v42  ;;  %812 = vmatprep.subr.mxu0 %v7303_v15 }
 0x1dd   :  { %v486_v46 = vsel %vm452_vm5, %v439_v47, %v477_v54  ;;  %v483_v62 = vsel %vm460_vm9, %v482_v57, %v474_v39  ;;  %813 = vmatpush1.msra.mxu0 %v7309_v16 }
 0x1de   :  { %v487_v63 = vsel %vm454_vm6, %v486_v46, %v439_v47  ;;  %6064 = vmatmul.mubr.msk.f32.gmra.mxu0 %vm513_vm11, %v472_v59  ;;  %v484_v0 = vsel %vm462_vm10, %v483_v62, %v427_v42  ;;  %814 = vmatprep.subr.mxu0 %v7316_v18 }
 0x1df   :  { %v488_v45 = vsel %vm456_vm7, %v487_v63, %v477_v54  ;;  %602 = vmatprep.mubr.f32.mxu0 %v9239_v17  ;;  %815 = vmatpush1.msra.mxu0 %v7323_v19  ;;  %v485_v4 = vsel %vm464_vm12, %v484_v0, %v474_v39 }
 0x1e0   :  { %v489_v1 = vsel %vm458_vm8, %v488_v45, %v439_v47  ;;  %816 = vmatprep.subr.mxu0 %v7329_v20 }
 0x1e1   :  { %v490_v5 = vsel %vm460_vm9, %v489_v1, %v477_v54  ;;  %817 = vmatpush1.msra.mxu0 %v7335_v21 }
 0x1e2   :  { %6065 = vmatmul.mubr.msk.f32.gmra.mxu0 %vm513_vm11, %v485_v4  ;;  %v491_v6 = vsel %vm462_vm10, %v490_v5, %v439_v47  ;;  %818 = vmatprep.subr.mxu0 %v7341_v22 }
 0x1e3   :  { %608 = vmatprep.mubr.f32.mxu0 %v9239_v17  ;;  %819 = vmatpush1.msra.mxu0 %v7347_v23  ;;  %v492_v7 = vsel %vm464_vm12, %v491_v6, %v477_v54  ;;  %v727_v54 = vpop.permute.xlu1 %726  ;;  %v764_v59 = vpop.permute.xlu0 %763 }
 0x1e4   :  { %820 = vmatprep.subr.mxu0 %v7353_v24 }
 0x1e5   :  { %821 = vmatpush1.msra.mxu0 %v7359_v25 }
 0x1e6   :  { %6066 = vmatmul.mubr.msk.f32.gmra.mxu0 %vm513_vm11, %v492_v7  ;;  %822 = vmatprep.subr.mxu0 %v7365_v26 }
 0x1e7   :  { %823 = vmatpush1.msra.mxu0 %v7371_v27  ;;  %858 = vmatprep.mubr.f32.mxu0 %v9239_v17 }
 0x1e8   :  { %824 = vmatprep.subr.mxu0 %v7377_v28 }
 0x1e9   :  { %825 = vmatpush1.msra.mxu0 %v7383_v29 }
 0x1ea   :  { %1125 = vmatprep.subr.mxu0 %v7293_v13 }
 0x29a   :  { %v592_v11 = vpop.f32.mrf.mxu0 }
 0x29b   :  { %v7504_v12 = vadd.f32 %v592_v11, %v506_v9 }
 0x29c   :  { %v594_v30 = vpop.f32.mrf.mxu0 }
 0x29d   :  { %v7506_v31 = vadd.f32 %v594_v30, %v510_v10  ;;  %v718_v32 = vadd.f32 %v7429_v58, %v7504_v12 }
 0x29e   :  { %v598_v33 = vpop.f32.mrf.mxu0 }
 0x29f   :  { %v7510_v34 = vadd.f32 %v598_v33, %v506_v9  ;;  %v6067_v35 = vmul.f32 -1.442695, %v718_v32 }
 0x2a0   :  { %v600_v36 = vpop.f32.mrf.mxu0 }
 0x2a1   :  { %v7512_v37 = vadd.f32 %v600_v36, %v510_v10  ;;  %6282 = vpow2.f32 %v6067_v35 }
 0x2a2   :  { %v604_v38 = vpop.f32.mrf.mxu0 }
 0x2a3   :  { %v7514_v39 = vadd.f32 %v604_v38, %v506_v9 }
 0x2a4   :  { %v606_v40 = vpop.f32.mrf.mxu0 }
 0x2a5   :  { %v7516_v41 = vadd.f32 %v606_v40, %v510_v10 }
 0x2a6   :  { %v610_v42 = vpop.f32.mrf.mxu0 }
 0x2a7   :  { %v7519_v44 = vadd.f32 %v610_v42, %v506_v9 }
 0x2a8   :  { %v612_v0 = vpop.f32.mrf.mxu0 }
 0x2a9   :  { %v746_v49 = vadd.f32 %v744_v43, %v7519_v44  ;;  %v7525_v45 = vadd.f32 %v612_v0, %v510_v10 }
 0x2ab   :  { %v6068_v50 = vmul.f32 -1.442695, %v746_v49  ;;  %v756_v7 = vadd.f32 %v754_v61, %v7525_v45 }
 0x2ad   :  { %6284 = vpow2.f32 %v6068_v50  ;;  %v6069_v8 = vmul.f32 -1.442695, %v756_v7 }
 0x2ae   :  { %v6283_v51 = vpop.eup %6282 }
 0x2af   :  { %v722_v48 = vadd.f32 1.0, %v6283_v51 }
 0x2b1   :  { %6286 = vrcp.f32 %v722_v48 }
 0x2ba   :  { %v6285_v52 = vpop.eup %6284 }
 0x2bb   :  { %v750_v53 = vadd.f32 1.0, %v6285_v52 }
 0x2bd   :  { %6288 = vrcp.f32 %v750_v53 }
 0x2be   :  { %v6287_v47 = vpop.eup %6286 }
 0x2bf   :  { %v729_v57 = vmul.f32 %v6287_v47, %v727_v54  ;;  %v736_v11 = vsub.f32 1.0, %v6287_v47  ;;  %v742_v32 = vmul.f32 0.0, %v6287_v47 }
 0x2c1   :  { %731 = vrot.lane.b32.xlu1 %v729_v57, %s7129_s1 }
 0x2ca   :  { %v6289_v46 = vpop.eup %6288 }
 0x2cb   :  { %v766_v58 = vmul.f32 %v6289_v46, %v764_v59 }
 0x2cd   :  { %768 = vrot.lane.b32.xlu0 %v766_v58, %s7129_s1 }
 0x333   :  { %v732_v62 = vpop.permute.xlu1 %731 }
 0x334   :  { %v734_v63 = vadd.f32 %v732_v62, %v7504_v12 }
 0x336   :  { %6290 = vtanh.f32 %v734_v63 }
 0x33f   :  { %v769_v1 = vpop.permute.xlu0 %768 }
 0x340   :  { %v771_v4 = vadd.f32 %v769_v1, %v7525_v45 }
 0x342   :  { %6292 = vtanh.f32 %v771_v4 }
 0x343   :  { %v6291_v5 = vpop.eup %6290  ;;  %6294 = vpow2.f32 %v6069_v8 }
 0x344   :  { %738 = vrot.lane.b32.xlu1 %v6291_v5, %s7130_s17 }
 0x34f   :  { %v6293_v6 = vpop.eup %6292 }
 0x350   :  { %775 = vrot.lane.b32.xlu0 %v6293_v6, %s7130_s17  ;;  %v6295_v9 = vpop.eup %6294 }
 0x351   :  { %v760_v10 = vadd.f32 1.0, %v6295_v9 }
 0x353   :  { %6296 = vrcp.f32 %v760_v10 }
 0x360   :  { %v6297_v36 = vpop.eup %6296 }
 0x361   :  { %v773_v38 = vsub.f32 1.0, %v6297_v36  ;;  %v779_v42 = vmul.f32 0.0, %v6297_v36 }
 0x3b6   :  { %v739_v30 = vpop.permute.xlu1 %738 }
 0x3b7   :  { %v741_v33 = vmul.f32 %v739_v30, %v736_v11 }
 0x3b9   :  { %v743_v35 = vadd.f32 %v742_v32, %v741_v33 }
 0x3bb   :  { %782 = vrot.lane.b32.xlu0 %v743_v35, %s7130_s17 }
 0x3c2   :  { %v776_v40 = vpop.permute.xlu0 %775 }
 0x3c3   :  { %v778_v43 = vmul.f32 %v776_v40, %v773_v38 }
 0x3c5   :  { %v7534_v49 = vadd.f32 %v779_v42, %v778_v43 }
 0x3c7   :  { %v786_v60 = vrot.slane %v7534_v49, 6 }
 0x3c9   :  { %787 = vrot.lane.b32.xlu1 %v786_v60, %s7131_s11 }
 0x42d   :  { %v7538_v61 = vpop.permute.xlu0 %782 }
 0x43b   :  { %v788_v50 = vpop.permute.xlu1 %787 }
 0x43c   :  { %v790_v51 = vsel %vm513_vm11, %v7538_v61, %v788_v50 }
 0x43d   :  { %6070 = vmatmul.mubr.msk.f32.vlgmr.msra.gmra.mxu0 %vm643_vm13, %v790_v51  ;;  %v932_v30 = vrot.slane %v790_v51, 4  ;;  %v891_v32 = vrot.slane %v790_v51, 6 }
 0x43e   :  { %1126 = vmatpush1.msra.mxu0 %v7298_v14  ;;  %1173 = vmatprep.mubr.f32.mxu0 %v9239_v17 }
 0x43f   :  { %1127 = vmatprep.subr.mxu0 %v7303_v15 }
 0x440   :  { %1128 = vmatpush1.msra.mxu0 %v7309_v16 }
 0x441   :  { %1129 = vmatprep.subr.mxu0 %v7316_v18 }
 0x442   :  { %1130 = vmatpush1.msra.mxu0 %v7323_v19 }
 0x443   :  { %1131 = vmatprep.subr.mxu0 %v7329_v20 }
 0x444   :  { %1132 = vmatpush1.msra.mxu0 %v7335_v21 }
 0x445   :  { %1133 = vmatprep.subr.mxu0 %v7341_v22 }
 0x446   :  { %1134 = vmatpush1.msra.mxu0 %v7347_v23 }
 0x447   :  { %1135 = vmatprep.subr.mxu0 %v7353_v24 }
 0x448   :  { %1136 = vmatpush1.msra.mxu0 %v7359_v25 }
 0x449   :  { %1137 = vmatprep.subr.mxu0 %v7365_v26 }
 0x44a   :  { %1138 = vmatpush1.msra.mxu0 %v7371_v27 }
 0x44b   :  { %1139 = vmatprep.subr.mxu0 %v7377_v28 }
 0x44c   :  { %1140 = vmatpush1.msra.mxu0 %v7383_v29 }
 0x44d   :  { %1431 = vmatprep.subr.mxu0 %v7293_v13 }
 0x4fd   :  { %v860_v48 = vpop.f32.mrf.mxu0 }
 0x4fe   :  { %v861_v52 = vadd.f32 %v860_v48, %v7423_v55 }
 0x4ff   :  { %v862_v53 = vpop.f32.mrf.mxu0 }
 0x500   :  { %v866_v54 = vrot.slane %v861_v52, 6  ;;  %v863_v47 = vadd.f32 %v862_v53, %v7426_v56  ;;  %v897_v46 = vrot.slane %v861_v52, 4 }
 0x502   :  { %v907_v57 = vrot.slane %v863_v47, 4  ;;  %875 = vrot.lane.b32.xlu1 %v866_v54, %s7129_s1  ;;  %v868_v59 = vadd.f32 %v866_v54, %v7504_v12  ;;  %v899_v58 = vadd.f32 %v897_v46, %v7519_v44 }
 0x504   :  { %916 = vrot.lane.b32.xlu0 %v907_v57, %s7129_s1  ;;  %v6071_v62 = vmul.f32 -1.442695, %v868_v59  ;;  %v6072_v63 = vmul.f32 -1.442695, %v899_v58  ;;  %v909_v43 = vadd.f32 %v907_v57, %v7525_v45 }
 0x506   :  { %6298 = vpow2.f32 %v6071_v62  ;;  %v6073_v60 = vmul.f32 -1.442695, %v909_v43 }
 0x507   :  { %6300 = vpow2.f32 %v6072_v63 }
 0x513   :  { %v6299_v0 = vpop.eup %6298 }
 0x514   :  { %v6301_v1 = vpop.eup %6300  ;;  %v872_v4 = vadd.f32 1.0, %v6299_v0 }
 0x515   :  { %v903_v5 = vadd.f32 1.0, %v6301_v1 }
 0x516   :  { %6302 = vrcp.f32 %v872_v4 }
 0x517   :  { %6304 = vrcp.f32 %v903_v5 }
 0x523   :  { %v6303_v6 = vpop.eup %6302 }
 0x524   :  { %v6305_v9 = vpop.eup %6304  ;;  %v885_v62 = vsub.f32 1.0, %v6303_v6 }
 0x574   :  { %v876_v7 = vpop.permute.xlu1 %875 }
 0x575   :  { %v878_v8 = vmul.f32 %v6303_v6, %v876_v7 }
 0x576   :  { %v917_v10 = vpop.permute.xlu0 %916 }
 0x577   :  { %v919_v11 = vmul.f32 %v6305_v9, %v917_v10  ;;  %880 = vrot.lane.b32.xlu1 %v878_v8, %s7129_s1 }
 0x579   :  { %921 = vrot.lane.b32.xlu0 %v919_v11, %s7129_s1 }
 0x57b   :  { %933 = vrot.lane.b32.xlu1 %v932_v30, %s7130_s17 }
 0x57f   :  { %892 = vrot.lane.b32.xlu1 %v891_v32, %s7131_s11 }
 0x5e9   :  { %v881_v33 = vpop.permute.xlu1 %880 }
 0x5ea   :  { %v883_v38 = vadd.f32 %v881_v33, %v7504_v12 }
 0x5eb   :  { %v922_v35 = vpop.permute.xlu0 %921 }
 0x5ec   :  { %v924_v36 = vadd.f32 %v922_v35, %v7525_v45 }
 0x5ed   :  { %v934_v52 = vpop.permute.xlu1 %933 }
 0x5ee   :  { %6306 = vtanh.f32 %v924_v36 }
 0x5ef   :  { %6308 = vtanh.f32 %v883_v38 }
 0x5f0   :  { %6310 = vpow2.f32 %v6073_v60 }
 0x5f1   :  { %v893_v59 = vpop.permute.xlu1 %892 }
 0x5f2   :  { %v895_v0 = vmul.f32 %v6303_v6, %v893_v59 }
 0x5fb   :  { %v6307_v40 = vpop.eup %6306 }
 0x5fc   :  { %928 = vrot.lane.b32.xlu0 %v6307_v40, %s7130_s17  ;;  %v6309_v42 = vpop.eup %6308 }
 0x5fd   :  { %v6311_v50 = vpop.eup %6310 }
 0x5fe   :  { %v913_v51 = vadd.f32 1.0, %v6311_v50 }
 0x600   :  { %887 = vrot.lane.b32.xlu0 %v6309_v42, %s7130_s17  ;;  %6312 = vrcp.f32 %v913_v51 }
 0x60d   :  { %v6313_v48 = vpop.eup %6312 }
 0x60e   :  { %v926_v53 = vsub.f32 1.0, %v6313_v48  ;;  %v936_v47 = vmul.f32 %v6313_v48, %v934_v52 }
 0x66e   :  { %v929_v54 = vpop.permute.xlu0 %928 }
 0x66f   :  { %v931_v46 = vmul.f32 %v929_v54, %v926_v53 }
 0x671   :  { %v7575_v58 = vadd.f32 %v936_v47, %v931_v46 }
 0x672   :  { %v888_v63 = vpop.permute.xlu0 %887 }
 0x673   :  { %v890_v1 = vmul.f32 %v888_v63, %v885_v62  ;;  %v943_v57 = vrot.slane %v7575_v58, 2 }
 0x675   :  { %v896_v4 = vadd.f32 %v895_v0, %v890_v1  ;;  %944 = vrot.lane.b32.xlu1 %v943_v57, %s7131_s11 }
 0x677   :  { %939 = vrot.lane.b32.xlu0 %v896_v4, %s7130_s17 }
 0x6e7   :  { %v945_v5 = vpop.permute.xlu1 %944 }
 0x6e9   :  { %v7580_v7 = vpop.permute.xlu0 %939 }
 0x6ea   :  { %v947_v8 = vsel %vm513_vm11, %v7580_v7, %v945_v5 }
 0x6eb   :  { %v949_v9 = vrot.slane %v947_v8, 2  ;;  %v1049_v59 = vrot.slane %v947_v8, 6 }
 0x6ed   :  { %6074 = vmatmul.mubr.msk.f32.vlgmr.msra.gmra.mxu1 %vm643_vm13, %v949_v9 }
 0x6ee   :  { %1279 = vmatpush1.msra.mxu1 %v7298_v14  ;;  %1326 = vmatprep.mubr.f32.mxu1 %v9239_v17 }
 0x6ef   :  { %1280 = vmatprep.subr.mxu1 %v7303_v15 }
 0x6f0   :  { %1281 = vmatpush1.msra.mxu1 %v7309_v16 }
 0x6f1   :  { %1282 = vmatprep.subr.mxu1 %v7316_v18 }
 0x6f2   :  { %1283 = vmatpush1.msra.mxu1 %v7323_v19 }
 0x6f3   :  { %1284 = vmatprep.subr.mxu1 %v7329_v20 }
 0x6f4   :  { %1285 = vmatpush1.msra.mxu1 %v7335_v21 }
 0x6f5   :  { %1286 = vmatprep.subr.mxu1 %v7341_v22 }
 0x6f6   :  { %1287 = vmatpush1.msra.mxu1 %v7347_v23 }
 0x6f7   :  { %1288 = vmatprep.subr.mxu1 %v7353_v24 }
 0x6f8   :  { %1289 = vmatpush1.msra.mxu1 %v7359_v25 }
 0x6f9   :  { %1290 = vmatprep.subr.mxu1 %v7365_v26 }
 0x6fa   :  { %1291 = vmatpush1.msra.mxu1 %v7371_v27 }
 0x6fb   :  { %1292 = vmatprep.subr.mxu1 %v7377_v28 }
 0x6fc   :  { %1293 = vmatpush1.msra.mxu1 %v7383_v29 }
 0x6fd   :  { %1589 = vmatprep.subr.mxu1 %v7293_v13 }
 0x7ad   :  { %v1018_v6 = vpop.f32.mrf.mxu1 }
 0x7ae   :  { %v1019_v10 = vadd.f32 %v1018_v6, %v7423_v55 }
 0x7af   :  { %v1020_v11 = vpop.f32.mrf.mxu1 }
 0x7b0   :  { %v1024_v30 = vrot.slane %v1019_v10, 4  ;;  %v1021_v32 = vadd.f32 %v1020_v11, %v7426_v56  ;;  %v1055_v35 = vrot.slane %v1019_v10, 6 }
 0x7b2   :  { %v1065_v33 = vrot.slane %v1021_v32, 6  ;;  %1033 = vrot.lane.b32.xlu1 %v1024_v30, %s7129_s1  ;;  %v1026_v36 = vadd.f32 %v1024_v30, %v7504_v12  ;;  %v1057_v38 = vadd.f32 %v1055_v35, %v7519_v44 }
 0x7b4   :  { %1074 = vrot.lane.b32.xlu0 %v1065_v33, %s7129_s1  ;;  %v6075_v40 = vmul.f32 -1.442695, %v1026_v36  ;;  %v6076_v42 = vmul.f32 -1.442695, %v1057_v38  ;;  %v1067_v5 = vadd.f32 %v1065_v33, %v7525_v45 }
 0x7b6   :  { %6314 = vpow2.f32 %v6075_v40  ;;  %v6077_v9 = vmul.f32 -1.442695, %v1067_v5 }
 0x7b7   :  { %6316 = vpow2.f32 %v6076_v42 }
 0x7c3   :  { %v6315_v43 = vpop.eup %6314 }
 0x7c4   :  { %v6317_v60 = vpop.eup %6316  ;;  %v1030_v50 = vadd.f32 1.0, %v6315_v43 }
 0x7c5   :  { %v1061_v51 = vadd.f32 1.0, %v6317_v60 }
 0x7c6   :  { %6318 = vrcp.f32 %v1030_v50 }
 0x7c7   :  { %6320 = vrcp.f32 %v1061_v51 }
 0x7d3   :  { %v6319_v48 = vpop.eup %6318 }
 0x7d4   :  { %v6321_v54 = vpop.eup %6320  ;;  %v1043_v42 = vsub.f32 1.0, %v6319_v48 }
 0x824   :  { %v1034_v52 = vpop.permute.xlu1 %1033 }
 0x825   :  { %v1036_v53 = vmul.f32 %v6319_v48, %v1034_v52 }
 0x826   :  { %v1075_v47 = vpop.permute.xlu0 %1074 }
 0x827   :  { %v1077_v46 = vmul.f32 %v6321_v54, %v1075_v47  ;;  %1038 = vrot.lane.b32.xlu1 %v1036_v53, %s7129_s1 }
 0x829   :  { %1079 = vrot.lane.b32.xlu0 %v1077_v46, %s7129_s1 }
 0x82b   :  { %1090 = vrot.lane.b32.xlu1 %v947_v8, %s7130_s17 }
 0x82f   :  { %1050 = vrot.lane.b32.xlu1 %v1049_v59, %s7131_s11 }
 0x899   :  { %v1039_v62 = vpop.permute.xlu1 %1038 }
 0x89a   :  { %v1041_v1 = vadd.f32 %v1039_v62, %v7504_v12 }
 0x89b   :  { %v1080_v63 = vpop.permute.xlu0 %1079 }
 0x89c   :  { %v1082_v0 = vadd.f32 %v1080_v63, %v7525_v45 }
 0x89d   :  { %v1091_v11 = vpop.permute.xlu1 %1090 }
 0x89e   :  { %6322 = vtanh.f32 %v1082_v0 }
 0x89f   :  { %6324 = vtanh.f32 %v1041_v1 }
 0x8a0   :  { %6326 = vpow2.f32 %v6077_v9 }
 0x8a1   :  { %v1051_v38 = vpop.permute.xlu1 %1050 }
 0x8a2   :  { %v1053_v60 = vmul.f32 %v6319_v48, %v1051_v38 }
 0x8ab   :  { %v6323_v57 = vpop.eup %6322 }
 0x8ac   :  { %1086 = vrot.lane.b32.xlu0 %v6323_v57, %s7130_s17  ;;  %v6325_v4 = vpop.eup %6324 }
 0x8ad   :  { %v6327_v8 = vpop.eup %6326 }
 0x8ae   :  { %v1071_v6 = vadd.f32 1.0, %v6327_v8 }
 0x8b0   :  { %1045 = vrot.lane.b32.xlu0 %v6325_v4, %s7130_s17  ;;  %6328 = vrcp.f32 %v1071_v6 }
 0x8bd   :  { %v6329_v10 = vpop.eup %6328 }
 0x8be   :  { %v1084_v30 = vsub.f32 1.0, %v6329_v10  ;;  %v1093_v35 = vmul.f32 %v6329_v10, %v1091_v11 }
 0x91e   :  { %v1087_v32 = vpop.permute.xlu0 %1086 }
 0x91f   :  { %v1089_v36 = vmul.f32 %v1087_v32, %v1084_v30 }
 0x921   :  { %v7617_v40 = vadd.f32 %v1093_v35, %v1089_v36 }
 0x922   :  { %v1046_v43 = vpop.permute.xlu0 %1045 }
 0x923   :  { %v1048_v50 = vmul.f32 %v1046_v43, %v1043_v42  ;;  %v1100_v33 = vrot.slane %v7617_v40, 6 }
 0x925   :  { %v1054_v51 = vadd.f32 %v1053_v60, %v1048_v50  ;;  %1101 = vrot.lane.b32.xlu1 %v1100_v33, %s7131_s11 }
 0x927   :  { %1096 = vrot.lane.b32.xlu0 %v1054_v51, %s7130_s17 }
 0x997   :  { %v1102_v52 = vpop.permute.xlu1 %1101 }
 0x999   :  { %v7622_v53 = vpop.permute.xlu0 %1096 }
 0x99a   :  { %v1104_v54 = vsel %vm513_vm11, %v7622_v53, %v1102_v52 }
 0x99b   :  { %v1106_v47 = vrot.slane %v1104_v54, 4  ;;  %v1206_v8 = vrot.slane %v1104_v54, 6 }
 0x99d   :  { %6078 = vmatmul.mubr.msk.f32.vlgmr.msra.gmra.mxu0 %vm643_vm13, %v1106_v47 }
 0x99e   :  { %1432 = vmatpush1.msra.mxu0 %v7298_v14  ;;  %1479 = vmatprep.mubr.f32.mxu0 %v9239_v17 }
 0x99f   :  { %1433 = vmatprep.subr.mxu0 %v7303_v15 }
 0x9a0   :  { %1434 = vmatpush1.msra.mxu0 %v7309_v16 }
 0x9a1   :  { %1435 = vmatprep.subr.mxu0 %v7316_v18 }
 0x9a2   :  { %1436 = vmatpush1.msra.mxu0 %v7323_v19 }
 0x9a3   :  { %1437 = vmatprep.subr.mxu0 %v7329_v20 }
 0x9a4   :  { %1438 = vmatpush1.msra.mxu0 %v7335_v21 }
 0x9a5   :  { %1439 = vmatprep.subr.mxu0 %v7341_v22 }
 0x9a6   :  { %1440 = vmatpush1.msra.mxu0 %v7347_v23 }
 0x9a7   :  { %1441 = vmatprep.subr.mxu0 %v7353_v24 }
 0x9a8   :  { %1442 = vmatpush1.msra.mxu0 %v7359_v25 }
 0x9a9   :  { %1443 = vmatprep.subr.mxu0 %v7365_v26 }
 0x9aa   :  { %1444 = vmatpush1.msra.mxu0 %v7371_v27 }
 0x9ab   :  { %1445 = vmatprep.subr.mxu0 %v7377_v28 }
 0x9ac   :  { %1446 = vmatpush1.msra.mxu0 %v7383_v29 }
 0x9ad   :  { %1746 = vmatprep.subr.mxu0 %v7293_v13 }
 0xa5d   :  { %v1175_v14 = vpop.f32.mrf.mxu0 }
 0xa5e   :  { %v1176_v15 = vadd.f32 %v1175_v14, %v7423_v55 }
 0xa5f   :  { %v1177_v16 = vpop.f32.mrf.mxu0 }
 0xa60   :  { %v1181_v18 = vrot.slane %v1176_v15, 2  ;;  %v1178_v19 = vadd.f32 %v1177_v16, %v7426_v56  ;;  %v1212_v20 = vadd.f32 %v1176_v15, %v7519_v44 }
 0xa62   :  { %1227 = vrot.lane.b32.xlu0 %v1178_v19, %s7129_s1  ;;  %1190 = vrot.lane.b32.xlu1 %v1181_v18, %s7129_s1  ;;  %v1183_v21 = vadd.f32 %v1181_v18, %v7504_v12  ;;  %v6080_v48 = vmul.f32 -1.442695, %v1212_v20  ;;  %v1219_v36 = vadd.f32 %v1178_v19, %v7525_v45 }
 0xa64   :  { %v6079_v46 = vmul.f32 -1.442695, %v1183_v21  ;;  %6330 = vpow2.f32 %v6080_v48  ;;  %v6081_v38 = vmul.f32 -1.442695, %v1219_v36 }
 0xa66   :  { %6332 = vpow2.f32 %v6079_v46 }
 0xa71   :  { %v6331_v13 = vpop.eup %6330 }
 0xa72   :  { %v1216_v62 = vadd.f32 1.0, %v6331_v13 }
 0xa73   :  { %v6333_v59 = vpop.eup %6332 }
 0xa74   :  { %v1187_v63 = vadd.f32 1.0, %v6333_v59  ;;  %6334 = vrcp.f32 %v1216_v62  ;;  %v7672_v59 = vld [vmem:[%s9226_s4 + $0x70] sm:$0xff]  ;;  %v7679_v62 = vld [vmem:[%s9226_s4 + $0x68] sm:$0xff] }
 0xa76   :  { %6336 = vrcp.f32 %v1187_v63  ;;  %v7685_v63 = vld [vmem:[%s9226_s4 + $0x60] sm:$0xff] }
 0xa81   :  { %v6335_v0 = vpop.eup %6334 }
 0xa83   :  { %v6337_v1 = vpop.eup %6336 }
 0xa84   :  { %v1200_v15 = vsub.f32 1.0, %v6337_v1 }
 0xad4   :  { %v1228_v57 = vpop.permute.xlu0 %1227  ;;  %v1191_v4 = vpop.permute.xlu1 %1190 }
 0xad5   :  { %v1230_v5 = vmul.f32 %v6335_v0, %v1228_v57  ;;  %v1193_v9 = vmul.f32 %v6337_v1, %v1191_v4  ;;  %v7691_v0 = vld [vmem:[%s9226_s4 + $0x58] sm:$0xff]  ;;  %v7703_v57 = vld [vmem:[%s9226_s4 + $0x48] sm:$0xff]  ;;  %v7709_v4 = vld [vmem:[%s9226_s4 + $0x40] sm:$0xff] }
 0xad7   :  { %1232 = vrot.lane.b32.xlu0 %v1230_v5, %s7129_s1  ;;  %1195 = vrot.lane.b32.xlu1 %v1193_v9, %s7129_s1  ;;  %v7723_v5 = vld [vmem:[%s9226_s4 + $0x78] sm:$0xff] }
 0xadb   :  { %1243 = vrot.lane.b32.xlu1 %v1106_v47, %s7130_s17 }
 0xadf   :  { %1207 = vrot.lane.b32.xlu1 %v1206_v8, %s7131_s11 }
 0xb49   :  { %v1233_v6 = vpop.permute.xlu0 %1232  ;;  %v1196_v10 = vpop.permute.xlu1 %1195 }
 0xb4a   :  { %v1235_v11 = vadd.f32 %v1233_v6, %v7525_v45  ;;  %v1198_v30 = vadd.f32 %v1196_v10, %v7504_v12 }
 0xb4c   :  { %6338 = vtanh.f32 %v1235_v11 }
 0xb4d   :  { %6340 = vtanh.f32 %v1198_v30  ;;  %v1244_v50 = vpop.permute.xlu1 %1243 }
 0xb4e   :  { %6342 = vpow2.f32 %v6081_v38 }
 0xb51   :  { %v1208_v47 = vpop.permute.xlu1 %1207 }
 0xb52   :  { %v1210_v18 = vmul.f32 %v6337_v1, %v1208_v47  ;;  %v7697_v1 = vld [vmem:[%s9226_s4 + $0x50] sm:$0xff] }
 0xb59   :  { %v6339_v32 = vpop.eup %6338 }
 0xb5a   :  { %1239 = vrot.lane.b32.xlu0 %v6339_v32, %s7130_s17  ;;  %v6341_v35 = vpop.eup %6340 }
 0xb5b   :  { %v6343_v42 = vpop.eup %6342 }
 0xb5c   :  { %v1223_v43 = vadd.f32 1.0, %v6343_v42 }
 0xb5e   :  { %1202 = vrot.lane.b32.xlu0 %v6341_v35, %s7130_s17  ;;  %6344 = vrcp.f32 %v1223_v43 }
 0xb6b   :  { %v6345_v60 = vpop.eup %6344 }
 0xb6c   :  { %v1237_v33 = vsub.f32 1.0, %v6345_v60  ;;  %v1246_v52 = vmul.f32 %v6345_v60, %v1244_v50 }
 0xbcc   :  { %v1240_v51 = vpop.permute.xlu0 %1239 }
 0xbcd   :  { %v1242_v54 = vmul.f32 %v1240_v51, %v1237_v33 }
 0xbcf   :  { %v7659_v14 = vadd.f32 %v1246_v52, %v1242_v54 }
 0xbd0   :  { %v1203_v16 = vpop.permute.xlu0 %1202 }
 0xbd1   :  { %v1205_v20 = vmul.f32 %v1203_v16, %v1200_v15  ;;  %v1253_v45 = vrot.slane %v7659_v14, 2 }
 0xbd3   :  { %v1211_v19 = vadd.f32 %v1210_v18, %v1205_v20  ;;  %1254 = vrot.lane.b32.xlu1 %v1253_v45, %s7131_s11 }
 0xbd5   :  { %1249 = vrot.lane.b32.xlu0 %v1211_v19, %s7130_s17 }
 0xc45   :  { %v1255_v21 = vpop.permute.xlu1 %1254 }
 0xc47   :  { %v7664_v48 = vpop.permute.xlu0 %1249 }
 0xc48   :  { %v1257_v46 = vsel %vm513_vm11, %v7664_v48, %v1255_v21 }
 0xc49   :  { %v1259_v13 = vrot.slane %v1257_v46, 6 }
 0xc4b   :  { %6082 = vmatmul.mubr.msk.f32.vlgmr.msra.gmra.mxu1 %vm643_vm13, %v1259_v13 }
 0xc4c   :  { %1590 = vmatpush1.msra.mxu1 %v7672_v59  ;;  %1637 = vmatprep.mubr.f32.mxu1 %v9239_v17 }
 0xc4d   :  { %1591 = vmatprep.subr.mxu1 %v7679_v62 }
 0xc4e   :  { %1592 = vmatpush1.msra.mxu1 %v7685_v63 }
 0xc4f   :  { %1593 = vmatprep.subr.mxu1 %v7691_v0 }
 0xc50   :  { %1594 = vmatpush1.msra.mxu1 %v7697_v1 }
 0xc51   :  { %1595 = vmatprep.subr.mxu1 %v7703_v57 }
 0xc52   :  { %1596 = vmatpush1.msra.mxu1 %v7709_v4 }
 0xc53   :  { %1597 = vmatprep.subr.mxu1 %v7341_v22 }
 0xc54   :  { %1598 = vmatpush1.msra.mxu1 %v7347_v23 }
 0xc55   :  { %1599 = vmatprep.subr.mxu1 %v7353_v24 }
 0xc56   :  { %1600 = vmatpush1.msra.mxu1 %v7359_v25 }
 0xc57   :  { %1601 = vmatprep.subr.mxu1 %v7365_v26 }
 0xc58   :  { %1602 = vmatpush1.msra.mxu1 %v7371_v27 }
 0xc59   :  { %1603 = vmatprep.subr.mxu1 %v7377_v28 }
 0xc5a   :  { %1604 = vmatpush1.msra.mxu1 %v7383_v29 }
 0xc5b   :  { %1899 = vmatprep.subr.mxu1 %v7723_v5 }
 0xd0b   :  { %v1328_v22 = vpop.f32.mrf.mxu1 }
 0xd0c   :  { %v1329_v23 = vadd.f32 %v1328_v22, %v7423_v55 }
 0xd0d   :  { %v1330_v24 = vpop.f32.mrf.mxu1 }
 0xd0e   :  { %v1331_v25 = vadd.f32 %v1330_v24, %v7426_v56  ;;  %1341 = vrot.lane.b32.xlu1 %v1329_v23, %s7129_s1  ;;  %v1333_v27 = vadd.f32 %v1329_v23, %v7510_v34  ;;  %v1362_v28 = vrot.slane %v1329_v23, 2 }
 0xd10   :  { %v1372_v26 = vrot.slane %v1331_v25, 2  ;;  %v6083_v29 = vmul.f32 -1.442695, %v1333_v27  ;;  %v1364_v9 = vadd.f32 %v1362_v28, %v7514_v39 }
 0xd12   :  { %1381 = vrot.lane.b32.xlu0 %v1372_v26, %s7129_s1  ;;  %6346 = vpow2.f32 %v6083_v29  ;;  %v6084_v8 = vmul.f32 -1.442695, %v1364_v9  ;;  %v1374_v47 = vadd.f32 %v1372_v26, %v7516_v41 }
 0xd14   :  { %6348 = vpow2.f32 %v6084_v8  ;;  %v6085_v15 = vmul.f32 -1.442695, %v1374_v47 }
 0xd1f   :  { %v6347_v6 = vpop.eup %6346 }
 0xd20   :  { %v1337_v10 = vadd.f32 1.0, %v6347_v6 }
 0xd21   :  { %v6349_v11 = vpop.eup %6348 }
 0xd22   :  { %6350 = vrcp.f32 %v1337_v10  ;;  %v1368_v30 = vadd.f32 1.0, %v6349_v11  ;;  %v7762_v10 = vld [vmem:[%s9226_s4 + $0x38] sm:$0xff]  ;;  %v7768_v11 = vld [vmem:[%s9226_s4 + $0x30] sm:$0xff] }
 0xd24   :  { %6352 = vrcp.f32 %v1368_v30  ;;  %v7774_v30 = vld [vmem:[%s9226_s4 + $0x28] sm:$0xff] }
 0xd2f   :  { %v6351_v32 = vpop.eup %6350 }
 0xd30   :  { %v1351_v24 = vsub.f32 1.0, %v6351_v32 }
 0xd31   :  { %v6353_v38 = vpop.eup %6352 }
 0xd80   :  { %v1342_v35 = vpop.permute.xlu1 %1341 }
 0xd81   :  { %v1344_v36 = vmul.f32 %v6351_v32, %v1342_v35  ;;  %v7786_v35 = vld [vmem:[%s9226_s4 + $0x18] sm:$0xff] }
 0xd83   :  { %1346 = vrot.lane.b32.xlu1 %v1344_v36, %s7129_s1  ;;  %v7792_v36 = vld [vmem:[%s9226_s4 + $0x10] sm:$0xff] }
 0xd84   :  { %v1382_v42 = vpop.permute.xlu0 %1381 }
 0xd85   :  { %v1384_v43 = vmul.f32 %v6353_v38, %v1382_v42  ;;  %v7798_v38 = vld [vmem:[%s9226_s4 + $0x8] sm:$0xff]  ;;  %v7804_v42 = vld [vmem:[%s9226_s4] sm:$0xff] }
 0xd87   :  { %1386 = vrot.lane.b32.xlu0 %v1384_v43, %s7129_s1  ;;  %1397 = vrot.lane.b32.xlu1 %v1257_v46, %s7130_s17 }
 0xd8b   :  { %1357 = vrot.lane.b32.xlu1 %v1259_v13, %s7131_s11 }
 0xdf5   :  { %v1347_v60 = vpop.permute.xlu1 %1346 }
 0xdf6   :  { %v1349_v51 = vadd.f32 %v1347_v60, %v7510_v34 }
 0xdf9   :  { %v1387_v50 = vpop.permute.xlu0 %1386  ;;  %v1398_v45 = vpop.permute.xlu1 %1397 }
 0xdfa   :  { %v1389_v33 = vadd.f32 %v1387_v50, %v7516_v41 }
 0xdfc   :  { %6354 = vtanh.f32 %v1389_v33 }
 0xdfd   :  { %6356 = vtanh.f32 %v1349_v51  ;;  %v1358_v22 = vpop.permute.xlu1 %1357 }
 0xdfe   :  { %6358 = vpow2.f32 %v6085_v15  ;;  %v1360_v27 = vmul.f32 %v6351_v32, %v1358_v22  ;;  %v7780_v32 = vld [vmem:[%s9226_s4 + $0x20] sm:$0xff] }
 0xe09   :  { %v6355_v52 = vpop.eup %6354 }
 0xe0a   :  { %1393 = vrot.lane.b32.xlu0 %v6355_v52, %s7130_s17  ;;  %v6357_v54 = vpop.eup %6356 }
 0xe0b   :  { %v6359_v16 = vpop.eup %6358 }
 0xe0c   :  { %v1378_v18 = vadd.f32 1.0, %v6359_v16 }
 0xe0e   :  { %1353 = vrot.lane.b32.xlu0 %v6357_v54, %s7130_s17  ;;  %6360 = vrcp.f32 %v1378_v18 }
 0xe1b   :  { %v6361_v20 = vpop.eup %6360 }
 0xe1c   :  { %v1391_v19 = vsub.f32 1.0, %v6361_v20  ;;  %v1400_v46 = vmul.f32 %v6361_v20, %v1398_v45 }
 0xe7c   :  { %v1394_v21 = vpop.permute.xlu0 %1393 }
 0xe7d   :  { %v1396_v13 = vmul.f32 %v1394_v21, %v1391_v19 }
 0xe7f   :  { %v7741_v23 = vadd.f32 %v1400_v46, %v1396_v13 }
 0xe80   :  { %v1354_v25 = vpop.permute.xlu0 %1353 }
 0xe81   :  { %v1356_v28 = vmul.f32 %v1354_v25, %v1351_v24  ;;  %v1407_v26 = vrot.slane %v7741_v23, 6 }
 0xe83   :  { %v1361_v29 = vadd.f32 %v1360_v27, %v1356_v28  ;;  %1408 = vrot.lane.b32.xlu1 %v1407_v26, %s7131_s11 }
 0xe85   :  { %1403 = vrot.lane.b32.xlu0 %v1361_v29, %s7130_s17 }
 0xef5   :  { %v1409_v9 = vpop.permute.xlu1 %1408 }
 0xef7   :  { %v7746_v8 = vpop.permute.xlu0 %1403 }
 0xef8   :  { %v1411_v6 = vsel %vm513_vm11, %v7746_v8, %v1409_v9 }
 0xef9   :  { %6086 = vmatmul.mubr.msk.f32.vlgmr.msra.gmra.mxu0 %vm643_vm13, %v1411_v6  ;;  %v1553_v28 = vrot.slane %v1411_v6, 4  ;;  %v1512_v26 = vrot.slane %v1411_v6, 6 }
 0xefa   :  { %1747 = vmatpush1.msra.mxu0 %v7672_v59  ;;  %1794 = vmatprep.mubr.f32.mxu0 %v9239_v17 }
 0xefb   :  { %1748 = vmatprep.subr.mxu0 %v7679_v62 }
 0xefc   :  { %1749 = vmatpush1.msra.mxu0 %v7685_v63 }
 0xefd   :  { %1750 = vmatprep.subr.mxu0 %v7691_v0 }
 0xefe   :  { %1751 = vmatpush1.msra.mxu0 %v7697_v1 }
 0xeff   :  { %1752 = vmatprep.subr.mxu0 %v7703_v57 }
 0xf00   :  { %1753 = vmatpush1.msra.mxu0 %v7709_v4 }
 0xf01   :  { %1754 = vmatprep.subr.mxu0 %v7762_v10 }
 0xf02   :  { %1755 = vmatpush1.msra.mxu0 %v7768_v11 }
 0xf03   :  { %1756 = vmatprep.subr.mxu0 %v7774_v30 }
 0xf04   :  { %1757 = vmatpush1.msra.mxu0 %v7780_v32 }
 0xf05   :  { %1758 = vmatprep.subr.mxu0 %v7786_v35 }
 0xf06   :  { %1759 = vmatpush1.msra.mxu0 %v7792_v36 }
 0xf07   :  { %1760 = vmatprep.subr.mxu0 %v7798_v38 }
 0xf08   :  { %1761 = vmatpush1.msra.mxu0 %v7804_v42 }
 0xf09   :  { %2052 = vmatprep.subr.mxu0 %v7723_v5 }
 0xfb9   :  { %v1481_v43 = vpop.f32.mrf.mxu0 }
 0xfba   :  { %v1482_v60 = vadd.f32 %v1481_v43, %v7423_v55 }
 0xfbb   :  { %v1483_v50 = vpop.f32.mrf.mxu0 }
 0xfbc   :  { %v1487_v33 = vrot.slane %v1482_v60, 6  ;;  %v1484_v51 = vadd.f32 %v1483_v50, %v7426_v56  ;;  %v1518_v54 = vrot.slane %v1482_v60, 4 }
 0xfbe   :  { %v1528_v52 = vrot.slane %v1484_v51, 4  ;;  %1496 = vrot.lane.b32.xlu1 %v1487_v33, %s7129_s1  ;;  %v1489_v47 = vadd.f32 %v1487_v33, %v7510_v34  ;;  %v1520_v15 = vadd.f32 %v1518_v54, %v7514_v39 }
 0xfc0   :  { %1537 = vrot.lane.b32.xlu0 %v1528_v52, %s7129_s1  ;;  %v6087_v16 = vmul.f32 -1.442695, %v1489_v47  ;;  %v6088_v18 = vmul.f32 -1.442695, %v1520_v15  ;;  %v1530_v51 = vadd.f32 %v1528_v52, %v7516_v41 }
 0xfc2   :  { %6362 = vpow2.f32 %v6087_v16  ;;  %v6089_v54 = vmul.f32 -1.442695, %v1530_v51 }
 0xfc3   :  { %6364 = vpow2.f32 %v6088_v18 }
 0xfcf   :  { %v6363_v20 = vpop.eup %6362 }
 0xfd0   :  { %v6365_v45 = vpop.eup %6364  ;;  %v1493_v19 = vadd.f32 1.0, %v6363_v20 }
 0xfd1   :  { %v1524_v21 = vadd.f32 1.0, %v6365_v45 }
 0xfd2   :  { %6366 = vrcp.f32 %v1493_v19 }
 0xfd3   :  { %6368 = vrcp.f32 %v1524_v21 }
 0xfdf   :  { %v6367_v46 = vpop.eup %6366 }
 0xfe0   :  { %v6369_v24 = vpop.eup %6368 }
0x1030   :  { %v1497_v13 = vpop.permute.xlu1 %1496 }
0x1031   :  { %v1499_v22 = vmul.f32 %v6367_v46, %v1497_v13 }
0x1032   :  { %v1538_v25 = vpop.permute.xlu0 %1537 }
0x1033   :  { %v1540_v27 = vmul.f32 %v6369_v24, %v1538_v25  ;;  %1501 = vrot.lane.b32.xlu1 %v1499_v22, %s7129_s1  ;;  %v1506_v22 = vsub.f32 1.0, %v6367_v46 }
0x1035   :  { %1542 = vrot.lane.b32.xlu0 %v1540_v27, %s7129_s1 }
0x1037   :  { %1554 = vrot.lane.b32.xlu1 %v1553_v28, %s7130_s17 }
0x103b   :  { %1513 = vrot.lane.b32.xlu1 %v1512_v26, %s7131_s11 }
0x10a5   :  { %v1502_v29 = vpop.permute.xlu1 %1501 }
0x10a6   :  { %v1504_v60 = vadd.f32 %v1502_v29, %v7510_v34 }
0x10a7   :  { %v1543_v9 = vpop.permute.xlu0 %1542 }
0x10a8   :  { %v1545_v43 = vadd.f32 %v1543_v9, %v7516_v41 }
0x10a9   :  { %v1555_v16 = vpop.permute.xlu1 %1554 }
0x10aa   :  { %6370 = vtanh.f32 %v1545_v43 }
0x10ab   :  { %6372 = vtanh.f32 %v1504_v60 }
0x10ac   :  { %6374 = vpow2.f32 %v6089_v54 }
0x10ad   :  { %v1514_v21 = vpop.permute.xlu1 %1513 }
0x10ae   :  { %v1516_v25 = vmul.f32 %v6367_v46, %v1514_v21 }
0x10b7   :  { %v6371_v50 = vpop.eup %6370 }
0x10b8   :  { %1549 = vrot.lane.b32.xlu0 %v6371_v50, %s7130_s17  ;;  %v6373_v33 = vpop.eup %6372 }
0x10b9   :  { %v6375_v6 = vpop.eup %6374 }
0x10ba   :  { %v1534_v47 = vadd.f32 1.0, %v6375_v6 }
0x10bc   :  { %1508 = vrot.lane.b32.xlu0 %v6373_v33, %s7130_s17  ;;  %6376 = vrcp.f32 %v1534_v47 }
0x10c9   :  { %v6377_v15 = vpop.eup %6376 }
0x10ca   :  { %v1547_v18 = vsub.f32 1.0, %v6377_v15  ;;  %v1557_v45 = vmul.f32 %v6377_v15, %v1555_v16 }
0x112a   :  { %v1550_v20 = vpop.permute.xlu0 %1549 }
0x112b   :  { %v1552_v19 = vmul.f32 %v1550_v20, %v1547_v18 }
0x112d   :  { %v7823_v13 = vadd.f32 %v1557_v45, %v1552_v19 }
0x112e   :  { %v1509_v24 = vpop.permute.xlu0 %1508 }
0x112f   :  { %v1511_v27 = vmul.f32 %v1509_v24, %v1506_v22  ;;  %v1564_v52 = vrot.slane %v7823_v13, 2 }
0x1131   :  { %v1517_v28 = vadd.f32 %v1516_v25, %v1511_v27  ;;  %1565 = vrot.lane.b32.xlu1 %v1564_v52, %s7131_s11 }
0x1133   :  { %1560 = vrot.lane.b32.xlu0 %v1517_v28, %s7130_s17 }
0x11a3   :  { %v1566_v26 = vpop.permute.xlu1 %1565 }
0x11a5   :  { %v7828_v29 = vpop.permute.xlu0 %1560 }
0x11a6   :  { %v1568_v9 = vsel %vm513_vm11, %v7828_v29, %v1566_v26 }
0x11a7   :  { %v1570_v43 = vrot.slane %v1568_v9, 2  ;;  %v1670_v26 = vrot.slane %v1568_v9, 6 }
0x11a9   :  { %6090 = vmatmul.mubr.msk.f32.vlgmr.msra.gmra.mxu1 %vm643_vm13, %v1570_v43 }
0x11aa   :  { %1900 = vmatpush1.msra.mxu1 %v7672_v59  ;;  %1947 = vmatprep.mubr.f32.mxu1 %v9239_v17 }
0x11ab   :  { %1901 = vmatprep.subr.mxu1 %v7679_v62 }
0x11ac   :  { %1902 = vmatpush1.msra.mxu1 %v7685_v63 }
0x11ad   :  { %1903 = vmatprep.subr.mxu1 %v7691_v0 }
0x11ae   :  { %1904 = vmatpush1.msra.mxu1 %v7697_v1 }
0x11af   :  { %1905 = vmatprep.subr.mxu1 %v7703_v57 }
0x11b0   :  { %1906 = vmatpush1.msra.mxu1 %v7709_v4 }
0x11b1   :  { %1907 = vmatprep.subr.mxu1 %v7762_v10 }
0x11b2   :  { %1908 = vmatpush1.msra.mxu1 %v7768_v11 }
0x11b3   :  { %1909 = vmatprep.subr.mxu1 %v7774_v30 }
0x11b4   :  { %1910 = vmatpush1.msra.mxu1 %v7780_v32 }
0x11b5   :  { %1911 = vmatprep.subr.mxu1 %v7786_v35 }
0x11b6   :  { %1912 = vmatpush1.msra.mxu1 %v7792_v36 }
0x11b7   :  { %1913 = vmatprep.subr.mxu1 %v7798_v38 }
0x11b8   :  { %1914 = vmatpush1.msra.mxu1 %v7804_v42 }
0x11b9   :  { %2210 = vmatprep.subr.mxu1 %v7723_v5 }
0x1269   :  { %v1639_v46 = vpop.f32.mrf.mxu1 }
0x126a   :  { %v1640_v60 = vadd.f32 %v1639_v46, %v7423_v55 }
0x126b   :  { %v1641_v50 = vpop.f32.mrf.mxu1 }
0x126c   :  { %v1645_v33 = vrot.slane %v1640_v60, 4  ;;  %v1642_v51 = vadd.f32 %v1641_v50, %v7426_v56  ;;  %v1676_v6 = vrot.slane %v1640_v60, 6 }
0x126e   :  { %v1686_v54 = vrot.slane %v1642_v51, 6  ;;  %1654 = vrot.lane.b32.xlu1 %v1645_v33, %s7129_s1  ;;  %v1647_v47 = vadd.f32 %v1645_v33, %v7510_v34  ;;  %v1678_v15 = vadd.f32 %v1676_v6, %v7514_v39 }
0x1270   :  { %1695 = vrot.lane.b32.xlu0 %v1686_v54, %s7129_s1  ;;  %v6091_v16 = vmul.f32 -1.442695, %v1647_v47  ;;  %v6092_v18 = vmul.f32 -1.442695, %v1678_v15  ;;  %v1688_v6 = vadd.f32 %v1686_v54, %v7516_v41 }
0x1272   :  { %6378 = vpow2.f32 %v6091_v16  ;;  %v6093_v47 = vmul.f32 -1.442695, %v1688_v6 }
0x1273   :  { %6380 = vpow2.f32 %v6092_v18 }
0x127f   :  { %v6379_v20 = vpop.eup %6378 }
0x1280   :  { %v6381_v45 = vpop.eup %6380  ;;  %v1651_v19 = vadd.f32 1.0, %v6379_v20 }
0x1281   :  { %v1682_v21 = vadd.f32 1.0, %v6381_v45 }
0x1282   :  { %6382 = vrcp.f32 %v1651_v19 }
0x1283   :  { %6384 = vrcp.f32 %v1682_v21 }
0x128f   :  { %v6383_v22 = vpop.eup %6382 }
0x1290   :  { %v6385_v27 = vpop.eup %6384 }
0x12e0   :  { %v1655_v24 = vpop.permute.xlu1 %1654 }
0x12e1   :  { %v1657_v25 = vmul.f32 %v6383_v22, %v1655_v24 }
0x12e2   :  { %v1696_v52 = vpop.permute.xlu0 %1695 }
0x12e3   :  { %v1698_v28 = vmul.f32 %v6385_v27, %v1696_v52  ;;  %1659 = vrot.lane.b32.xlu1 %v1657_v25, %s7129_s1  ;;  %v1664_v27 = vsub.f32 1.0, %v6383_v22 }
0x12e5   :  { %1700 = vrot.lane.b32.xlu0 %v1698_v28, %s7129_s1 }
0x12e7   :  { %1711 = vrot.lane.b32.xlu1 %v1568_v9, %s7130_s17 }
0x12eb   :  { %1671 = vrot.lane.b32.xlu1 %v1670_v26, %s7131_s11 }
0x1355   :  { %v1660_v43 = vpop.permute.xlu1 %1659 }
0x1356   :  { %v1662_v50 = vadd.f32 %v1660_v43, %v7510_v34 }
0x1357   :  { %v1701_v46 = vpop.permute.xlu0 %1700 }
0x1358   :  { %v1703_v60 = vadd.f32 %v1701_v46, %v7516_v41 }
0x1359   :  { %v1712_v18 = vpop.permute.xlu1 %1711 }
0x135a   :  { %6386 = vtanh.f32 %v1703_v60 }
0x135b   :  { %6388 = vtanh.f32 %v1662_v50 }
0x135c   :  { %6390 = vpow2.f32 %v6093_v47 }
0x135d   :  { %v1672_v24 = vpop.permute.xlu1 %1671 }
0x135e   :  { %v1674_v28 = vmul.f32 %v6383_v22, %v1672_v24 }
0x1367   :  { %v6387_v33 = vpop.eup %6386 }
0x1368   :  { %1707 = vrot.lane.b32.xlu0 %v6387_v33, %s7130_s17  ;;  %v6389_v51 = vpop.eup %6388 }
0x1369   :  { %v6391_v9 = vpop.eup %6390 }
0x136a   :  { %v1692_v15 = vadd.f32 1.0, %v6391_v9 }
0x136c   :  { %1666 = vrot.lane.b32.xlu0 %v6389_v51, %s7130_s17  ;;  %6392 = vrcp.f32 %v1692_v15 }
0x1379   :  { %v6393_v16 = vpop.eup %6392 }
0x137a   :  { %v1705_v20 = vsub.f32 1.0, %v6393_v16  ;;  %v1714_v19 = vmul.f32 %v6393_v16, %v1712_v18 }
0x13da   :  { %v1708_v45 = vpop.permute.xlu0 %1707 }
0x13db   :  { %v1710_v21 = vmul.f32 %v1708_v45, %v1705_v20 }
0x13dd   :  { %v7865_v25 = vadd.f32 %v1714_v19, %v1710_v21 }
0x13de   :  { %v1667_v52 = vpop.permute.xlu0 %1666 }
0x13df   :  { %v1669_v26 = vmul.f32 %v1667_v52, %v1664_v27  ;;  %v1721_v54 = vrot.slane %v7865_v25, 6 }
0x13e1   :  { %v1675_v43 = vadd.f32 %v1674_v28, %v1669_v26  ;;  %1722 = vrot.lane.b32.xlu1 %v1721_v54, %s7131_s11 }
0x13e3   :  { %1717 = vrot.lane.b32.xlu0 %v1675_v43, %s7130_s17 }
0x1453   :  { %v1723_v46 = vpop.permute.xlu1 %1722 }
0x1455   :  { %v7870_v60 = vpop.permute.xlu0 %1717 }
0x1456   :  { %v1725_v50 = vsel %vm513_vm11, %v7870_v60, %v1723_v46 }
0x1457   :  { %v1727_v33 = vrot.slane %v1725_v50, 4  ;;  %v1827_v46 = vrot.slane %v1725_v50, 6 }
0x1459   :  { %6094 = vmatmul.mubr.msk.f32.vlgmr.msra.gmra.mxu0 %vm643_vm13, %v1727_v33 }
0x145a   :  { %2053 = vmatpush1.msra.mxu0 %v7672_v59  ;;  %2100 = vmatprep.mubr.f32.mxu0 %v9239_v17 }
0x145b   :  { %2054 = vmatprep.subr.mxu0 %v7679_v62 }
0x145c   :  { %2055 = vmatpush1.msra.mxu0 %v7685_v63 }
0x145d   :  { %2056 = vmatprep.subr.mxu0 %v7691_v0 }
0x145e   :  { %2057 = vmatpush1.msra.mxu0 %v7697_v1 }
0x145f   :  { %2058 = vmatprep.subr.mxu0 %v7703_v57 }
0x1460   :  { %2059 = vmatpush1.msra.mxu0 %v7709_v4 }
0x1461   :  { %2060 = vmatprep.subr.mxu0 %v7762_v10 }
0x1462   :  { %2061 = vmatpush1.msra.mxu0 %v7768_v11 }
0x1463   :  { %2062 = vmatprep.subr.mxu0 %v7774_v30 }
0x1464   :  { %2063 = vmatpush1.msra.mxu0 %v7780_v32 }
0x1465   :  { %2064 = vmatprep.subr.mxu0 %v7786_v35 }
0x1466   :  { %2065 = vmatpush1.msra.mxu0 %v7792_v36 }
0x1467   :  { %2066 = vmatprep.subr.mxu0 %v7798_v38 }
0x1468   :  { %2067 = vmatpush1.msra.mxu0 %v7804_v42 }
0x1469   :  { %2367 = vmatprep.subr.mxu0 %v7723_v5 }
0x1519   :  { %v1796_v22 = vpop.f32.mrf.mxu0 }
0x151a   :  { %v1797_v51 = vadd.f32 %v1796_v22, %v7423_v55 }
0x151b   :  { %v1798_v6 = vpop.f32.mrf.mxu0 }
0x151c   :  { %v1802_v47 = vrot.slane %v1797_v51, 2  ;;  %v1799_v9 = vadd.f32 %v1798_v6, %v7426_v56  ;;  %v1833_v15 = vadd.f32 %v1797_v51, %v7514_v39 }
0x151e   :  { %1848 = vrot.lane.b32.xlu0 %v1799_v9, %s7129_s1  ;;  %1811 = vrot.lane.b32.xlu1 %v1802_v47, %s7129_s1  ;;  %v1804_v16 = vadd.f32 %v1802_v47, %v7510_v34  ;;  %v6096_v18 = vmul.f32 -1.442695, %v1833_v15 }
0x1520   :  { %v6095_v20 = vmul.f32 -1.442695, %v1804_v16  ;;  %6394 = vpow2.f32 %v6096_v18  ;;  %v1840_v18 = vadd.f32 %v1799_v9, %v7516_v41 }
0x1522   :  { %6396 = vpow2.f32 %v6095_v20 }
0x152d   :  { %v6395_v45 = vpop.eup %6394 }
0x152e   :  { %v1837_v21 = vadd.f32 1.0, %v6395_v45 }
0x152f   :  { %v6397_v19 = vpop.eup %6396 }
0x1530   :  { %v1808_v24 = vadd.f32 1.0, %v6397_v19  ;;  %6398 = vrcp.f32 %v1837_v21 }
0x1532   :  { %6400 = vrcp.f32 %v1808_v24 }
0x153d   :  { %v6399_v27 = vpop.eup %6398 }
0x153f   :  { %v6401_v52 = vpop.eup %6400 }
0x1590   :  { %v1849_v28 = vpop.permute.xlu0 %1848  ;;  %v1812_v26 = vpop.permute.xlu1 %1811 }
0x1591   :  { %v1851_v54 = vmul.f32 %v6399_v27, %v1849_v28  ;;  %v1814_v43 = vmul.f32 %v6401_v52, %v1812_v26 }
0x1593   :  { %1853 = vrot.lane.b32.xlu0 %v1851_v54, %s7129_s1  ;;  %1816 = vrot.lane.b32.xlu1 %v1814_v43, %s7129_s1  ;;  %v1821_v43 = vsub.f32 1.0, %v6401_v52 }
0x1597   :  { %1864 = vrot.lane.b32.xlu1 %v1727_v33, %s7130_s17  ;;  %v6097_v33 = vmul.f32 -1.442695, %v1840_v18 }
0x159b   :  { %1828 = vrot.lane.b32.xlu1 %v1827_v46, %s7131_s11 }
0x1605   :  { %v1854_v22 = vpop.permute.xlu0 %1853  ;;  %v1817_v51 = vpop.permute.xlu1 %1816 }
0x1606   :  { %v1856_v6 = vadd.f32 %v1854_v22, %v7516_v41  ;;  %v1819_v47 = vadd.f32 %v1817_v51, %v7510_v34 }
0x1608   :  { %6402 = vtanh.f32 %v1856_v6 }
0x1609   :  { %6404 = vtanh.f32 %v1819_v47  ;;  %v1865_v19 = vpop.permute.xlu1 %1864 }
0x160a   :  { %6406 = vpow2.f32 %v6097_v33 }
0x160d   :  { %v1829_v26 = vpop.permute.xlu1 %1828 }
0x160e   :  { %v1831_v22 = vmul.f32 %v6401_v52, %v1829_v26 }
0x1615   :  { %v6403_v15 = vpop.eup %6402 }
0x1616   :  { %1860 = vrot.lane.b32.xlu0 %v6403_v15, %s7130_s17  ;;  %v6405_v16 = vpop.eup %6404 }
0x1617   :  { %v6407_v50 = vpop.eup %6406 }
0x1618   :  { %v1844_v20 = vadd.f32 1.0, %v6407_v50 }
0x161a   :  { %1823 = vrot.lane.b32.xlu0 %v6405_v16, %s7130_s17  ;;  %6408 = vrcp.f32 %v1844_v20 }
0x1627   :  { %v6409_v45 = vpop.eup %6408 }
0x1628   :  { %v1858_v21 = vsub.f32 1.0, %v6409_v45  ;;  %v1867_v27 = vmul.f32 %v6409_v45, %v1865_v19 }
0x1688   :  { %v1861_v24 = vpop.permute.xlu0 %1860 }
0x1689   :  { %v1863_v28 = vmul.f32 %v1861_v24, %v1858_v21 }
0x168b   :  { %v7907_v54 = vadd.f32 %v1867_v27, %v1863_v28 }
0x168c   :  { %v1824_v46 = vpop.permute.xlu0 %1823 }
0x168d   :  { %v1826_v51 = vmul.f32 %v1824_v46, %v1821_v43  ;;  %v1874_v41 = vrot.slane %v7907_v54, 2 }
0x168f   :  { %v1832_v9 = vadd.f32 %v1831_v22, %v1826_v51  ;;  %1875 = vrot.lane.b32.xlu1 %v1874_v41, %s7131_s11 }
0x1691   :  { %1870 = vrot.lane.b32.xlu0 %v1832_v9, %s7130_s17 }
0x1701   :  { %v1876_v6 = vpop.permute.xlu1 %1875 }
0x1703   :  { %v7912_v47 = vpop.permute.xlu0 %1870 }
0x1704   :  { %9245 = vst [vmem:[#allocation28_spill] sm:$0xff] %v7912_v47  ;;  %v1878_v15 = vsel %vm513_vm11, %v7912_v47, %v1876_v6 }
0x1705   :  { %v1880_v16 = vrot.slane %v1878_v15, 6 }
0x1707   :  { %6098 = vmatmul.mubr.msk.f32.vlgmr.msra.gmra.mxu1 %vm643_vm13, %v1880_v16 }
0x1708   :  { %2211 = vmatpush1.msra.mxu1 %v7672_v59  ;;  %2258 = vmatprep.mubr.f32.mxu1 %v9239_v17 }
0x1709   :  { %2212 = vmatprep.subr.mxu1 %v7679_v62 }
0x170a   :  { %2213 = vmatpush1.msra.mxu1 %v7685_v63 }
0x170b   :  { %2214 = vmatprep.subr.mxu1 %v7691_v0 }
0x170c   :  { %2215 = vmatpush1.msra.mxu1 %v7697_v1 }
0x170d   :  { %2216 = vmatprep.subr.mxu1 %v7703_v57 }
0x170e   :  { %2217 = vmatpush1.msra.mxu1 %v7709_v4 }
0x170f   :  { %2218 = vmatprep.subr.mxu1 %v7762_v10 }
0x1710   :  { %2219 = vmatpush1.msra.mxu1 %v7768_v11 }
0x1711   :  { %2220 = vmatprep.subr.mxu1 %v7774_v30 }
0x1712   :  { %2221 = vmatpush1.msra.mxu1 %v7780_v32 }
0x1713   :  { %2222 = vmatprep.subr.mxu1 %v7786_v35 }
0x1714   :  { %2223 = vmatpush1.msra.mxu1 %v7792_v36 }
0x1715   :  { %2224 = vmatprep.subr.mxu1 %v7798_v38 }
0x1716   :  { %2225 = vmatpush1.msra.mxu1 %v7804_v42 }
0x1717   :  { %2520 = vmatprep.subr.mxu1 %v7723_v5 }
0x17c7   :  { %v1949_v52 = vpop.f32.mrf.mxu1 }
0x17c8   :  { %v1950_v18 = vadd.f32 %v1949_v52, %v7423_v55 }
0x17c9   :  { %v1951_v33 = vpop.f32.mrf.mxu1 }
0x17ca   :  { %v1952_v50 = vadd.f32 %v1951_v33, %v7426_v56  ;;  %1962 = vrot.lane.b32.xlu1 %v1950_v18, %s7129_s1  ;;  %v1954_v45 = vadd.f32 %v1950_v18, %v7514_v39  ;;  %v1983_v19 = vrot.slane %v1950_v18, 2 }
0x17cc   :  { %v1993_v20 = vrot.slane %v1952_v50, 2  ;;  %v6099_v21 = vmul.f32 -1.442695, %v1954_v45  ;;  %v1985_v24 = vadd.f32 %v1983_v19, %v7510_v34 }
0x17ce   :  { %2002 = vrot.lane.b32.xlu0 %v1993_v20, %s7129_s1  ;;  %6410 = vpow2.f32 %v6099_v21  ;;  %v6100_v27 = vmul.f32 -1.442695, %v1985_v24  ;;  %v1995_v24 = vadd.f32 %v1993_v20, %v7512_v37 }
0x17d0   :  { %6412 = vpow2.f32 %v6100_v27  ;;  %v6101_v27 = vmul.f32 -1.442695, %v1995_v24 }
0x17db   :  { %v6411_v28 = vpop.eup %6410 }
0x17dc   :  { %v1958_v26 = vadd.f32 1.0, %v6411_v28 }
0x17dd   :  { %v6413_v43 = vpop.eup %6412 }
0x17de   :  { %6414 = vrcp.f32 %v1958_v26  ;;  %v1989_v46 = vadd.f32 1.0, %v6413_v43 }
0x17e0   :  { %6416 = vrcp.f32 %v1989_v46 }
0x17eb   :  { %v6415_v22 = vpop.eup %6414 }
0x17ed   :  { %v6417_v9 = vpop.eup %6416 }
0x183c   :  { %v1963_v51 = vpop.permute.xlu1 %1962 }
0x183d   :  { %v1965_v41 = vmul.f32 %v6415_v22, %v1963_v51 }
0x183f   :  { %1967 = vrot.lane.b32.xlu1 %v1965_v41, %s7129_s1 }
0x1840   :  { %v2003_v6 = vpop.permute.xlu0 %2002 }
0x1841   :  { %v2005_v52 = vmul.f32 %v6417_v9, %v2003_v6 }
0x1843   :  { %2007 = vrot.lane.b32.xlu0 %v2005_v52, %s7129_s1  ;;  %2018 = vrot.lane.b32.xlu1 %v1878_v15, %s7130_s17  ;;  %v1972_v52 = vsub.f32 1.0, %v6415_v22 }
0x1847   :  { %1978 = vrot.lane.b32.xlu1 %v1880_v16, %s7131_s11 }
0x18b1   :  { %v1968_v18 = vpop.permute.xlu1 %1967 }
0x18b2   :  { %v1970_v45 = vadd.f32 %v1968_v18, %v7514_v39 }
0x18b5   :  { %v2008_v33 = vpop.permute.xlu0 %2007  ;;  %v2019_v26 = vpop.permute.xlu1 %2018 }
0x18b6   :  { %v2010_v50 = vadd.f32 %v2008_v33, %v7512_v37 }
0x18b8   :  { %6418 = vtanh.f32 %v2010_v50 }
0x18b9   :  { %6420 = vtanh.f32 %v1970_v45  ;;  %v1979_v9 = vpop.permute.xlu1 %1978 }
0x18ba   :  { %6422 = vpow2.f32 %v6101_v27  ;;  %v1981_v33 = vmul.f32 %v6415_v22, %v1979_v9 }
0x18c5   :  { %v6419_v19 = vpop.eup %6418 }
0x18c6   :  { %2014 = vrot.lane.b32.xlu0 %v6419_v19, %s7130_s17  ;;  %v6421_v21 = vpop.eup %6420 }
0x18c7   :  { %v6423_v15 = vpop.eup %6422 }
0x18c8   :  { %v1999_v16 = vadd.f32 1.0, %v6423_v15 }
0x18ca   :  { %1974 = vrot.lane.b32.xlu0 %v6421_v21, %s7130_s17  ;;  %6424 = vrcp.f32 %v1999_v16 }
0x18d7   :  { %v6425_v28 = vpop.eup %6424 }
0x18d8   :  { %v2012_v43 = vsub.f32 1.0, %v6425_v28  ;;  %v2021_v51 = vmul.f32 %v6425_v28, %v2019_v26 }
0x1938   :  { %v2015_v46 = vpop.permute.xlu0 %2014 }
0x1939   :  { %v2017_v41 = vmul.f32 %v2015_v46, %v2012_v43 }
0x193b   :  { %v7949_v6 = vadd.f32 %v2021_v51, %v2017_v41 }
0x193c   :  { %v1975_v18 = vpop.permute.xlu0 %1974 }
0x193d   :  { %v1977_v50 = vmul.f32 %v1975_v18, %v1972_v52  ;;  %v2028_v20 = vrot.slane %v7949_v6, 6 }
0x193f   :  { %v1982_v45 = vadd.f32 %v1981_v33, %v1977_v50  ;;  %2029 = vrot.lane.b32.xlu1 %v2028_v20, %s7131_s11 }
0x1941   :  { %2024 = vrot.lane.b32.xlu0 %v1982_v45, %s7130_s17 }
0x19b1   :  { %v2030_v19 = vpop.permute.xlu1 %2029 }
0x19b3   :  { %v7954_v21 = vpop.permute.xlu0 %2024 }
0x19b4   :  { %v2032_v24 = vsel %vm513_vm11, %v7954_v21, %v2030_v19 }
0x19b5   :  { %6102 = vmatmul.mubr.msk.f32.vlgmr.msra.gmra.mxu0 %vm643_vm13, %v2032_v24 }
0x19b6   :  { %2368 = vmatpush1.msra.mxu0 %v7672_v59  ;;  %2415 = vmatprep.mubr.f32.mxu0 %v9239_v17 }
0x19b7   :  { %2369 = vmatprep.subr.mxu0 %v7679_v62 }
0x19b8   :  { %2370 = vmatpush1.msra.mxu0 %v7685_v63 }
0x19b9   :  { %2371 = vmatprep.subr.mxu0 %v7691_v0 }
0x19ba   :  { %2372 = vmatpush1.msra.mxu0 %v7697_v1 }
0x19bb   :  { %2373 = vmatprep.subr.mxu0 %v7703_v57 }
0x19bc   :  { %2374 = vmatpush1.msra.mxu0 %v7709_v4 }
0x19bd   :  { %2375 = vmatprep.subr.mxu0 %v7762_v10 }
0x19be   :  { %2376 = vmatpush1.msra.mxu0 %v7768_v11 }
0x19bf   :  { %2377 = vmatprep.subr.mxu0 %v7774_v30 }
0x19c0   :  { %2378 = vmatpush1.msra.mxu0 %v7780_v32 }
0x19c1   :  { %2379 = vmatprep.subr.mxu0 %v7786_v35 }
0x19c2   :  { %2380 = vmatpush1.msra.mxu0 %v7792_v36 }
0x19c3   :  { %2381 = vmatprep.subr.mxu0 %v7798_v38 }
0x19c4   :  { %2382 = vmatpush1.msra.mxu0 %v7804_v42 }
0x19c5   :  { %2673 = vmatprep.subr.mxu0 %v7723_v5 }
0x1a75   :  { %v2102_v22 = vpop.f32.mrf.mxu0 }
0x1a76   :  { %v2103_v27 = vadd.f32 %v2102_v22, %v7423_v55 }
0x1a77   :  { %v2104_v15 = vpop.f32.mrf.mxu0 }
0x1a78   :  { %v2108_v16 = vrot.slane %v2103_v27, 6  ;;  %v2105_v28 = vadd.f32 %v2104_v15, %v7426_v56  ;;  %v2139_v43 = vrot.slane %v2103_v27, 4 }
0x1a7a   :  { %v2149_v26 = vrot.slane %v2105_v28, 4  ;;  %2117 = vrot.lane.b32.xlu1 %v2108_v16, %s7129_s1  ;;  %v2110_v46 = vadd.f32 %v2108_v16, %v7514_v39  ;;  %v2141_v51 = vadd.f32 %v2139_v43, %v7510_v34  ;;  %v2174_v16 = vrot.slane %v2032_v24, 4 }
0x1a7b   :  { %v2133_v28 = vrot.slane %v2032_v24, 6 }
0x1a7c   :  { %2158 = vrot.lane.b32.xlu0 %v2149_v26, %s7129_s1  ;;  %v6103_v41 = vmul.f32 -1.442695, %v2110_v46  ;;  %v6104_v9 = vmul.f32 -1.442695, %v2141_v51 }
0x1a7e   :  { %6426 = vpow2.f32 %v6103_v41 }
0x1a7f   :  { %6428 = vpow2.f32 %v6104_v9 }
0x1a8b   :  { %v6427_v52 = vpop.eup %6426 }
0x1a8c   :  { %v6429_v18 = vpop.eup %6428  ;;  %v2114_v33 = vadd.f32 1.0, %v6427_v52 }
0x1a8d   :  { %v2145_v50 = vadd.f32 1.0, %v6429_v18  ;;  %v2151_v18 = vadd.f32 %v2149_v26, %v7512_v37 }
0x1a8e   :  { %6430 = vrcp.f32 %v2114_v33 }
0x1a8f   :  { %6432 = vrcp.f32 %v2145_v50  ;;  %v6105_v33 = vmul.f32 -1.442695, %v2151_v18 }
0x1a9b   :  { %v6431_v20 = vpop.eup %6430 }
0x1a9c   :  { %v6433_v22 = vpop.eup %6432 }
0x1aec   :  { %v2118_v45 = vpop.permute.xlu1 %2117 }
0x1aed   :  { %v2120_v19 = vmul.f32 %v6431_v20, %v2118_v45 }
0x1aee   :  { %v2159_v15 = vpop.permute.xlu0 %2158 }
0x1aef   :  { %v2161_v27 = vmul.f32 %v6433_v22, %v2159_v15  ;;  %2122 = vrot.lane.b32.xlu1 %v2120_v19, %s7129_s1 }
0x1af1   :  { %2163 = vrot.lane.b32.xlu0 %v2161_v27, %s7129_s1 }
0x1af3   :  { %2175 = vrot.lane.b32.xlu1 %v2174_v16, %s7130_s17 }
0x1af7   :  { %2134 = vrot.lane.b32.xlu1 %v2133_v28, %s7131_s11 }
0x1b61   :  { %v2123_v43 = vpop.permute.xlu1 %2122 }
0x1b62   :  { %v2125_v41 = vadd.f32 %v2123_v43, %v7514_v39 }
0x1b63   :  { %v2164_v46 = vpop.permute.xlu0 %2163 }
0x1b64   :  { %v2166_v51 = vadd.f32 %v2164_v46, %v7512_v37  ;;  %v2127_v46 = vsub.f32 1.0, %v6431_v20 }
0x1b65   :  { %v2176_v19 = vpop.permute.xlu1 %2175 }
0x1b66   :  { %6434 = vtanh.f32 %v2166_v51 }
0x1b67   :  { %6436 = vtanh.f32 %v2125_v41 }
0x1b68   :  { %6438 = vpow2.f32 %v6105_v33 }
0x1b69   :  { %v2135_v28 = vpop.permute.xlu1 %2134 }
0x1b6a   :  { %v2137_v41 = vmul.f32 %v6431_v20, %v2135_v28 }
0x1b73   :  { %v6435_v9 = vpop.eup %6434 }
0x1b74   :  { %2170 = vrot.lane.b32.xlu0 %v6435_v9, %s7130_s17  ;;  %v6437_v52 = vpop.eup %6436 }
0x1b75   :  { %v6439_v24 = vpop.eup %6438 }
0x1b76   :  { %v2155_v50 = vadd.f32 1.0, %v6439_v24 }
0x1b78   :  { %2129 = vrot.lane.b32.xlu0 %v6437_v52, %s7130_s17  ;;  %6440 = vrcp.f32 %v2155_v50 }
0x1b85   :  { %v6441_v45 = vpop.eup %6440 }
0x1b86   :  { %v2168_v22 = vsub.f32 1.0, %v6441_v45  ;;  %v2178_v27 = vmul.f32 %v6441_v45, %v2176_v19 }
0x1be6   :  { %v2171_v15 = vpop.permute.xlu0 %2170 }
0x1be7   :  { %v2173_v16 = vmul.f32 %v2171_v15, %v2168_v22 }
0x1be9   :  { %v7991_v43 = vadd.f32 %v2178_v27, %v2173_v16 }
0x1bea   :  { %v2130_v51 = vpop.permute.xlu0 %2129 }
0x1beb   :  { %v2185_v9 = vrot.slane %v7991_v43, 2  ;;  %v2132_v26 = vmul.f32 %v2130_v51, %v2127_v46 }
0x1bed   :  { %v2138_v52 = vadd.f32 %v2137_v41, %v2132_v26  ;;  %2186 = vrot.lane.b32.xlu1 %v2185_v9, %s7131_s11 }
0x1bef   :  { %2181 = vrot.lane.b32.xlu0 %v2138_v52, %s7130_s17 }
0x1c5f   :  { %v2187_v18 = vpop.permute.xlu1 %2186 }
0x1c61   :  { %v7996_v33 = vpop.permute.xlu0 %2181 }
0x1c62   :  { %9246 = vst [vmem:[#allocation29_spill] sm:$0xff] %v7996_v33  ;;  %v2189_v24 = vsel %vm513_vm11, %v7996_v33, %v2187_v18 }
0x1c63   :  { %v2191_v50 = vrot.slane %v2189_v24, 2  ;;  %v2291_v27 = vrot.slane %v2189_v24, 6 }
0x1c65   :  { %6106 = vmatmul.mubr.msk.f32.vlgmr.msra.gmra.mxu1 %vm643_vm13, %v2191_v50 }
0x1c66   :  { %2521 = vmatpush1.msra.mxu1 %v7672_v59  ;;  %2568 = vmatprep.mubr.f32.mxu1 %v9239_v17 }
0x1c67   :  { %2522 = vmatprep.subr.mxu1 %v7679_v62 }
0x1c68   :  { %2523 = vmatpush1.msra.mxu1 %v7685_v63 }
0x1c69   :  { %2524 = vmatprep.subr.mxu1 %v7691_v0 }
0x1c6a   :  { %2525 = vmatpush1.msra.mxu1 %v7697_v1 }
0x1c6b   :  { %2526 = vmatprep.subr.mxu1 %v7703_v57 }
0x1c6c   :  { %2527 = vmatpush1.msra.mxu1 %v7709_v4 }
0x1c6d   :  { %2528 = vmatprep.subr.mxu1 %v7762_v10 }
0x1c6e   :  { %2529 = vmatpush1.msra.mxu1 %v7768_v11 }
0x1c6f   :  { %2530 = vmatprep.subr.mxu1 %v7774_v30 }
0x1c70   :  { %2531 = vmatpush1.msra.mxu1 %v7780_v32 }
0x1c71   :  { %2532 = vmatprep.subr.mxu1 %v7786_v35 }
0x1c72   :  { %2533 = vmatpush1.msra.mxu1 %v7792_v36 }
0x1c73   :  { %2534 = vmatprep.subr.mxu1 %v7798_v38 }
0x1c74   :  { %2535 = vmatpush1.msra.mxu1 %v7804_v42 }
0x1c75   :  { %2831 = vmatprep.subr.mxu1 %v7723_v5 }
0x1d25   :  { %v2260_v59 = vpop.f32.mrf.mxu1 }
0x1d26   :  { %v2261_v62 = vadd.f32 %v2260_v59, %v7423_v55 }
0x1d27   :  { %v2262_v63 = vpop.f32.mrf.mxu1 }
0x1d28   :  { %v2266_v0 = vrot.slane %v2261_v62, 4  ;;  %v2263_v1 = vadd.f32 %v2262_v63, %v7426_v56  ;;  %v2297_v4 = vrot.slane %v2261_v62, 6 }
0x1d2a   :  { %v2307_v57 = vrot.slane %v2263_v1, 6  ;;  %2275 = vrot.lane.b32.xlu1 %v2266_v0, %s7129_s1  ;;  %v2268_v10 = vadd.f32 %v2266_v0, %v7514_v39  ;;  %v2299_v11 = vadd.f32 %v2297_v4, %v7510_v34 }
0x1d2c   :  { %2316 = vrot.lane.b32.xlu0 %v2307_v57, %s7129_s1  ;;  %v6107_v30 = vmul.f32 -1.442695, %v2268_v10  ;;  %v6108_v32 = vmul.f32 -1.442695, %v2299_v11  ;;  %v2309_v26 = vadd.f32 %v2307_v57, %v7512_v37 }
0x1d2e   :  { %6442 = vpow2.f32 %v6107_v30  ;;  %v6109_v52 = vmul.f32 -1.442695, %v2309_v26  ;;  %v8116_v26 = vld [vmem:[%s9226_s4 + $0x18] sm:$0xff] }
0x1d2f   :  { %6444 = vpow2.f32 %v6108_v32 }
0x1d3b   :  { %v6443_v5 = vpop.eup %6442 }
0x1d3c   :  { %v6445_v35 = vpop.eup %6444  ;;  %v2272_v36 = vadd.f32 1.0, %v6443_v5 }
0x1d3d   :  { %v2303_v38 = vadd.f32 1.0, %v6445_v35 }
0x1d3e   :  { %6446 = vrcp.f32 %v2272_v36 }
0x1d3f   :  { %6448 = vrcp.f32 %v2303_v38 }
0x1d4b   :  { %v6447_v42 = vpop.eup %6446 }
0x1d4c   :  { %v6449_v19 = vpop.eup %6448  ;;  %v2285_v11 = vsub.f32 1.0, %v6447_v42 }
0x1d9c   :  { %v2276_v20 = vpop.permute.xlu1 %2275 }
0x1d9d   :  { %v2278_v45 = vmul.f32 %v6447_v42, %v2276_v20 }
0x1d9e   :  { %v2317_v22 = vpop.permute.xlu0 %2316 }
0x1d9f   :  { %v2319_v15 = vmul.f32 %v6449_v19, %v2317_v22  ;;  %2280 = vrot.lane.b32.xlu1 %v2278_v45, %s7129_s1  ;;  %v8056_v19 = vld [vmem:[%s9226_s4 + $0x68] sm:$0xff]  ;;  %v8062_v22 = vld [vmem:[%s9226_s4 + $0x60] sm:$0xff] }
0x1da1   :  { %2321 = vrot.lane.b32.xlu0 %v2319_v15, %s7129_s1  ;;  %v8068_v15 = vld [vmem:[%s9226_s4 + $0x58] sm:$0xff] }
0x1da3   :  { %2332 = vrot.lane.b32.xlu1 %v2189_v24, %s7130_s17 }
0x1da7   :  { %2292 = vrot.lane.b32.xlu1 %v2291_v27, %s7131_s11  ;;  %v8074_v27 = vld [vmem:[%s9226_s4 + $0x50] sm:$0xff] }
0x1e11   :  { %v2281_v16 = vpop.permute.xlu1 %2280 }
0x1e12   :  { %v2283_v51 = vadd.f32 %v2281_v16, %v7514_v39  ;;  %v8080_v16 = vld [vmem:[%s9226_s4 + $0x48] sm:$0xff] }
0x1e13   :  { %v2322_v28 = vpop.permute.xlu0 %2321 }
0x1e14   :  { %v2324_v46 = vadd.f32 %v2322_v28, %v7512_v37  ;;  %v8086_v28 = vld [vmem:[%s9226_s4 + $0x40] sm:$0xff] }
0x1e15   :  { %v2333_v59 = vpop.permute.xlu1 %2332 }
0x1e16   :  { %6450 = vtanh.f32 %v2324_v46  ;;  %v8092_v46 = vld [vmem:[%s9226_s4 + $0x38] sm:$0xff] }
0x1e17   :  { %6452 = vtanh.f32 %v2283_v51  ;;  %v8098_v51 = vld [vmem:[%s9226_s4 + $0x30] sm:$0xff] }
0x1e18   :  { %6454 = vpow2.f32 %v6109_v52  ;;  %v8122_v52 = vld [vmem:[%s9226_s4 + $0x10] sm:$0xff] }
0x1e19   :  { %v2293_v4 = vpop.permute.xlu1 %2292 }
0x1e1a   :  { %v2295_v32 = vmul.f32 %v6447_v42, %v2293_v4  ;;  %v8049_v42 = vld [vmem:[%s9226_s4 + $0x70] sm:$0xff] }
0x1e23   :  { %v6451_v41 = vpop.eup %6450 }
0x1e24   :  { %2328 = vrot.lane.b32.xlu0 %v6451_v41, %s7130_s17  ;;  %v6453_v9 = vpop.eup %6452  ;;  %v8104_v41 = vld [vmem:[%s9226_s4 + $0x28] sm:$0xff] }
0x1e25   :  { %v6455_v18 = vpop.eup %6454 }
0x1e26   :  { %v2313_v24 = vadd.f32 1.0, %v6455_v18  ;;  %v8128_v18 = vld [vmem:[%s9226_s4 + $0x8] sm:$0xff] }
0x1e28   :  { %2287 = vrot.lane.b32.xlu0 %v6453_v9, %s7130_s17  ;;  %6456 = vrcp.f32 %v2313_v24  ;;  %v8110_v9 = vld [vmem:[%s9226_s4 + $0x20] sm:$0xff] }
0x1e29   :  { %v8134_v24 = vld [vmem:[%s9226_s4] sm:$0xff] }
0x1e35   :  { %v6457_v50 = vpop.eup %6456 }
0x1e36   :  { %v2326_v62 = vsub.f32 1.0, %v6457_v50  ;;  %v2335_v0 = vmul.f32 %v6457_v50, %v2333_v59  ;;  %v6827_v50 = vld [vmem:[%s9226_s4 + $0x78] sm:$0xff] }
0x1e96   :  { %v2329_v63 = vpop.permute.xlu0 %2328 }
0x1e97   :  { %v2331_v1 = vmul.f32 %v2329_v63, %v2326_v62 }
0x1e99   :  { %v8033_v10 = vadd.f32 %v2335_v0, %v2331_v1 }
0x1e9a   :  { %v2288_v30 = vpop.permute.xlu0 %2287 }
0x1e9b   :  { %v2342_v5 = vrot.slane %v8033_v10, 6  ;;  %v2290_v57 = vmul.f32 %v2288_v30, %v2285_v11 }
0x1e9d   :  { %v2296_v35 = vadd.f32 %v2295_v32, %v2290_v57  ;;  %2343 = vrot.lane.b32.xlu1 %v2342_v5, %s7131_s11 }
0x1e9f   :  { %2338 = vrot.lane.b32.xlu0 %v2296_v35, %s7130_s17 }
0x1f0f   :  { %v2344_v36 = vpop.permute.xlu1 %2343 }
0x1f11   :  { %v8038_v38 = vpop.permute.xlu0 %2338 }
0x1f12   :  { %v8042_v20 = vsel %vm513_vm11, %v8038_v38, %v2344_v36 }
0x1f13   :  { %v2348_v45 = vrot.slane %v8042_v20, 4 }
0x1f15   :  { %6110 = vmatmul.mubr.msk.f32.vlgmr.msra.gmra.mxu0 %vm643_vm13, %v2348_v45 }
0x1f16   :  { %2674 = vmatpush1.msra.mxu0 %v8049_v42  ;;  %2721 = vmatprep.mubr.f32.mxu0 %v9239_v17 }
0x1f17   :  { %2675 = vmatprep.subr.mxu0 %v8056_v19 }
0x1f18   :  { %2676 = vmatpush1.msra.mxu0 %v8062_v22 }
0x1f19   :  { %2677 = vmatprep.subr.mxu0 %v8068_v15 }
0x1f1a   :  { %2678 = vmatpush1.msra.mxu0 %v8074_v27 }
0x1f1b   :  { %2679 = vmatprep.subr.mxu0 %v8080_v16 }
0x1f1c   :  { %2680 = vmatpush1.msra.mxu0 %v8086_v28 }
0x1f1d   :  { %2681 = vmatprep.subr.mxu0 %v8092_v46 }
0x1f1e   :  { %2682 = vmatpush1.msra.mxu0 %v8098_v51 }
0x1f1f   :  { %2683 = vmatprep.subr.mxu0 %v8104_v41 }
0x1f20   :  { %2684 = vmatpush1.msra.mxu0 %v8110_v9 }
0x1f21   :  { %2685 = vmatprep.subr.mxu0 %v8116_v26 }
0x1f22   :  { %2686 = vmatpush1.msra.mxu0 %v8122_v52 }
0x1f23   :  { %2687 = vmatprep.subr.mxu0 %v8128_v18 }
0x1f24   :  { %2688 = vmatpush1.msra.mxu0 %v8134_v24 }
0x1f25   :  { %2988 = vmatprep.subr.mxu0 %v6827_v50 }
0x1fd5   :  { %v2417_v59 = vpop.f32.mrf.mxu0 }
0x1fd6   :  { %v2418_v62 = vadd.f32 %v2417_v59, %v7423_v55 }
0x1fd7   :  { %v2419_v63 = vpop.f32.mrf.mxu0 }
0x1fd8   :  { %v2423_v0 = vrot.slane %v2418_v62, 2  ;;  %v2420_v1 = vadd.f32 %v2419_v63, %v7426_v56  ;;  %v2454_v4 = vadd.f32 %v2418_v62, %v7510_v34  ;;  %v2448_v34 = vrot.slane %v8042_v20, 6 }
0x1fda   :  { %2469 = vrot.lane.b32.xlu0 %v2420_v1, %s7129_s1  ;;  %2432 = vrot.lane.b32.xlu1 %v2423_v0, %s7129_s1  ;;  %v2425_v11 = vadd.f32 %v2423_v0, %v7514_v39  ;;  %v6112_v30 = vmul.f32 -1.442695, %v2454_v4 }
0x1fdc   :  { %v6111_v32 = vmul.f32 -1.442695, %v2425_v11  ;;  %6458 = vpow2.f32 %v6112_v30 }
0x1fde   :  { %6460 = vpow2.f32 %v6111_v32 }
0x1fe9   :  { %v6459_v5 = vpop.eup %6458 }
0x1fea   :  { %v2458_v35 = vadd.f32 1.0, %v6459_v5 }
0x1feb   :  { %v6461_v57 = vpop.eup %6460 }
0x1fec   :  { %v2429_v36 = vadd.f32 1.0, %v6461_v57  ;;  %6462 = vrcp.f32 %v2458_v35 }
0x1fee   :  { %6464 = vrcp.f32 %v2429_v36 }
0x1ff9   :  { %v6463_v50 = vpop.eup %6462 }
0x1ffb   :  { %v6465_v59 = vpop.eup %6464 }
0x204c   :  { %v2470_v63 = vpop.permute.xlu0 %2469  ;;  %v2433_v17 = vpop.permute.xlu1 %2432 }
0x204d   :  { %v2472_v33 = vmul.f32 %v6463_v50, %v2470_v63  ;;  %v2435_v47 = vmul.f32 %v6465_v59, %v2433_v17 }
0x204f   :  { %2474 = vrot.lane.b32.xlu0 %v2472_v33, %s7129_s1  ;;  %2437 = vrot.lane.b32.xlu1 %v2435_v47, %s7129_s1  ;;  %v2461_v47 = vadd.f32 %v2420_v1, %v7512_v37 }
0x2051   :  { %v6113_v33 = vmul.f32 -1.442695, %v2461_v47 }
0x2053   :  { %2485 = vrot.lane.b32.xlu1 %v2348_v45, %s7130_s17 }
0x2057   :  { %2449 = vrot.lane.b32.xlu1 %v2448_v34, %s7131_s11  ;;  %v2442_v34 = vsub.f32 1.0, %v6465_v59 }
0x20c1   :  { %v2475_v62 = vpop.permute.xlu0 %2474  ;;  %v2438_v0 = vpop.permute.xlu1 %2437 }
0x20c2   :  { %v2477_v4 = vadd.f32 %v2475_v62, %v7512_v37  ;;  %v2440_v11 = vadd.f32 %v2438_v0, %v7514_v39 }
0x20c4   :  { %6466 = vtanh.f32 %v2477_v4 }
0x20c5   :  { %6468 = vtanh.f32 %v2440_v11  ;;  %v2486_v5 = vpop.permute.xlu1 %2485 }
0x20c6   :  { %6470 = vpow2.f32 %v6113_v33 }
0x20c9   :  { %v2450_v50 = vpop.permute.xlu1 %2449 }
0x20ca   :  { %v2452_v0 = vmul.f32 %v6465_v59, %v2450_v50  ;;  %v9247_v59 = vmov 0.0  }
0x20d1   :  { %v6467_v30 = vpop.eup %6466 }
0x20d2   :  { %2481 = vrot.lane.b32.xlu0 %v6467_v30, %s7130_s17  ;;  %v6469_v17 = vpop.eup %6468 }
0x20d3   :  { %v6471_v20 = vpop.eup %6470 }
0x20d4   :  { %v2465_v45 = vadd.f32 1.0, %v6471_v20 }
0x20d6   :  { %2444 = vrot.lane.b32.xlu0 %v6469_v17, %s7130_s17  ;;  %6472 = vrcp.f32 %v2465_v45 }
0x20e3   :  { %v6473_v32 = vpop.eup %6472 }
0x20e4   :  { %v2479_v57 = vsub.f32 1.0, %v6473_v32  ;;  %v2488_v36 = vmul.f32 %v6473_v32, %v2486_v5 }
0x2144   :  { %v2482_v35 = vpop.permute.xlu0 %2481 }
0x2145   :  { %v2484_v39 = vmul.f32 %v2482_v35, %v2479_v57 }
0x2147   :  { %v8156_v63 = vadd.f32 %v2488_v36, %v2484_v39 }
0x2148   :  { %v2445_v62 = vpop.permute.xlu0 %2444 }
0x2149   :  { %v2495_v4 = vrot.slane %v8156_v63, 2  ;;  %v2447_v37 = vmul.f32 %v2445_v62, %v2442_v34 }
0x214b   :  { %v2453_v1 = vadd.f32 %v2452_v0, %v2447_v37  ;;  %2496 = vrot.lane.b32.xlu1 %v2495_v4, %s7131_s11 }
0x214d   :  { %2491 = vrot.lane.b32.xlu0 %v2453_v1, %s7130_s17 }
0x21bd   :  { %v2497_v11 = vpop.permute.xlu1 %2496 }
0x21bf   :  { %v8161_v30 = vpop.permute.xlu0 %2491 }
0x21c0   :  { %v2499_v17 = vsel %vm513_vm11, %v8161_v30, %v2497_v11 }
0x21c1   :  { %v2501_v47 = vrot.slane %v2499_v17, 6 }
0x21c3   :  { %6114 = vmatmul.mubr.msk.f32.vlgmr.msra.gmra.mxu1 %vm643_vm13, %v2501_v47 }
0x21c4   :  { %2832 = vmatpush1.msra.mxu1 %v8049_v42  ;;  %2879 = vmatprep.mubr.f32.mxu1 %v9247_v59 }
0x21c5   :  { %2833 = vmatprep.subr.mxu1 %v8056_v19 }
0x21c6   :  { %2834 = vmatpush1.msra.mxu1 %v8062_v22 }
0x21c7   :  { %2835 = vmatprep.subr.mxu1 %v8068_v15 }
0x21c8   :  { %2836 = vmatpush1.msra.mxu1 %v8074_v27 }
0x21c9   :  { %2837 = vmatprep.subr.mxu1 %v8080_v16 }
0x21ca   :  { %2838 = vmatpush1.msra.mxu1 %v8086_v28 }
0x21cb   :  { %2839 = vmatprep.subr.mxu1 %v8092_v46 }
0x21cc   :  { %2840 = vmatpush1.msra.mxu1 %v8098_v51 }
0x21cd   :  { %2841 = vmatprep.subr.mxu1 %v8104_v41 }
0x21ce   :  { %2842 = vmatpush1.msra.mxu1 %v8110_v9 }
0x21cf   :  { %2843 = vmatprep.subr.mxu1 %v8116_v26 }
0x21d0   :  { %2844 = vmatpush1.msra.mxu1 %v8122_v52 }
0x21d1   :  { %2845 = vmatprep.subr.mxu1 %v8128_v18 }
0x21d2   :  { %2846 = vmatpush1.msra.mxu1 %v8134_v24 }
0x2283   :  { %v2570_v33 = vpop.f32.mrf.mxu1 }
0x2284   :  { %v2571_v20 = vadd.f32 %v2570_v33, %v7423_v55 }
0x2285   :  { %v2572_v45 = vpop.f32.mrf.mxu1 }
0x2286   :  { %v2573_v32 = vadd.f32 %v2572_v45, %v7426_v56  ;;  %2583 = vrot.lane.b32.xlu1 %v2571_v20, %s7129_s1  ;;  %v2575_v57 = vadd.f32 %v2571_v20, %v7519_v44  ;;  %v2604_v35 = vrot.slane %v2571_v20, 2 }
0x2288   :  { %v2614_v5 = vrot.slane %v2573_v32, 2  ;;  %v6115_v36 = vmul.f32 -1.442695, %v2575_v57  ;;  %v2606_v39 = vadd.f32 %v2604_v35, %v7504_v12 }
0x228a   :  { %2623 = vrot.lane.b32.xlu0 %v2614_v5, %s7129_s1  ;;  %6474 = vpow2.f32 %v6115_v36  ;;  %v6116_v50 = vmul.f32 -1.442695, %v2606_v39 }
0x228c   :  { %6476 = vpow2.f32 %v6116_v50 }
0x2297   :  { %v6475_v34 = vpop.eup %6474 }
0x2298   :  { %v2579_v62 = vadd.f32 1.0, %v6475_v34  ;;  %v2616_v34 = vadd.f32 %v2614_v5, %v7506_v31 }
0x2299   :  { %v6477_v0 = vpop.eup %6476 }
0x229a   :  { %6478 = vrcp.f32 %v2579_v62  ;;  %v2610_v4 = vadd.f32 1.0, %v6477_v0  ;;  %v6117_v62 = vmul.f32 -1.442695, %v2616_v34 }
0x229c   :  { %6480 = vrcp.f32 %v2610_v4 }
0x22a7   :  { %v6479_v37 = vpop.eup %6478 }
0x22a9   :  { %v6481_v33 = vpop.eup %6480 }
0x22f8   :  { %v2584_v1 = vpop.permute.xlu1 %2583 }
0x22f9   :  { %v2586_v11 = vmul.f32 %v6479_v37, %v2584_v1 }
0x22fb   :  { %2588 = vrot.lane.b32.xlu1 %v2586_v11, %s7129_s1 }
0x22fc   :  { %v2624_v45 = vpop.permute.xlu0 %2623 }
0x22fd   :  { %v2626_v20 = vmul.f32 %v6481_v33, %v2624_v45 }
0x22ff   :  { %2628 = vrot.lane.b32.xlu0 %v2626_v20, %s7129_s1  ;;  %2639 = vrot.lane.b32.xlu1 %v2499_v17, %s7130_s17 }
0x2303   :  { %2599 = vrot.lane.b32.xlu1 %v2501_v47, %s7131_s11 }
0x236d   :  { %v2589_v32 = vpop.permute.xlu1 %2588 }
0x236e   :  { %v2591_v36 = vadd.f32 %v2589_v32, %v7519_v44 }
0x2371   :  { %v2629_v57 = vpop.permute.xlu0 %2628  ;;  %v2640_v4 = vpop.permute.xlu1 %2639 }
0x2372   :  { %v2631_v35 = vadd.f32 %v2629_v57, %v7506_v31  ;;  %v2593_v57 = vsub.f32 1.0, %v6479_v37 }
0x2374   :  { %6482 = vtanh.f32 %v2631_v35 }
0x2375   :  { %6484 = vtanh.f32 %v2591_v36  ;;  %v2600_v20 = vpop.permute.xlu1 %2599 }
0x2376   :  { %6486 = vpow2.f32 %v6117_v62  ;;  %v2602_v36 = vmul.f32 %v6479_v37, %v2600_v20 }
0x2381   :  { %v6483_v39 = vpop.eup %6482 }
0x2382   :  { %2635 = vrot.lane.b32.xlu0 %v6483_v39, %s7130_s17  ;;  %v6485_v50 = vpop.eup %6484 }
0x2383   :  { %v6487_v17 = vpop.eup %6486 }
0x2384   :  { %v2620_v47 = vadd.f32 1.0, %v6487_v17 }
0x2386   :  { %2595 = vrot.lane.b32.xlu0 %v6485_v50, %s7130_s17  ;;  %6488 = vrcp.f32 %v2620_v47 }
0x2393   :  { %v6489_v0 = vpop.eup %6488 }
0x2394   :  { %v2633_v1 = vsub.f32 1.0, %v6489_v0  ;;  %v2642_v33 = vmul.f32 %v6489_v0, %v2640_v4 }
0x23f4   :  { %v2636_v11 = vpop.permute.xlu0 %2635 }
0x23f5   :  { %v2638_v45 = vmul.f32 %v2636_v11, %v2633_v1 }
0x23f7   :  { %v8197_v32 = vadd.f32 %v2642_v33, %v2638_v45 }
0x23f8   :  { %v2596_v35 = vpop.permute.xlu0 %2595 }
0x23f9   :  { %v2649_v39 = vrot.slane %v8197_v32, 6  ;;  %v2598_v5 = vmul.f32 %v2596_v35, %v2593_v57 }
0x23fb   :  { %v2603_v50 = vadd.f32 %v2602_v36, %v2598_v5  ;;  %2650 = vrot.lane.b32.xlu1 %v2649_v39, %s7131_s11 }
0x23fd   :  { %2645 = vrot.lane.b32.xlu0 %v2603_v50, %s7130_s17 }
0x246d   :  { %v2651_v34 = vpop.permute.xlu1 %2650 }
0x246f   :  { %v8202_v62 = vpop.permute.xlu0 %2645 }
0x2470   :  { %v2653_v17 = vsel %vm513_vm11, %v8202_v62, %v2651_v34 }
0x2471   :  { %6118 = vmatmul.mubr.msk.f32.vlgmr.msra.gmra.mxu0 %vm643_vm13, %v2653_v17  ;;  %v2795_v33 = vrot.slane %v2653_v17, 4  ;;  %v2754_v45 = vrot.slane %v2653_v17, 6 }
0x2472   :  { %2989 = vmatpush1.msra.mxu0 %v8049_v42  ;;  %3036 = vmatprep.mubr.f32.mxu0 %v9247_v59 }
0x2473   :  { %2990 = vmatprep.subr.mxu0 %v8056_v19 }
0x2474   :  { %2991 = vmatpush1.msra.mxu0 %v8062_v22 }
0x2475   :  { %2992 = vmatprep.subr.mxu0 %v8068_v15 }
0x2476   :  { %2993 = vmatpush1.msra.mxu0 %v8074_v27 }
0x2477   :  { %2994 = vmatprep.subr.mxu0 %v8080_v16 }
0x2478   :  { %2995 = vmatpush1.msra.mxu0 %v8086_v28 }
0x2479   :  { %2996 = vmatprep.subr.mxu0 %v8092_v46 }
0x247a   :  { %2997 = vmatpush1.msra.mxu0 %v8098_v51 }
0x247b   :  { %2998 = vmatprep.subr.mxu0 %v8104_v41 }
0x247c   :  { %2999 = vmatpush1.msra.mxu0 %v8110_v9 }
0x247d   :  { %3000 = vmatprep.subr.mxu0 %v8116_v26 }
0x247e   :  { %3001 = vmatpush1.msra.mxu0 %v8122_v52 }
0x247f   :  { %3002 = vmatprep.subr.mxu0 %v8128_v18 }
0x2480   :  { %3003 = vmatpush1.msra.mxu0 %v8134_v24 }
0x2531   :  { %v2723_v42 = vpop.f32.mrf.mxu0 }
0x2532   :  { %v2724_v19 = vadd.f32 %v2723_v42, %v7423_v55 }
0x2533   :  { %v2725_v22 = vpop.f32.mrf.mxu0 }
0x2534   :  { %v2729_v15 = vrot.slane %v2724_v19, 6  ;;  %v2726_v27 = vadd.f32 %v2725_v22, %v7426_v56  ;;  %v2760_v28 = vrot.slane %v2724_v19, 4 }
0x2536   :  { %v2770_v16 = vrot.slane %v2726_v27, 4  ;;  %2738 = vrot.lane.b32.xlu1 %v2729_v15, %s7129_s1  ;;  %v2731_v46 = vadd.f32 %v2729_v15, %v7519_v44  ;;  %v2762_v51 = vadd.f32 %v2760_v28, %v7504_v12 }
0x2538   :  { %2779 = vrot.lane.b32.xlu0 %v2770_v16, %s7129_s1  ;;  %v6119_v41 = vmul.f32 -1.442695, %v2731_v46  ;;  %v6120_v9 = vmul.f32 -1.442695, %v2762_v51  ;;  %v2772_v50 = vadd.f32 %v2770_v16, %v7506_v31 }
0x253a   :  { %6490 = vpow2.f32 %v6119_v41  ;;  %v6121_v34 = vmul.f32 -1.442695, %v2772_v50 }
0x253b   :  { %6492 = vpow2.f32 %v6120_v9 }
0x2547   :  { %v6491_v26 = vpop.eup %6490 }
0x2548   :  { %v6493_v52 = vpop.eup %6492  ;;  %v2735_v18 = vadd.f32 1.0, %v6491_v26 }
0x2549   :  { %v2766_v24 = vadd.f32 1.0, %v6493_v52 }
0x254a   :  { %6494 = vrcp.f32 %v2735_v18 }
0x254b   :  { %6496 = vrcp.f32 %v2766_v24 }
0x2557   :  { %v6495_v37 = vpop.eup %6494 }
0x2558   :  { %v6497_v4 = vpop.eup %6496  ;;  %v2748_v9 = vsub.f32 1.0, %v6495_v37 }
0x25a8   :  { %v2739_v47 = vpop.permute.xlu1 %2738 }
0x25a9   :  { %v2741_v0 = vmul.f32 %v6495_v37, %v2739_v47 }
0x25aa   :  { %v2780_v1 = vpop.permute.xlu0 %2779 }
0x25ab   :  { %v2782_v11 = vmul.f32 %v6497_v4, %v2780_v1  ;;  %2743 = vrot.lane.b32.xlu1 %v2741_v0, %s7129_s1 }
0x25ad   :  { %2784 = vrot.lane.b32.xlu0 %v2782_v11, %s7129_s1 }
0x25af   :  { %2796 = vrot.lane.b32.xlu1 %v2795_v33, %s7130_s17 }
0x25b3   :  { %2755 = vrot.lane.b32.xlu1 %v2754_v45, %s7131_s11 }
0x261d   :  { %v2744_v20 = vpop.permute.xlu1 %2743 }
0x261e   :  { %v2746_v36 = vadd.f32 %v2744_v20, %v7519_v44 }
0x261f   :  { %v2785_v57 = vpop.permute.xlu0 %2784 }
0x2620   :  { %v2787_v35 = vadd.f32 %v2785_v57, %v7506_v31 }
0x2621   :  { %v2797_v22 = vpop.permute.xlu1 %2796 }
0x2622   :  { %6498 = vtanh.f32 %v2787_v35 }
0x2623   :  { %6500 = vtanh.f32 %v2746_v36 }
0x2624   :  { %6502 = vpow2.f32 %v6121_v34 }
0x2625   :  { %v2756_v51 = vpop.permute.xlu1 %2755 }
0x2626   :  { %v2758_v52 = vmul.f32 %v6495_v37, %v2756_v51 }
0x262f   :  { %v6499_v39 = vpop.eup %6498 }
0x2630   :  { %2791 = vrot.lane.b32.xlu0 %v6499_v39, %s7130_s17  ;;  %v6501_v5 = vpop.eup %6500 }
0x2631   :  { %v6503_v17 = vpop.eup %6502 }
0x2632   :  { %v2776_v42 = vadd.f32 1.0, %v6503_v17 }
0x2634   :  { %2750 = vrot.lane.b32.xlu0 %v6501_v5, %s7130_s17  ;;  %6504 = vrcp.f32 %v2776_v42 }
0x2641   :  { %v6505_v19 = vpop.eup %6504 }
0x2642   :  { %v2789_v15 = vsub.f32 1.0, %v6505_v19  ;;  %v2799_v28 = vmul.f32 %v6505_v19, %v2797_v22 }
0x26a2   :  { %v2792_v27 = vpop.permute.xlu0 %2791 }
0x26a3   :  { %v2794_v46 = vmul.f32 %v2792_v27, %v2789_v15 }
0x26a5   :  { %v8238_v41 = vadd.f32 %v2799_v28, %v2794_v46 }
0x26a6   :  { %v2751_v26 = vpop.permute.xlu0 %2750 }
0x26a7   :  { %v2806_v18 = vrot.slane %v8238_v41, 2  ;;  %v2753_v16 = vmul.f32 %v2751_v26, %v2748_v9 }
0x26a9   :  { %v2759_v24 = vadd.f32 %v2758_v52, %v2753_v16  ;;  %2807 = vrot.lane.b32.xlu1 %v2806_v18, %s7131_s11 }
0x26ab   :  { %2802 = vrot.lane.b32.xlu0 %v2759_v24, %s7130_s17 }
0x271b   :  { %v2808_v47 = vpop.permute.xlu1 %2807 }
0x271d   :  { %v8243_v0 = vpop.permute.xlu0 %2802 }
0x271e   :  { %v2810_v4 = vsel %vm513_vm11, %v8243_v0, %v2808_v47 }
0x271f   :  { %v2812_v1 = vrot.slane %v2810_v4, 2  ;;  %v2912_v9 = vrot.slane %v2810_v4, 6 }
0x2721   :  { %6122 = vmatmul.mubr.msk.f32.vlgmr.msra.gmra.mxu1 %vm643_vm13, %v2812_v1 }
0x2722   :  { %3296 = vmatprep.mubr.f32.mxu1 %v9247_v59 }
0x27e1   :  { %v2881_v37 = vpop.f32.mrf.mxu1 }
0x27e2   :  { %v2882_v11 = vadd.f32 %v2881_v37, %v7423_v55 }
0x27e3   :  { %v2883_v33 = vpop.f32.mrf.mxu1 }
0x27e4   :  { %v2887_v45 = vrot.slane %v2882_v11, 4  ;;  %v2884_v20 = vadd.f32 %v2883_v33, %v7426_v56  ;;  %v2918_v35 = vrot.slane %v2882_v11, 6 }
0x27e6   :  { %v2928_v57 = vrot.slane %v2884_v20, 6  ;;  %2896 = vrot.lane.b32.xlu1 %v2887_v45, %s7129_s1  ;;  %v2889_v36 = vadd.f32 %v2887_v45, %v7519_v44  ;;  %v2920_v39 = vadd.f32 %v2918_v35, %v7504_v12 }
0x27e8   :  { %2937 = vrot.lane.b32.xlu0 %v2928_v57, %s7129_s1  ;;  %v6123_v5 = vmul.f32 -1.442695, %v2889_v36  ;;  %v6124_v50 = vmul.f32 -1.442695, %v2920_v39  ;;  %v2930_v1 = vadd.f32 %v2928_v57, %v7506_v31 }
0x27ea   :  { %6506 = vpow2.f32 %v6123_v5  ;;  %v6125_v37 = vmul.f32 -1.442695, %v2930_v1 }
0x27eb   :  { %6508 = vpow2.f32 %v6124_v50 }
0x27f7   :  { %v6507_v34 = vpop.eup %6506 }
0x27f8   :  { %v6509_v17 = vpop.eup %6508  ;;  %v2893_v42 = vadd.f32 1.0, %v6507_v34 }
0x27f9   :  { %v2924_v19 = vadd.f32 1.0, %v6509_v17 }
0x27fa   :  { %6510 = vrcp.f32 %v2893_v42 }
0x27fb   :  { %6512 = vrcp.f32 %v2924_v19 }
0x2807   :  { %v6511_v22 = vpop.eup %6510 }
0x2808   :  { %v6513_v28 = vpop.eup %6512  ;;  %v2906_v34 = vsub.f32 1.0, %v6511_v22 }
0x2858   :  { %v2897_v15 = vpop.permute.xlu1 %2896 }
0x2859   :  { %v2899_v27 = vmul.f32 %v6511_v22, %v2897_v15 }
0x285a   :  { %v2938_v46 = vpop.permute.xlu0 %2937 }
0x285b   :  { %v2940_v51 = vmul.f32 %v6513_v28, %v2938_v46  ;;  %2901 = vrot.lane.b32.xlu1 %v2899_v27, %s7129_s1 }
0x285d   :  { %2942 = vrot.lane.b32.xlu0 %v2940_v51, %s7129_s1 }
0x285f   :  { %2953 = vrot.lane.b32.xlu1 %v2810_v4, %s7130_s17 }
0x2863   :  { %2913 = vrot.lane.b32.xlu1 %v2912_v9, %s7131_s11 }
0x28cd   :  { %v2902_v26 = vpop.permute.xlu1 %2901 }
0x28ce   :  { %v2904_v16 = vadd.f32 %v2902_v26, %v7519_v44 }
0x28cf   :  { %v2943_v52 = vpop.permute.xlu0 %2942 }
0x28d0   :  { %v2945_v18 = vadd.f32 %v2943_v52, %v7506_v31 }
0x28d1   :  { %v2954_v45 = vpop.permute.xlu1 %2953 }
0x28d2   :  { %6514 = vtanh.f32 %v2945_v18 }
0x28d3   :  { %6516 = vtanh.f32 %v2904_v16 }
0x28d4   :  { %6518 = vpow2.f32 %v6125_v37 }
0x28d5   :  { %v2914_v5 = vpop.permute.xlu1 %2913 }
0x28d6   :  { %v2916_v42 = vmul.f32 %v6511_v22, %v2914_v5 }
0x28df   :  { %v6515_v24 = vpop.eup %6514 }
0x28e0   :  { %2949 = vrot.lane.b32.xlu0 %v6515_v24, %s7130_s17  ;;  %v6517_v47 = vpop.eup %6516 }
0x28e1   :  { %v6519_v4 = vpop.eup %6518 }
0x28e2   :  { %v2934_v11 = vadd.f32 1.0, %v6519_v4 }
0x28e4   :  { %2908 = vrot.lane.b32.xlu0 %v6517_v47, %s7130_s17  ;;  %6520 = vrcp.f32 %v2934_v11 }
0x28f1   :  { %v6521_v33 = vpop.eup %6520 }
0x28f2   :  { %v2947_v20 = vsub.f32 1.0, %v6521_v33  ;;  %v2956_v36 = vmul.f32 %v6521_v33, %v2954_v45 }
0x2952   :  { %v2950_v35 = vpop.permute.xlu0 %2949 }
0x2953   :  { %v2952_v39 = vmul.f32 %v2950_v35, %v2947_v20 }
0x2955   :  { %v2957_v50 = vadd.f32 %v2956_v36, %v2952_v39 }
0x2956   :  { %v2909_v17 = vpop.permute.xlu0 %2908 }
0x2957   :  { %v2963_v19 = vrot.slane %v2957_v50, 6  ;;  %v2911_v15 = vmul.f32 %v2909_v17, %v2906_v34  ;;  %v8314_v34 = vld [vmem:[#allocation10 + $0x60] sm:$0xff]  ;;  %v8320_v17 = vld [vmem:[#allocation10 + $0x50] sm:$0xff] }
0x2959   :  { %v2917_v27 = vadd.f32 %v2916_v42, %v2911_v15  ;;  %2964 = vrot.lane.b32.xlu1 %v2963_v19, %s7131_s11  ;;  %v8328_v42 = vld [vmem:[#allocation10 + $0x40] sm:$0xff]  ;;  %v3207_v19 = vld [vmem:[#allocation8 + $0x78] sm:$0xff]  ;;  %v3206_v15 = vld [vmem:[#allocation8 + $0x70] sm:$0xff] }
0x295a   :  { %3248 = vmatprep.subr.mxu1 %v3207_v19 }
0x295b   :  { %2959 = vrot.lane.b32.xlu0 %v2917_v27, %s7130_s17  ;;  %v8331_v27 = vld [vmem:[#allocation10 + $0x38] sm:$0xff]  ;;  %3249 = vmatpush1.msra.mxu1 %v3206_v15 }
0x29cb   :  { %v2965_v57 = vpop.permute.xlu1 %2964 }
0x29cd   :  { %v8266_v28 = vpop.permute.xlu0 %2959 }
0x29ce   :  { %v2967_v46 = vsel %vm513_vm11, %v8266_v28, %v2965_v57  ;;  %v3205_v57 = vld [vmem:[#allocation8 + $0x68] sm:$0xff] }
0x29cf   :  { %v2969_v51 = vrot.slane %v2967_v46, 4  ;;  %v3069_v36 = vrot.slane %v2967_v46, 6  ;;  %v8334_v46 = vld [vmem:[#allocation10 + $0x30] sm:$0xff]  ;;  %3250 = vmatprep.subr.mxu1 %v3205_v57 }
0x29d1   :  { %6126 = vmatmul.mubr.msk.f32.vlgmr.msra.gmra.mxu0 %vm643_vm13, %v2969_v51 }
0x29d2   :  { %3413 = vmatprep.mubr.f32.mxu0 %v9247_v59 }
0x2a91   :  { %v3038_v9 = vpop.f32.mrf.mxu0 }
0x2a92   :  { %v3039_v22 = vadd.f32 %v3038_v9, %v7423_v55  ;;  %v3203_v9 = vld [vmem:[#allocation8 + $0x58] sm:$0xff] }
0x2a93   :  { %v3040_v26 = vpop.f32.mrf.mxu0 }
0x2a94   :  { %v3044_v52 = vrot.slane %v3039_v22, 2  ;;  %v8274_v18 = vadd.f32 %v3040_v26, %v7426_v56  ;;  %v3075_v16 = vadd.f32 %v3039_v22, %v7504_v12  ;;  %v8342_v22 = vld [vmem:[#allocation10 + $0x20] sm:$0xff]  ;;  %v8345_v26 = vld [vmem:[#allocation10 + $0x18] sm:$0xff] }
0x2a96   :  { %3090 = vrot.lane.b32.xlu0 %v8274_v18, %s7129_s1  ;;  %3053 = vrot.lane.b32.xlu1 %v3044_v52, %s7129_s1  ;;  %v3046_v24 = vadd.f32 %v3044_v52, %v7519_v44  ;;  %v6128_v47 = vmul.f32 -1.442695, %v3075_v16  ;;  %v3202_v52 = vld [vmem:[#allocation8 + $0x50] sm:$0xff] }
0x2a97   :  { %v8348_v16 = vld [vmem:[#allocation10 + $0x10] sm:$0xff] }
0x2a98   :  { %v6127_v1 = vmul.f32 -1.442695, %v3046_v24  ;;  %6522 = vpow2.f32 %v6128_v47  ;;  %v8353_v24 = vld [vmem:[#allocation10 + $0x8] sm:$0xff]  ;;  %v3200_v47 = vld [vmem:[#allocation8 + $0x40] sm:$0xff] }
0x2a9a   :  { %6524 = vpow2.f32 %v6127_v1  ;;  %v8356_v1 = vld [vmem:[#allocation10] sm:$0xff] }
0x2aa5   :  { %v6523_v37 = vpop.eup %6522 }
0x2aa6   :  { %v3079_v4 = vadd.f32 1.0, %v6523_v37  ;;  %v3199_v37 = vld [vmem:[#allocation8 + $0x38] sm:$0xff] }
0x2aa7   :  { %v6525_v55 = vpop.eup %6524 }
0x2aa8   :  { %v3050_v11 = vadd.f32 1.0, %v6525_v55  ;;  %6526 = vrcp.f32 %v3079_v4  ;;  %v3198_v55 = vld [vmem:[#allocation8 + $0x30] sm:$0xff]  ;;  %v3197_v4 = vld [vmem:[#allocation8 + $0x28] sm:$0xff] }
0x2aaa   :  { %6528 = vrcp.f32 %v3050_v11  ;;  %v3082_v11 = vadd.f32 %v8274_v18, %v7506_v31 }
0x2ab5   :  { %v6527_v56 = vpop.eup %6526 }
0x2ab7   :  { %v8281_v33 = vpop.eup %6528 }
0x2ab8   :  { %v3063_v15 = vsub.f32 1.0, %v8281_v33 }
0x2b08   :  { %v3091_v45 = vpop.permute.xlu0 %3090  ;;  %v3054_v20 = vpop.permute.xlu1 %3053 }
0x2b09   :  { %v3093_v35 = vmul.f32 %v6527_v56, %v3091_v45  ;;  %v3056_v12 = vmul.f32 %v8281_v33, %v3054_v20  ;;  %v6129_v56 = vmul.f32 -1.442695, %v3082_v11 }
0x2b0b   :  { %3095 = vrot.lane.b32.xlu0 %v3093_v35, %s7129_s1  ;;  %3058 = vrot.lane.b32.xlu1 %v3056_v12, %s7129_s1  ;;  %v3195_v35 = vld [vmem:[#allocation8 + $0x18] sm:$0xff]  ;;  %v3194_v12 = vld [vmem:[#allocation8 + $0x10] sm:$0xff] }
0x2b0f   :  { %3106 = vrot.lane.b32.xlu1 %v2969_v51, %s7130_s17  ;;  %v8339_v51 = vld [vmem:[#allocation10 + $0x28] sm:$0xff] }
0x2b13   :  { %3070 = vrot.lane.b32.xlu1 %v3069_v36, %s7131_s11  ;;  %v3193_v36 = vld [vmem:[#allocation8 + $0x8] sm:$0xff] }
0x2b17   :  { %3116 = vrot.lane.b32.xlu1 %v2957_v50, %s7131_s11 }
0x2b1b   :  { %3124 = vrot.lane.b32.xlu1 %v8197_v32, %s7131_s11 }
0x2b1f   :  { %3132 = vrot.lane.b32.xlu1 %v8033_v10, %s7131_s11 }
0x2b23   :  { %3140 = vrot.lane.b32.xlu1 %v7949_v6, %s7131_s11 }
0x2b27   :  { %3148 = vrot.lane.b32.xlu1 %v7865_v25, %s7131_s11  ;;  %v8311_v25 = vld [vmem:[#allocation10 + $0x68] sm:$0xff] }
0x2b2b   :  { %3156 = vrot.lane.b32.xlu1 %v7741_v23, %s7131_s11  ;;  %v8307_v23 = vld [vmem:[#allocation10 + $0x78] sm:$0xff] }
0x2b2c   :  { %3365 = vmatprep.subr.mxu0 %v8307_v23 }
0x2b2f   :  { %3164 = vrot.lane.b32.xlu1 %v7617_v40, %s7131_s11  ;;  %v8309_v40 = vld [vmem:[#allocation10 + $0x70] sm:$0xff] }
0x2b30   :  { %3366 = vmatpush1.msra.mxu0 %v8309_v40 }
0x2b31   :  { %3367 = vmatprep.subr.mxu0 %v8311_v25 }
0x2b32   :  { %3368 = vmatpush1.msra.mxu0 %v8314_v34 }
0x2b7d   :  { %v3096_v39 = vpop.permute.xlu0 %3095  ;;  %v3059_v5 = vpop.permute.xlu1 %3058 }
0x2b7e   :  { %v3098_v50 = vadd.f32 %v3096_v39, %v7506_v31  ;;  %v3061_v32 = vadd.f32 %v3059_v5, %v7519_v44  ;;  %v8317_v44 = vld [vmem:[#allocation10 + $0x58] sm:$0xff]  ;;  %v3192_v39 = vld [vmem:[#allocation8] sm:$0xff] }
0x2b7f   :  { %3369 = vmatprep.subr.mxu0 %v8317_v44 }
0x2b80   :  { %6530 = vtanh.f32 %v3098_v50  ;;  %3370 = vmatpush1.msra.mxu0 %v8320_v17 }
0x2b81   :  { %6532 = vtanh.f32 %v3061_v32  ;;  %v3107_v50 = vpop.permute.xlu1 %3106 }
0x2b82   :  { %6534 = vpow2.f32 %v6129_v56 }
0x2b8d   :  { %v6531_v10 = vpop.eup %6530 }
0x2b8e   :  { %3102 = vrot.lane.b32.xlu0 %v6531_v10, %s7130_s17  ;;  %v6533_v6 = vpop.eup %6532 }
0x2b8f   :  { %v6535_v45 = vpop.eup %6534 }
0x2b90   :  { %v3086_v20 = vadd.f32 1.0, %v6535_v45 }
0x2b92   :  { %3065 = vrot.lane.b32.xlu0 %v6533_v6, %s7130_s17  ;;  %6536 = vrcp.f32 %v3086_v20  ;;  %v3071_v6 = vpop.permute.xlu1 %3070 }
0x2b96   :  { %3120 = vrot.lane.b32.xlu0 %v8238_v41, %s7131_s11  ;;  %v8325_v41 = vld [vmem:[#allocation10 + $0x48] sm:$0xff] }
0x2b97   :  { %3371 = vmatprep.subr.mxu0 %v8325_v41 }
0x2b98   :  { %3372 = vmatpush1.msra.mxu0 %v8328_v42 }
0x2b99   :  { %3373 = vmatprep.subr.mxu0 %v8331_v27 }
0x2b9a   :  { %3128 = vrot.lane.b32.xlu0 %v8156_v63, %s7131_s11  ;;  %v3204_v63 = vld [vmem:[#allocation8 + $0x60] sm:$0xff]  ;;  %3374 = vmatpush1.msra.mxu0 %v8334_v46 }
0x2b9b   :  { %3251 = vmatpush1.msra.mxu1 %v3204_v63  ;;  %3375 = vmatprep.subr.mxu0 %v8339_v51  ;;  %v3073_v63 = vmul.f32 %v8281_v33, %v3071_v6  ;;  %v3337_v33 = vld [vmem:[#allocation11] sm:$0x3] }
0x2b9c   :  { %3252 = vmatprep.subr.mxu1 %v3203_v9  ;;  %3376 = vmatpush1.msra.mxu0 %v8342_v22 }
0x2b9d   :  { %3377 = vmatprep.subr.mxu0 %v8345_v26  ;;  %3253 = vmatpush1.msra.mxu1 %v3202_v52 }
0x2b9e   :  { %3136 = vrot.lane.b32.xlu0 %v7991_v43, %s7131_s11  ;;  %v3201_v43 = vld [vmem:[#allocation8 + $0x48] sm:$0xff]  ;;  %3378 = vmatpush1.msra.mxu0 %v8348_v16 }
0x2b9f   :  { %3254 = vmatprep.subr.mxu1 %v3201_v43  ;;  %3379 = vmatprep.subr.mxu0 %v8353_v24  ;;  %v6537_v5 = vpop.eup %6536  ;;  %v3117_v43 = vpop.permute.xlu1 %3116 }
0x2ba0   :  { %3255 = vmatpush1.msra.mxu1 %v3200_v47  ;;  %3380 = vmatpush1.msra.mxu0 %v8356_v1  ;;  %v3100_v32 = vsub.f32 1.0, %v6537_v5  ;;  %v3109_v31 = vmul.f32 %v6537_v5, %v3107_v50 }
0x2ba1   :  { %3256 = vmatprep.subr.mxu1 %v3199_v37  ;;  %3414 = vmatmul.mubr.f32.vlgmr.msra.gmra.mxu0 %v9247_v59  ;;  %v8396_v37 = vrot.slane %v3337_v33, %v7263_v3 }
0x2ba2   :  { %3144 = vrot.lane.b32.xlu0 %v7907_v54, %s7131_s11  ;;  %v3196_v54 = vld [vmem:[#allocation8 + $0x20] sm:$0xff]  ;;  %3257 = vmatpush1.msra.mxu1 %v3198_v55 }
0x2ba3   :  { %3258 = vmatprep.subr.mxu1 %v3197_v4  ;;  %3670 = vmatprep.subr.mxu0 %v8307_v23  ;;  %v3125_v55 = vpop.permute.xlu1 %3124 }
0x2ba4   :  { %3259 = vmatpush1.msra.mxu1 %v3196_v54  ;;  %3671 = vmatpush1.msra.mxu0 %v8309_v40 }
0x2ba5   :  { %3672 = vmatprep.subr.mxu0 %v8311_v25  ;;  %3718 = vmatprep.mubr.f32.mxu0 %v9247_v59 }
0x2ba6   :  { %3673 = vmatpush1.msra.mxu0 %v8314_v34  ;;  %3260 = vmatprep.subr.mxu1 %v3195_v35 }
0x2ba7   :  { %3674 = vmatprep.subr.mxu0 %v8317_v44  ;;  %3261 = vmatpush1.msra.mxu1 %v3194_v12 }
0x2ba8   :  { %3675 = vmatpush1.msra.mxu0 %v8320_v17  ;;  %3262 = vmatprep.subr.mxu1 %v3193_v36 }
0x2ba9   :  { %3676 = vmatprep.subr.mxu0 %v8325_v41  ;;  %3263 = vmatpush1.msra.mxu1 %v3192_v39  ;;  %v3119_v39 = vsel %vm513_vm11, %v7580_v7, %v3117_v43 }
0x2baa   :  { %3677 = vmatpush1.msra.mxu0 %v8328_v42  ;;  %3512 = vmatprep.subr.mxu1 %v8307_v23 }
0x2bab   :  { %3678 = vmatprep.subr.mxu0 %v8331_v27 }
0x2bac   :  { %3679 = vmatpush1.msra.mxu0 %v8334_v46 }
0x2bad   :  { %3680 = vmatprep.subr.mxu0 %v8339_v51 }
0x2bae   :  { %3681 = vmatpush1.msra.mxu0 %v8342_v22 }
0x2baf   :  { %3682 = vmatprep.subr.mxu0 %v8345_v26 }
0x2bb0   :  { %3683 = vmatpush1.msra.mxu0 %v8348_v16 }
0x2bb1   :  { %3684 = vmatprep.subr.mxu0 %v8353_v24 }
0x2bb2   :  { %3685 = vmatpush1.msra.mxu0 %v8356_v1 }
0x2bb3   :  { %3980 = vmatprep.subr.mxu0 %v8307_v23 }
0x2c00   :  { %v3103_v10 = vpop.permute.xlu0 %3102 }
0x2c01   :  { %v3105_v18 = vmul.f32 %v3103_v10, %v3100_v32 }
0x2c03   :  { %v3110_v19 = vadd.f32 %v3109_v31, %v3105_v18  ;;  %v3127_v18 = vsel %vm513_vm11, %v7664_v48, %v3125_v55 }
0x2c04   :  { %v3066_v57 = vpop.permute.xlu0 %3065 }
0x2c05   :  { %v3068_v9 = vmul.f32 %v3066_v57, %v3063_v15  ;;  %3112 = vrot.lane.b32.xlu0 %v3110_v19, %s7131_s11 }
0x2c07   :  { %v3074_v52 = vadd.f32 %v3073_v63, %v3068_v9  ;;  %v9249_v63 = vld [vmem:[#allocation29_spill] sm:$0xff] }
0x2c08   :  { %v3121_v47 = vpop.permute.xlu0 %3120 }
0x2c09   :  { %3152 = vrot.lane.b32.xlu0 %v7823_v13, %s7131_s11  ;;  %3173 = vrot.lane.b32.xlu1 %v3074_v52, %s7130_s17  ;;  %v8399_v13 = vrot.slane %v3337_v33, %v7261_v2  ;;  %v3123_v32 = vsel %vm513_vm11, %v7622_v53, %v3121_v47 }
0x2c0c   :  { %v3129_v4 = vpop.permute.xlu0 %3128 }
0x2c0d   :  { %3160 = vrot.lane.b32.xlu0 %v7659_v14, %s7131_s11  ;;  %v3131_v5 = vsel %vm513_vm11, %v7746_v8, %v3129_v4 }
0x2c10   :  { %v3137_v45 = vpop.permute.xlu0 %3136 }
0x2c11   :  { %3168 = vrot.lane.b32.xlu0 %v7575_v58, %s7131_s11  ;;  %v3133_v58 = vpop.permute.xlu1 %3132  ;;  %v3139_v10 = vsel %vm513_vm11, %v7870_v60, %v3137_v45 }
0x2c12   :  { %v3135_v7 = vsel %vm513_vm11, %v7828_v29, %v3133_v58  ;;  %v9248_v29 = vld [vmem:[#allocation28_spill] sm:$0xff] }
0x2c13   :  { %v3183_v8 = vsel %vm454_vm6, %v3131_v5, %v3135_v7 }
0x2c14   :  { %v3145_v35 = vpop.permute.xlu0 %3144  ;;  %v3184_v53 = vsel %vm458_vm8, %v3183_v8, %v3139_v10 }
0x2c15   :  { %3176 = vrot.lane.b32.xlu0 %v7534_v49, %s7131_s11  ;;  %v3141_v20 = vpop.permute.xlu1 %3140  ;;  %v3147_v60 = vsel %vm513_vm11, %v7954_v21, %v3145_v35 }
0x2c16   :  { %v3143_v57 = vsel %vm513_vm11, %v9248_v29, %v3141_v20 }
0x2c17   :  { %v3185_v43 = vsel %vm462_vm10, %v3184_v53, %v3143_v57 }
0x2c19   :  { %v3149_v12 = vpop.permute.xlu1 %3148 }
0x2c1a   :  { %v3151_v9 = vsel %vm513_vm11, %v9249_v63, %v3149_v12 }
0x2c1b   :  { %v3186_v21 = vsel %vm454_vm6, %v3147_v60, %v3151_v9 }
0x2c1d   :  { %v3157_v15 = vpop.permute.xlu1 %3156 }
0x2c1e   :  { %v3159_v33 = vsel %vm513_vm11, %v8161_v30, %v3157_v15 }
0x2c21   :  { %v3165_v47 = vpop.permute.xlu1 %3164 }
0x2c22   :  { %v3167_v30 = vsel %vm513_vm11, %v8243_v0, %v3165_v47  ;;  %v3208_v0 = vld [vmem:[%s9229_s7] sm:$0x3] }
0x2c23   :  { %v3213_v12 = vrot.slane %v3208_v0, %v7263_v3 }
0x2c61   :  { %v3415_v54 = vpop.f32.mrf.mxu0 }
0x2c62   :  { %v8402_v14 = vadd.f32 %v3415_v54, %v8396_v37 }
0x2c63   :  { %v3417_v11 = vpop.f32.mrf.mxu0 }
0x2c64   :  { %3428 = vrot.lane.b32.xlu0 %v8402_v14, %s7129_s1  ;;  %v8407_v49 = vadd.f32 %v3417_v11, %v8399_v13  ;;  %v3446_v15 = vrot.slane %v8402_v14, 2 }
0x2c66   :  { %v3456_v56 = vrot.slane %v8407_v49, 2 }
0x2c68   :  { %3465 = vrot.lane.b32.xlu1 %v3456_v56, %s7129_s1 }
0x2c77   :  { %v3113_v36 = vpop.permute.xlu0 %3112 }
0x2c78   :  { %v3115_v50 = vsel %vm513_vm11, %v7538_v61, %v3113_v36  ;;  %v3217_v36 = vrot.slane %v3208_v0, %v7261_v2 }
0x2c79   :  { %v3180_v31 = vsel %vm454_vm6, %v3115_v50, %v3119_v39 }
0x2c7a   :  { %v3181_v6 = vsel %vm458_vm8, %v3180_v31, %v3123_v32 }
0x2c7b   :  { %v3153_v19 = vpop.permute.xlu0 %3152  ;;  %v3182_v61 = vsel %vm462_vm10, %v3181_v6, %v3127_v18  ;;  %v3174_v58 = vpop.permute.xlu1 %3173 }
0x2c7c   :  { %6130 = vmatmul.mubr.msk.f32.vlgmr.msra.gmra.mxu1 %vm643_vm13, %v3182_v61  ;;  %v3155_v48 = vsel %vm513_vm11, %v8038_v38, %v3153_v19 }
0x2c7d   :  { %3302 = vmatprep.mubr.f32.mxu1 %v9247_v59  ;;  %3513 = vmatpush1.msra.mxu1 %v8309_v40  ;;  %v3187_v38 = vsel %vm458_vm8, %v3186_v21, %v3155_v48 }
0x2c7e   :  { %3514 = vmatprep.subr.mxu1 %v8311_v25  ;;  %v3188_v4 = vsel %vm462_vm10, %v3187_v38, %v3159_v33 }
0x2c7f   :  { %v3161_v52 = vpop.permute.xlu0 %3160  ;;  %3515 = vmatpush1.msra.mxu1 %v8314_v34 }
0x2c80   :  { %6131 = vmatmul.mubr.msk.f32.gmra.mxu1 %vm643_vm13, %v3185_v43  ;;  %3516 = vmatprep.subr.mxu1 %v8317_v44  ;;  %v3163_v54 = vsel %vm513_vm11, %v8202_v62, %v3161_v52 }
0x2c81   :  { %3308 = vmatprep.mubr.f32.mxu1 %v9247_v59  ;;  %3517 = vmatpush1.msra.mxu1 %v8320_v17  ;;  %v3189_v45 = vsel %vm454_vm6, %v3163_v54, %v3167_v30 }
0x2c82   :  { %3518 = vmatprep.subr.mxu1 %v8325_v41 }
0x2c83   :  { %v3169_v55 = vpop.permute.xlu0 %3168  ;;  %3519 = vmatpush1.msra.mxu1 %v8328_v42 }
0x2c84   :  { %6132 = vmatmul.mubr.msk.f32.gmra.mxu1 %vm643_vm13, %v3188_v4  ;;  %3520 = vmatprep.subr.mxu1 %v8331_v27  ;;  %v3171_v11 = vsel %vm513_vm11, %v8266_v28, %v3169_v55 }
0x2c85   :  { %3314 = vmatprep.mubr.f32.mxu1 %v9247_v59  ;;  %3521 = vmatpush1.msra.mxu1 %v8334_v46  ;;  %v3190_v20 = vsel %vm458_vm8, %v3189_v45, %v3171_v11 }
0x2c86   :  { %3522 = vmatprep.subr.mxu1 %v8339_v51 }
0x2c87   :  { %v3177_v62 = vpop.permute.xlu0 %3176  ;;  %3523 = vmatpush1.msra.mxu1 %v8342_v22 }
0x2c88   :  { %v3179_v35 = vsel %vm513_vm11, %v3174_v58, %v3177_v62  ;;  %3524 = vmatprep.subr.mxu1 %v8345_v26 }
0x2c89   :  { %v3191_v28 = vsel %vm462_vm10, %v3190_v20, %v3179_v35  ;;  %3525 = vmatpush1.msra.mxu1 %v8348_v16 }
0x2c8a   :  { %6133 = vmatmul.mubr.msk.f32.gmra.mxu1 %vm643_vm13, %v3191_v28  ;;  %3526 = vmatprep.subr.mxu1 %v8353_v24 }
0x2c8b   :  { %3527 = vmatpush1.msra.mxu1 %v8356_v1  ;;  %3560 = vmatprep.mubr.f32.mxu1 %v9247_v59 }
0x2c8c   :  { %3827 = vmatprep.subr.mxu1 %v8307_v23 }
0x2cd6   :  { %v3429_v52 = vpop.permute.xlu0 %3428 }
0x2cda   :  { %v3466_v55 = vpop.permute.xlu1 %3465 }
0x2d3c   :  { %v3298_v39 = vpop.f32.mrf.mxu1 }
0x2d3d   :  { %v8485_v5 = vadd.f32 %v3298_v39, %v3213_v12 }
0x2d3e   :  { %v3300_v50 = vpop.f32.mrf.mxu1 }
0x2d3f   :  { %v8487_v32 = vadd.f32 %v3300_v50, %v3217_v36  ;;  %v3420_v10 = vadd.f32 %v8402_v14, %v8485_v5 }
0x2d40   :  { %v3304_v31 = vpop.f32.mrf.mxu1 }
0x2d41   :  { %v8491_v18 = vadd.f32 %v3304_v31, %v3213_v12  ;;  %v6134_v7 = vmul.f32 -1.442695, %v3420_v10 }
0x2d42   :  { %v3306_v6 = vpop.f32.mrf.mxu1 }
0x2d43   :  { %v8493_v8 = vadd.f32 %v3306_v6, %v3217_v36  ;;  %6538 = vpow2.f32 %v6134_v7 }
0x2d44   :  { %v3310_v19 = vpop.f32.mrf.mxu1 }
0x2d45   :  { %v8495_v61 = vadd.f32 %v3310_v19, %v3213_v12 }
0x2d46   :  { %v3312_v2 = vpop.f32.mrf.mxu1 }
0x2d47   :  { %v8497_v53 = vadd.f32 %v3312_v2, %v3217_v36 }
0x2d4a   :  { %v3316_v60 = vpop.f32.mrf.mxu1 }
0x2d4b   :  { %v8500_v48 = vadd.f32 %v3316_v60, %v3213_v12 }
0x2d4c   :  { %v3318_v11 = vpop.f32.mrf.mxu1 }
0x2d4d   :  { %v3448_v29 = vadd.f32 %v3446_v15, %v8500_v48  ;;  %v8506_v30 = vadd.f32 %v3318_v11, %v3217_v36 }
0x2d4f   :  { %v6135_v57 = vmul.f32 -1.442695, %v3448_v29  ;;  %v3458_v35 = vadd.f32 %v3456_v56, %v8506_v30 }
0x2d50   :  { %v6539_v63 = vpop.eup %6538 }
0x2d51   :  { %v3424_v9 = vadd.f32 1.0, %v6539_v63  ;;  %6540 = vpow2.f32 %v6135_v57  ;;  %v6136_v28 = vmul.f32 -1.442695, %v3458_v35 }
0x2d53   :  { %6542 = vrcp.f32 %v3424_v9 }
0x2d5e   :  { %v6541_v21 = vpop.eup %6540 }
0x2d5f   :  { %v3452_v43 = vadd.f32 1.0, %v6541_v21 }
0x2d60   :  { %v6543_v38 = vpop.eup %6542 }
0x2d61   :  { %v3431_v33 = vmul.f32 %v6543_v38, %v3429_v52  ;;  %6544 = vrcp.f32 %v3452_v43  ;;  %v3438_v36 = vsub.f32 1.0, %v6543_v38  ;;  %v3444_v50 = vmul.f32 0.0, %v6543_v38 }
0x2d63   :  { %3433 = vrot.lane.b32.xlu0 %v3431_v33, %s7129_s1 }
0x2d6e   :  { %v6545_v47 = vpop.eup %6544 }
0x2d6f   :  { %v3468_v14 = vmul.f32 %v6545_v47, %v3466_v55 }
0x2d71   :  { %3470 = vrot.lane.b32.xlu1 %v3468_v14, %s7129_s1 }
0x2dd5   :  { %v3434_v4 = vpop.permute.xlu0 %3433 }
0x2dd6   :  { %v3436_v54 = vadd.f32 %v3434_v4, %v8485_v5 }
0x2dd8   :  { %6546 = vtanh.f32 %v3436_v54 }
0x2de3   :  { %v3471_v58 = vpop.permute.xlu1 %3470 }
0x2de4   :  { %v3473_v45 = vadd.f32 %v3471_v58, %v8506_v30 }
0x2de5   :  { %v6547_v62 = vpop.eup %6546 }
0x2de6   :  { %6548 = vtanh.f32 %v3473_v45  ;;  %3440 = vrot.lane.b32.xlu0 %v6547_v62, %s7130_s17 }
0x2de7   :  { %6550 = vpow2.f32 %v6136_v28 }
0x2df3   :  { %v6549_v20 = vpop.eup %6548 }
0x2df4   :  { %3477 = vrot.lane.b32.xlu1 %v6549_v20, %s7130_s17  ;;  %v6551_v0 = vpop.eup %6550 }
0x2df5   :  { %v3462_v12 = vadd.f32 1.0, %v6551_v0 }
0x2df7   :  { %6552 = vrcp.f32 %v3462_v12 }
0x2e04   :  { %v6553_v7 = vpop.eup %6552 }
0x2e05   :  { %v3475_v6 = vsub.f32 1.0, %v6553_v7  ;;  %v3481_v2 = vmul.f32 0.0, %v6553_v7 }
0x2e58   :  { %v3441_v39 = vpop.permute.xlu0 %3440 }
0x2e59   :  { %v3443_v10 = vmul.f32 %v3441_v39, %v3438_v36 }
0x2e5b   :  { %v8514_v31 = vadd.f32 %v3444_v50, %v3443_v10 }
0x2e5d   :  { %3484 = vrot.lane.b32.xlu1 %v8514_v31, %s7130_s17 }
0x2e66   :  { %v3478_v19 = vpop.permute.xlu1 %3477 }
0x2e67   :  { %v3480_v49 = vmul.f32 %v3478_v19, %v3475_v6 }
0x2e69   :  { %v8518_v56 = vadd.f32 %v3481_v2, %v3480_v49 }
0x2e6b   :  { %v3488_v60 = vrot.slane %v8518_v56, 6 }
0x2e6d   :  { %3489 = vrot.lane.b32.xlu0 %v3488_v60, %s7131_s11 }
0x2ecf   :  { %v3485_v15 = vpop.permute.xlu1 %3484 }
0x2edf   :  { %v3490_v29 = vpop.permute.xlu0 %3489 }
0x2ee0   :  { %v3492_v57 = vsel %vm513_vm11, %v3485_v15, %v3490_v29 }
0x2ee1   :  { %6137 = vmatmul.mubr.msk.f32.vlgmr.msra.gmra.mxu1 %vm643_vm13, %v3492_v57  ;;  %v3634_v36 = vrot.slane %v3492_v57, 4  ;;  %v3593_v39 = vrot.slane %v3492_v57, 6 }
0x2ee2   :  { %3828 = vmatpush1.msra.mxu1 %v8309_v40  ;;  %3875 = vmatprep.mubr.f32.mxu1 %v9247_v59 }
0x2ee3   :  { %3829 = vmatprep.subr.mxu1 %v8311_v25 }
0x2ee4   :  { %3830 = vmatpush1.msra.mxu1 %v8314_v34 }
0x2ee5   :  { %3831 = vmatprep.subr.mxu1 %v8317_v44 }
0x2ee6   :  { %3832 = vmatpush1.msra.mxu1 %v8320_v17 }
0x2ee7   :  { %3833 = vmatprep.subr.mxu1 %v8325_v41 }
0x2ee8   :  { %3834 = vmatpush1.msra.mxu1 %v8328_v42 }
0x2ee9   :  { %3835 = vmatprep.subr.mxu1 %v8331_v27 }
0x2eea   :  { %3836 = vmatpush1.msra.mxu1 %v8334_v46 }
0x2eeb   :  { %3837 = vmatprep.subr.mxu1 %v8339_v51 }
0x2eec   :  { %3838 = vmatpush1.msra.mxu1 %v8342_v22 }
0x2eed   :  { %3839 = vmatprep.subr.mxu1 %v8345_v26 }
0x2eee   :  { %3840 = vmatpush1.msra.mxu1 %v8348_v16 }
0x2eef   :  { %3841 = vmatprep.subr.mxu1 %v8353_v24 }
0x2ef0   :  { %3842 = vmatpush1.msra.mxu1 %v8356_v1 }
0x2ef1   :  { %4133 = vmatprep.subr.mxu1 %v8307_v23 }
0x2fa1   :  { %v3562_v63 = vpop.f32.mrf.mxu1 }
0x2fa2   :  { %v3563_v9 = vadd.f32 %v3562_v63, %v8396_v37 }
0x2fa3   :  { %v3564_v21 = vpop.f32.mrf.mxu1 }
0x2fa4   :  { %v3568_v52 = vrot.slane %v3563_v9, 6  ;;  %v3565_v43 = vadd.f32 %v3564_v21, %v8399_v13  ;;  %v3599_v33 = vrot.slane %v3563_v9, 4 }
0x2fa6   :  { %v3609_v38 = vrot.slane %v3565_v43, 4  ;;  %3577 = vrot.lane.b32.xlu0 %v3568_v52, %s7129_s1  ;;  %v3570_v47 = vadd.f32 %v3568_v52, %v8485_v5  ;;  %v3601_v55 = vadd.f32 %v3599_v33, %v8500_v48 }
0x2fa8   :  { %3618 = vrot.lane.b32.xlu1 %v3609_v38, %s7129_s1  ;;  %v6138_v14 = vmul.f32 -1.442695, %v3570_v47  ;;  %v6139_v4 = vmul.f32 -1.442695, %v3601_v55  ;;  %v3611_v49 = vadd.f32 %v3609_v38, %v8506_v30 }
0x2faa   :  { %6554 = vpow2.f32 %v6138_v14  ;;  %v6140_v60 = vmul.f32 -1.442695, %v3611_v49 }
0x2fab   :  { %6556 = vpow2.f32 %v6139_v4 }
0x2fb7   :  { %v6555_v54 = vpop.eup %6554 }
0x2fb8   :  { %v6557_v11 = vpop.eup %6556  ;;  %v3574_v58 = vadd.f32 1.0, %v6555_v54 }
0x2fb9   :  { %v3605_v45 = vadd.f32 1.0, %v6557_v11 }
0x2fba   :  { %6558 = vrcp.f32 %v3574_v58 }
0x2fbb   :  { %6560 = vrcp.f32 %v3605_v45 }
0x2fc7   :  { %v6559_v62 = vpop.eup %6558 }
0x2fc8   :  { %v6561_v28 = vpop.eup %6560  ;;  %v3587_v55 = vsub.f32 1.0, %v6559_v62 }
0x3018   :  { %v3578_v20 = vpop.permute.xlu0 %3577 }
0x3019   :  { %v3580_v35 = vmul.f32 %v6559_v62, %v3578_v20 }
0x301a   :  { %v3619_v0 = vpop.permute.xlu1 %3618 }
0x301b   :  { %v3621_v12 = vmul.f32 %v6561_v28, %v3619_v0  ;;  %3582 = vrot.lane.b32.xlu0 %v3580_v35, %s7129_s1 }
0x301d   :  { %3623 = vrot.lane.b32.xlu1 %v3621_v12, %s7129_s1 }
0x301f   :  { %3635 = vrot.lane.b32.xlu0 %v3634_v36, %s7130_s17 }
0x3023   :  { %3594 = vrot.lane.b32.xlu0 %v3593_v39, %s7131_s11 }
0x308d   :  { %v3583_v50 = vpop.permute.xlu0 %3582 }
0x308e   :  { %v3585_v6 = vadd.f32 %v3583_v50, %v8485_v5 }
0x308f   :  { %v3624_v10 = vpop.permute.xlu1 %3623 }
0x3090   :  { %v3626_v7 = vadd.f32 %v3624_v10, %v8506_v30 }
0x3091   :  { %v3636_v63 = vpop.permute.xlu0 %3635 }
0x3092   :  { %6562 = vtanh.f32 %v3626_v7 }
0x3093   :  { %6564 = vtanh.f32 %v3585_v6 }
0x3094   :  { %6566 = vpow2.f32 %v6140_v60 }
0x3095   :  { %v3595_v33 = vpop.permute.xlu0 %3594 }
0x3096   :  { %v3597_v4 = vmul.f32 %v6559_v62, %v3595_v33 }
0x309f   :  { %v6563_v19 = vpop.eup %6562 }
0x30a0   :  { %3630 = vrot.lane.b32.xlu1 %v6563_v19, %s7130_s17  ;;  %v6565_v2 = vpop.eup %6564 }
0x30a1   :  { %v6567_v15 = vpop.eup %6566 }
0x30a2   :  { %v3615_v29 = vadd.f32 1.0, %v6567_v15 }
0x30a4   :  { %3589 = vrot.lane.b32.xlu1 %v6565_v2, %s7130_s17  ;;  %6568 = vrcp.f32 %v3615_v29 }
0x30b1   :  { %v6569_v57 = vpop.eup %6568 }
0x30b2   :  { %v3628_v9 = vsub.f32 1.0, %v6569_v57  ;;  %v3638_v52 = vmul.f32 %v6569_v57, %v3636_v63 }
0x3112   :  { %v3631_v21 = vpop.permute.xlu1 %3630 }
0x3113   :  { %v3633_v43 = vmul.f32 %v3631_v21, %v3628_v9 }
0x3115   :  { %v8556_v47 = vadd.f32 %v3638_v52, %v3633_v43 }
0x3116   :  { %v3590_v14 = vpop.permute.xlu1 %3589 }
0x3117   :  { %v3645_v54 = vrot.slane %v8556_v47, 2  ;;  %v3592_v38 = vmul.f32 %v3590_v14, %v3587_v55 }
0x3119   :  { %v8559_v11 = vadd.f32 %v3597_v4, %v3592_v38  ;;  %3646 = vrot.lane.b32.xlu0 %v3645_v54, %s7131_s11 }
0x311b   :  { %3641 = vrot.lane.b32.xlu1 %v8559_v11, %s7130_s17 }
0x318b   :  { %v3647_v58 = vpop.permute.xlu0 %3646 }
0x318d   :  { %v3642_v45 = vpop.permute.xlu1 %3641 }
0x318e   :  { %v3649_v20 = vsel %vm513_vm11, %v3642_v45, %v3647_v58 }
0x318f   :  { %v3651_v35 = vrot.slane %v3649_v20, 2  ;;  %v3751_v43 = vrot.slane %v3649_v20, 6 }
0x3191   :  { %6141 = vmatmul.mubr.msk.f32.vlgmr.msra.gmra.mxu0 %vm643_vm13, %v3651_v35 }
0x3192   :  { %3981 = vmatpush1.msra.mxu0 %v8309_v40  ;;  %4028 = vmatprep.mubr.f32.mxu0 %v9247_v59 }
0x3193   :  { %3982 = vmatprep.subr.mxu0 %v8311_v25 }
0x3194   :  { %3983 = vmatpush1.msra.mxu0 %v8314_v34 }
0x3195   :  { %3984 = vmatprep.subr.mxu0 %v8317_v44 }
0x3196   :  { %3985 = vmatpush1.msra.mxu0 %v8320_v17 }
0x3197   :  { %3986 = vmatprep.subr.mxu0 %v8325_v41 }
0x3198   :  { %3987 = vmatpush1.msra.mxu0 %v8328_v42 }
0x3199   :  { %3988 = vmatprep.subr.mxu0 %v8331_v27 }
0x319a   :  { %3989 = vmatpush1.msra.mxu0 %v8334_v46 }
0x319b   :  { %3990 = vmatprep.subr.mxu0 %v8339_v51 }
0x319c   :  { %3991 = vmatpush1.msra.mxu0 %v8342_v22 }
0x319d   :  { %3992 = vmatprep.subr.mxu0 %v8345_v26 }
0x319e   :  { %3993 = vmatpush1.msra.mxu0 %v8348_v16 }
0x319f   :  { %3994 = vmatprep.subr.mxu0 %v8353_v24 }
0x31a0   :  { %3995 = vmatpush1.msra.mxu0 %v8356_v1 }
0x31a1   :  { %4291 = vmatprep.subr.mxu0 %v8307_v23 }
0x3251   :  { %v3720_v62 = vpop.f32.mrf.mxu0 }
0x3252   :  { %v3721_v28 = vadd.f32 %v3720_v62, %v8396_v37 }
0x3253   :  { %v3722_v0 = vpop.f32.mrf.mxu0 }
0x3254   :  { %v3726_v12 = vrot.slane %v3721_v28, 4  ;;  %v3723_v36 = vadd.f32 %v3722_v0, %v8399_v13  ;;  %v3757_v50 = vrot.slane %v3721_v28, 6 }
0x3256   :  { %v3767_v39 = vrot.slane %v3723_v36, 6  ;;  %3735 = vrot.lane.b32.xlu0 %v3726_v12, %s7129_s1  ;;  %v3728_v10 = vadd.f32 %v3726_v12, %v8485_v5  ;;  %v3759_v7 = vadd.f32 %v3757_v50, %v8500_v48  ;;  %v5855_v12 = vrot.slane %v8556_v47, 6 }
0x3258   :  { %3776 = vrot.lane.b32.xlu1 %v3767_v39, %s7129_s1  ;;  %v6142_v6 = vmul.f32 -1.442695, %v3728_v10  ;;  %v6143_v19 = vmul.f32 -1.442695, %v3759_v7  ;;  %v3769_v58 = vadd.f32 %v3767_v39, %v8506_v30  ;;  %v5814_v39 = vrot.slane %v8559_v11, 2 }
0x325a   :  { %6570 = vpow2.f32 %v6142_v6  ;;  %v6144_v45 = vmul.f32 -1.442695, %v3769_v58  ;;  %v5816_v47 = vadd.f32 %v5814_v39, %v8514_v31 }
0x325b   :  { %6572 = vpow2.f32 %v6143_v19 }
0x3267   :  { %v6571_v2 = vpop.eup %6570 }
0x3268   :  { %v6573_v49 = vpop.eup %6572  ;;  %v3732_v60 = vadd.f32 1.0, %v6571_v2  ;;  %v5857_v2 = vadd.f32 %v5855_v12, %v8518_v56 }
0x3269   :  { %v3763_v15 = vadd.f32 1.0, %v6573_v49 }
0x326a   :  { %6574 = vrcp.f32 %v3732_v60 }
0x326b   :  { %6576 = vrcp.f32 %v3763_v15 }
0x3277   :  { %v6575_v29 = vpop.eup %6574 }
0x3278   :  { %v6577_v9 = vpop.eup %6576  ;;  %v3745_v19 = vsub.f32 1.0, %v6575_v29 }
0x32c8   :  { %v3736_v57 = vpop.permute.xlu0 %3735 }
0x32c9   :  { %v3738_v63 = vmul.f32 %v6575_v29, %v3736_v57 }
0x32ca   :  { %v3777_v21 = vpop.permute.xlu1 %3776 }
0x32cb   :  { %v3779_v52 = vmul.f32 %v6577_v9, %v3777_v21  ;;  %3740 = vrot.lane.b32.xlu0 %v3738_v63, %s7129_s1 }
0x32cd   :  { %3781 = vrot.lane.b32.xlu1 %v3779_v52, %s7129_s1 }
0x32cf   :  { %3792 = vrot.lane.b32.xlu0 %v3649_v20, %s7130_s17 }
0x32d3   :  { %3752 = vrot.lane.b32.xlu0 %v3751_v43, %s7131_s11 }
0x333d   :  { %v3741_v33 = vpop.permute.xlu0 %3740 }
0x333e   :  { %v3743_v4 = vadd.f32 %v3741_v33, %v8485_v5 }
0x333f   :  { %v3782_v55 = vpop.permute.xlu1 %3781 }
0x3340   :  { %v3784_v14 = vadd.f32 %v3782_v55, %v8506_v30 }
0x3341   :  { %v3793_v28 = vpop.permute.xlu0 %3792 }
0x3342   :  { %6578 = vtanh.f32 %v3784_v14 }
0x3343   :  { %6580 = vtanh.f32 %v3743_v4 }
0x3344   :  { %6582 = vpow2.f32 %v6144_v45 }
0x3345   :  { %v3753_v7 = vpop.permute.xlu0 %3752 }
0x3346   :  { %v3755_v60 = vmul.f32 %v6575_v29, %v3753_v7 }
0x334f   :  { %v6579_v54 = vpop.eup %6578 }
0x3350   :  { %3788 = vrot.lane.b32.xlu1 %v6579_v54, %s7130_s17  ;;  %v6581_v38 = vpop.eup %6580 }
0x3351   :  { %v6583_v20 = vpop.eup %6582 }
0x3352   :  { %v3773_v35 = vadd.f32 1.0, %v6583_v20 }
0x3354   :  { %3747 = vrot.lane.b32.xlu1 %v6581_v38, %s7130_s17  ;;  %6584 = vrcp.f32 %v3773_v35 }
0x3361   :  { %v6585_v62 = vpop.eup %6584 }
0x3362   :  { %v3786_v0 = vsub.f32 1.0, %v6585_v62  ;;  %v3795_v50 = vmul.f32 %v6585_v62, %v3793_v28 }
0x33c2   :  { %v3789_v36 = vpop.permute.xlu1 %3788 }
0x33c3   :  { %v3791_v10 = vmul.f32 %v3789_v36, %v3786_v0 }
0x33c5   :  { %v3796_v6 = vadd.f32 %v3795_v50, %v3791_v10 }
0x33c6   :  { %v3748_v49 = vpop.permute.xlu1 %3747 }
0x33c7   :  { %v3802_v15 = vrot.slane %v3796_v6, 6  ;;  %v5858_v57 = vrot.slane %v3796_v6, 4  ;;  %v3750_v63 = vmul.f32 %v3748_v49, %v3745_v19 }
0x33c9   :  { %v8601_v9 = vadd.f32 %v5858_v57, %v5857_v2  ;;  %v3756_v21 = vadd.f32 %v3755_v60, %v3750_v63  ;;  %3803 = vrot.lane.b32.xlu0 %v3802_v15, %s7131_s11 }
0x33cb   :  { %v5817_v52 = vrot.slane %v3756_v21, 4  ;;  %3798 = vrot.lane.b32.xlu1 %v3756_v21, %s7130_s17 }
0x33cd   :  { %v8606_v43 = vadd.f32 %v5817_v52, %v5816_v47 }
0x343b   :  { %v3804_v56 = vpop.permute.xlu0 %3803 }
0x343d   :  { %v3799_v33 = vpop.permute.xlu1 %3798 }
0x343e   :  { %v3806_v11 = vsel %vm513_vm11, %v3799_v33, %v3804_v56 }
0x343f   :  { %v3808_v29 = vrot.slane %v3806_v11, 4  ;;  %v3908_v58 = vrot.slane %v3806_v11, 6 }
0x3441   :  { %6145 = vmatmul.mubr.msk.f32.vlgmr.msra.gmra.mxu1 %vm643_vm13, %v3808_v29 }
0x3442   :  { %4134 = vmatpush1.msra.mxu1 %v8309_v40  ;;  %4181 = vmatprep.mubr.f32.mxu1 %v9247_v59 }
0x3443   :  { %4135 = vmatprep.subr.mxu1 %v8311_v25 }
0x3444   :  { %4136 = vmatpush1.msra.mxu1 %v8314_v34 }
0x3445   :  { %4137 = vmatprep.subr.mxu1 %v8317_v44 }
0x3446   :  { %4138 = vmatpush1.msra.mxu1 %v8320_v17 }
0x3447   :  { %4139 = vmatprep.subr.mxu1 %v8325_v41 }
0x3448   :  { %4140 = vmatpush1.msra.mxu1 %v8328_v42 }
0x3449   :  { %4141 = vmatprep.subr.mxu1 %v8331_v27 }
0x344a   :  { %4142 = vmatpush1.msra.mxu1 %v8334_v46 }
0x344b   :  { %4143 = vmatprep.subr.mxu1 %v8339_v51 }
0x344c   :  { %4144 = vmatpush1.msra.mxu1 %v8342_v22 }
0x344d   :  { %4145 = vmatprep.subr.mxu1 %v8345_v26 }
0x344e   :  { %4146 = vmatpush1.msra.mxu1 %v8348_v16 }
0x344f   :  { %4147 = vmatprep.subr.mxu1 %v8353_v24 }
0x3450   :  { %4148 = vmatpush1.msra.mxu1 %v8356_v1 }
0x3451   :  { %4448 = vmatprep.subr.mxu1 %v8307_v23 }
0x3501   :  { %v3877_v40 = vpop.f32.mrf.mxu1 }
0x3502   :  { %v3878_v25 = vadd.f32 %v3877_v40, %v8396_v37 }
0x3503   :  { %v3879_v34 = vpop.f32.mrf.mxu1 }
0x3504   :  { %v3883_v44 = vrot.slane %v3878_v25, 2  ;;  %v3880_v17 = vadd.f32 %v3879_v34, %v8399_v13  ;;  %v3914_v41 = vadd.f32 %v3878_v25, %v8500_v48 }
0x3506   :  { %3929 = vrot.lane.b32.xlu1 %v3880_v17, %s7129_s1  ;;  %3892 = vrot.lane.b32.xlu0 %v3883_v44, %s7129_s1  ;;  %v3885_v42 = vadd.f32 %v3883_v44, %v8485_v5  ;;  %v6147_v27 = vmul.f32 -1.442695, %v3914_v41  ;;  %v3921_v12 = vadd.f32 %v3880_v17, %v8506_v30  ;;  %v8652_v44 = vld [vmem:[#allocation10 + $0x70] sm:$0xff]  ;;  %v8659_v17 = vld [vmem:[#allocation10 + $0x60] sm:$0xff] }
0x3507   :  { %v8665_v41 = vld [vmem:[#allocation10 + $0x50] sm:$0xff] }
0x3508   :  { %v6146_v46 = vmul.f32 -1.442695, %v3885_v42  ;;  %6586 = vpow2.f32 %v6147_v27  ;;  %v6148_v36 = vmul.f32 -1.442695, %v3921_v12  ;;  %v8668_v42 = vld [vmem:[#allocation10 + $0x48] sm:$0xff]  ;;  %v8671_v27 = vld [vmem:[#allocation10 + $0x40] sm:$0xff] }
0x350a   :  { %6588 = vpow2.f32 %v6146_v46  ;;  %v8674_v46 = vld [vmem:[#allocation10 + $0x38] sm:$0xff] }
0x3515   :  { %v6587_v23 = vpop.eup %6586 }
0x3516   :  { %v3918_v22 = vadd.f32 1.0, %v6587_v23  ;;  %v8677_v23 = vld [vmem:[#allocation10 + $0x30] sm:$0xff] }
0x3517   :  { %v6589_v51 = vpop.eup %6588 }
0x3518   :  { %v3889_v26 = vadd.f32 1.0, %v6589_v51  ;;  %6590 = vrcp.f32 %v3918_v22  ;;  %v8680_v51 = vld [vmem:[#allocation10 + $0x28] sm:$0xff]  ;;  %v8683_v22 = vld [vmem:[#allocation10 + $0x20] sm:$0xff] }
0x351a   :  { %6592 = vrcp.f32 %v3889_v26  ;;  %v8686_v26 = vld [vmem:[#allocation10 + $0x18] sm:$0xff] }
0x3525   :  { %v6591_v31 = vpop.eup %6590 }
0x3527   :  { %v6593_v55 = vpop.eup %6592 }
0x3528   :  { %v3902_v57 = vsub.f32 1.0, %v6593_v55 }
0x3578   :  { %v3930_v14 = vpop.permute.xlu1 %3929  ;;  %v3893_v4 = vpop.permute.xlu0 %3892 }
0x3579   :  { %v3932_v54 = vmul.f32 %v6591_v31, %v3930_v14  ;;  %v3895_v38 = vmul.f32 %v6593_v55, %v3893_v4  ;;  %v8692_v31 = vld [vmem:[#allocation10 + $0x78] sm:$0xff] }
0x357b   :  { %3934 = vrot.lane.b32.xlu1 %v3932_v54, %s7129_s1  ;;  %3897 = vrot.lane.b32.xlu0 %v3895_v38, %s7129_s1 }
0x357f   :  { %3945 = vrot.lane.b32.xlu0 %v3808_v29, %s7130_s17 }
0x3583   :  { %3909 = vrot.lane.b32.xlu0 %v3908_v58, %s7131_s11 }
0x35ed   :  { %v3935_v45 = vpop.permute.xlu1 %3934  ;;  %v3898_v20 = vpop.permute.xlu0 %3897 }
0x35ee   :  { %v3937_v35 = vadd.f32 %v3935_v45, %v8506_v30  ;;  %v3900_v62 = vadd.f32 %v3898_v20, %v8485_v5 }
0x35f0   :  { %6594 = vtanh.f32 %v3937_v35 }
0x35f1   :  { %6596 = vtanh.f32 %v3900_v62  ;;  %v3946_v6 = vpop.permute.xlu0 %3945 }
0x35f2   :  { %6598 = vpow2.f32 %v6148_v36 }
0x35f5   :  { %v3910_v60 = vpop.permute.xlu0 %3909 }
0x35f6   :  { %v3912_v21 = vmul.f32 %v6593_v55, %v3910_v60 }
0x35fd   :  { %v6595_v28 = vpop.eup %6594 }
0x35fe   :  { %3941 = vrot.lane.b32.xlu1 %v6595_v28, %s7130_s17  ;;  %v6597_v0 = vpop.eup %6596 }
0x35ff   :  { %v6599_v50 = vpop.eup %6598 }
0x3600   :  { %v3925_v10 = vadd.f32 1.0, %v6599_v50 }
0x3602   :  { %3904 = vrot.lane.b32.xlu1 %v6597_v0, %s7130_s17  ;;  %6600 = vrcp.f32 %v3925_v10 }
0x360f   :  { %v6601_v7 = vpop.eup %6600 }
0x3610   :  { %v3939_v19 = vsub.f32 1.0, %v6601_v7  ;;  %v3948_v39 = vmul.f32 %v6601_v7, %v3946_v6 }
0x3670   :  { %v3942_v2 = vpop.permute.xlu1 %3941 }
0x3671   :  { %v3944_v49 = vmul.f32 %v3942_v2, %v3939_v19 }
0x3673   :  { %v3949_v15 = vadd.f32 %v3948_v39, %v3944_v49 }
0x3674   :  { %v3905_v63 = vpop.permute.xlu1 %3904 }
0x3675   :  { %v3955_v47 = vrot.slane %v3949_v15, 2  ;;  %v3907_v52 = vmul.f32 %v3905_v63, %v3902_v57 }
0x3677   :  { %v8643_v30 = vadd.f32 %v8601_v9, %v3955_v47  ;;  %v3913_v56 = vadd.f32 %v3912_v21, %v3907_v52  ;;  %3956 = vrot.lane.b32.xlu0 %v3955_v47, %s7131_s11  ;;  %v8656_v9 = vld [vmem:[#allocation10 + $0x68] sm:$0xff] }
0x3679   :  { %v5820_v33 = vrot.slane %v3913_v56, 6  ;;  %3951 = vrot.lane.b32.xlu1 %v3913_v56, %s7130_s17 }
0x367b   :  { %v8648_v11 = vadd.f32 %v5820_v33, %v8606_v43  ;;  %v8662_v43 = vld [vmem:[#allocation10 + $0x58] sm:$0xff] }
0x36e9   :  { %v3957_v29 = vpop.permute.xlu0 %3956 }
0x36eb   :  { %v3952_v40 = vpop.permute.xlu1 %3951 }
0x36ec   :  { %v3959_v25 = vsel %vm513_vm11, %v3952_v40, %v3957_v29 }
0x36ed   :  { %v3961_v34 = vrot.slane %v3959_v25, 6 }
0x36ef   :  { %6149 = vmatmul.mubr.msk.f32.vlgmr.msra.gmra.mxu0 %vm643_vm13, %v3961_v34 }
0x36f0   :  { %4292 = vmatpush1.msra.mxu0 %v8652_v44  ;;  %4339 = vmatprep.mubr.f32.mxu0 %v9247_v59 }
0x36f1   :  { %4293 = vmatprep.subr.mxu0 %v8656_v9 }
0x36f2   :  { %4294 = vmatpush1.msra.mxu0 %v8659_v17 }
0x36f3   :  { %4295 = vmatprep.subr.mxu0 %v8662_v43 }
0x36f4   :  { %4296 = vmatpush1.msra.mxu0 %v8665_v41 }
0x36f5   :  { %4297 = vmatprep.subr.mxu0 %v8668_v42 }
0x36f6   :  { %4298 = vmatpush1.msra.mxu0 %v8671_v27 }
0x36f7   :  { %4299 = vmatprep.subr.mxu0 %v8674_v46 }
0x36f8   :  { %4300 = vmatpush1.msra.mxu0 %v8677_v23 }
0x36f9   :  { %4301 = vmatprep.subr.mxu0 %v8680_v51 }
0x36fa   :  { %4302 = vmatpush1.msra.mxu0 %v8683_v22 }
0x36fb   :  { %4303 = vmatprep.subr.mxu0 %v8686_v26 }
0x36fc   :  { %4304 = vmatpush1.msra.mxu0 %v8348_v16 }
0x36fd   :  { %4305 = vmatprep.subr.mxu0 %v8353_v24 }
0x36fe   :  { %4306 = vmatpush1.msra.mxu0 %v8356_v1 }
0x36ff   :  { %4601 = vmatprep.subr.mxu0 %v8692_v31 }
0x37af   :  { %v4030_v55 = vpop.f32.mrf.mxu0 }
0x37b0   :  { %v4031_v14 = vadd.f32 %v4030_v55, %v8396_v37 }
0x37b1   :  { %v4032_v4 = vpop.f32.mrf.mxu0 }
0x37b2   :  { %v4033_v54 = vadd.f32 %v4032_v4, %v8399_v13  ;;  %4043 = vrot.lane.b32.xlu0 %v4031_v14, %s7129_s1  ;;  %v4035_v16 = vadd.f32 %v4031_v14, %v8491_v18  ;;  %v4064_v24 = vrot.slane %v4031_v14, 2 }
0x37b4   :  { %v4074_v38 = vrot.slane %v4033_v54, 2  ;;  %v6150_v58 = vmul.f32 -1.442695, %v4035_v16  ;;  %v4066_v1 = vadd.f32 %v4064_v24, %v8495_v61 }
0x37b6   :  { %4083 = vrot.lane.b32.xlu1 %v4074_v38, %s7129_s1  ;;  %6602 = vpow2.f32 %v6150_v58  ;;  %v6151_v45 = vmul.f32 -1.442695, %v4066_v1  ;;  %v4076_v15 = vadd.f32 %v4074_v38, %v8497_v53 }
0x37b8   :  { %6604 = vpow2.f32 %v6151_v45  ;;  %v6152_v57 = vmul.f32 -1.442695, %v4076_v15 }
0x37c3   :  { %v6603_v20 = vpop.eup %6602 }
0x37c4   :  { %v4039_v35 = vadd.f32 1.0, %v6603_v20 }
0x37c5   :  { %v6605_v62 = vpop.eup %6604 }
0x37c6   :  { %6606 = vrcp.f32 %v4039_v35  ;;  %v4070_v28 = vadd.f32 1.0, %v6605_v62  ;;  %v8739_v35 = vld [vmem:[#allocation10] sm:$0xff] }
0x37c8   :  { %6608 = vrcp.f32 %v4070_v28 }
0x37d3   :  { %v6607_v0 = vpop.eup %6606 }
0x37d4   :  { %v4053_v55 = vsub.f32 1.0, %v6607_v0 }
0x37d5   :  { %v6609_v50 = vpop.eup %6608 }
0x3824   :  { %v4044_v12 = vpop.permute.xlu0 %4043 }
0x3825   :  { %v4046_v36 = vmul.f32 %v6607_v0, %v4044_v12 }
0x3827   :  { %4048 = vrot.lane.b32.xlu0 %v4046_v36, %s7129_s1 }
0x3828   :  { %v4084_v10 = vpop.permute.xlu1 %4083 }
0x3829   :  { %v4086_v7 = vmul.f32 %v6609_v50, %v4084_v10 }
0x382b   :  { %4088 = vrot.lane.b32.xlu1 %v4086_v7, %s7129_s1  ;;  %4099 = vrot.lane.b32.xlu0 %v3959_v25, %s7130_s17 }
0x382f   :  { %4059 = vrot.lane.b32.xlu0 %v3961_v34, %s7131_s11 }
0x3899   :  { %v4049_v6 = vpop.permute.xlu0 %4048 }
0x389a   :  { %v4051_v39 = vadd.f32 %v4049_v6, %v8491_v18 }
0x389d   :  { %v4089_v19 = vpop.permute.xlu1 %4088  ;;  %v4100_v52 = vpop.permute.xlu0 %4099 }
0x389e   :  { %v4091_v2 = vadd.f32 %v4089_v19, %v8497_v53 }
0x38a0   :  { %6610 = vtanh.f32 %v4091_v2 }
0x38a1   :  { %6612 = vtanh.f32 %v4051_v39  ;;  %v4060_v25 = vpop.permute.xlu0 %4059 }
0x38a2   :  { %6614 = vpow2.f32 %v6152_v57  ;;  %v4062_v4 = vmul.f32 %v6607_v0, %v4060_v25 }
0x38ad   :  { %v6611_v49 = vpop.eup %6610 }
0x38ae   :  { %4095 = vrot.lane.b32.xlu1 %v6611_v49, %s7130_s17  ;;  %v6613_v60 = vpop.eup %6612 }
0x38af   :  { %v6615_v63 = vpop.eup %6614 }
0x38b0   :  { %v4080_v21 = vadd.f32 1.0, %v6615_v63 }
0x38b2   :  { %4055 = vrot.lane.b32.xlu1 %v6613_v60, %s7130_s17  ;;  %6616 = vrcp.f32 %v4080_v21 }
0x38bf   :  { %v6617_v47 = vpop.eup %6616 }
0x38c0   :  { %v4093_v56 = vsub.f32 1.0, %v6617_v47  ;;  %v4102_v29 = vmul.f32 %v6617_v47, %v4100_v52 }
0x3920   :  { %v4096_v33 = vpop.permute.xlu1 %4095 }
0x3921   :  { %v4098_v40 = vmul.f32 %v4096_v33, %v4093_v56 }
0x3923   :  { %v4103_v34 = vadd.f32 %v4102_v29, %v4098_v40 }
0x3924   :  { %v4056_v14 = vpop.permute.xlu1 %4055 }
0x3925   :  { %v4109_v54 = vrot.slane %v4103_v34, 6  ;;  %v8711_v16 = vadd.f32 %v8643_v30, %v4103_v34  ;;  %v4058_v38 = vmul.f32 %v4056_v14, %v4053_v55  ;;  %v8733_v30 = vld [vmem:[#allocation10 + $0x10] sm:$0xff] }
0x3927   :  { %v4063_v24 = vadd.f32 %v4062_v4, %v4058_v38  ;;  %4110 = vrot.lane.b32.xlu0 %v4109_v54, %s7131_s11 }
0x3929   :  { %v8715_v58 = vadd.f32 %v8648_v11, %v4063_v24  ;;  %4105 = vrot.lane.b32.xlu1 %v4063_v24, %s7130_s17  ;;  %v8736_v11 = vld [vmem:[#allocation10 + $0x8] sm:$0xff] }
0x3999   :  { %v4111_v1 = vpop.permute.xlu0 %4110 }
0x399b   :  { %v4106_v45 = vpop.permute.xlu1 %4105 }
0x399c   :  { %v4113_v20 = vsel %vm513_vm11, %v4106_v45, %v4111_v1 }
0x399d   :  { %6153 = vmatmul.mubr.msk.f32.vlgmr.msra.gmra.mxu1 %vm643_vm13, %v4113_v20  ;;  %v4255_v33 = vrot.slane %v4113_v20, 4  ;;  %v4214_v29 = vrot.slane %v4113_v20, 6 }
0x399e   :  { %4449 = vmatpush1.msra.mxu1 %v8652_v44  ;;  %4496 = vmatprep.mubr.f32.mxu1 %v9247_v59 }
0x399f   :  { %4450 = vmatprep.subr.mxu1 %v8656_v9 }
0x39a0   :  { %4451 = vmatpush1.msra.mxu1 %v8659_v17 }
0x39a1   :  { %4452 = vmatprep.subr.mxu1 %v8662_v43 }
0x39a2   :  { %4453 = vmatpush1.msra.mxu1 %v8665_v41 }
0x39a3   :  { %4454 = vmatprep.subr.mxu1 %v8668_v42 }
0x39a4   :  { %4455 = vmatpush1.msra.mxu1 %v8671_v27 }
0x39a5   :  { %4456 = vmatprep.subr.mxu1 %v8674_v46 }
0x39a6   :  { %4457 = vmatpush1.msra.mxu1 %v8677_v23 }
0x39a7   :  { %4458 = vmatprep.subr.mxu1 %v8680_v51 }
0x39a8   :  { %4459 = vmatpush1.msra.mxu1 %v8683_v22 }
0x39a9   :  { %4460 = vmatprep.subr.mxu1 %v8686_v26 }
0x39aa   :  { %4461 = vmatpush1.msra.mxu1 %v8733_v30 }
0x39ab   :  { %4462 = vmatprep.subr.mxu1 %v8736_v11 }
0x39ac   :  { %4463 = vmatpush1.msra.mxu1 %v8739_v35 }
0x39ad   :  { %4754 = vmatprep.subr.mxu1 %v8692_v31 }
0x3a5d   :  { %v4183_v62 = vpop.f32.mrf.mxu1 }
0x3a5e   :  { %v4184_v28 = vadd.f32 %v4183_v62, %v8396_v37 }
0x3a5f   :  { %v4185_v0 = vpop.f32.mrf.mxu1 }
0x3a60   :  { %v4189_v12 = vrot.slane %v4184_v28, 6  ;;  %v4186_v36 = vadd.f32 %v4185_v0, %v8399_v13  ;;  %v4220_v10 = vrot.slane %v4184_v28, 4 }
0x3a62   :  { %v4230_v50 = vrot.slane %v4186_v36, 4  ;;  %4198 = vrot.lane.b32.xlu0 %v4189_v12, %s7129_s1  ;;  %v4191_v7 = vadd.f32 %v4189_v12, %v8491_v18  ;;  %v4222_v6 = vadd.f32 %v4220_v10, %v8495_v61 }
0x3a64   :  { %4239 = vrot.lane.b32.xlu1 %v4230_v50, %s7129_s1  ;;  %v6154_v19 = vmul.f32 -1.442695, %v4191_v7  ;;  %v6155_v2 = vmul.f32 -1.442695, %v4222_v6  ;;  %v4232_v54 = vadd.f32 %v4230_v50, %v8497_v53 }
0x3a66   :  { %6618 = vpow2.f32 %v6154_v19  ;;  %v6156_v38 = vmul.f32 -1.442695, %v4232_v54 }
0x3a67   :  { %6620 = vpow2.f32 %v6155_v2 }
0x3a73   :  { %v6619_v39 = vpop.eup %6618 }
0x3a74   :  { %v6621_v49 = vpop.eup %6620  ;;  %v4195_v60 = vadd.f32 1.0, %v6619_v39 }
0x3a75   :  { %v4226_v15 = vadd.f32 1.0, %v6621_v49 }
0x3a76   :  { %6622 = vrcp.f32 %v4195_v60 }
0x3a77   :  { %6624 = vrcp.f32 %v4226_v15 }
0x3a83   :  { %v6623_v57 = vpop.eup %6622 }
0x3a84   :  { %v6625_v47 = vpop.eup %6624  ;;  %v4208_v7 = vsub.f32 1.0, %v6623_v57 }
0x3ad4   :  { %v4199_v63 = vpop.permute.xlu0 %4198 }
0x3ad5   :  { %v4201_v21 = vmul.f32 %v6623_v57, %v4199_v63 }
0x3ad6   :  { %v4240_v52 = vpop.permute.xlu1 %4239 }
0x3ad7   :  { %v4242_v56 = vmul.f32 %v6625_v47, %v4240_v52  ;;  %4203 = vrot.lane.b32.xlu0 %v4201_v21, %s7129_s1 }
0x3ad9   :  { %4244 = vrot.lane.b32.xlu1 %v4242_v56, %s7129_s1 }
0x3adb   :  { %4256 = vrot.lane.b32.xlu0 %v4255_v33, %s7130_s17 }
0x3adf   :  { %4215 = vrot.lane.b32.xlu0 %v4214_v29, %s7131_s11 }
0x3b49   :  { %v4204_v40 = vpop.permute.xlu0 %4203 }
0x3b4a   :  { %v4206_v55 = vadd.f32 %v4204_v40, %v8491_v18 }
0x3b4b   :  { %v4245_v25 = vpop.permute.xlu1 %4244 }
0x3b4c   :  { %v4247_v34 = vadd.f32 %v4245_v25, %v8497_v53 }
0x3b4d   :  { %v4257_v20 = vpop.permute.xlu0 %4256 }
0x3b4e   :  { %6626 = vtanh.f32 %v4247_v34 }
0x3b4f   :  { %6628 = vtanh.f32 %v4206_v55 }
0x3b50   :  { %6630 = vpow2.f32 %v6156_v38 }
0x3b51   :  { %v4216_v36 = vpop.permute.xlu0 %4215 }
0x3b52   :  { %v4218_v19 = vmul.f32 %v6623_v57, %v4216_v36 }
0x3b5b   :  { %v6627_v14 = vpop.eup %6626 }
0x3b5c   :  { %4251 = vrot.lane.b32.xlu1 %v6627_v14, %s7130_s17  ;;  %v6629_v4 = vpop.eup %6628 }
0x3b5d   :  { %v6631_v24 = vpop.eup %6630 }
0x3b5e   :  { %v4236_v1 = vadd.f32 1.0, %v6631_v24 }
0x3b60   :  { %4210 = vrot.lane.b32.xlu1 %v6629_v4, %s7130_s17  ;;  %6632 = vrcp.f32 %v4236_v1 }
0x3b6d   :  { %v6633_v45 = vpop.eup %6632 }
0x3b6e   :  { %v4249_v62 = vsub.f32 1.0, %v6633_v45  ;;  %v4259_v0 = vmul.f32 %v6633_v45, %v4257_v20 }
0x3bce   :  { %v4252_v28 = vpop.permute.xlu1 %4251 }
0x3bcf   :  { %v4254_v12 = vmul.f32 %v4252_v28, %v4249_v62 }
0x3bd1   :  { %v4260_v10 = vadd.f32 %v4259_v0, %v4254_v12 }
0x3bd2   :  { %v4211_v6 = vpop.permute.xlu1 %4210 }
0x3bd3   :  { %v4266_v2 = vrot.slane %v4260_v10, 2  ;;  %v5864_v39 = vrot.slane %v4260_v10, 6  ;;  %v4213_v49 = vmul.f32 %v4211_v6, %v4208_v7 }
0x3bd5   :  { %v8759_v50 = vadd.f32 %v5864_v39, %v8711_v16  ;;  %v4219_v60 = vadd.f32 %v4218_v19, %v4213_v49  ;;  %4267 = vrot.lane.b32.xlu0 %v4266_v2, %s7131_s11 }
0x3bd7   :  { %v5824_v15 = vrot.slane %v4219_v60, 2  ;;  %4262 = vrot.lane.b32.xlu1 %v4219_v60, %s7130_s17 }
0x3bd9   :  { %v8764_v63 = vadd.f32 %v5824_v15, %v8715_v58 }
0x3c47   :  { %v4268_v21 = vpop.permute.xlu0 %4267 }
0x3c49   :  { %v4263_v47 = vpop.permute.xlu1 %4262 }
0x3c4a   :  { %v4270_v52 = vsel %vm513_vm11, %v4263_v47, %v4268_v21 }
0x3c4b   :  { %v4272_v57 = vrot.slane %v4270_v52, 2  ;;  %v4372_v36 = vrot.slane %v4270_v52, 6 }
0x3c4d   :  { %6157 = vmatmul.mubr.msk.f32.vlgmr.msra.gmra.mxu0 %vm643_vm13, %v4272_v57 }
0x3c4e   :  { %4602 = vmatpush1.msra.mxu0 %v8652_v44  ;;  %4649 = vmatprep.mubr.f32.mxu0 %v9247_v59 }
0x3c4f   :  { %4603 = vmatprep.subr.mxu0 %v8656_v9 }
0x3c50   :  { %4604 = vmatpush1.msra.mxu0 %v8659_v17 }
0x3c51   :  { %4605 = vmatprep.subr.mxu0 %v8662_v43 }
0x3c52   :  { %4606 = vmatpush1.msra.mxu0 %v8665_v41 }
0x3c53   :  { %4607 = vmatprep.subr.mxu0 %v8668_v42 }
0x3c54   :  { %4608 = vmatpush1.msra.mxu0 %v8671_v27 }
0x3c55   :  { %4609 = vmatprep.subr.mxu0 %v8674_v46 }
0x3c56   :  { %4610 = vmatpush1.msra.mxu0 %v8677_v23 }
0x3c57   :  { %4611 = vmatprep.subr.mxu0 %v8680_v51 }
0x3c58   :  { %4612 = vmatpush1.msra.mxu0 %v8683_v22 }
0x3c59   :  { %4613 = vmatprep.subr.mxu0 %v8686_v26 }
0x3c5a   :  { %4614 = vmatpush1.msra.mxu0 %v8733_v30 }
0x3c5b   :  { %4615 = vmatprep.subr.mxu0 %v8736_v11 }
0x3c5c   :  { %4616 = vmatpush1.msra.mxu0 %v8739_v35 }
0x3c5d   :  { %4912 = vmatprep.subr.mxu0 %v8692_v31 }
0x3d0d   :  { %v4341_v16 = vpop.f32.mrf.mxu0 }
0x3d0e   :  { %v4342_v58 = vadd.f32 %v4341_v16, %v8396_v37 }
0x3d0f   :  { %v4343_v56 = vpop.f32.mrf.mxu0 }
0x3d10   :  { %v4347_v33 = vrot.slane %v4342_v58, 4  ;;  %v4344_v29 = vadd.f32 %v4343_v56, %v8399_v13  ;;  %v4378_v25 = vrot.slane %v4342_v58, 6 }
0x3d12   :  { %v4388_v40 = vrot.slane %v4344_v29, 6  ;;  %4356 = vrot.lane.b32.xlu0 %v4347_v33, %s7129_s1  ;;  %v4349_v34 = vadd.f32 %v4347_v33, %v8491_v18  ;;  %v4380_v55 = vadd.f32 %v4378_v25, %v8495_v61 }
0x3d14   :  { %4397 = vrot.lane.b32.xlu1 %v4388_v40, %s7129_s1  ;;  %v6158_v14 = vmul.f32 -1.442695, %v4349_v34  ;;  %v6159_v4 = vmul.f32 -1.442695, %v4380_v55  ;;  %v4390_v49 = vadd.f32 %v4388_v40, %v8497_v53 }
0x3d16   :  { %6634 = vpow2.f32 %v6158_v14  ;;  %v6160_v60 = vmul.f32 -1.442695, %v4390_v49 }
0x3d17   :  { %6636 = vpow2.f32 %v6159_v4 }
0x3d23   :  { %v6635_v54 = vpop.eup %6634 }
0x3d24   :  { %v6637_v38 = vpop.eup %6636  ;;  %v4353_v24 = vadd.f32 1.0, %v6635_v54 }
0x3d25   :  { %v4384_v1 = vadd.f32 1.0, %v6637_v38 }
0x3d26   :  { %6638 = vrcp.f32 %v4353_v24 }
0x3d27   :  { %6640 = vrcp.f32 %v4384_v1 }
0x3d33   :  { %v6639_v45 = vpop.eup %6638 }
0x3d34   :  { %v6641_v28 = vpop.eup %6640  ;;  %v4366_v25 = vsub.f32 1.0, %v6639_v45 }
0x3d84   :  { %v4357_v20 = vpop.permute.xlu0 %4356 }
0x3d85   :  { %v4359_v62 = vmul.f32 %v6639_v45, %v4357_v20 }
0x3d86   :  { %v4398_v0 = vpop.permute.xlu1 %4397 }
0x3d87   :  { %v4400_v12 = vmul.f32 %v6641_v28, %v4398_v0  ;;  %4361 = vrot.lane.b32.xlu0 %v4359_v62, %s7129_s1 }
0x3d89   :  { %4402 = vrot.lane.b32.xlu1 %v4400_v12, %s7129_s1 }
0x3d8b   :  { %4413 = vrot.lane.b32.xlu0 %v4270_v52, %s7130_s17 }
0x3d8f   :  { %4373 = vrot.lane.b32.xlu0 %v4372_v36, %s7131_s11 }
0x3df9   :  { %v4362_v10 = vpop.permute.xlu0 %4361 }
0x3dfa   :  { %v4364_v19 = vadd.f32 %v4362_v10, %v8491_v18 }
0x3dfb   :  { %v4403_v7 = vpop.permute.xlu1 %4402 }
0x3dfc   :  { %v4405_v6 = vadd.f32 %v4403_v7, %v8497_v53 }
0x3dfd   :  { %v4414_v52 = vpop.permute.xlu0 %4413 }
0x3dfe   :  { %6642 = vtanh.f32 %v4405_v6 }
0x3dff   :  { %6644 = vtanh.f32 %v4364_v19 }
0x3e00   :  { %6646 = vpow2.f32 %v6160_v60 }
0x3e01   :  { %v4374_v33 = vpop.permute.xlu0 %4373 }
0x3e02   :  { %v4376_v55 = vmul.f32 %v6639_v45, %v4374_v33 }
0x3e0b   :  { %v6643_v2 = vpop.eup %6642 }
0x3e0c   :  { %4409 = vrot.lane.b32.xlu1 %v6643_v2, %s7130_s17  ;;  %v6645_v39 = vpop.eup %6644 }
0x3e0d   :  { %v6647_v15 = vpop.eup %6646 }
0x3e0e   :  { %v4394_v21 = vadd.f32 1.0, %v6647_v15 }
0x3e10   :  { %4368 = vrot.lane.b32.xlu1 %v6645_v39, %s7130_s17  ;;  %6648 = vrcp.f32 %v4394_v21 }
0x3e1d   :  { %v6649_v47 = vpop.eup %6648 }
0x3e1e   :  { %v4407_v57 = vsub.f32 1.0, %v6649_v47  ;;  %v4416_v58 = vmul.f32 %v6649_v47, %v4414_v52 }
0x3e7e   :  { %v4410_v16 = vpop.permute.xlu1 %4409 }
0x3e7f   :  { %v4412_v56 = vmul.f32 %v4410_v16, %v4407_v57 }
0x3e81   :  { %v4417_v29 = vadd.f32 %v4416_v58, %v4412_v56 }
0x3e82   :  { %v4369_v34 = vpop.permute.xlu1 %4368 }
0x3e83   :  { %v4423_v14 = vrot.slane %v4417_v29, 6  ;;  %v5867_v4 = vrot.slane %v4417_v29, 4  ;;  %v4371_v54 = vmul.f32 %v4369_v34, %v4366_v25 }
0x3e85   :  { %v8801_v40 = vadd.f32 %v5867_v4, %v8759_v50  ;;  %v4377_v38 = vadd.f32 %v4376_v55, %v4371_v54  ;;  %4424 = vrot.lane.b32.xlu0 %v4423_v14, %s7131_s11 }
0x3e87   :  { %v5827_v24 = vrot.slane %v4377_v38, 4  ;;  %4419 = vrot.lane.b32.xlu1 %v4377_v38, %s7130_s17 }
0x3e89   :  { %v8806_v1 = vadd.f32 %v5827_v24, %v8764_v63 }
0x3ef7   :  { %v4425_v20 = vpop.permute.xlu0 %4424 }
0x3ef9   :  { %v4420_v62 = vpop.permute.xlu1 %4419 }
0x3efa   :  { %v4427_v28 = vsel %vm513_vm11, %v4420_v62, %v4425_v20 }
0x3efb   :  { %v4429_v45 = vrot.slane %v4427_v28, 4  ;;  %v4529_v58 = vrot.slane %v4427_v28, 6 }
0x3efd   :  { %6161 = vmatmul.mubr.msk.f32.vlgmr.msra.gmra.mxu1 %vm643_vm13, %v4429_v45 }
0x3efe   :  { %4755 = vmatpush1.msra.mxu1 %v8652_v44  ;;  %4802 = vmatprep.mubr.f32.mxu1 %v9247_v59 }
0x3eff   :  { %4756 = vmatprep.subr.mxu1 %v8656_v9 }
0x3f00   :  { %4757 = vmatpush1.msra.mxu1 %v8659_v17 }
0x3f01   :  { %4758 = vmatprep.subr.mxu1 %v8662_v43 }
0x3f02   :  { %4759 = vmatpush1.msra.mxu1 %v8665_v41 }
0x3f03   :  { %4760 = vmatprep.subr.mxu1 %v8668_v42 }
0x3f04   :  { %4761 = vmatpush1.msra.mxu1 %v8671_v27 }
0x3f05   :  { %4762 = vmatprep.subr.mxu1 %v8674_v46 }
0x3f06   :  { %4763 = vmatpush1.msra.mxu1 %v8677_v23 }
0x3f07   :  { %4764 = vmatprep.subr.mxu1 %v8680_v51 }
0x3f08   :  { %4765 = vmatpush1.msra.mxu1 %v8683_v22 }
0x3f09   :  { %4766 = vmatprep.subr.mxu1 %v8686_v26 }
0x3f0a   :  { %4767 = vmatpush1.msra.mxu1 %v8733_v30 }
0x3f0b   :  { %4768 = vmatprep.subr.mxu1 %v8736_v11 }
0x3f0c   :  { %4769 = vmatpush1.msra.mxu1 %v8739_v35 }
0x3f0d   :  { %5069 = vmatprep.subr.mxu1 %v8692_v31 }
0x3fbd   :  { %v4498_v50 = vpop.f32.mrf.mxu1 }
0x3fbe   :  { %v4499_v63 = vadd.f32 %v4498_v50, %v8396_v37 }
0x3fbf   :  { %v4500_v0 = vpop.f32.mrf.mxu1 }
0x3fc0   :  { %v4504_v12 = vrot.slane %v4499_v63, 2  ;;  %v4501_v36 = vadd.f32 %v4500_v0, %v8399_v13  ;;  %v4535_v10 = vadd.f32 %v4499_v63, %v8495_v61 }
0x3fc2   :  { %4550 = vrot.lane.b32.xlu1 %v4501_v36, %s7129_s1  ;;  %4513 = vrot.lane.b32.xlu0 %v4504_v12, %s7129_s1  ;;  %v4506_v7 = vadd.f32 %v4504_v12, %v8491_v18  ;;  %v6163_v6 = vmul.f32 -1.442695, %v4535_v10  ;;  %v4542_v14 = vadd.f32 %v4501_v36, %v8497_v53 }
0x3fc4   :  { %v6162_v19 = vmul.f32 -1.442695, %v4506_v7  ;;  %6650 = vpow2.f32 %v6163_v6  ;;  %v6164_v4 = vmul.f32 -1.442695, %v4542_v14 }
0x3fc6   :  { %6652 = vpow2.f32 %v6162_v19 }
0x3fd1   :  { %v6651_v2 = vpop.eup %6650 }
0x3fd2   :  { %v4539_v49 = vadd.f32 1.0, %v6651_v2 }
0x3fd3   :  { %v6653_v39 = vpop.eup %6652 }
0x3fd4   :  { %v4510_v60 = vadd.f32 1.0, %v6653_v39  ;;  %6654 = vrcp.f32 %v4539_v49 }
0x3fd6   :  { %6656 = vrcp.f32 %v4510_v60 }
0x3fe1   :  { %v6655_v15 = vpop.eup %6654 }
0x3fe3   :  { %v6657_v21 = vpop.eup %6656 }
0x3fe4   :  { %v4523_v12 = vsub.f32 1.0, %v6657_v21 }
0x4034   :  { %v4551_v47 = vpop.permute.xlu1 %4550  ;;  %v4514_v52 = vpop.permute.xlu0 %4513 }
0x4035   :  { %v4553_v57 = vmul.f32 %v6655_v15, %v4551_v47  ;;  %v4516_v16 = vmul.f32 %v6657_v21, %v4514_v52 }
0x4037   :  { %4555 = vrot.lane.b32.xlu1 %v4553_v57, %s7129_s1  ;;  %4518 = vrot.lane.b32.xlu0 %v4516_v16, %s7129_s1 }
0x403b   :  { %4566 = vrot.lane.b32.xlu0 %v4429_v45, %s7130_s17 }
0x403f   :  { %4530 = vrot.lane.b32.xlu0 %v4529_v58, %s7131_s11 }
0x40a9   :  { %v4556_v56 = vpop.permute.xlu1 %4555  ;;  %v4519_v33 = vpop.permute.xlu0 %4518 }
0x40aa   :  { %v4558_v29 = vadd.f32 %v4556_v56, %v8497_v53  ;;  %v4521_v25 = vadd.f32 %v4519_v33, %v8491_v18 }
0x40ac   :  { %6658 = vtanh.f32 %v4558_v29 }
0x40ad   :  { %6660 = vtanh.f32 %v4521_v25  ;;  %v4567_v20 = vpop.permute.xlu0 %4566 }
0x40ae   :  { %6662 = vpow2.f32 %v6164_v4 }
0x40b1   :  { %v4531_v63 = vpop.permute.xlu0 %4530 }
0x40b2   :  { %v4533_v7 = vmul.f32 %v6657_v21, %v4531_v63 }
0x40b9   :  { %v6659_v34 = vpop.eup %6658 }
0x40ba   :  { %4562 = vrot.lane.b32.xlu1 %v6659_v34, %s7130_s17  ;;  %v6661_v55 = vpop.eup %6660 }
0x40bb   :  { %v6663_v54 = vpop.eup %6662 }
0x40bc   :  { %v4546_v38 = vadd.f32 1.0, %v6663_v54 }
0x40be   :  { %4525 = vrot.lane.b32.xlu1 %v6661_v55, %s7130_s17  ;;  %6664 = vrcp.f32 %v4546_v38 }
0x40cb   :  { %v6665_v24 = vpop.eup %6664 }
0x40cc   :  { %v4560_v62 = vsub.f32 1.0, %v6665_v24  ;;  %v4569_v45 = vmul.f32 %v6665_v24, %v4567_v20 }
0x412c   :  { %v4563_v28 = vpop.permute.xlu1 %4562 }
0x412d   :  { %v4565_v50 = vmul.f32 %v4563_v28, %v4560_v62 }
0x412f   :  { %v4570_v0 = vadd.f32 %v4569_v45, %v4565_v50 }
0x4130   :  { %v4526_v10 = vpop.permute.xlu1 %4525 }
0x4131   :  { %v4576_v6 = vrot.slane %v4570_v0, 2  ;;  %v4528_v19 = vmul.f32 %v4526_v10, %v4523_v12 }
0x4133   :  { %v8843_v53 = vadd.f32 %v8801_v40, %v4576_v6  ;;  %v4534_v36 = vadd.f32 %v4533_v7, %v4528_v19  ;;  %4577 = vrot.lane.b32.xlu0 %v4576_v6, %s7131_s11 }
0x4135   :  { %v5830_v2 = vrot.slane %v4534_v36, 6  ;;  %4572 = vrot.lane.b32.xlu1 %v4534_v36, %s7130_s17 }
0x4137   :  { %v8848_v39 = vadd.f32 %v5830_v2, %v8806_v1 }
0x41a5   :  { %v4578_v49 = vpop.permute.xlu0 %4577 }
0x41a7   :  { %v4573_v60 = vpop.permute.xlu1 %4572 }
0x41a8   :  { %v4580_v15 = vsel %vm513_vm11, %v4573_v60, %v4578_v49 }
0x41a9   :  { %v4582_v47 = vrot.slane %v4580_v15, 6 }
0x41ab   :  { %6165 = vmatmul.mubr.msk.f32.vlgmr.msra.gmra.mxu0 %vm643_vm13, %v4582_v47 }
0x41ac   :  { %4913 = vmatpush1.msra.mxu0 %v8652_v44  ;;  %4960 = vmatprep.mubr.f32.mxu0 %v9247_v59 }
0x41ad   :  { %4914 = vmatprep.subr.mxu0 %v8656_v9 }
0x41ae   :  { %4915 = vmatpush1.msra.mxu0 %v8659_v17 }
0x41af   :  { %4916 = vmatprep.subr.mxu0 %v8662_v43 }
0x41b0   :  { %4917 = vmatpush1.msra.mxu0 %v8665_v41 }
0x41b1   :  { %4918 = vmatprep.subr.mxu0 %v8668_v42 }
0x41b2   :  { %4919 = vmatpush1.msra.mxu0 %v8671_v27 }
0x41b3   :  { %4920 = vmatprep.subr.mxu0 %v8674_v46 }
0x41b4   :  { %4921 = vmatpush1.msra.mxu0 %v8677_v23 }
0x41b5   :  { %4922 = vmatprep.subr.mxu0 %v8680_v51 }
0x41b6   :  { %4923 = vmatpush1.msra.mxu0 %v8683_v22 }
0x41b7   :  { %4924 = vmatprep.subr.mxu0 %v8686_v26 }
0x41b8   :  { %4925 = vmatpush1.msra.mxu0 %v8733_v30 }
0x41b9   :  { %4926 = vmatprep.subr.mxu0 %v8736_v11 }
0x41ba   :  { %4927 = vmatpush1.msra.mxu0 %v8739_v35 }
0x41bb   :  { %5222 = vmatprep.subr.mxu0 %v8692_v31 }
0x426b   :  { %v4651_v40 = vpop.f32.mrf.mxu0 }
0x426c   :  { %v4652_v1 = vadd.f32 %v4651_v40, %v8396_v37 }
0x426d   :  { %v4653_v21 = vpop.f32.mrf.mxu0 }
0x426e   :  { %v4654_v52 = vadd.f32 %v4653_v21, %v8399_v13  ;;  %4664 = vrot.lane.b32.xlu0 %v4652_v1, %s7129_s1  ;;  %v4656_v16 = vadd.f32 %v4652_v1, %v8495_v61  ;;  %v4685_v58 = vrot.slane %v4652_v1, 2 }
0x4270   :  { %v4695_v57 = vrot.slane %v4654_v52, 2  ;;  %v6166_v56 = vmul.f32 -1.442695, %v4656_v16  ;;  %v4687_v33 = vadd.f32 %v4685_v58, %v8491_v18 }
0x4272   :  { %4704 = vrot.lane.b32.xlu1 %v4695_v57, %s7129_s1  ;;  %6666 = vpow2.f32 %v6166_v56  ;;  %v6167_v29 = vmul.f32 -1.442695, %v4687_v33  ;;  %v4697_v10 = vadd.f32 %v4695_v57, %v8493_v8 }
0x4274   :  { %6668 = vpow2.f32 %v6167_v29  ;;  %v6168_v7 = vmul.f32 -1.442695, %v4697_v10 }
0x427f   :  { %v6667_v25 = vpop.eup %6666 }
0x4280   :  { %v4660_v34 = vadd.f32 1.0, %v6667_v25 }
0x4281   :  { %v6669_v55 = vpop.eup %6668 }
0x4282   :  { %6670 = vrcp.f32 %v4660_v34  ;;  %v4691_v14 = vadd.f32 1.0, %v6669_v55 }
0x4284   :  { %6672 = vrcp.f32 %v4691_v14 }
0x428f   :  { %v6671_v4 = vpop.eup %6670 }
0x4290   :  { %v4674_v21 = vsub.f32 1.0, %v6671_v4 }
0x4291   :  { %v6673_v24 = vpop.eup %6672 }
0x42e0   :  { %v4665_v54 = vpop.permute.xlu0 %4664 }
0x42e1   :  { %v4667_v38 = vmul.f32 %v6671_v4, %v4665_v54 }
0x42e3   :  { %4669 = vrot.lane.b32.xlu0 %v4667_v38, %s7129_s1 }
0x42e4   :  { %v4705_v20 = vpop.permute.xlu1 %4704 }
0x42e5   :  { %v4707_v62 = vmul.f32 %v6673_v24, %v4705_v20 }
0x42e7   :  { %4709 = vrot.lane.b32.xlu1 %v4707_v62, %s7129_s1  ;;  %4720 = vrot.lane.b32.xlu0 %v4580_v15, %s7130_s17 }
0x42eb   :  { %4680 = vrot.lane.b32.xlu0 %v4582_v47, %s7131_s11 }
0x4355   :  { %v4670_v28 = vpop.permute.xlu0 %4669 }
0x4356   :  { %v4672_v63 = vadd.f32 %v4670_v28, %v8495_v61 }
0x4359   :  { %v4710_v45 = vpop.permute.xlu1 %4709  ;;  %v4721_v2 = vpop.permute.xlu0 %4720 }
0x435a   :  { %v4712_v50 = vadd.f32 %v4710_v45, %v8493_v8 }
0x435c   :  { %6674 = vtanh.f32 %v4712_v50 }
0x435d   :  { %6676 = vtanh.f32 %v4672_v63  ;;  %v4681_v40 = vpop.permute.xlu0 %4680 }
0x435e   :  { %6678 = vpow2.f32 %v6168_v7  ;;  %v4683_v16 = vmul.f32 %v6671_v4, %v4681_v40 }
0x4369   :  { %v6675_v0 = vpop.eup %6674 }
0x436a   :  { %4716 = vrot.lane.b32.xlu1 %v6675_v0, %s7130_s17  ;;  %v6677_v12 = vpop.eup %6676 }
0x436b   :  { %v6679_v6 = vpop.eup %6678 }
0x436c   :  { %v4701_v19 = vadd.f32 1.0, %v6679_v6 }
0x436e   :  { %4676 = vrot.lane.b32.xlu1 %v6677_v12, %s7130_s17  ;;  %6680 = vrcp.f32 %v4701_v19 }
0x437b   :  { %v6681_v36 = vpop.eup %6680 }
0x437c   :  { %v4714_v49 = vsub.f32 1.0, %v6681_v36  ;;  %v4723_v15 = vmul.f32 %v6681_v36, %v4721_v2 }
0x43dc   :  { %v4717_v60 = vpop.permute.xlu1 %4716 }
0x43dd   :  { %v4719_v47 = vmul.f32 %v4717_v60, %v4714_v49 }
0x43df   :  { %v4724_v1 = vadd.f32 %v4723_v15, %v4719_v47 }
0x43e0   :  { %v4677_v52 = vpop.permute.xlu1 %4676 }
0x43e1   :  { %v4730_v58 = vrot.slane %v4724_v1, 6  ;;  %v8885_v56 = vadd.f32 %v8843_v53, %v4724_v1  ;;  %v4679_v57 = vmul.f32 %v4677_v52, %v4674_v21 }
0x43e3   :  { %v4684_v33 = vadd.f32 %v4683_v16, %v4679_v57  ;;  %4731 = vrot.lane.b32.xlu0 %v4730_v58, %s7131_s11 }
0x43e5   :  { %v8889_v29 = vadd.f32 %v8848_v39, %v4684_v33  ;;  %4726 = vrot.lane.b32.xlu1 %v4684_v33, %s7130_s17 }
0x4455   :  { %v4732_v25 = vpop.permute.xlu0 %4731 }
0x4457   :  { %v4727_v34 = vpop.permute.xlu1 %4726 }
0x4458   :  { %v4734_v55 = vsel %vm513_vm11, %v4727_v34, %v4732_v25 }
0x4459   :  { %6169 = vmatmul.mubr.msk.f32.vlgmr.msra.gmra.mxu1 %vm643_vm13, %v4734_v55  ;;  %v4876_v62 = vrot.slane %v4734_v55, 4  ;;  %v4835_v28 = vrot.slane %v4734_v55, 6 }
0x445a   :  { %5070 = vmatpush1.msra.mxu1 %v8652_v44  ;;  %5117 = vmatprep.mubr.f32.mxu1 %v9247_v59 }
0x445b   :  { %5071 = vmatprep.subr.mxu1 %v8656_v9 }
0x445c   :  { %5072 = vmatpush1.msra.mxu1 %v8659_v17 }
0x445d   :  { %5073 = vmatprep.subr.mxu1 %v8662_v43 }
0x445e   :  { %5074 = vmatpush1.msra.mxu1 %v8665_v41 }
0x445f   :  { %5075 = vmatprep.subr.mxu1 %v8668_v42 }
0x4460   :  { %5076 = vmatpush1.msra.mxu1 %v8671_v27 }
0x4461   :  { %5077 = vmatprep.subr.mxu1 %v8674_v46 }
0x4462   :  { %5078 = vmatpush1.msra.mxu1 %v8677_v23 }
0x4463   :  { %5079 = vmatprep.subr.mxu1 %v8680_v51 }
0x4464   :  { %5080 = vmatpush1.msra.mxu1 %v8683_v22 }
0x4465   :  { %5081 = vmatprep.subr.mxu1 %v8686_v26 }
0x4466   :  { %5082 = vmatpush1.msra.mxu1 %v8733_v30 }
0x4467   :  { %5083 = vmatprep.subr.mxu1 %v8736_v11 }
0x4468   :  { %5084 = vmatpush1.msra.mxu1 %v8739_v35 }
0x4469   :  { %5375 = vmatprep.subr.mxu1 %v8692_v31 }
0x4519   :  { %v4804_v44 = vpop.f32.mrf.mxu1 }
0x451a   :  { %v4805_v9 = vadd.f32 %v4804_v44, %v8396_v37 }
0x451b   :  { %v4806_v17 = vpop.f32.mrf.mxu1 }
0x451c   :  { %v4810_v43 = vrot.slane %v4805_v9, 6  ;;  %v4807_v41 = vadd.f32 %v4806_v17, %v8399_v13  ;;  %v4841_v27 = vrot.slane %v4805_v9, 4 }
0x451e   :  { %v4851_v42 = vrot.slane %v4807_v41, 4  ;;  %4819 = vrot.lane.b32.xlu0 %v4810_v43, %s7129_s1  ;;  %v4812_v46 = vadd.f32 %v4810_v43, %v8495_v61  ;;  %v4843_v23 = vadd.f32 %v4841_v27, %v8491_v18  ;;  %v8943_v27 = vld [vmem:[#allocation10 + $0x68] sm:$0xff] }
0x4520   :  { %4860 = vrot.lane.b32.xlu1 %v4851_v42, %s7129_s1  ;;  %v6170_v51 = vmul.f32 -1.442695, %v4812_v46  ;;  %v6171_v22 = vmul.f32 -1.442695, %v4843_v23  ;;  %v4853_v7 = vadd.f32 %v4851_v42, %v8493_v8  ;;  %v8949_v46 = vld [vmem:[#allocation10 + $0x58] sm:$0xff]  ;;  %v8952_v23 = vld [vmem:[#allocation10 + $0x50] sm:$0xff] }
0x4522   :  { %6682 = vpow2.f32 %v6170_v51  ;;  %v6172_v6 = vmul.f32 -1.442695, %v4853_v7  ;;  %v8955_v51 = vld [vmem:[#allocation10 + $0x48] sm:$0xff] }
0x4523   :  { %6684 = vpow2.f32 %v6171_v22  ;;  %v8958_v22 = vld [vmem:[#allocation10 + $0x40] sm:$0xff] }
0x452f   :  { %v6683_v26 = vpop.eup %6682 }
0x4530   :  { %v6685_v31 = vpop.eup %6684  ;;  %v4816_v53 = vadd.f32 1.0, %v6683_v26  ;;  %v8961_v26 = vld [vmem:[#allocation10 + $0x38] sm:$0xff] }
0x4531   :  { %v4847_v39 = vadd.f32 1.0, %v6685_v31  ;;  %v8964_v31 = vld [vmem:[#allocation10 + $0x30] sm:$0xff] }
0x4532   :  { %6686 = vrcp.f32 %v4816_v53  ;;  %v8967_v53 = vld [vmem:[#allocation10 + $0x28] sm:$0xff] }
0x4533   :  { %6688 = vrcp.f32 %v4847_v39  ;;  %v8970_v39 = vld [vmem:[#allocation10 + $0x20] sm:$0xff] }
0x453f   :  { %v6687_v14 = vpop.eup %6686 }
0x4540   :  { %v6689_v38 = vpop.eup %6688  ;;  %v4829_v52 = vsub.f32 1.0, %v6687_v14 }
0x4590   :  { %v4820_v4 = vpop.permute.xlu0 %4819 }
0x4591   :  { %v4822_v54 = vmul.f32 %v6687_v14, %v4820_v4  ;;  %v8979_v4 = vld [vmem:[#allocation10 + $0x78] sm:$0xff] }
0x4592   :  { %v4861_v24 = vpop.permute.xlu1 %4860 }
0x4593   :  { %v4863_v20 = vmul.f32 %v6689_v38, %v4861_v24  ;;  %4824 = vrot.lane.b32.xlu0 %v4822_v54, %s7129_s1 }
0x4595   :  { %4865 = vrot.lane.b32.xlu1 %v4863_v20, %s7129_s1 }
0x4597   :  { %4877 = vrot.lane.b32.xlu0 %v4876_v62, %s7130_s17 }
0x459b   :  { %4836 = vrot.lane.b32.xlu0 %v4835_v28, %s7131_s11 }
0x4605   :  { %v4825_v45 = vpop.permute.xlu0 %4824 }
0x4606   :  { %v4827_v0 = vadd.f32 %v4825_v45, %v8495_v61 }
0x4607   :  { %v4866_v50 = vpop.permute.xlu1 %4865 }
0x4608   :  { %v4868_v63 = vadd.f32 %v4866_v50, %v8493_v8 }
0x4609   :  { %v4878_v49 = vpop.permute.xlu0 %4877 }
0x460a   :  { %6690 = vtanh.f32 %v4868_v63 }
0x460b   :  { %6692 = vtanh.f32 %v4827_v0 }
0x460c   :  { %6694 = vpow2.f32 %v6172_v6 }
0x460d   :  { %v4837_v1 = vpop.permute.xlu0 %4836 }
0x460e   :  { %v4839_v58 = vmul.f32 %v6687_v14, %v4837_v1  ;;  %v8973_v14 = vld [vmem:[#allocation10 + $0x18] sm:$0xff] }
0x4617   :  { %v6691_v12 = vpop.eup %6690 }
0x4618   :  { %4872 = vrot.lane.b32.xlu1 %v6691_v12, %s7130_s17  ;;  %v6693_v10 = vpop.eup %6692 }
0x4619   :  { %v6695_v19 = vpop.eup %6694 }
0x461a   :  { %v4857_v36 = vadd.f32 1.0, %v6695_v19 }
0x461c   :  { %4831 = vrot.lane.b32.xlu1 %v6693_v10, %s7130_s17  ;;  %6696 = vrcp.f32 %v4857_v36 }
0x4629   :  { %v6697_v2 = vpop.eup %6696 }
0x462a   :  { %v4870_v60 = vsub.f32 1.0, %v6697_v2  ;;  %v4880_v47 = vmul.f32 %v6697_v2, %v4878_v49 }
0x468a   :  { %v4873_v15 = vpop.permute.xlu1 %4872 }
0x468b   :  { %v4875_v40 = vmul.f32 %v4873_v15, %v4870_v60 }
0x468d   :  { %v4881_v21 = vadd.f32 %v4880_v47, %v4875_v40 }
0x468e   :  { %v4832_v16 = vpop.permute.xlu1 %4831 }
0x468f   :  { %v4887_v57 = vrot.slane %v4881_v21, 2  ;;  %v5873_v33 = vrot.slane %v4881_v21, 6  ;;  %v4834_v25 = vmul.f32 %v4832_v16, %v4829_v52 }
0x4691   :  { %v8927_v34 = vadd.f32 %v5873_v33, %v8885_v56  ;;  %v4840_v55 = vadd.f32 %v4839_v58, %v4834_v25  ;;  %4888 = vrot.lane.b32.xlu0 %v4887_v57, %s7131_s11  ;;  %v8939_v56 = vld [vmem:[#allocation10 + $0x70] sm:$0xff] }
0x4693   :  { %v5834_v44 = vrot.slane %v4840_v55, 2  ;;  %4883 = vrot.lane.b32.xlu1 %v4840_v55, %s7130_s17 }
0x4695   :  { %v8932_v9 = vadd.f32 %v5834_v44, %v8889_v29  ;;  %v8946_v29 = vld [vmem:[#allocation10 + $0x60] sm:$0xff] }
0x4703   :  { %v4889_v17 = vpop.permute.xlu0 %4888 }
0x4705   :  { %v4884_v43 = vpop.permute.xlu1 %4883 }
0x4706   :  { %v8935_v41 = vsel %vm513_vm11, %v4884_v43, %v4889_v17 }
0x4707   :  { %v4893_v42 = vrot.slane %v8935_v41, 2  ;;  %v4993_v60 = vrot.slane %v8935_v41, 6 }
0x4709   :  { %6173 = vmatmul.mubr.msk.f32.vlgmr.msra.gmra.mxu0 %vm643_vm13, %v4893_v42 }
0x470a   :  { %5223 = vmatpush1.msra.mxu0 %v8939_v56  ;;  %5270 = vmatprep.mubr.f32.mxu0 %v9247_v59 }
0x470b   :  { %5224 = vmatprep.subr.mxu0 %v8943_v27 }
0x470c   :  { %5225 = vmatpush1.msra.mxu0 %v8946_v29 }
0x470d   :  { %5226 = vmatprep.subr.mxu0 %v8949_v46 }
0x470e   :  { %5227 = vmatpush1.msra.mxu0 %v8952_v23 }
0x470f   :  { %5228 = vmatprep.subr.mxu0 %v8955_v51 }
0x4710   :  { %5229 = vmatpush1.msra.mxu0 %v8958_v22 }
0x4711   :  { %5230 = vmatprep.subr.mxu0 %v8961_v26 }
0x4712   :  { %5231 = vmatpush1.msra.mxu0 %v8964_v31 }
0x4713   :  { %5232 = vmatprep.subr.mxu0 %v8967_v53 }
0x4714   :  { %5233 = vmatpush1.msra.mxu0 %v8970_v39 }
0x4715   :  { %5234 = vmatprep.subr.mxu0 %v8973_v14 }
0x4716   :  { %5235 = vmatpush1.msra.mxu0 %v8733_v30 }
0x4717   :  { %5236 = vmatprep.subr.mxu0 %v8736_v11 }
0x4718   :  { %5237 = vmatpush1.msra.mxu0 %v8739_v35 }
0x4719   :  { %5533 = vmatprep.subr.mxu0 %v8979_v4 }
0x47c9   :  { %v4962_v54 = vpop.f32.mrf.mxu0 }
0x47ca   :  { %v4963_v38 = vadd.f32 %v4962_v54, %v8396_v37 }
0x47cb   :  { %v4964_v24 = vpop.f32.mrf.mxu0 }
0x47cc   :  { %v4968_v20 = vrot.slane %v4963_v38, 4  ;;  %v4965_v62 = vadd.f32 %v4964_v24, %v8399_v13  ;;  %v4999_v30 = vrot.slane %v4963_v38, 6 }
0x47ce   :  { %v5009_v28 = vrot.slane %v4965_v62, 6  ;;  %4977 = vrot.lane.b32.xlu0 %v4968_v20, %s7129_s1  ;;  %v4970_v11 = vadd.f32 %v4968_v20, %v8495_v61  ;;  %v5001_v35 = vadd.f32 %v4999_v30, %v8491_v18 }
0x47d0   :  { %5018 = vrot.lane.b32.xlu1 %v5009_v28, %s7129_s1  ;;  %v6174_v45 = vmul.f32 -1.442695, %v4970_v11  ;;  %v6175_v50 = vmul.f32 -1.442695, %v5001_v35  ;;  %v5011_v16 = vadd.f32 %v5009_v28, %v8493_v8 }
0x47d2   :  { %6698 = vpow2.f32 %v6174_v45  ;;  %v6176_v58 = vmul.f32 -1.442695, %v5011_v16 }
0x47d3   :  { %6700 = vpow2.f32 %v6175_v50 }
0x47df   :  { %v6699_v63 = vpop.eup %6698 }
0x47e0   :  { %v6701_v0 = vpop.eup %6700  ;;  %v4974_v12 = vadd.f32 1.0, %v6699_v63 }
0x47e1   :  { %v5005_v10 = vadd.f32 1.0, %v6701_v0 }
0x47e2   :  { %6702 = vrcp.f32 %v4974_v12 }
0x47e3   :  { %6704 = vrcp.f32 %v5005_v10 }
0x47ef   :  { %v6703_v7 = vpop.eup %6702 }
0x47f0   :  { %v6705_v36 = vpop.eup %6704  ;;  %v4987_v38 = vsub.f32 1.0, %v6703_v7 }
0x4840   :  { %v4978_v6 = vpop.permute.xlu0 %4977 }
0x4841   :  { %v4980_v19 = vmul.f32 %v6703_v7, %v4978_v6 }
0x4842   :  { %v5019_v2 = vpop.permute.xlu1 %5018 }
0x4843   :  { %v5021_v49 = vmul.f32 %v6705_v36, %v5019_v2  ;;  %4982 = vrot.lane.b32.xlu0 %v4980_v19, %s7129_s1 }
0x4845   :  { %5023 = vrot.lane.b32.xlu1 %v5021_v49, %s7129_s1 }
0x4847   :  { %5034 = vrot.lane.b32.xlu0 %v8935_v41, %s7130_s17 }
0x484b   :  { %4994 = vrot.lane.b32.xlu0 %v4993_v60, %s7131_s11 }
0x48b5   :  { %v4983_v15 = vpop.permute.xlu0 %4982 }
0x48b6   :  { %v4985_v1 = vadd.f32 %v4983_v15, %v8495_v61 }
0x48b7   :  { %v5024_v47 = vpop.permute.xlu1 %5023 }
0x48b8   :  { %v5026_v40 = vadd.f32 %v5024_v47, %v8493_v8 }
0x48b9   :  { %v5035_v55 = vpop.permute.xlu0 %5034 }
0x48ba   :  { %6706 = vtanh.f32 %v5026_v40 }
0x48bb   :  { %6708 = vtanh.f32 %v4985_v1 }
0x48bc   :  { %6710 = vpow2.f32 %v6176_v58 }
0x48bd   :  { %v4995_v42 = vpop.permute.xlu0 %4994 }
0x48be   :  { %v4997_v20 = vmul.f32 %v6703_v7, %v4995_v42  ;;  %v9028_v7 = vld [vmem:[#allocation10] sm:$0xff] }
0x48c7   :  { %v6707_v21 = vpop.eup %6706 }
0x48c8   :  { %5030 = vrot.lane.b32.xlu1 %v6707_v21, %s7130_s17  ;;  %v6709_v52 = vpop.eup %6708 }
0x48c9   :  { %v6711_v57 = vpop.eup %6710 }
0x48ca   :  { %v5015_v33 = vadd.f32 1.0, %v6711_v57 }
0x48cc   :  { %4989 = vrot.lane.b32.xlu1 %v6709_v52, %s7130_s17  ;;  %6712 = vrcp.f32 %v5015_v33 }
0x48d9   :  { %v6713_v25 = vpop.eup %6712 }
0x48da   :  { %v5028_v44 = vsub.f32 1.0, %v6713_v25  ;;  %v5037_v43 = vmul.f32 %v6713_v25, %v5035_v55 }
0x493a   :  { %v5031_v17 = vpop.permute.xlu1 %5030 }
0x493b   :  { %v5033_v41 = vmul.f32 %v5031_v17, %v5028_v44 }
0x493d   :  { %v5038_v54 = vadd.f32 %v5037_v43, %v5033_v41 }
0x493e   :  { %v4990_v24 = vpop.permute.xlu1 %4989 }
0x493f   :  { %v5044_v62 = vrot.slane %v5038_v54, 6  ;;  %v5876_v30 = vrot.slane %v5038_v54, 4  ;;  %v4992_v11 = vmul.f32 %v4990_v24, %v4987_v38 }
0x4941   :  { %v9000_v28 = vadd.f32 %v5876_v30, %v8927_v34  ;;  %v4998_v35 = vadd.f32 %v4997_v20, %v4992_v11  ;;  %5045 = vrot.lane.b32.xlu0 %v5044_v62, %s7131_s11  ;;  %v9022_v34 = vld [vmem:[#allocation10 + $0x10] sm:$0xff] }
0x4943   :  { %v5837_v45 = vrot.slane %v4998_v35, 4  ;;  %5040 = vrot.lane.b32.xlu1 %v4998_v35, %s7130_s17 }
0x4945   :  { %v9005_v50 = vadd.f32 %v5837_v45, %v8932_v9  ;;  %v9025_v9 = vld [vmem:[#allocation10 + $0x8] sm:$0xff] }
0x49b3   :  { %v5046_v63 = vpop.permute.xlu0 %5045 }
0x49b5   :  { %v5041_v0 = vpop.permute.xlu1 %5040 }
0x49b6   :  { %v5048_v12 = vsel %vm513_vm11, %v5041_v0, %v5046_v63 }
0x49b7   :  { %v5050_v10 = vrot.slane %v5048_v12, 4 }
0x49b9   :  { %6177 = vmatmul.mubr.msk.f32.vlgmr.msra.gmra.mxu1 %vm643_vm13, %v5050_v10 }
0x49ba   :  { %5376 = vmatpush1.msra.mxu1 %v8939_v56  ;;  %5423 = vmatprep.mubr.f32.mxu1 %v9247_v59 }
0x49bb   :  { %5377 = vmatprep.subr.mxu1 %v8943_v27 }
0x49bc   :  { %5378 = vmatpush1.msra.mxu1 %v8946_v29 }
0x49bd   :  { %5379 = vmatprep.subr.mxu1 %v8949_v46 }
0x49be   :  { %5380 = vmatpush1.msra.mxu1 %v8952_v23 }
0x49bf   :  { %5381 = vmatprep.subr.mxu1 %v8955_v51 }
0x49c0   :  { %5382 = vmatpush1.msra.mxu1 %v8958_v22 }
0x49c1   :  { %5383 = vmatprep.subr.mxu1 %v8961_v26 }
0x49c2   :  { %5384 = vmatpush1.msra.mxu1 %v8964_v31 }
0x49c3   :  { %5385 = vmatprep.subr.mxu1 %v8967_v53 }
0x49c4   :  { %5386 = vmatpush1.msra.mxu1 %v8970_v39 }
0x49c5   :  { %5387 = vmatprep.subr.mxu1 %v8973_v14 }
0x49c6   :  { %5388 = vmatpush1.msra.mxu1 %v9022_v34 }
0x49c7   :  { %5389 = vmatprep.subr.mxu1 %v9025_v9 }
0x49c8   :  { %5390 = vmatpush1.msra.mxu1 %v9028_v7 }
0x49c9   :  { %5690 = vmatprep.subr.mxu1 %v8979_v4 }
0x4a79   :  { %v5119_v6 = vpop.f32.mrf.mxu1 }
0x4a7a   :  { %v5120_v19 = vadd.f32 %v5119_v6, %v8396_v37 }
0x4a7b   :  { %v5121_v36 = vpop.f32.mrf.mxu1 }
0x4a7c   :  { %v5125_v2 = vrot.slane %v5120_v19, 2  ;;  %v5122_v49 = vadd.f32 %v5121_v36, %v8399_v13  ;;  %v5156_v60 = vadd.f32 %v5120_v19, %v8491_v18  ;;  %v5150_v18 = vrot.slane %v5048_v12, 6 }
0x4a7e   :  { %5171 = vrot.lane.b32.xlu1 %v5122_v49, %s7129_s1  ;;  %5134 = vrot.lane.b32.xlu0 %v5125_v2, %s7129_s1  ;;  %v5127_v15 = vadd.f32 %v5125_v2, %v8495_v61  ;;  %v6179_v47 = vmul.f32 -1.442695, %v5156_v60  ;;  %v5163_v38 = vadd.f32 %v5122_v49, %v8493_v8 }
0x4a80   :  { %v6178_v40 = vmul.f32 -1.442695, %v5127_v15  ;;  %6714 = vpow2.f32 %v6179_v47  ;;  %v6180_v24 = vmul.f32 -1.442695, %v5163_v38 }
0x4a82   :  { %6716 = vpow2.f32 %v6178_v40 }
0x4a8d   :  { %v6715_v4 = vpop.eup %6714 }
0x4a8e   :  { %v5160_v21 = vadd.f32 1.0, %v6715_v4 }
0x4a8f   :  { %v6717_v1 = vpop.eup %6716 }
0x4a90   :  { %v5131_v52 = vadd.f32 1.0, %v6717_v1  ;;  %6718 = vrcp.f32 %v5160_v21 }
0x4a92   :  { %6720 = vrcp.f32 %v5131_v52 }
0x4a9d   :  { %v6719_v16 = vpop.eup %6718 }
0x4a9f   :  { %v6721_v58 = vpop.eup %6720 }
0x4af0   :  { %v5172_v57 = vpop.permute.xlu1 %5171  ;;  %v5135_v33 = vpop.permute.xlu0 %5134 }
0x4af1   :  { %v5174_v25 = vmul.f32 %v6719_v16, %v5172_v57  ;;  %v5137_v55 = vmul.f32 %v6721_v58, %v5135_v33 }
0x4af3   :  { %5176 = vrot.lane.b32.xlu1 %v5174_v25, %s7129_s1  ;;  %5139 = vrot.lane.b32.xlu0 %v5137_v55, %s7129_s1 }
0x4af7   :  { %5187 = vrot.lane.b32.xlu0 %v5050_v10, %s7130_s17  ;;  %v5144_v10 = vsub.f32 1.0, %v6721_v58 }
0x4afb   :  { %5151 = vrot.lane.b32.xlu0 %v5150_v18, %s7131_s11 }
0x4b65   :  { %v5177_v44 = vpop.permute.xlu1 %5176  ;;  %v5140_v17 = vpop.permute.xlu0 %5139 }
0x4b66   :  { %v5179_v43 = vadd.f32 %v5177_v44, %v8493_v8  ;;  %v5142_v41 = vadd.f32 %v5140_v17, %v8495_v61 }
0x4b68   :  { %6722 = vtanh.f32 %v5179_v43 }
0x4b69   :  { %6724 = vtanh.f32 %v5142_v41  ;;  %v5188_v11 = vpop.permute.xlu0 %5187 }
0x4b6a   :  { %6726 = vpow2.f32 %v6180_v24 }
0x4b6d   :  { %v5152_v0 = vpop.permute.xlu0 %5151 }
0x4b6e   :  { %v5154_v19 = vmul.f32 %v6721_v58, %v5152_v0 }
0x4b75   :  { %v6723_v42 = vpop.eup %6722 }
0x4b76   :  { %5183 = vrot.lane.b32.xlu1 %v6723_v42, %s7130_s17  ;;  %v6725_v54 = vpop.eup %6724 }
0x4b77   :  { %v6727_v20 = vpop.eup %6726 }
0x4b78   :  { %v5167_v62 = vadd.f32 1.0, %v6727_v20 }
0x4b7a   :  { %5146 = vrot.lane.b32.xlu1 %v6725_v54, %s7130_s17  ;;  %6728 = vrcp.f32 %v5167_v62 }
0x4b87   :  { %v6729_v30 = vpop.eup %6728 }
0x4b88   :  { %v5181_v35 = vsub.f32 1.0, %v6729_v30  ;;  %v5190_v63 = vmul.f32 %v6729_v30, %v5188_v11 }
0x4be8   :  { %v5184_v45 = vpop.permute.xlu1 %5183 }
0x4be9   :  { %v5186_v61 = vmul.f32 %v5184_v45, %v5181_v35 }
0x4beb   :  { %v5191_v12 = vadd.f32 %v5190_v63, %v5186_v61 }
0x4bec   :  { %v5147_v6 = vpop.permute.xlu1 %5146 }
0x4bed   :  { %v5197_v36 = vrot.slane %v5191_v12, 2  ;;  %v5149_v2 = vmul.f32 %v5147_v6, %v5144_v10 }
0x4bef   :  { %v9048_v8 = vadd.f32 %v9000_v28, %v5197_v36  ;;  %v5155_v49 = vadd.f32 %v5154_v19, %v5149_v2  ;;  %5198 = vrot.lane.b32.xlu0 %v5197_v36, %s7131_s11 }
0x4bf1   :  { %v5840_v60 = vrot.slane %v5155_v49, 6  ;;  %5193 = vrot.lane.b32.xlu1 %v5155_v49, %s7130_s17 }
0x4bf3   :  { %v9053_v15 = vadd.f32 %v5840_v60, %v9005_v50 }
0x4c61   :  { %v5199_v47 = vpop.permute.xlu0 %5198 }
0x4c63   :  { %v5194_v40 = vpop.permute.xlu1 %5193 }
0x4c64   :  { %v5201_v4 = vsel %vm513_vm11, %v5194_v40, %v5199_v47 }
0x4c65   :  { %v5203_v1 = vrot.slane %v5201_v4, 6 }
0x4c67   :  { %6181 = vmatmul.mubr.msk.f32.vlgmr.msra.gmra.mxu0 %vm643_vm13, %v5203_v1 }
0x4c68   :  { %5534 = vmatpush1.msra.mxu0 %v8939_v56  ;;  %5581 = vmatprep.mubr.f32.mxu0 %v9247_v59 }
0x4c69   :  { %5535 = vmatprep.subr.mxu0 %v8943_v27 }
0x4c6a   :  { %5536 = vmatpush1.msra.mxu0 %v8946_v29 }
0x4c6b   :  { %5537 = vmatprep.subr.mxu0 %v8949_v46 }
0x4c6c   :  { %5538 = vmatpush1.msra.mxu0 %v8952_v23 }
0x4c6d   :  { %5539 = vmatprep.subr.mxu0 %v8955_v51 }
0x4c6e   :  { %5540 = vmatpush1.msra.mxu0 %v8958_v22 }
0x4c6f   :  { %5541 = vmatprep.subr.mxu0 %v8961_v26 }
0x4c70   :  { %5542 = vmatpush1.msra.mxu0 %v8964_v31 }
0x4c71   :  { %5543 = vmatprep.subr.mxu0 %v8967_v53 }
0x4c72   :  { %5544 = vmatpush1.msra.mxu0 %v8970_v39 }
0x4c73   :  { %5545 = vmatprep.subr.mxu0 %v8973_v14 }
0x4c74   :  { %5546 = vmatpush1.msra.mxu0 %v9022_v34 }
0x4c75   :  { %5547 = vmatprep.subr.mxu0 %v9025_v9 }
0x4c76   :  { %5548 = vmatpush1.msra.mxu0 %v9028_v7 }
0x4c77   :  { %6243 = vmatprep.subr.mxu0 %v9247_v59 }
0x4d27   :  { %v5272_v28 = vpop.f32.mrf.mxu0 }
0x4d28   :  { %v5273_v50 = vadd.f32 %v5272_v28, %v8396_v37 }
0x4d29   :  { %v5274_v21 = vpop.f32.mrf.mxu0 }
0x4d2a   :  { %v5275_v52 = vadd.f32 %v5274_v21, %v8399_v13  ;;  %5285 = vrot.lane.b32.xlu0 %v5273_v50, %s7129_s1  ;;  %v5277_v58 = vadd.f32 %v5273_v50, %v8500_v48  ;;  %v5306_v57 = vrot.slane %v5273_v50, 2 }
0x4d2c   :  { %v5316_v16 = vrot.slane %v5275_v52, 2  ;;  %v6182_v33 = vmul.f32 -1.442695, %v5277_v58  ;;  %v5308_v25 = vadd.f32 %v5306_v57, %v8485_v5 }
0x4d2e   :  { %5325 = vrot.lane.b32.xlu1 %v5316_v16, %s7129_s1  ;;  %6730 = vpow2.f32 %v6182_v33  ;;  %v6183_v55 = vmul.f32 -1.442695, %v5308_v25  ;;  %v5318_v61 = vadd.f32 %v5316_v16, %v8487_v32 }
0x4d30   :  { %6732 = vpow2.f32 %v6183_v55  ;;  %v6184_v0 = vmul.f32 -1.442695, %v5318_v61 }
0x4d3b   :  { %v6731_v18 = vpop.eup %6730 }
0x4d3c   :  { %v5281_v44 = vadd.f32 1.0, %v6731_v18 }
0x4d3d   :  { %v6733_v17 = vpop.eup %6732 }
0x4d3e   :  { %6734 = vrcp.f32 %v5281_v44  ;;  %v5312_v43 = vadd.f32 1.0, %v6733_v17 }
0x4d40   :  { %6736 = vrcp.f32 %v5312_v43 }
0x4d4b   :  { %v6735_v41 = vpop.eup %6734 }
0x4d4d   :  { %v6737_v38 = vpop.eup %6736 }
0x4d9c   :  { %v5286_v42 = vpop.permute.xlu0 %5285 }
0x4d9d   :  { %v5288_v54 = vmul.f32 %v6735_v41, %v5286_v42 }
0x4d9f   :  { %5290 = vrot.lane.b32.xlu0 %v5288_v54, %s7129_s1 }
0x4da0   :  { %v5326_v24 = vpop.permute.xlu1 %5325 }
0x4da1   :  { %v5328_v20 = vmul.f32 %v6737_v38, %v5326_v24 }
0x4da3   :  { %5330 = vrot.lane.b32.xlu1 %v5328_v20, %s7129_s1  ;;  %5341 = vrot.lane.b32.xlu0 %v5201_v4, %s7130_s17  ;;  %v5295_v4 = vsub.f32 1.0, %v6735_v41 }
0x4da7   :  { %5301 = vrot.lane.b32.xlu0 %v5203_v1, %s7131_s11 }
0x4e11   :  { %v5291_v62 = vpop.permute.xlu0 %5290 }
0x4e12   :  { %v5293_v35 = vadd.f32 %v5291_v62, %v8500_v48 }
0x4e15   :  { %v5331_v30 = vpop.permute.xlu1 %5330  ;;  %v5342_v19 = vpop.permute.xlu0 %5341 }
0x4e16   :  { %v5333_v11 = vadd.f32 %v5331_v30, %v8487_v32 }
0x4e18   :  { %6738 = vtanh.f32 %v5333_v11 }
0x4e19   :  { %6740 = vtanh.f32 %v5293_v35  ;;  %v5302_v47 = vpop.permute.xlu0 %5301 }
0x4e1a   :  { %6742 = vpow2.f32 %v6184_v0  ;;  %v5304_v28 = vmul.f32 %v6735_v41, %v5302_v47 }
0x4e25   :  { %v6739_v45 = vpop.eup %6738 }
0x4e26   :  { %5337 = vrot.lane.b32.xlu1 %v6739_v45, %s7130_s17  ;;  %v6741_v63 = vpop.eup %6740 }
0x4e27   :  { %v6743_v12 = vpop.eup %6742 }
0x4e28   :  { %v5322_v10 = vadd.f32 1.0, %v6743_v12 }
0x4e2a   :  { %5297 = vrot.lane.b32.xlu1 %v6741_v63, %s7130_s17  ;;  %6744 = vrcp.f32 %v5322_v10 }
0x4e37   :  { %v6745_v6 = vpop.eup %6744 }
0x4e38   :  { %v5335_v36 = vsub.f32 1.0, %v6745_v6  ;;  %v5344_v49 = vmul.f32 %v6745_v6, %v5342_v19 }
0x4e98   :  { %v5338_v2 = vpop.permute.xlu1 %5337 }
0x4e99   :  { %v5340_v60 = vmul.f32 %v5338_v2, %v5335_v36 }
0x4e9b   :  { %v5345_v40 = vadd.f32 %v5344_v49, %v5340_v60 }
0x4e9c   :  { %v5298_v1 = vpop.permute.xlu1 %5297 }
0x4e9d   :  { %v5351_v50 = vrot.slane %v5345_v40, 6  ;;  %v9090_v21 = vadd.f32 %v9048_v8, %v5345_v40  ;;  %v5300_v52 = vmul.f32 %v5298_v1, %v5295_v4 }
0x4e9f   :  { %v5305_v16 = vadd.f32 %v5304_v28, %v5300_v52  ;;  %5352 = vrot.lane.b32.xlu0 %v5351_v50, %s7131_s11 }
0x4ea1   :  { %v9094_v58 = vadd.f32 %v9053_v15, %v5305_v16  ;;  %5347 = vrot.lane.b32.xlu1 %v5305_v16, %s7130_s17 }
0x4f11   :  { %v5353_v57 = vpop.permute.xlu0 %5352 }
0x4f13   :  { %v5348_v33 = vpop.permute.xlu1 %5347 }
0x4f14   :  { %v5355_v25 = vsel %vm513_vm11, %v5348_v33, %v5353_v57 }
0x4f15   :  { %6185 = vmatmul.mubr.msk.f32.vlgmr.msra.gmra.mxu1 %vm643_vm13, %v5355_v25  ;;  %v5497_v43 = vrot.slane %v5355_v25, 4  ;;  %v5456_v41 = vrot.slane %v5355_v25, 6 }
0x4f16   :  { %5691 = vmatpush1.msra.mxu1 %v8939_v56  ;;  %5738 = vmatprep.mubr.f32.mxu1 %v9247_v59 }
0x4f17   :  { %5692 = vmatprep.subr.mxu1 %v8943_v27 }
0x4f18   :  { %5693 = vmatpush1.msra.mxu1 %v8946_v29 }
0x4f19   :  { %5694 = vmatprep.subr.mxu1 %v8949_v46 }
0x4f1a   :  { %5695 = vmatpush1.msra.mxu1 %v8952_v23 }
0x4f1b   :  { %5696 = vmatprep.subr.mxu1 %v8955_v51 }
0x4f1c   :  { %5697 = vmatpush1.msra.mxu1 %v8958_v22 }
0x4f1d   :  { %5698 = vmatprep.subr.mxu1 %v8961_v26 }
0x4f1e   :  { %5699 = vmatpush1.msra.mxu1 %v8964_v31 }
0x4f1f   :  { %5700 = vmatprep.subr.mxu1 %v8967_v53 }
0x4f20   :  { %5701 = vmatpush1.msra.mxu1 %v8970_v39 }
0x4f21   :  { %5702 = vmatprep.subr.mxu1 %v8973_v14 }
0x4f22   :  { %5703 = vmatpush1.msra.mxu1 %v9022_v34 }
0x4f23   :  { %5704 = vmatprep.subr.mxu1 %v9025_v9 }
0x4f24   :  { %5705 = vmatpush1.msra.mxu1 %v9028_v7 }
0x4fd5   :  { %v5425_v56 = vpop.f32.mrf.mxu1 }
0x4fd6   :  { %v5426_v27 = vadd.f32 %v5425_v56, %v8396_v37 }
0x4fd7   :  { %v5427_v29 = vpop.f32.mrf.mxu1 }
0x4fd8   :  { %v5431_v46 = vrot.slane %v5426_v27, 6  ;;  %v5428_v23 = vadd.f32 %v5427_v29, %v8399_v13  ;;  %v5462_v22 = vrot.slane %v5426_v27, 4 }
0x4fda   :  { %v5472_v51 = vrot.slane %v5428_v23, 4  ;;  %5440 = vrot.lane.b32.xlu0 %v5431_v46, %s7129_s1  ;;  %v5433_v26 = vadd.f32 %v5431_v46, %v8500_v48  ;;  %v5464_v31 = vadd.f32 %v5462_v22, %v8485_v5 }
0x4fdc   :  { %5481 = vrot.lane.b32.xlu1 %v5472_v51, %s7129_s1  ;;  %v6186_v53 = vmul.f32 -1.442695, %v5433_v26  ;;  %v6187_v39 = vmul.f32 -1.442695, %v5464_v31  ;;  %v5474_v30 = vadd.f32 %v5472_v51, %v8487_v32 }
0x4fde   :  { %6746 = vpow2.f32 %v6186_v53  ;;  %v6188_v11 = vmul.f32 -1.442695, %v5474_v30 }
0x4fdf   :  { %6748 = vpow2.f32 %v6187_v39 }
0x4feb   :  { %v6747_v14 = vpop.eup %6746 }
0x4fec   :  { %v6749_v34 = vpop.eup %6748  ;;  %v5437_v9 = vadd.f32 1.0, %v6747_v14 }
0x4fed   :  { %v5468_v7 = vadd.f32 1.0, %v6749_v34 }
0x4fee   :  { %6750 = vrcp.f32 %v5437_v9 }
0x4fef   :  { %6752 = vrcp.f32 %v5468_v7 }
0x4ffb   :  { %v6751_v8 = vpop.eup %6750 }
0x4ffc   :  { %v6753_v18 = vpop.eup %6752  ;;  %v5450_v2 = vsub.f32 1.0, %v6751_v8 }
0x504c   :  { %v5441_v15 = vpop.permute.xlu0 %5440 }
0x504d   :  { %v5443_v55 = vmul.f32 %v6751_v8, %v5441_v15 }
0x504e   :  { %v5482_v44 = vpop.permute.xlu1 %5481 }
0x504f   :  { %v5484_v17 = vmul.f32 %v6753_v18, %v5482_v44  ;;  %5445 = vrot.lane.b32.xlu0 %v5443_v55, %s7129_s1 }
0x5051   :  { %5486 = vrot.lane.b32.xlu1 %v5484_v17, %s7129_s1 }
0x5053   :  { %5498 = vrot.lane.b32.xlu0 %v5497_v43, %s7130_s17 }
0x5057   :  { %5457 = vrot.lane.b32.xlu0 %v5456_v41, %s7131_s11 }
0x50c1   :  { %v5446_v42 = vpop.permute.xlu0 %5445 }
0x50c2   :  { %v5448_v24 = vadd.f32 %v5446_v42, %v8500_v48 }
0x50c3   :  { %v5487_v54 = vpop.permute.xlu1 %5486 }
0x50c4   :  { %v5489_v38 = vadd.f32 %v5487_v54, %v8487_v32 }
0x50c5   :  { %v5499_v61 = vpop.permute.xlu0 %5498 }
0x50c6   :  { %6754 = vtanh.f32 %v5489_v38 }
0x50c7   :  { %6756 = vtanh.f32 %v5448_v24 }
0x50c8   :  { %6758 = vpow2.f32 %v6188_v11 }
0x50c9   :  { %v5458_v19 = vpop.permute.xlu0 %5457 }
0x50ca   :  { %v5460_v60 = vmul.f32 %v6751_v8, %v5458_v19 }
0x50d3   :  { %v6755_v20 = vpop.eup %6754 }
0x50d4   :  { %5493 = vrot.lane.b32.xlu1 %v6755_v20, %s7130_s17  ;;  %v6757_v62 = vpop.eup %6756 }
0x50d5   :  { %v6759_v35 = vpop.eup %6758 }
0x50d6   :  { %v5478_v45 = vadd.f32 1.0, %v6759_v35 }
0x50d8   :  { %5452 = vrot.lane.b32.xlu1 %v6757_v62, %s7130_s17  ;;  %6760 = vrcp.f32 %v5478_v45 }
0x50e5   :  { %v6761_v63 = vpop.eup %6760 }
0x50e6   :  { %v5491_v0 = vsub.f32 1.0, %v6761_v63  ;;  %v5501_v10 = vmul.f32 %v6761_v63, %v5499_v61 }
0x5146   :  { %v5494_v12 = vpop.permute.xlu1 %5493 }
0x5147   :  { %v5496_v6 = vmul.f32 %v5494_v12, %v5491_v0 }
0x5149   :  { %v5502_v36 = vadd.f32 %v5501_v10, %v5496_v6 }
0x514a   :  { %v5453_v49 = vpop.permute.xlu1 %5452 }
0x514b   :  { %v5508_v47 = vrot.slane %v5502_v36, 2  ;;  %v5882_v40 = vrot.slane %v5502_v36, 6  ;;  %v5455_v4 = vmul.f32 %v5453_v49, %v5450_v2 }
0x514d   :  { %v9131_v1 = vadd.f32 %v5882_v40, %v9090_v21  ;;  %v5461_v28 = vadd.f32 %v5460_v60, %v5455_v4  ;;  %5509 = vrot.lane.b32.xlu0 %v5508_v47, %s7131_s11 }
0x514f   :  { %v5844_v50 = vrot.slane %v5461_v28, 2  ;;  %5504 = vrot.lane.b32.xlu1 %v5461_v28, %s7130_s17 }
0x5151   :  { %v9136_v52 = vadd.f32 %v5844_v50, %v9094_v58 }
0x51bf   :  { %v5510_v16 = vpop.permute.xlu0 %5509 }
0x51c1   :  { %v5505_v57 = vpop.permute.xlu1 %5504 }
0x51c2   :  { %v5512_v33 = vsel %vm513_vm11, %v5505_v57, %v5510_v16 }
0x51c3   :  { %v5514_v25 = vrot.slane %v5512_v33, 2  ;;  %v5614_v44 = vrot.slane %v5512_v33, 6 }
0x51c5   :  { %6189 = vmatmul.mubr.msk.f32.vlgmr.msra.gmra.mxu0 %vm643_vm13, %v5514_v25 }
0x51c6   :  { %6259 = vmatprep.mubr.msk.f32.mxu0 %vm7132_vm14, %v9247_v59 }
0x5285   :  { %v5583_v56 = vpop.f32.mrf.mxu0 }
0x5286   :  { %v5584_v21 = vadd.f32 %v5583_v56, %v8396_v37 }
0x5287   :  { %v5585_v27 = vpop.f32.mrf.mxu0 }
0x5288   :  { %v5589_v29 = vrot.slane %v5584_v21, 4  ;;  %v5586_v46 = vadd.f32 %v5585_v27, %v8399_v13  ;;  %v5620_v58 = vrot.slane %v5584_v21, 6 }
0x528a   :  { %v5630_v23 = vrot.slane %v5586_v46, 6  ;;  %5598 = vrot.lane.b32.xlu0 %v5589_v29, %s7129_s1  ;;  %v5591_v51 = vadd.f32 %v5589_v29, %v8500_v48  ;;  %v5622_v22 = vadd.f32 %v5620_v58, %v8485_v5 }
0x528c   :  { %5639 = vrot.lane.b32.xlu1 %v5630_v23, %s7129_s1  ;;  %v6190_v26 = vmul.f32 -1.442695, %v5591_v51  ;;  %v6191_v31 = vmul.f32 -1.442695, %v5622_v22  ;;  %v5632_v24 = vadd.f32 %v5630_v23, %v8487_v32 }
0x528e   :  { %6762 = vpow2.f32 %v6190_v26  ;;  %v6192_v20 = vmul.f32 -1.442695, %v5632_v24 }
0x528f   :  { %6764 = vpow2.f32 %v6191_v31 }
0x529b   :  { %v6763_v53 = vpop.eup %6762 }
0x529c   :  { %v6765_v39 = vpop.eup %6764  ;;  %v5595_v14 = vadd.f32 1.0, %v6763_v53 }
0x529d   :  { %v5626_v34 = vadd.f32 1.0, %v6765_v39 }
0x529e   :  { %6766 = vrcp.f32 %v5595_v14 }
0x529f   :  { %6768 = vrcp.f32 %v5626_v34 }
0x52ab   :  { %v6767_v9 = vpop.eup %6766 }
0x52ac   :  { %v6769_v15 = vpop.eup %6768  ;;  %v5608_v6 = vsub.f32 1.0, %v6767_v9 }
0x52fc   :  { %v5599_v7 = vpop.permute.xlu0 %5598 }
0x52fd   :  { %v5601_v8 = vmul.f32 %v6767_v9, %v5599_v7 }
0x52fe   :  { %v5640_v55 = vpop.permute.xlu1 %5639 }
0x52ff   :  { %v5642_v18 = vmul.f32 %v6769_v15, %v5640_v55  ;;  %5603 = vrot.lane.b32.xlu0 %v5601_v8, %s7129_s1  ;;  %v5944_v55 = vld [vmem:[%s9236_s14 + $0x38] sm:$0xff] }
0x5300   :  { %6244 = vmatpush3.msra.mxu0 %v5944_v55 }
0x5301   :  { %5644 = vrot.lane.b32.xlu1 %v5642_v18, %s7129_s1  ;;  %6245 = vmatprep.subr.mxu0 %v9247_v59 }
0x5303   :  { %5655 = vrot.lane.b32.xlu0 %v5512_v33, %s7130_s17 }
0x5307   :  { %5615 = vrot.lane.b32.xlu0 %v5614_v44, %s7131_s11 }
0x5371   :  { %v5604_v17 = vpop.permute.xlu0 %5603 }
0x5372   :  { %v5606_v42 = vadd.f32 %v5604_v17, %v8500_v48 }
0x5373   :  { %v5645_v43 = vpop.permute.xlu1 %5644 }
0x5374   :  { %v5647_v41 = vadd.f32 %v5645_v43, %v8487_v32 }
0x5375   :  { %v5656_v35 = vpop.permute.xlu0 %5655 }
0x5376   :  { %6770 = vtanh.f32 %v5647_v41 }
0x5377   :  { %6772 = vtanh.f32 %v5606_v42 }
0x5378   :  { %6774 = vpow2.f32 %v6192_v20 }
0x5379   :  { %v5616_v12 = vpop.permute.xlu0 %5615 }
0x537a   :  { %v5618_v36 = vmul.f32 %v6767_v9, %v5616_v12 }
0x5383   :  { %v6771_v54 = vpop.eup %6770 }
0x5384   :  { %5651 = vrot.lane.b32.xlu1 %v6771_v54, %s7130_s17  ;;  %v6773_v38 = vpop.eup %6772  ;;  %v5943_v54 = vld [vmem:[%s9236_s14 + $0x30] sm:$0xff] }
0x5385   :  { %v6775_v62 = vpop.eup %6774  ;;  %6246 = vmatpush3.msra.mxu0 %v5943_v54 }
0x5386   :  { %v5636_v30 = vadd.f32 1.0, %v6775_v62  ;;  %6247 = vmatprep.subr.mxu0 %v9247_v59 }
0x5388   :  { %5610 = vrot.lane.b32.xlu1 %v6773_v38, %s7130_s17  ;;  %6776 = vrcp.f32 %v5636_v30 }
0x5395   :  { %v6777_v11 = vpop.eup %6776 }
0x5396   :  { %v5649_v45 = vsub.f32 1.0, %v6777_v11  ;;  %v5658_v61 = vmul.f32 %v6777_v11, %v5656_v35  ;;  %v5941_v11 = vld [vmem:[%s9236_s14 + $0x20] sm:$0xff] }
0x53f6   :  { %v5652_v63 = vpop.permute.xlu1 %5651 }
0x53f7   :  { %v5654_v0 = vmul.f32 %v5652_v63, %v5649_v45 }
0x53f9   :  { %v5659_v10 = vadd.f32 %v5658_v61, %v5654_v0  ;;  %v5940_v61 = vld [vmem:[%s9236_s14 + $0x18] sm:$0xff] }
0x53fa   :  { %v5611_v19 = vpop.permute.xlu1 %5610 }
0x53fb   :  { %v5665_v2 = vrot.slane %v5659_v10, 6  ;;  %v5885_v49 = vrot.slane %v5659_v10, 4  ;;  %v5613_v60 = vmul.f32 %v5611_v19, %v5608_v6  ;;  %v5939_v6 = vld [vmem:[%s9236_s14 + $0x10] sm:$0xff] }
0x53fd   :  { %v9156_v47 = vadd.f32 %v5885_v49, %v9131_v1  ;;  %v5619_v40 = vadd.f32 %v5618_v36, %v5613_v60  ;;  %5666 = vrot.lane.b32.xlu0 %v5665_v2, %s7131_s11  ;;  %v5938_v2 = vld [vmem:[%s9236_s14 + $0x8] sm:$0xff] }
0x53ff   :  { %v5847_v4 = vrot.slane %v5619_v40, 4  ;;  %5661 = vrot.lane.b32.xlu1 %v5619_v40, %s7130_s17  ;;  %v5937_v40 = vld [vmem:[%s9236_s14] sm:$0xff] }
0x5401   :  { %v9161_v28 = vadd.f32 %v5847_v4, %v9136_v52  ;;  %v5903_v4 = vld [vmem:[#allocation17] sm:$0x1] }
0x546f   :  { %v5667_v50 = vpop.permute.xlu0 %5666 }
0x5471   :  { %v5662_v16 = vpop.permute.xlu1 %5661 }
0x5472   :  { %v5669_v57 = vsel %vm513_vm11, %v5662_v16, %v5667_v50  ;;  %v5904_v50 = vadd.f32 1e-05, %v5903_v4 }
0x5473   :  { %v5671_v33 = vrot.slane %v5669_v57, 4 }
0x5475   :  { %6193 = vmatmul.mubr.msk.f32.vlgmr.msra.gmra.mxu1 %vm643_vm13, %v5671_v33 }
0x5535   :  { %v5740_v25 = vpop.f32.mrf.mxu1 }
0x5536   :  { %v5741_v1 = vadd.f32 %v5740_v25, %v8396_v37  ;;  %v6197_v25 = vld [vmem:[#allocation16] ss:$0 sm:$0xff] }
0x5537   :  { %v5742_v56 = vpop.f32.mrf.mxu1 }
0x5538   :  { %v5746_v21 = vrot.slane %v5741_v1, 2  ;;  %v5743_v27 = vadd.f32 %v5742_v56, %v8399_v13  ;;  %v5777_v52 = vadd.f32 %v5741_v1, %v8485_v5  ;;  %v5771_v5 = vrot.slane %v5669_v57, 6 }
0x553a   :  { %5792 = vrot.lane.b32.xlu1 %v5743_v27, %s7129_s1  ;;  %5755 = vrot.lane.b32.xlu0 %v5746_v21, %s7129_s1  ;;  %v5748_v29 = vadd.f32 %v5746_v21, %v8500_v48  ;;  %v6195_v46 = vmul.f32 -1.442695, %v5777_v52  ;;  %v5784_v44 = vadd.f32 %v5743_v27, %v8487_v32  ;;  %v6198_v27 = vld [vmem:[#allocation13] ss:$0 sm:$0xff]  ;;  %v6199_v52 = vld [vmem:[#allocation14] ss:$0 sm:$0xff] }
0x553c   :  { %v6194_v23 = vmul.f32 -1.442695, %v5748_v29  ;;  %6778 = vpow2.f32 %v6195_v46  ;;  %v6196_v17 = vmul.f32 -1.442695, %v5784_v44 }
0x553e   :  { %6780 = vpow2.f32 %v6194_v23  ;;  %v6200_v23 = vld [vmem:[#allocation19] ss:$0 sm:$0xff] }
0x5549   :  { %v6779_v58 = vpop.eup %6778 }
0x554a   :  { %v5781_v22 = vadd.f32 1.0, %v6779_v58 }
0x554b   :  { %v6781_v51 = vpop.eup %6780 }
0x554c   :  { %v5752_v37 = vadd.f32 1.0, %v6781_v51  ;;  %6782 = vrcp.f32 %v5781_v22 }
0x554e   :  { %6784 = vrcp.f32 %v5752_v37 }
0x5559   :  { %v6783_v26 = vpop.eup %6782 }
0x555b   :  { %v6785_v13 = vpop.eup %6784 }
0x555c   :  { %v5765_v45 = vsub.f32 1.0, %v6785_v13 }
0x55ac   :  { %v5793_v31 = vpop.permute.xlu1 %5792  ;;  %v5756_v53 = vpop.permute.xlu0 %5755 }
0x55ad   :  { %v5795_v39 = vmul.f32 %v6783_v26, %v5793_v31  ;;  %v5758_v14 = vmul.f32 %v6785_v13, %v5756_v53 }
0x55af   :  { %5797 = vrot.lane.b32.xlu1 %v5795_v39, %s7129_s1  ;;  %5760 = vrot.lane.b32.xlu0 %v5758_v14, %s7129_s1 }
0x55b3   :  { %5808 = vrot.lane.b32.xlu0 %v5671_v33, %s7130_s17 }
0x55b7   :  { %5772 = vrot.lane.b32.xlu0 %v5771_v5, %s7131_s11 }
0x5621   :  { %v5798_v34 = vpop.permute.xlu1 %5797  ;;  %v5761_v9 = vpop.permute.xlu0 %5760 }
0x5622   :  { %v5800_v7 = vadd.f32 %v5798_v34, %v8487_v32  ;;  %v5763_v8 = vadd.f32 %v5761_v9, %v8500_v48  ;;  %v5942_v32 = vld [vmem:[%s9236_s14 + $0x28] sm:$0xff]  ;;  %s7133_s14 = smov [#allocation20]  }
0x5623   :  { %6248 = vmatpush3.msra.mxu0 %v5942_v32 }
0x5624   :  { %6786 = vtanh.f32 %v5800_v7  ;;  %6249 = vmatprep.subr.mxu0 %v9247_v59 }
0x5625   :  { %6788 = vtanh.f32 %v5763_v8  ;;  %v5809_v42 = vpop.permute.xlu0 %5808  ;;  %6250 = vmatpush3.msra.mxu0 %v5941_v11 }
0x5626   :  { %6790 = vpow2.f32 %v6196_v17  ;;  %6251 = vmatprep.subr.mxu0 %v9247_v59 }
0x5627   :  { %6252 = vmatpush3.msra.mxu0 %v5940_v61 }
0x5628   :  { %6253 = vmatprep.subr.mxu0 %v9247_v59 }
0x5629   :  { %v5773_v30 = vpop.permute.xlu0 %5772  ;;  %6254 = vmatpush3.msra.mxu0 %v5939_v6 }
0x562a   :  { %v5775_v0 = vmul.f32 %v6785_v13, %v5773_v30  ;;  %6255 = vmatprep.subr.mxu0 %v9247_v59 }
0x562b   :  { %6256 = vmatpush3.msra.mxu0 %v5938_v2 }
0x562c   :  { %6257 = vmatprep.subr.mxu0 %v9247_v59 }
0x562d   :  { %6258 = vmatpush3.msra.mxu0 %v5937_v40 }
0x5631   :  { %v6787_v15 = vpop.eup %6786 }
0x5632   :  { %5804 = vrot.lane.b32.xlu1 %v6787_v15, %s7130_s17  ;;  %v6789_v18 = vpop.eup %6788 }
0x5633   :  { %v6791_v43 = vpop.eup %6790 }
0x5634   :  { %v5788_v48 = vadd.f32 1.0, %v6791_v43 }
0x5636   :  { %5767 = vrot.lane.b32.xlu1 %v6789_v18, %s7130_s17  ;;  %6792 = vrcp.f32 %v5788_v48 }
0x5637   :  { %6794 = vrsqrt.f32 %v5904_v50 }
0x5643   :  { %v6793_v41 = vpop.eup %6792 }
0x5644   :  { %v5802_v38 = vsub.f32 1.0, %v6793_v41  ;;  %v5811_v20 = vmul.f32 %v6793_v41, %v5809_v42  ;;  %v6795_v16 = vpop.eup %6794 }
0x5645   :  { %v5918_v56 = vrot.slane %v6795_v16, %v7263_v3 }
0x56a4   :  { %v5805_v24 = vpop.permute.xlu1 %5804 }
0x56a5   :  { %v5807_v62 = vmul.f32 %v5805_v24, %v5802_v38 }
0x56a7   :  { %v5812_v35 = vadd.f32 %v5811_v20, %v5807_v62 }
0x56a8   :  { %v5768_v63 = vpop.permute.xlu1 %5767 }
0x56a9   :  { %v5889_v12 = vrot.slane %v5812_v35, 2  ;;  %v5770_v10 = vmul.f32 %v5768_v63, %v5765_v45 }
0x56ab   :  { %v5891_v19 = vadd.f32 %v5889_v12, %v9156_v47  ;;  %v5776_v36 = vadd.f32 %v5775_v0, %v5770_v10 }
0x56ad   :  { %v5897_v49 = vrot.slane %v5891_v19, 6  ;;  %v5851_v60 = vrot.slane %v5776_v36, 6 }
0x56af   :  { %v5853_v47 = vadd.f32 %v5851_v60, %v9161_v28  ;;  %5898 = vrot.lane.b32.xlu0 %v5897_v49, %s7131_s11 }
0x56b1   :  { %5893 = vrot.lane.b32.xlu1 %v5853_v47, %s7130_s17  ;;  %s6033_s17 = sshll.u32 %s7133_s14, 4  ;;  %s6034_s17 = int_to_ptr.vmem [resolvable:$true] %s6033_s17 }
0x56b2   :  { %s7080_s11 = scalar_lea.vmem %s6034_s17, 32  ;;  %p7085_p0 = scmp.lt.s32.totalorder %s6034_s17, %s6034_s17 }
0x56b3   :  { %p7081_p13 = scmp.ne.s32.totalorder %s6034_s17, %s7080_s11  ;;  %p7086_p1 = scmp.lt.s32.totalorder %s7080_s11, %s7080_s11 }
0x56b5   :  { %p7087_p2 = por %p7086_p1, %p7085_p0 }
0x56b7   :  { %p7088_p3 = pnand %p7087_p2, %p7081_p13 }
0x5721   :  { %v5899_v57 = vpop.permute.xlu0 %5898 }
0x5723   :  { %v5894_v33 = vpop.permute.xlu1 %5893 }
0x5724   :  { %v5901_v1 = vsel %vm513_vm11, %v5894_v33, %v5899_v57 }
0x5725   :  { %v5902_v21 = vmul.f32 0.0625, %v5901_v1 }
0x5727   :  { %v5913_v59 = vsub.f32 %v5902_v21, %v6197_v25 }
0x5729   :  { %v5920_v28 = vmul.f32 %v5918_v56, %v5913_v59 }
0x572b   :  { %v5928_v29 = vmul.f32 %v6198_v27, %v5920_v28 }
0x572d   :  { %v5936_v46 = vadd.f32 %v6199_v52, %v5928_v29 }
0x572f   :  { %6260 = vmatmul.mubr.msk.f32.vlgmr.msra.gmra.mxu0 %vm643_vm13, %v5936_v46 }
0x57ef   :  { %v6021_v58 = vpop.f32.mrf.mxu0 }
0x57f0   :  { %v6022_v51 = vadd.f32 %v6200_v23, %v6021_v58 }
0x57f1   :  { %v6261_v22 = vpop.f32.mrf.mxu0 }
0x57f2   :  { %6026 = vst.msk [vmem:[#allocation20] sm:$0x3] %vm6025_vm15, %v6022_v51 }
0x57f3   :  { %7091 = shalt.err (!%p7088_p3)
}
0x57f4   :  { %6036 = dma.vmem_to_hbm [thread:$0]  %s6034_s17, 32, %s9238_s16, [#allocation4]  }
0x57f5   :  { %7112 = dma.done.wait [#allocation4], 32  }
0x57f6   :  { %7113 = vsyncadd [#allocation4], 4294967264 }
0x57f7   :  { %6040 = vsyncpa [#allocation3], 1 }
0x57f8   :  { %6041 = vsyncpa [#allocation6], 1 }
0x57f9   :  { %6042 = vsyncpa [#allocation9], 1 }
0x57fa   :  { %6043 = vsyncpa [#allocation12], 1 }
0x57fb   :  { %6044 = vsyncpa [#allocation15], 1 }
0x57fc   :  { %6045 = vsyncpa [#allocation18], 1 }
0x57fd   :  { %6046 = vsyncpa [#allocation4], 1 }

</bundles_post_ra>
